<compile_context>
chip_gen: v5e
topology: v5e:2x2
jax: 0.10.0
libtpu: 0.0.40
codegen_flags: <defaults>
</compile_context>

<pallas_src>
import functools
import math

import jax
import jax.numpy as jnp
from jax.experimental import pallas as pl
from jax.experimental.pallas import tpu as pltpu

EPS = 1e-5  # nn.LayerNorm default


def transformer_block_kernel(
    value_ref, key_ref, query_ref, bias_ref,
    wq_ref, bq_ref, wk_ref, bk_ref, wv_ref, bv_ref, wo_ref, bo_ref,
    g1_ref, be1_ref, wff1_ref, bff1_ref, wff2_ref, bff2_ref,
    g2_ref, be2_ref,
    out_ref, attn_sc,
    *, heads):
    """Grid = (batch, q_tile). value_ref/out_ref are (TQ, E); key/query refs (L, E)."""
    f32, bf16 = jnp.float32, jnp.bfloat16
    TQ, E = value_ref.shape
    L = key_ref.shape[0]
    hd = E // heads
    scale = 1.0 / math.sqrt(hd)

    def matmul(x_bf16, w_ref):          # bf16 x bf16 -> f32 accumulate on MXU
        return jnp.dot(x_bf16, w_ref[...], preferred_element_type=f32)

    q_in = value_ref[...].astype(bf16)   # MHA query  <- `value` forward arg (TQ, E)
    k_in = key_ref[...].astype(bf16)     # MHA key    <- `key`   forward arg (L, E)
    v_in = query_ref[...].astype(bf16)   # MHA value  <- `query` forward arg (L, E)

    # Full-width projections (N = E keeps the MXU filled); scale folded into q.
    q = (matmul(q_in, wq_ref) + bq_ref[...]) * scale        # (TQ, E) f32
    k = matmul(k_in, wk_ref) + bk_ref[...]                  # (L,  E) f32
    v = matmul(v_in, wv_ref) + bv_ref[...]                  # (L,  E) f32
    qb, kb, vb = q.astype(bf16), k.astype(bf16), v.astype(bf16)

    bias = bias_ref[...]                                    # (1, L) f32: -1e30 at masked keys
    nt_dims = (((1,), (1,)), ((), ()))                      # contract last dims == A @ B.T, no transpose

    # Per-head attention; context written into a VMEM scratch slab (no concat).
    for h in range(heads):                                  # heads is small & static
        sl = slice(h * hd, (h + 1) * hd)
        s = jax.lax.dot_general(qb[:, sl], kb[:, sl], nt_dims,
                                preferred_element_type=f32) + bias      # (TQ, L)
        s = s - jnp.max(s, axis=-1, keepdims=True)
        p = jnp.exp(s)
        p = p * pl.reciprocal(jnp.sum(p, axis=-1, keepdims=True), approx=True)
        attn_sc[:, sl] = jnp.dot(p.astype(bf16), vb[:, sl],
                                 preferred_element_type=f32)            # (TQ, hd)

    attn = matmul(attn_sc[...].astype(bf16), wo_ref) + bo_ref[...]      # out_proj (TQ, E)

    def layernorm(x, g_ref, b_ref):
        mu = jnp.mean(x, axis=-1, keepdims=True)
        var = jnp.mean((x - mu) ** 2, axis=-1, keepdims=True)
        return (x - mu) * jax.lax.rsqrt(var + EPS) * g_ref[...] + b_ref[...]

    # Residual uses the `query` forward arg rows matching this Q tile.
    row0 = pl.multiple_of(pl.program_id(1) * TQ, TQ)
    resid = query_ref[pl.ds(row0, TQ), :]                   # (TQ, E) f32

    # TODO(synk): nn.Dropout layers are identity here (inference mode); no RNG dropout applied.
    x = layernorm(attn + resid, g1_ref, be1_ref)
    h1 = jnp.maximum(matmul(x.astype(bf16), wff1_ref) + bff1_ref[...], 0.0)
    ff = matmul(h1.astype(bf16), wff2_ref) + bff2_ref[...]
    out_ref[...] = layernorm(ff + x, g2_ref, be2_ref)


def transformer_block(value, key_, query, mask, params, *, heads, q_tile=128):
    B, L, E = query.shape
    H = params["wff1"].shape[1]
    TQ = min(q_tile, L)
    assert L % TQ == 0 and E % heads == 0
    bf16 = jnp.bfloat16

    # key_padding_mask: True == "ignore this key". Precompute additive bias once.
    bias = jnp.where(mask, -1e30, 0.0).astype(jnp.float32).reshape(B, 1, L)

    q_spec = pl.BlockSpec((None, TQ, E), lambda b, i: (b, i, 0))       # Q-tile / output / residual rows
    kv_spec = pl.BlockSpec((None, L, E), lambda b, i: (b, 0, 0))       # full keys/values per batch
    bias_spec = pl.BlockSpec((None, 1, L), lambda b, i: (b, 0, 0))

    def w_spec(shape):
        return pl.BlockSpec(shape, lambda b, i: (0, 0))

    kernel = functools.partial(transformer_block_kernel, heads=heads)
    return pl.pallas_call(
        kernel,
        out_shape=jax.ShapeDtypeStruct((B, L, E), jnp.float32),
        grid=(B, L // TQ),
        in_specs=[
            q_spec, kv_spec, kv_spec, bias_spec,
            w_spec((E, E)), w_spec((1, E)),   # Wq, bq
            w_spec((E, E)), w_spec((1, E)),   # Wk, bk
            w_spec((E, E)), w_spec((1, E)),   # Wv, bv
            w_spec((E, E)), w_spec((1, E)),   # Wo, bo
            w_spec((1, E)), w_spec((1, E)),   # norm1 gamma, beta
            w_spec((E, H)), w_spec((1, H)),   # ff1 W, b
            w_spec((H, E)), w_spec((1, E)),   # ff2 W, b
            w_spec((1, E)), w_spec((1, E)),   # norm2 gamma, beta
        ],
        out_specs=q_spec,
        scratch_shapes=[pltpu.VMEM((TQ, E), jnp.float32)],
        compiler_params=pltpu.CompilerParams(
            dimension_semantics=("parallel", "parallel"),
            vmem_limit_bytes=48 * 1024 * 1024),
    )(value, key_, query, bias,
      params["wq"].astype(bf16), params["bq"],
      params["wk"].astype(bf16), params["bk"],
      params["wv"].astype(bf16), params["bv"],
      params["wo"].astype(bf16), params["bo"],
      params["g1"], params["be1"],
      params["wff1"].astype(bf16), params["bff1"],
      params["wff2"].astype(bf16), params["bff2"],
      params["g2"], params["be2"])


def reference(value, key_, query, mask, params, *, heads):
    """Pure-JAX f32 reference mirroring the PyTorch forward (eval mode)."""
    hp = jax.lax.Precision.HIGHEST
    q_in, k_in, v_in = value, key_, query
    B, L, E = q_in.shape
    hd = E // heads

    def lin(x, w, b):
        return jnp.dot(x, w, precision=hp) + b

    q = lin(q_in, params["wq"], params["bq"])
    k = lin(k_in, params["wk"], params["bk"])
    v = lin(v_in, params["wv"], params["bv"])

    def split(x):
        return x.reshape(B, L, heads, hd).transpose(0, 2, 1, 3)

    qh, kh, vh = split(q), split(k), split(v)
    s = jnp.einsum("bhqd,bhkd->bhqk", qh, kh, precision=hp) / math.sqrt(hd)
    s = s + jnp.where(mask, -1e30, 0.0)[:, None, None, :]
    p = jax.nn.softmax(s, axis=-1)
    o = jnp.einsum("bhqk,bhkd->bhqd", p, vh, precision=hp)
    attn = lin(o.transpose(0, 2, 1, 3).reshape(B, L, E), params["wo"], params["bo"])

    def layernorm(x, g, b):
        mu = jnp.mean(x, axis=-1, keepdims=True)
        var = jnp.mean((x - mu) ** 2, axis=-1, keepdims=True)
        return (x - mu) * jax.lax.rsqrt(var + EPS) * g + b

    x = layernorm(attn + v_in, params["g1"], params["be1"])
    ff = lin(jnp.maximum(lin(x, params["wff1"], params["bff1"]), 0.0),
             params["wff2"], params["bff2"])
    return layernorm(ff + x, params["g2"], params["be2"])


def init_params(rng, E, H):
    ks = jax.random.split(rng, 10)
    s = 1.0 / math.sqrt(E)
    sh = 1.0 / math.sqrt(H)
    return {
        "wq": jax.random.normal(ks[0], (E, E), jnp.float32) * s,
        "bq": jax.random.normal(ks[1], (1, E), jnp.float32) * 0.02,
        "wk": jax.random.normal(ks[2], (E, E), jnp.float32) * s,
        "bk": jax.random.normal(ks[3], (1, E), jnp.float32) * 0.02,
        "wv": jax.random.normal(ks[4], (E, E), jnp.float32) * s,
        "bv": jax.random.normal(ks[5], (1, E), jnp.float32) * 0.02,
        "wo": jax.random.normal(ks[6], (E, E), jnp.float32) * s,
        "bo": jax.random.normal(ks[7], (1, E), jnp.float32) * 0.02,
        "g1": jnp.ones((1, E), jnp.float32),
        "be1": jnp.zeros((1, E), jnp.float32),
        "wff1": jax.random.normal(ks[8], (E, H), jnp.float32) * s,
        "bff1": jnp.full((1, H), 0.01, jnp.float32),
        "wff2": jax.random.normal(ks[9], (H, E), jnp.float32) * sh,
        "bff2": jnp.full((1, E), 0.01, jnp.float32),
        "g2": jnp.ones((1, E), jnp.float32),
        "be2": jnp.zeros((1, E), jnp.float32),
    }


if __name__ == "__main__":
    # E multiple of 128 (lane-dense), L spans two Q tiles so the new grid axis is exercised.
    B, L, E, heads, fwd_exp = 2, 256, 128, 4, 4
    H = fwd_exp * E

    root = jax.random.PRNGKey(0)
    kv, kk, kq, kp = jax.random.split(root, 4)
    value = jax.random.normal(kv, (B, L, E), jnp.float32)
    key_ = jax.random.normal(kk, (B, L, E), jnp.float32)
    query = jax.random.normal(kq, (B, L, E), jnp.float32)
    # key_padding_mask: True == masked-out key position (last 16 keys of batch 1)
    mask = jnp.zeros((B, L), jnp.bool_).at[1, L - 16:].set(True)
    params = init_params(kp, E, H)

    out = transformer_block(value, key_, query, mask, params, heads=heads)
    out = jax.block_until_ready(out)

    ref = reference(value, key_, query, mask, params, heads=heads)
    assert out.shape == (B, L, E)
    # Kernel uses bf16 MXU operands (f32 accumulate) + approx EUP reciprocal, reference is
    # f32 HIGHEST precision -> compare with bf16-appropriate tolerances plus a mean gate.
    diff = jnp.abs(out - ref)
    mean_err = float(jnp.mean(diff))
    max_err = float(jnp.max(diff))
    assert mean_err < 1.5e-2, f"mean err too large: {mean_err:.3e}"
    assert bool(jnp.allclose(out, ref, rtol=5e-2, atol=5e-2)), \
        f"mismatch vs reference (max {max_err:.3e}, mean {mean_err:.3e})"

    print("KERNEL_OK")
</pallas_src>

<mosaic_0001>
module attributes {stable_mosaic.version = 11 : i64} {
  func.func @transformer_block_kernel(%arg0: i32, %arg1: i32, %arg2: memref<1x128x128xf32, #tpu.memory_space<vmem>>, %arg3: memref<1x256x128xf32, #tpu.memory_space<vmem>>, %arg4: memref<1x256x128xf32, #tpu.memory_space<vmem>>, %arg5: memref<1x1x256xf32, #tpu.memory_space<vmem>>, %arg6: memref<128x128xbf16, #tpu.memory_space<vmem>>, %arg7: memref<1x128xf32, #tpu.memory_space<vmem>>, %arg8: memref<128x128xbf16, #tpu.memory_space<vmem>>, %arg9: memref<1x128xf32, #tpu.memory_space<vmem>>, %arg10: memref<128x128xbf16, #tpu.memory_space<vmem>>, %arg11: memref<1x128xf32, #tpu.memory_space<vmem>>, %arg12: memref<128x128xbf16, #tpu.memory_space<vmem>>, %arg13: memref<1x128xf32, #tpu.memory_space<vmem>>, %arg14: memref<1x128xf32, #tpu.memory_space<vmem>>, %arg15: memref<1x128xf32, #tpu.memory_space<vmem>>, %arg16: memref<128x512xbf16, #tpu.memory_space<vmem>>, %arg17: memref<1x512xf32, #tpu.memory_space<vmem>>, %arg18: memref<512x128xbf16, #tpu.memory_space<vmem>>, %arg19: memref<1x128xf32, #tpu.memory_space<vmem>>, %arg20: memref<1x128xf32, #tpu.memory_space<vmem>>, %arg21: memref<1x128xf32, #tpu.memory_space<vmem>>, %arg22: memref<1x128x128xf32, #tpu.memory_space<vmem>>, %arg23: memref<128x128xf32, #tpu.memory_space<vmem>>) attributes {dimension_semantics = [#tpu.dimension_semantics<parallel>, #tpu.dimension_semantics<parallel>], iteration_bounds = array<i64: 2, 2>, scalar_prefetch = 0 : i64, scratch_operands = 1 : i64, tpu.core_type = #tpu.core_type<tc>, window_params = [{transform_indices = @transform_0, window_bounds = array<i64: 1, 128, 128>}, {transform_indices = @transform_1, window_bounds = array<i64: 1, 256, 128>}, {transform_indices = @transform_2, window_bounds = array<i64: 1, 256, 128>}, {transform_indices = @transform_3, window_bounds = array<i64: 1, 1, 256>}, {pipeline_mode = #tpu.pipeline_mode<synchronous>, transform_indices = @transform_4, window_bounds = array<i64: 128, 128>}, {pipeline_mode = #tpu.pipeline_mode<synchronous>, transform_indices = @transform_5, window_bounds = array<i64: 1, 128>}, {pipeline_mode = #tpu.pipeline_mode<synchronous>, transform_indices = @transform_6, window_bounds = array<i64: 128, 128>}, {pipeline_mode = #tpu.pipeline_mode<synchronous>, transform_indices = @transform_7, window_bounds = array<i64: 1, 128>}, {pipeline_mode = #tpu.pipeline_mode<synchronous>, transform_indices = @transform_8, window_bounds = array<i64: 128, 128>}, {pipeline_mode = #tpu.pipeline_mode<synchronous>, transform_indices = @transform_9, window_bounds = array<i64: 1, 128>}, {pipeline_mode = #tpu.pipeline_mode<synchronous>, transform_indices = @transform_10, window_bounds = array<i64: 128, 128>}, {pipeline_mode = #tpu.pipeline_mode<synchronous>, transform_indices = @transform_11, window_bounds = array<i64: 1, 128>}, {pipeline_mode = #tpu.pipeline_mode<synchronous>, transform_indices = @transform_12, window_bounds = array<i64: 1, 128>}, {pipeline_mode = #tpu.pipeline_mode<synchronous>, transform_indices = @transform_13, window_bounds = array<i64: 1, 128>}, {pipeline_mode = #tpu.pipeline_mode<synchronous>, transform_indices = @transform_14, window_bounds = array<i64: 128, 512>}, {pipeline_mode = #tpu.pipeline_mode<synchronous>, transform_indices = @transform_15, window_bounds = array<i64: 1, 512>}, {pipeline_mode = #tpu.pipeline_mode<synchronous>, transform_indices = @transform_16, window_bounds = array<i64: 512, 128>}, {pipeline_mode = #tpu.pipeline_mode<synchronous>, transform_indices = @transform_17, window_bounds = array<i64: 1, 128>}, {pipeline_mode = #tpu.pipeline_mode<synchronous>, transform_indices = @transform_18, window_bounds = array<i64: 1, 128>}, {pipeline_mode = #tpu.pipeline_mode<synchronous>, transform_indices = @transform_19, window_bounds = array<i64: 1, 128>}, {transform_indices = @transform_20, window_bounds = array<i64: 1, 128, 128>}]} {
    %c0 = arith.constant 0 : index
    %c0_0 = arith.constant 0 : index
    %c0_1 = arith.constant 0 : index
    %0 = vector.load %arg2[%c0, %c0_0, %c0_1] : memref<1x128x128xf32, #tpu.memory_space<vmem>>, vector<1x128x128xf32>
    %1 = vector.shape_cast %0 : vector<1x128x128xf32> to vector<128x128xf32>
    %2 = arith.truncf %1 : vector<128x128xf32> to vector<128x128xbf16>
    %c0_2 = arith.constant 0 : index
    %c0_3 = arith.constant 0 : index
    %c0_4 = arith.constant 0 : index
    %3 = vector.load %arg3[%c0_2, %c0_3, %c0_4] : memref<1x256x128xf32, #tpu.memory_space<vmem>>, vector<1x256x128xf32>
    %4 = vector.shape_cast %3 : vector<1x256x128xf32> to vector<256x128xf32>
    %5 = arith.truncf %4 : vector<256x128xf32> to vector<256x128xbf16>
    %c0_5 = arith.constant 0 : index
    %c0_6 = arith.constant 0 : index
    %c0_7 = arith.constant 0 : index
    %6 = vector.load %arg4[%c0_5, %c0_6, %c0_7] : memref<1x256x128xf32, #tpu.memory_space<vmem>>, vector<1x256x128xf32>
    %7 = vector.shape_cast %6 : vector<1x256x128xf32> to vector<256x128xf32>
    %8 = arith.truncf %7 : vector<256x128xf32> to vector<256x128xbf16>
    %c0_8 = arith.constant 0 : index
    %c0_9 = arith.constant 0 : index
    %9 = vector.load %arg6[%c0_8, %c0_9] : memref<128x128xbf16, #tpu.memory_space<vmem>>, vector<128x128xbf16>
    %cst = arith.constant dense<0.000000e+00> : vector<128x128xf32>
    %10 = tpu.matmul %2, %9, %cst {dimension_numbers = #tpu.dot_dimension_numbers<[1], [0], [0], [1], [0, 0, 1, 1], [], []>} : vector<128x128xbf16>, vector<128x128xbf16>, vector<128x128xf32> -> vector<128x128xf32>
    %c0_10 = arith.constant 0 : index
    %c0_11 = arith.constant 0 : index
    %11 = vector.load %arg7[%c0_10, %c0_11] : memref<1x128xf32, #tpu.memory_space<vmem>>, vector<1x128xf32>
    %12 = vector.broadcast %11 : vector<1x128xf32> to vector<128x128xf32>
    %13 = arith.addf %10, %12 : vector<128x128xf32>
    %cst_12 = arith.constant 0.176776692 : f32
    %14 = vector.broadcast %cst_12 : f32 to vector<128x128xf32>
    %15 = arith.mulf %13, %14 : vector<128x128xf32>
    %c0_13 = arith.constant 0 : index
    %c0_14 = arith.constant 0 : index
    %16 = vector.load %arg8[%c0_13, %c0_14] : memref<128x128xbf16, #tpu.memory_space<vmem>>, vector<128x128xbf16>
    %cst_15 = arith.constant dense<0.000000e+00> : vector<256x128xf32>
    %17 = tpu.matmul %5, %16, %cst_15 {dimension_numbers = #tpu.dot_dimension_numbers<[1], [0], [0], [1], [0, 0, 1, 1], [], []>} : vector<256x128xbf16>, vector<128x128xbf16>, vector<256x128xf32> -> vector<256x128xf32>
    %c0_16 = arith.constant 0 : index
    %c0_17 = arith.constant 0 : index
    %18 = vector.load %arg9[%c0_16, %c0_17] : memref<1x128xf32, #tpu.memory_space<vmem>>, vector<1x128xf32>
    %19 = vector.broadcast %18 : vector<1x128xf32> to vector<256x128xf32>
    %20 = arith.addf %17, %19 : vector<256x128xf32>
    %c0_18 = arith.constant 0 : index
    %c0_19 = arith.constant 0 : index
    %21 = vector.load %arg10[%c0_18, %c0_19] : memref<128x128xbf16, #tpu.memory_space<vmem>>, vector<128x128xbf16>
    %cst_20 = arith.constant dense<0.000000e+00> : vector<256x128xf32>
    %22 = tpu.matmul %8, %21, %cst_20 {dimension_numbers = #tpu.dot_dimension_numbers<[1], [0], [0], [1], [0, 0, 1, 1], [], []>} : vector<256x128xbf16>, vector<128x128xbf16>, vector<256x128xf32> -> vector<256x128xf32>
    %c0_21 = arith.constant 0 : index
    %c0_22 = arith.constant 0 : index
    %23 = vector.load %arg11[%c0_21, %c0_22] : memref<1x128xf32, #tpu.memory_space<vmem>>, vector<1x128xf32>
    %24 = vector.broadcast %23 : vector<1x128xf32> to vector<256x128xf32>
    %25 = arith.addf %22, %24 : vector<256x128xf32>
    %26 = arith.truncf %15 : vector<128x128xf32> to vector<128x128xbf16>
    %27 = arith.truncf %20 : vector<256x128xf32> to vector<256x128xbf16>
    %28 = arith.truncf %25 : vector<256x128xf32> to vector<256x128xbf16>
    %c0_23 = arith.constant 0 : index
    %c0_24 = arith.constant 0 : index
    %c0_25 = arith.constant 0 : index
    %29 = vector.load %arg5[%c0_23, %c0_24, %c0_25] : memref<1x1x256xf32, #tpu.memory_space<vmem>>, vector<1x1x256xf32>
    %30 = vector.shape_cast %29 : vector<1x1x256xf32> to vector<1x256xf32>
    %31 = vector.extract_strided_slice %26 {offsets = [0, 0], sizes = [128, 32], strides = [1, 1]} : vector<128x128xbf16> to vector<128x32xbf16>
    %32 = vector.extract_strided_slice %27 {offsets = [0, 0], sizes = [256, 32], strides = [1, 1]} : vector<256x128xbf16> to vector<256x32xbf16>
    %cst_26 = arith.constant dense<0.000000e+00> : vector<128x256xf32>
    %33 = tpu.matmul %31, %32, %cst_26 {dimension_numbers = #tpu.dot_dimension_numbers<[1], [1], [0], [0], [0, 0, 1, 0], [], []>} : vector<128x32xbf16>, vector<256x32xbf16>, vector<128x256xf32> -> vector<128x256xf32>
    %34 = vector.broadcast %30 : vector<1x256xf32> to vector<128x256xf32>
    %35 = arith.addf %33, %34 : vector<128x256xf32>
    %cst_27 = arith.constant dense<0xFF800000> : vector<128xf32>
    %36 = vector.multi_reduction <maximumf>, %35, %cst_27 [1] : vector<128x256xf32> to vector<128xf32>
    %37 = vector.shape_cast %36 : vector<128xf32> to vector<128x1xf32>
    %38 = vector.broadcast %37 : vector<128x1xf32> to vector<128x256xf32>
    %39 = arith.subf %35, %38 : vector<128x256xf32>
    %40 = math.exp %39 : vector<128x256xf32>
    %cst_28 = arith.constant dense<0.000000e+00> : vector<128xf32>
    %41 = vector.multi_reduction <add>, %40, %cst_28 [1] : vector<128x256xf32> to vector<128xf32>
    %42 = vector.shape_cast %41 : vector<128xf32> to vector<128x1xf32>
    %43 = tpu.reciprocal %42 {approx = true} : vector<128x1xf32> -> vector<128x1xf32>
    %44 = vector.broadcast %43 : vector<128x1xf32> to vector<128x256xf32>
    %45 = arith.mulf %40, %44 : vector<128x256xf32>
    %46 = arith.truncf %45 : vector<128x256xf32> to vector<128x256xbf16>
    %47 = vector.extract_strided_slice %28 {offsets = [0, 0], sizes = [256, 32], strides = [1, 1]} : vector<256x128xbf16> to vector<256x32xbf16>
    %cst_29 = arith.constant dense<0.000000e+00> : vector<128x32xf32>
    %48 = tpu.matmul %46, %47, %cst_29 {dimension_numbers = #tpu.dot_dimension_numbers<[1], [0], [0], [1], [0, 0, 1, 1], [], []>} : vector<128x256xbf16>, vector<256x32xbf16>, vector<128x32xf32> -> vector<128x32xf32>
    %c0_30 = arith.constant 0 : index
    %c0_31 = arith.constant 0 : index
    %49 = vector.load %arg23[%c0_30, %c0_31] : memref<128x128xf32, #tpu.memory_space<vmem>>, vector<128x32xf32>
    tpu.vector_store %arg23[%c0_30, %c0_31], %48 {strides = array<i32>} : memref<128x128xf32, #tpu.memory_space<vmem>>, vector<128x32xf32>,
    %50 = vector.extract_strided_slice %26 {offsets = [0, 32], sizes = [128, 32], strides = [1, 1]} : vector<128x128xbf16> to vector<128x32xbf16>
    %51 = vector.extract_strided_slice %27 {offsets = [0, 32], sizes = [256, 32], strides = [1, 1]} : vector<256x128xbf16> to vector<256x32xbf16>
    %cst_32 = arith.constant dense<0.000000e+00> : vector<128x256xf32>
    %52 = tpu.matmul %50, %51, %cst_32 {dimension_numbers = #tpu.dot_dimension_numbers<[1], [1], [0], [0], [0, 0, 1, 0], [], []>} : vector<128x32xbf16>, vector<256x32xbf16>, vector<128x256xf32> -> vector<128x256xf32>
    %53 = vector.broadcast %30 : vector<1x256xf32> to vector<128x256xf32>
    %54 = arith.addf %52, %53 : vector<128x256xf32>
    %cst_33 = arith.constant dense<0xFF800000> : vector<128xf32>
    %55 = vector.multi_reduction <maximumf>, %54, %cst_33 [1] : vector<128x256xf32> to vector<128xf32>
    %56 = vector.shape_cast %55 : vector<128xf32> to vector<128x1xf32>
    %57 = vector.broadcast %56 : vector<128x1xf32> to vector<128x256xf32>
    %58 = arith.subf %54, %57 : vector<128x256xf32>
    %59 = math.exp %58 : vector<128x256xf32>
    %cst_34 = arith.constant dense<0.000000e+00> : vector<128xf32>
    %60 = vector.multi_reduction <add>, %59, %cst_34 [1] : vector<128x256xf32> to vector<128xf32>
    %61 = vector.shape_cast %60 : vector<128xf32> to vector<128x1xf32>
    %62 = tpu.reciprocal %61 {approx = true} : vector<128x1xf32> -> vector<128x1xf32>
    %63 = vector.broadcast %62 : vector<128x1xf32> to vector<128x256xf32>
    %64 = arith.mulf %59, %63 : vector<128x256xf32>
    %65 = arith.truncf %64 : vector<128x256xf32> to vector<128x256xbf16>
    %66 = vector.extract_strided_slice %28 {offsets = [0, 32], sizes = [256, 32], strides = [1, 1]} : vector<256x128xbf16> to vector<256x32xbf16>
    %cst_35 = arith.constant dense<0.000000e+00> : vector<128x32xf32>
    %67 = tpu.matmul %65, %66, %cst_35 {dimension_numbers = #tpu.dot_dimension_numbers<[1], [0], [0], [1], [0, 0, 1, 1], [], []>} : vector<128x256xbf16>, vector<256x32xbf16>, vector<128x32xf32> -> vector<128x32xf32>
    %c0_36 = arith.constant 0 : index
    %c32 = arith.constant 32 : index
    %68 = vector.load %arg23[%c0_36, %c32] : memref<128x128xf32, #tpu.memory_space<vmem>>, vector<128x32xf32>
    tpu.vector_store %arg23[%c0_36, %c32], %67 {strides = array<i32>} : memref<128x128xf32, #tpu.memory_space<vmem>>, vector<128x32xf32>,
    %69 = vector.extract_strided_slice %26 {offsets = [0, 64], sizes = [128, 32], strides = [1, 1]} : vector<128x128xbf16> to vector<128x32xbf16>
    %70 = vector.extract_strided_slice %27 {offsets = [0, 64], sizes = [256, 32], strides = [1, 1]} : vector<256x128xbf16> to vector<256x32xbf16>
    %cst_37 = arith.constant dense<0.000000e+00> : vector<128x256xf32>
    %71 = tpu.matmul %69, %70, %cst_37 {dimension_numbers = #tpu.dot_dimension_numbers<[1], [1], [0], [0], [0, 0, 1, 0], [], []>} : vector<128x32xbf16>, vector<256x32xbf16>, vector<128x256xf32> -> vector<128x256xf32>
    %72 = vector.broadcast %30 : vector<1x256xf32> to vector<128x256xf32>
    %73 = arith.addf %71, %72 : vector<128x256xf32>
    %cst_38 = arith.constant dense<0xFF800000> : vector<128xf32>
    %74 = vector.multi_reduction <maximumf>, %73, %cst_38 [1] : vector<128x256xf32> to vector<128xf32>
    %75 = vector.shape_cast %74 : vector<128xf32> to vector<128x1xf32>
    %76 = vector.broadcast %75 : vector<128x1xf32> to vector<128x256xf32>
    %77 = arith.subf %73, %76 : vector<128x256xf32>
    %78 = math.exp %77 : vector<128x256xf32>
    %cst_39 = arith.constant dense<0.000000e+00> : vector<128xf32>
    %79 = vector.multi_reduction <add>, %78, %cst_39 [1] : vector<128x256xf32> to vector<128xf32>
    %80 = vector.shape_cast %79 : vector<128xf32> to vector<128x1xf32>
    %81 = tpu.reciprocal %80 {approx = true} : vector<128x1xf32> -> vector<128x1xf32>
    %82 = vector.broadcast %81 : vector<128x1xf32> to vector<128x256xf32>
    %83 = arith.mulf %78, %82 : vector<128x256xf32>
    %84 = arith.truncf %83 : vector<128x256xf32> to vector<128x256xbf16>
    %85 = vector.extract_strided_slice %28 {offsets = [0, 64], sizes = [256, 32], strides = [1, 1]} : vector<256x128xbf16> to vector<256x32xbf16>
    %cst_40 = arith.constant dense<0.000000e+00> : vector<128x32xf32>
    %86 = tpu.matmul %84, %85, %cst_40 {dimension_numbers = #tpu.dot_dimension_numbers<[1], [0], [0], [1], [0, 0, 1, 1], [], []>} : vector<128x256xbf16>, vector<256x32xbf16>, vector<128x32xf32> -> vector<128x32xf32>
    %c0_41 = arith.constant 0 : index
    %c64 = arith.constant 64 : index
    %87 = vector.load %arg23[%c0_41, %c64] : memref<128x128xf32, #tpu.memory_space<vmem>>, vector<128x32xf32>
    tpu.vector_store %arg23[%c0_41, %c64], %86 {strides = array<i32>} : memref<128x128xf32, #tpu.memory_space<vmem>>, vector<128x32xf32>,
    %88 = vector.extract_strided_slice %26 {offsets = [0, 96], sizes = [128, 32], strides = [1, 1]} : vector<128x128xbf16> to vector<128x32xbf16>
    %89 = vector.extract_strided_slice %27 {offsets = [0, 96], sizes = [256, 32], strides = [1, 1]} : vector<256x128xbf16> to vector<256x32xbf16>
    %cst_42 = arith.constant dense<0.000000e+00> : vector<128x256xf32>
    %90 = tpu.matmul %88, %89, %cst_42 {dimension_numbers = #tpu.dot_dimension_numbers<[1], [1], [0], [0], [0, 0, 1, 0], [], []>} : vector<128x32xbf16>, vector<256x32xbf16>, vector<128x256xf32> -> vector<128x256xf32>
    %91 = vector.broadcast %30 : vector<1x256xf32> to vector<128x256xf32>
    %92 = arith.addf %90, %91 : vector<128x256xf32>
    %cst_43 = arith.constant dense<0xFF800000> : vector<128xf32>
    %93 = vector.multi_reduction <maximumf>, %92, %cst_43 [1] : vector<128x256xf32> to vector<128xf32>
    %94 = vector.shape_cast %93 : vector<128xf32> to vector<128x1xf32>
    %95 = vector.broadcast %94 : vector<128x1xf32> to vector<128x256xf32>
    %96 = arith.subf %92, %95 : vector<128x256xf32>
    %97 = math.exp %96 : vector<128x256xf32>
    %cst_44 = arith.constant dense<0.000000e+00> : vector<128xf32>
    %98 = vector.multi_reduction <add>, %97, %cst_44 [1] : vector<128x256xf32> to vector<128xf32>
    %99 = vector.shape_cast %98 : vector<128xf32> to vector<128x1xf32>
    %100 = tpu.reciprocal %99 {approx = true} : vector<128x1xf32> -> vector<128x1xf32>
    %101 = vector.broadcast %100 : vector<128x1xf32> to vector<128x256xf32>
    %102 = arith.mulf %97, %101 : vector<128x256xf32>
    %103 = arith.truncf %102 : vector<128x256xf32> to vector<128x256xbf16>
    %104 = vector.extract_strided_slice %28 {offsets = [0, 96], sizes = [256, 32], strides = [1, 1]} : vector<256x128xbf16> to vector<256x32xbf16>
    %cst_45 = arith.constant dense<0.000000e+00> : vector<128x32xf32>
    %105 = tpu.matmul %103, %104, %cst_45 {dimension_numbers = #tpu.dot_dimension_numbers<[1], [0], [0], [1], [0, 0, 1, 1], [], []>} : vector<128x256xbf16>, vector<256x32xbf16>, vector<128x32xf32> -> vector<128x32xf32>
    %c0_46 = arith.constant 0 : index
    %c96 = arith.constant 96 : index
    %106 = vector.load %arg23[%c0_46, %c96] : memref<128x128xf32, #tpu.memory_space<vmem>>, vector<128x32xf32>
    tpu.vector_store %arg23[%c0_46, %c96], %105 {strides = array<i32>} : memref<128x128xf32, #tpu.memory_space<vmem>>, vector<128x32xf32>,
    %c0_47 = arith.constant 0 : index
    %c0_48 = arith.constant 0 : index
    %107 = vector.load %arg23[%c0_47, %c0_48] : memref<128x128xf32, #tpu.memory_space<vmem>>, vector<128x128xf32>
    %108 = arith.truncf %107 : vector<128x128xf32> to vector<128x128xbf16>
    %c0_49 = arith.constant 0 : index
    %c0_50 = arith.constant 0 : index
    %109 = vector.load %arg12[%c0_49, %c0_50] : memref<128x128xbf16, #tpu.memory_space<vmem>>, vector<128x128xbf16>
    %cst_51 = arith.constant dense<0.000000e+00> : vector<128x128xf32>
    %110 = tpu.matmul %108, %109, %cst_51 {dimension_numbers = #tpu.dot_dimension_numbers<[1], [0], [0], [1], [0, 0, 1, 1], [], []>} : vector<128x128xbf16>, vector<128x128xbf16>, vector<128x128xf32> -> vector<128x128xf32>
    %c0_52 = arith.constant 0 : index
    %c0_53 = arith.constant 0 : index
    %111 = vector.load %arg13[%c0_52, %c0_53] : memref<1x128xf32, #tpu.memory_space<vmem>>, vector<1x128xf32>
    %112 = vector.broadcast %111 : vector<1x128xf32> to vector<128x128xf32>
    %113 = arith.addf %110, %112 : vector<128x128xf32>
    %c128_i32 = arith.constant 128 : i32
    %114 = arith.muli %arg1, %c128_i32 : i32
    %115 = tpu.assume_multiple %114, 128 : i32
    %c0_54 = arith.constant 0 : index
    %116 = arith.index_cast %115 : i32 to index
    %c0_55 = arith.constant 0 : index
    %117 = vector.load %arg4[%c0_54, %116, %c0_55] : memref<1x256x128xf32, #tpu.memory_space<vmem>>, vector<1x128x128xf32>
    %118 = vector.shape_cast %117 : vector<1x128x128xf32> to vector<128x128xf32>
    %119 = arith.addf %113, %118 : vector<128x128xf32>
    %cst_56 = arith.constant dense<0.000000e+00> : vector<128xf32>
    %120 = vector.multi_reduction <add>, %119, %cst_56 [1] : vector<128x128xf32> to vector<128xf32>
    %121 = vector.shape_cast %120 : vector<128xf32> to vector<128x1xf32>
    %cst_57 = arith.constant 1.280000e+02 : f32
    %122 = vector.broadcast %cst_57 : f32 to vector<128x1xf32>
    %123 = arith.divf %121, %122 : vector<128x1xf32>
    %124 = vector.broadcast %123 : vector<128x1xf32> to vector<128x128xf32>
    %125 = arith.subf %119, %124 : vector<128x128xf32>
    %126 = arith.mulf %125, %125 : vector<128x128xf32>
    %cst_58 = arith.constant dense<0.000000e+00> : vector<128xf32>
    %127 = vector.multi_reduction <add>, %126, %cst_58 [1] : vector<128x128xf32> to vector<128xf32>
    %128 = vector.shape_cast %127 : vector<128xf32> to vector<128x1xf32>
    %cst_59 = arith.constant 1.280000e+02 : f32
    %129 = vector.broadcast %cst_59 : f32 to vector<128x1xf32>
    %130 = arith.divf %128, %129 : vector<128x1xf32>
    %131 = vector.broadcast %123 : vector<128x1xf32> to vector<128x128xf32>
    %132 = arith.subf %119, %131 : vector<128x128xf32>
    %cst_60 = arith.constant 9.99999974E-6 : f32
    %133 = vector.broadcast %cst_60 : f32 to vector<128x1xf32>
    %134 = arith.addf %130, %133 : vector<128x1xf32>
    %135 = math.rsqrt %134 : vector<128x1xf32>
    %136 = vector.broadcast %135 : vector<128x1xf32> to vector<128x128xf32>
    %137 = arith.mulf %132, %136 : vector<128x128xf32>
    %c0_61 = arith.constant 0 : index
    %c0_62 = arith.constant 0 : index
    %138 = vector.load %arg14[%c0_61, %c0_62] : memref<1x128xf32, #tpu.memory_space<vmem>>, vector<1x128xf32>
    %139 = vector.broadcast %138 : vector<1x128xf32> to vector<128x128xf32>
    %140 = arith.mulf %137, %139 : vector<128x128xf32>
    %c0_63 = arith.constant 0 : index
    %c0_64 = arith.constant 0 : index
    %141 = vector.load %arg15[%c0_63, %c0_64] : memref<1x128xf32, #tpu.memory_space<vmem>>, vector<1x128xf32>
    %142 = vector.broadcast %141 : vector<1x128xf32> to vector<128x128xf32>
    %143 = arith.addf %140, %142 : vector<128x128xf32>
    %144 = arith.truncf %143 : vector<128x128xf32> to vector<128x128xbf16>
    %c0_65 = arith.constant 0 : index
    %c0_66 = arith.constant 0 : index
    %145 = vector.load %arg16[%c0_65, %c0_66] : memref<128x512xbf16, #tpu.memory_space<vmem>>, vector<128x512xbf16>
    %cst_67 = arith.constant dense<0.000000e+00> : vector<128x512xf32>
    %146 = tpu.matmul %144, %145, %cst_67 {dimension_numbers = #tpu.dot_dimension_numbers<[1], [0], [0], [1], [0, 0, 1, 1], [], []>} : vector<128x128xbf16>, vector<128x512xbf16>, vector<128x512xf32> -> vector<128x512xf32>
    %c0_68 = arith.constant 0 : index
    %c0_69 = arith.constant 0 : index
    %147 = vector.load %arg17[%c0_68, %c0_69] : memref<1x512xf32, #tpu.memory_space<vmem>>, vector<1x512xf32>
    %148 = vector.broadcast %147 : vector<1x512xf32> to vector<128x512xf32>
    %149 = arith.addf %146, %148 : vector<128x512xf32>
    %cst_70 = arith.constant 0.000000e+00 : f32
    %150 = vector.broadcast %cst_70 : f32 to vector<128x512xf32>
    %151 = arith.maximumf %149, %150 : vector<128x512xf32>
    %152 = arith.truncf %151 : vector<128x512xf32> to vector<128x512xbf16>
    %c0_71 = arith.constant 0 : index
    %c0_72 = arith.constant 0 : index
    %153 = vector.load %arg18[%c0_71, %c0_72] : memref<512x128xbf16, #tpu.memory_space<vmem>>, vector<512x128xbf16>
    %cst_73 = arith.constant dense<0.000000e+00> : vector<128x128xf32>
    %154 = tpu.matmul %152, %153, %cst_73 {dimension_numbers = #tpu.dot_dimension_numbers<[1], [0], [0], [1], [0, 0, 1, 1], [], []>} : vector<128x512xbf16>, vector<512x128xbf16>, vector<128x128xf32> -> vector<128x128xf32>
    %c0_74 = arith.constant 0 : index
    %c0_75 = arith.constant 0 : index
    %155 = vector.load %arg19[%c0_74, %c0_75] : memref<1x128xf32, #tpu.memory_space<vmem>>, vector<1x128xf32>
    %156 = vector.broadcast %155 : vector<1x128xf32> to vector<128x128xf32>
    %157 = arith.addf %154, %156 : vector<128x128xf32>
    %158 = arith.addf %157, %143 : vector<128x128xf32>
    %cst_76 = arith.constant dense<0.000000e+00> : vector<128xf32>
    %159 = vector.multi_reduction <add>, %158, %cst_76 [1] : vector<128x128xf32> to vector<128xf32>
    %160 = vector.shape_cast %159 : vector<128xf32> to vector<128x1xf32>
    %cst_77 = arith.constant 1.280000e+02 : f32
    %161 = vector.broadcast %cst_77 : f32 to vector<128x1xf32>
    %162 = arith.divf %160, %161 : vector<128x1xf32>
    %163 = vector.broadcast %162 : vector<128x1xf32> to vector<128x128xf32>
    %164 = arith.subf %158, %163 : vector<128x128xf32>
    %165 = arith.mulf %164, %164 : vector<128x128xf32>
    %cst_78 = arith.constant dense<0.000000e+00> : vector<128xf32>
    %166 = vector.multi_reduction <add>, %165, %cst_78 [1] : vector<128x128xf32> to vector<128xf32>
    %167 = vector.shape_cast %166 : vector<128xf32> to vector<128x1xf32>
    %cst_79 = arith.constant 1.280000e+02 : f32
    %168 = vector.broadcast %cst_79 : f32 to vector<128x1xf32>
    %169 = arith.divf %167, %168 : vector<128x1xf32>
    %170 = vector.broadcast %162 : vector<128x1xf32> to vector<128x128xf32>
    %171 = arith.subf %158, %170 : vector<128x128xf32>
    %cst_80 = arith.constant 9.99999974E-6 : f32
    %172 = vector.broadcast %cst_80 : f32 to vector<128x1xf32>
    %173 = arith.addf %169, %172 : vector<128x1xf32>
    %174 = math.rsqrt %173 : vector<128x1xf32>
    %175 = vector.broadcast %174 : vector<128x1xf32> to vector<128x128xf32>
    %176 = arith.mulf %171, %175 : vector<128x128xf32>
    %c0_81 = arith.constant 0 : index
    %c0_82 = arith.constant 0 : index
    %177 = vector.load %arg20[%c0_81, %c0_82] : memref<1x128xf32, #tpu.memory_space<vmem>>, vector<1x128xf32>
    %178 = vector.broadcast %177 : vector<1x128xf32> to vector<128x128xf32>
    %179 = arith.mulf %176, %178 : vector<128x128xf32>
    %c0_83 = arith.constant 0 : index
    %c0_84 = arith.constant 0 : index
    %180 = vector.load %arg21[%c0_83, %c0_84] : memref<1x128xf32, #tpu.memory_space<vmem>>, vector<1x128xf32>
    %181 = vector.broadcast %180 : vector<1x128xf32> to vector<128x128xf32>
    %182 = arith.addf %179, %181 : vector<128x128xf32>
    %c0_85 = arith.constant 0 : index
    %c0_86 = arith.constant 0 : index
    %c0_87 = arith.constant 0 : index
    %183 = vector.load %arg22[%c0_85, %c0_86, %c0_87] : memref<1x128x128xf32, #tpu.memory_space<vmem>>, vector<1x128x128xf32>
    %184 = vector.shape_cast %183 : vector<1x128x128xf32> to vector<128x128xf32>
    %185 = vector.shape_cast %182 : vector<128x128xf32> to vector<1x128x128xf32>
    tpu.vector_store %arg22[%c0_85, %c0_86, %c0_87], %185 {strides = array<i32>} : memref<1x128x128xf32, #tpu.memory_space<vmem>>, vector<1x128x128xf32>,
    return
  }
  func.func @transform_0(%arg0: i32, %arg1: i32) -> (i32, i32, i32) {
    %c0_i32 = arith.constant 0 : i32
    %c0_i32_0 = arith.constant 0 : i32
    return %arg0, %arg1, %c0_i32 : i32, i32, i32
  }
  func.func @transform_1(%arg0: i32, %arg1: i32) -> (i32, i32, i32) {
    %c0_i32 = arith.constant 0 : i32
    %c0_i32_0 = arith.constant 0 : i32
    %c0_i32_1 = arith.constant 0 : i32
    return %arg0, %c0_i32, %c0_i32_0 : i32, i32, i32
  }
  func.func @transform_2(%arg0: i32, %arg1: i32) -> (i32, i32, i32) {
    %c0_i32 = arith.constant 0 : i32
    %c0_i32_0 = arith.constant 0 : i32
    %c0_i32_1 = arith.constant 0 : i32
    return %arg0, %c0_i32, %c0_i32_0 : i32, i32, i32
  }
  func.func @transform_3(%arg0: i32, %arg1: i32) -> (i32, i32, i32) {
    %c0_i32 = arith.constant 0 : i32
    %c0_i32_0 = arith.constant 0 : i32
    %c0_i32_1 = arith.constant 0 : i32
    return %arg0, %c0_i32, %c0_i32_0 : i32, i32, i32
  }
  func.func @transform_4(%arg0: i32, %arg1: i32) -> (i32, i32) {
    %c0_i32 = arith.constant 0 : i32
    %c0_i32_0 = arith.constant 0 : i32
    %c0_i32_1 = arith.constant 0 : i32
    return %c0_i32, %c0_i32_0 : i32, i32
  }
  func.func @transform_5(%arg0: i32, %arg1: i32) -> (i32, i32) {
    %c0_i32 = arith.constant 0 : i32
    %c0_i32_0 = arith.constant 0 : i32
    %c0_i32_1 = arith.constant 0 : i32
    return %c0_i32, %c0_i32_0 : i32, i32
  }
  func.func @transform_6(%arg0: i32, %arg1: i32) -> (i32, i32) {
    %c0_i32 = arith.constant 0 : i32
    %c0_i32_0 = arith.constant 0 : i32
    %c0_i32_1 = arith.constant 0 : i32
    return %c0_i32, %c0_i32_0 : i32, i32
  }
  func.func @transform_7(%arg0: i32, %arg1: i32) -> (i32, i32) {
    %c0_i32 = arith.constant 0 : i32
    %c0_i32_0 = arith.constant 0 : i32
    %c0_i32_1 = arith.constant 0 : i32
    return %c0_i32, %c0_i32_0 : i32, i32
  }
  func.func @transform_8(%arg0: i32, %arg1: i32) -> (i32, i32) {
    %c0_i32 = arith.constant 0 : i32
    %c0_i32_0 = arith.constant 0 : i32
    %c0_i32_1 = arith.constant 0 : i32
    return %c0_i32, %c0_i32_0 : i32, i32
  }
  func.func @transform_9(%arg0: i32, %arg1: i32) -> (i32, i32) {
    %c0_i32 = arith.constant 0 : i32
    %c0_i32_0 = arith.constant 0 : i32
    %c0_i32_1 = arith.constant 0 : i32
    return %c0_i32, %c0_i32_0 : i32, i32
  }
  func.func @transform_10(%arg0: i32, %arg1: i32) -> (i32, i32) {
    %c0_i32 = arith.constant 0 : i32
    %c0_i32_0 = arith.constant 0 : i32
    %c0_i32_1 = arith.constant 0 : i32
    return %c0_i32, %c0_i32_0 : i32, i32
  }
  func.func @transform_11(%arg0: i32, %arg1: i32) -> (i32, i32) {
    %c0_i32 = arith.constant 0 : i32
    %c0_i32_0 = arith.constant 0 : i32
    %c0_i32_1 = arith.constant 0 : i32
    return %c0_i32, %c0_i32_0 : i32, i32
  }
  func.func @transform_12(%arg0: i32, %arg1: i32) -> (i32, i32) {
    %c0_i32 = arith.constant 0 : i32
    %c0_i32_0 = arith.constant 0 : i32
    %c0_i32_1 = arith.constant 0 : i32
    return %c0_i32, %c0_i32_0 : i32, i32
  }
  func.func @transform_13(%arg0: i32, %arg1: i32) -> (i32, i32) {
    %c0_i32 = arith.constant 0 : i32
    %c0_i32_0 = arith.constant 0 : i32
    %c0_i32_1 = arith.constant 0 : i32
    return %c0_i32, %c0_i32_0 : i32, i32
  }
  func.func @transform_14(%arg0: i32, %arg1: i32) -> (i32, i32) {
    %c0_i32 = arith.constant 0 : i32
    %c0_i32_0 = arith.constant 0 : i32
    %c0_i32_1 = arith.constant 0 : i32
    return %c0_i32, %c0_i32_0 : i32, i32
  }
  func.func @transform_15(%arg0: i32, %arg1: i32) -> (i32, i32) {
    %c0_i32 = arith.constant 0 : i32
    %c0_i32_0 = arith.constant 0 : i32
    %c0_i32_1 = arith.constant 0 : i32
    return %c0_i32, %c0_i32_0 : i32, i32
  }
  func.func @transform_16(%arg0: i32, %arg1: i32) -> (i32, i32) {
    %c0_i32 = arith.constant 0 : i32
    %c0_i32_0 = arith.constant 0 : i32
    %c0_i32_1 = arith.constant 0 : i32
    return %c0_i32, %c0_i32_0 : i32, i32
  }
  func.func @transform_17(%arg0: i32, %arg1: i32) -> (i32, i32) {
    %c0_i32 = arith.constant 0 : i32
    %c0_i32_0 = arith.constant 0 : i32
    %c0_i32_1 = arith.constant 0 : i32
    return %c0_i32, %c0_i32_0 : i32, i32
  }
  func.func @transform_18(%arg0: i32, %arg1: i32) -> (i32, i32) {
    %c0_i32 = arith.constant 0 : i32
    %c0_i32_0 = arith.constant 0 : i32
    %c0_i32_1 = arith.constant 0 : i32
    return %c0_i32, %c0_i32_0 : i32, i32
  }
  func.func @transform_19(%arg0: i32, %arg1: i32) -> (i32, i32) {
    %c0_i32 = arith.constant 0 : i32
    %c0_i32_0 = arith.constant 0 : i32
    %c0_i32_1 = arith.constant 0 : i32
    return %c0_i32, %c0_i32_0 : i32, i32
  }
  func.func @transform_20(%arg0: i32, %arg1: i32) -> (i32, i32, i32) {
    %c0_i32 = arith.constant 0 : i32
    %c0_i32_0 = arith.constant 0 : i32
    return %arg0, %arg1, %c0_i32 : i32, i32, i32
  }
}

</mosaic_0001>

<bundles_post_ra>
// kernel: tpu_custom_call.1
= control target key start
LH: loop header
LB: loop body
LE: loop exit
PB: predicated region body
PF: predicated region fallthrough
CT: control target
= control target key end

     0   :  { %s11830_s0 = inlined_call_operand.hbm [shape: f32[2,256,128], index: 0, kind: input, shape index: {}]   ;;  %s11831_s1 = inlined_call_operand.hbm [shape: f32[2,256,128], index: 1, kind: input, shape index: {}]   ;;  %s11832_s2 = inlined_call_operand.hbm [shape: f32[2,256,128], index: 2, kind: input, shape index: {}]   ;;  %s11833_s3 = inlined_call_operand.hbm [shape: f32[2,1,256], index: 3, kind: input, shape index: {}]   ;;  %s11834_s4 = inlined_call_operand.hbm [shape: bf16[128,128], index: 4, kind: input, shape index: {}]   ;;  %s11835_s5 = inlined_call_operand.vmem [shape: f32[1,128], index: 5, kind: input, shape index: {}]   ;;  %s11836_s6 = inlined_call_operand.hbm [shape: bf16[128,128], index: 6, kind: input, shape index: {}]   ;;  %s11837_s7 = inlined_call_operand.vmem [shape: f32[1,128], index: 7, kind: input, shape index: {}]   ;;  %s11838_s8 = inlined_call_operand.hbm [shape: bf16[128,128], index: 8, kind: input, shape index: {}]   ;;  %s11839_s9 = inlined_call_operand.vmem [shape: f32[1,128], index: 9, kind: input, shape index: {}]   ;;  %s11840_s10 = inlined_call_operand.hbm [shape: bf16[128,128], index: 10, kind: input, shape index: {}]   ;;  %s11841_s11 = inlined_call_operand.vmem [shape: f32[1,128], index: 11, kind: input, shape index: {}]   ;;  %s11842_s12 = inlined_call_operand.vmem [shape: f32[1,128], index: 12, kind: input, shape index: {}]   ;;  %s11843_s13 = inlined_call_operand.vmem [shape: f32[1,128], index: 13, kind: input, shape index: {}]   ;;  %s11844_s14 = inlined_call_operand.hbm [shape: bf16[128,512], index: 14, kind: input, shape index: {}]   ;;  %s11845_s15 = inlined_call_operand.vmem [shape: f32[1,512], index: 15, kind: input, shape index: {}]   ;;  %s11846_s16 = inlined_call_operand.hbm [shape: bf16[512,128], index: 16, kind: input, shape index: {}]   ;;  %s11847_s17 = inlined_call_operand.vmem [shape: f32[1,128], index: 17, kind: input, shape index: {}]   ;;  %s11848_s18 = inlined_call_operand.vmem [shape: f32[1,128], index: 18, kind: input, shape index: {}]   ;;  %s11849_s19 = inlined_call_operand.vmem [shape: f32[1,128], index: 19, kind: input, shape index: {}]   ;;  %s11850_s20 = inlined_call_operand.hbm [shape: f32[2,256,128], index: 20, kind: output, shape index: {}]  }
   0x1   :  { %11943 = sst [smem:[#allocation80_spill]] %s11830_s0 }
   0x2   :  { %11944 = sst [smem:[#allocation81_spill]] %s11831_s1 }
   0x3   :  { %11945 = sst [smem:[#allocation82_spill]] %s11832_s2 }
   0x4   :  { %11946 = sst [smem:[#allocation83_spill]] %s11833_s3 }
   0x5   :  { %11947 = sst [smem:[#allocation84_spill]] %s11834_s4 }
   0x6   :  { %11948 = sst [smem:[#allocation85_spill]] %s11835_s5 }
   0x7   :  { %11949 = sst [smem:[#allocation86_spill]] %s11836_s6 }
   0x8   :  { %11950 = sst [smem:[#allocation87_spill]] %s11837_s7 }
   0x9   :  { %11951 = sst [smem:[#allocation88_spill]] %s11838_s8 }
   0xa   :  { %11952 = sst [smem:[#allocation89_spill]] %s11839_s9 }
   0xb   :  { %11953 = sst [smem:[#allocation90_spill]] %s11840_s10 }
   0xc   :  { %11954 = sst [smem:[#allocation91_spill]] %s11841_s11 }
   0xd   :  { %11955 = sst [smem:[#allocation92_spill]] %s11842_s12 }
   0xe   :  { %11956 = sst [smem:[#allocation93_spill]] %s11843_s13 }
   0xf   :  { %11957 = sst [smem:[#allocation94_spill]] %s11844_s14 }
  0x10   :  { %11958 = sst [smem:[#allocation95_spill]] %s11845_s15 }
  0x11   :  { %11959 = sst [smem:[#allocation96_spill]] %s11846_s16 }
  0x12   :  { %11960 = sst [smem:[#allocation97_spill]] %s11847_s17 }
  0x13   :  { %11961 = sst [smem:[#allocation98_spill]] %s11848_s18 }
  0x14   :  { %11962 = sst [smem:[#allocation99_spill]] %s11849_s19 }
  0x15   :  { %11963 = sst [smem:[#allocation100_spill]] %s11850_s20 }
  0x16   :  { %25 = vsyncpa [#allocation4], 0 }
  0x17   :  { %27 = vsyncpa [#allocation4 + $0x1], 0 }
  0x18   :  { %28 = vsyncpa [#allocation7], 0 }
  0x19   :  { %30 = vsyncpa [#allocation7 + $0x1], 0 }
  0x1a   :  { %31 = vsyncpa [#allocation10], 0 }
  0x1b   :  { %33 = vsyncpa [#allocation10 + $0x1], 0 }
  0x1c   :  { %34 = vsyncpa [#allocation13], 0 }
  0x1d   :  { %35 = vsyncpa [#allocation16], 0 }
  0x1e   :  { %36 = vsyncpa [#allocation19], 0 }
  0x1f   :  { %37 = vsyncpa [#allocation5], 0 }
  0x20   :  { %39 = vsyncpa [#allocation5 + $0x1], 0  ;;  %s8350_s1 = smov 0   ;;  %s8352_s22 = smov 0  }
  0x21   :  { %s8354_s23 = smov 0   ;;  %s8356_s24 = smov 0  }
  0x22   :  { %s8358_s2 = smov 0   ;;  %s8360_s25 = smov 0  }
  0x23   :  { %s8362_s3 = smov 0   ;;  %s8364_s26 = smov 0  }
  0x24   :  { %s8366_s27 = smov 0   ;;  %s8368_s28 = smov 0  }
  0x25   :  { %s8370_s4 = smov 0  }
  0x26 LB: > { %11964 = sst [smem:[#allocation29_spill]] %s8197_s24  ;;  %s8406_s29 = sadd.s32 4294967295, %s8225_s4   ;;  %s8225_s4 = sphi %s8370_s4, %s45_s4   ;;  %s8221_s28 = sphi %s8368_s28, %s12205_s28   ;;  %s8217_s27 = sphi %s8366_s27, %s12197_s27   ;;  %s8213_s26 = sphi %s8364_s26, %s12204_s26   ;;  %s8209_s3 = sphi %s8362_s3, %s12196_s3   ;;  %s8205_s25 = sphi %s8360_s25, %s12195_s25   ;;  %s8201_s2 = sphi %s8358_s2, %s12203_s2   ;;  %s8197_s24 = sphi %s8356_s24, %s12202_s24   ;;  %s8193_s23 = sphi %s8354_s23, %s12201_s23   ;;  %s8189_s22 = sphi %s8352_s22, %s12200_s22   ;;  %s8185_s1 = sphi %s8350_s1, %s12199_s1  }
  0x27   : > { %11965 = sst [smem:[#allocation30_spill]] %s8205_s25  ;;  %p6529_p0 = scmp.ge.s32.totalorder %s8225_s4, 1 }
  0x28   : > { %11966 = sst [smem:[#allocation31_spill]] %s8209_s3  ;;  %p80_p1 = scmp.eq.s32.totalorder %s8406_s29, 0 }
  0x29   : > { %11967 = sst [smem:[#allocation32_spill]] %s8213_s26  ;;  %p532_p2 = scmp.lt.s32.totalorder %s8225_s4, 5 }
  0x2a   : > { %11968 = sst [smem:[#allocation33_spill]] %s8217_s27  ;;  %s8227_s19 = smov [#allocation11]  }
  0x2b   : > { %s11969_s21 = sld [smem:[#allocation84_spill]]  ;;  %p8414_p3 = pnand %p6529_p0, %p532_p2 }
  0x2c   : > { %s545_s18 = sshll.u32 %s8227_s19, 4  ;;  %s11972_s6 = sld [smem:[#allocation86_spill]]  ;;  %s546_s18 = int_to_ptr.vmem [resolvable:$true] %s545_s18 }
  0x2d   : > { %p7164_p4 = pneg %p8414_p3  ;;  %s11852_s0 = smov 64  }
  0x2e   : > { %s11854_s19 = smov 4   ;;  %s8230_s13 = smov [#allocation12]  }
  0x2f   : > { %p8422_p5 = pnand %p7164_p4, %p80_p1  ;;  %s562_s15 = sshll.u32 %s8230_s13, 4  ;;  %s563_s15 = int_to_ptr.vmem [resolvable:$true] %s562_s15 }
  0x30   : > { %s11973_s10 = sld [smem:[#allocation90_spill]]  ;;  %p74_p6 = scmp.eq.s32.totalorder %s8225_s4, 0 }
  0x31   : > { %s543_s20 = sshll.u32 %s11969_s21, 4  ;;  %p99_p7 = scmp.ne.s32.totalorder %s8193_s23, %s8189_s22  ;;  %s544_s20 = int_to_ptr.hbm [resolvable:$true] %s543_s20 }
  0x32   : > { %s560_s30 = sshll.u32 %s11972_s6, 4  ;;  %p105_p8 = scmp.ne.s32.totalorder %s8189_s22, %s8185_s1  ;;  %s561_s30 = int_to_ptr.hbm [resolvable:$true] %s560_s30 }
  0x33   : > { %7167 = dma.hbm_to_vmem [thread:$0]  (!%p8422_p5), %s544_s20, 1024, %s546_s18, [#allocation10], %s11852_s0, %s11852_s0, %s11854_s19  }
  0x34   : > { %7170 = dma.hbm_to_vmem [thread:$0]  (!%p8422_p5), %s561_s30, 1024, %s563_s15, [#allocation13], %s11852_s0, %s11852_s0, %s11854_s19  }
  0x35   : > { %s8231_s18 = smov [#allocation15]   ;;  %p11864_p9 = scmp.lt.s32.totalorder %s8225_s4, 4 }
  0x36   : > { %s594_s12 = sshll.u32 %s11973_s10, 4  ;;  %s596_s20 = sshll.u32 %s8231_s18, 4  ;;  %s595_s12 = int_to_ptr.hbm [resolvable:$true] %s594_s12  ;;  %s597_s20 = int_to_ptr.vmem [resolvable:$true] %s596_s20 }
  0x37   : > { %7176 = dma.hbm_to_vmem [thread:$0]  (!%p8422_p5), %s595_s12, 1024, %s597_s20, [#allocation16], %s11852_s0, %s11852_s0, %s11854_s19  }
  0x38   : > { %p101_p10 = por %p99_p7, %p74_p6  ;;  %p8458_p11 = por %p105_p8, %p80_p1 }
  0x39   : > { %s11857_s15 = sand.u32 1, %s8193_s23   ;;  %s7016_s18 = sshll.u32 %s8221_s28, 8 }
  0x3a   : > { %s11974_s30 = scalar_select %p8458_p11, 1, 0 }
  0x3b   : > { %s6541_s21 = sshll.u32 %s11857_s15, 8  ;;  %s11976_s6 = sld [smem:[#allocation81_spill]] }
  0x3c   : > { %11975 = sst [smem:[#allocation34_spill]] %s11974_s30  ;;  %s687_s19 = scalar_lea.vmem [#allocation6], %s6541_s21 }
  0x3d   : > { %s695_s1 = sshll.u32 %s687_s19, 4  ;;  %p8472_p12 = pnand %p11864_p9, %p101_p10  ;;  %s696_s1 = int_to_ptr.vmem [resolvable:$true] %s695_s1 }
  0x3e   : > { %s11978_s9 = sld [smem:[#allocation82_spill]]  ;;  %s11979_s5 = sand.u32 1, %s8225_s4  }
  0x3f   : > { %s8481_s12 = scalar_lea.sflag [#allocation7], %s11979_s5  ;;  %s11860_s19 = smov 128  }
  0x40   : > { %s11980_s8 = sld [smem:[#allocation88_spill]]  ;;  %s8234_s13 = smov [#allocation14]  }
  0x41   : > { %s692_s0 = scalar_lea.hbm %s11976_s6, %s7016_s18  ;;  %s709_s6 = scalar_lea.vmem [#allocation8], %s6541_s21 }
  0x42   : > { %s693_s10 = sshll.u32 %s692_s0, 4  ;;  %s11862_s0 = smov 8   ;;  %s694_s10 = int_to_ptr.hbm [resolvable:$true] %s693_s10 }
  0x43   : > { %7189 = dma.hbm_to_vmem [thread:$0]  (!%p8472_p12), %s694_s10, 4096, %s696_s1, %s8481_s12, %s11860_s19, %s11860_s19, %s11862_s0  }
  0x44   : > { %s714_s15 = scalar_lea.hbm %s11978_s9, %s7016_s18  ;;  %s8491_s20 = sshll.u32 %s709_s6, 4  ;;  %s718_s20 = int_to_ptr.vmem [resolvable:$true] %s8491_s20 }
  0x45   : > { %s715_s7 = sshll.u32 %s714_s15, 4  ;;  %s579_s15 = sshll.u32 %s8234_s13, 4  ;;  %s8489_s7 = int_to_ptr.hbm [resolvable:$true] %s715_s7  ;;  %s580_s15 = int_to_ptr.vmem [resolvable:$true] %s579_s15 }
  0x46   : > { %s577_s5 = sshll.u32 %s11980_s8, 4  ;;  %s11981_s14 = sld [smem:[#allocation94_spill]]  ;;  %s578_s5 = int_to_ptr.hbm [resolvable:$true] %s577_s5 }
  0x47   : > { %s11982_s21 = smov 4   ;;  %s11983_s1 = smov 64  }
  0x48   : > { %7173 = dma.hbm_to_vmem [thread:$0]  (!%p8422_p5), %s578_s5, 1024, %s580_s15, [#allocation13], %s11983_s1, %s11983_s1, %s11982_s21  }
  0x49   : > { %s8235_s6 = smov [#allocation17]   ;;  %s11984_s16 = sld [smem:[#allocation96_spill]] }
  0x4a   : > { %s619_s9 = sshll.u32 %s8235_s6, 4  ;;  %s8236_s18 = smov 256   ;;  %s620_s9 = int_to_ptr.vmem [resolvable:$true] %s619_s9 }
  0x4b   : > { %s8237_s19 = smov 16   ;;  %s8238_s5 = smov [#allocation18]  }
  0x4c   : > { %s617_s10 = sshll.u32 %s11981_s14, 4  ;;  %s636_s15 = sshll.u32 %s8238_s5, 4  ;;  %s618_s10 = int_to_ptr.hbm [resolvable:$true] %s617_s10  ;;  %s637_s15 = int_to_ptr.vmem [resolvable:$true] %s636_s15 }
  0x4d   : > { %7179 = dma.hbm_to_vmem [thread:$0]  (!%p8422_p5), %s618_s10, 4096, %s620_s9, [#allocation16], %s8236_s18, %s8236_s18, %s8237_s19  }
  0x4e   : > { %s6528_s6 = sadd.s32 4294967294, %s8225_s4   ;;  %s54_s3 = sadd.s32 1, %s8217_s27 }
  0x4f   : > { %s634_s13 = sshll.u32 %s11984_s16, 4  ;;  %p55_p13 = scmp.ge.s32.totalorder %s54_s3, 2  ;;  %s635_s13 = int_to_ptr.hbm [resolvable:$true] %s634_s13 }
  0x50   : > { %7182 = dma.hbm_to_vmem [thread:$0]  (!%p8422_p5), %s635_s13, 4096, %s637_s15, [#allocation19], %s11983_s1, %s11983_s1, %s11982_s21  }
  0x51   : > { %s57_s30 = sadd.s32 1, %s8221_s28  ;;  %s66_s0 = sadd.s32 1, %s8205_s25 }
  0x52   : > { %p73_p0 = scmp.ne.s32.totalorder %s8205_s25, %s8201_s2  ;;  %s12207_s3 = smov (%p55_p13, %s54_s3), 0 }
  0x53   : > { %11985 = sst [smem:[#allocation35_spill]] %s12207_s3  ;;  %s12209_s30 = smov (!%p55_p13, %s57_s30), %s8221_s28 }
  0x54   : > { %s62_s17 = ssub.s32 %s8217_s27, %s12207_s3  ;;  %p8528_p2 = por %p74_p6, %p73_p0 }
  0x55   : > { %p59_p4 = scmp.ge.s32.totalorder %s12209_s30, 2  ;;  %p79_p5 = scmp.ne.s32.totalorder %s8201_s2, %s8197_s24 }
  0x56   : > { %p519_p7 = scmp.eq.s32.totalorder %s8406_s29, 3  ;;  %p525_p8 = scmp.eq.s32.totalorder %s6528_s6, 3 }
  0x57   : > { %s12211_s30 = smov (%p59_p4, %s12209_s30), 0  ;;  %p8539_p10 = por %p80_p1, %p79_p5 }
  0x58   : > { %11987 = sst [smem:[#allocation36_spill]] %s12211_s30  ;;  %p8543_p13 = por %p519_p7, %p73_p0 }
  0x59   : > { %s61_s1 = ssub.s32 %s8221_s28, %s12211_s30  ;;  %p8549_p6 = por %p525_p8, %p79_p5 }
  0x5a   : > { %s63_s13 = sor.u32 %s62_s17, %s61_s1  ;;  %p90_p4 = scmp.eq.s32.totalorder %s61_s1, 0 }
  0x5b   : > { %s11990_s9 = scalar_select %p8549_p6, 1, 0 }
  0x5c   : > { %p64_p9 = scmp.eq.s32.totalorder %s63_s13, 0  ;;  %s659_s18 = sand.u32 1, %s8205_s25  }
  0x5d   : > { %11991 = sst [smem:[#allocation37_spill]] %s11990_s9  ;;  %s11992_s5 = sadd.s32 1, %s8193_s23 }
  0x5e   : > { %s8557_s15 = scalar_select %p90_p4, %s8193_s23, %s11992_s5  }
  0x5f   : > { %s8560_s6 = scalar_select %p64_p9, %s8205_s25, %s66_s0  }
  0x60   : > { %11993 = sst [smem:[#allocation38_spill]] %s8557_s15  ;;  %s6537_s8 = sshll.u32 %s659_s18, 7 }
  0x61   : > { %11994 = sst [smem:[#allocation39_spill]] %s8560_s6  ;;  %s6538_s14 = sshll.u32 %s8217_s27, 4 }
  0x62   : > { %s6539_s16 = sshll.u32 %s8221_s28, 5  ;;  %s663_s30 = scalar_lea.vmem [#allocation3], %s6537_s8 }
  0x63   : > { %s673_s3 = sshll.u32 %s663_s30, 4  ;;  %s668_s17 = sadd.s32 %s6539_s16, %s6538_s14  ;;  %s674_s3 = int_to_ptr.vmem [resolvable:$true] %s673_s3 }
  0x64   : > { %s6540_s1 = sshll.u32 %s668_s17, 3  ;;  %p11995_p0 = scmp.lt.s32.totalorder %s8225_s4, 4 }
  0x65   : > { %s11996_s5 = sld [smem:[#allocation80_spill]]  ;;  %s11997_s15 = sand.u32 1, %s8193_s23  }
  0x66   : > { %p7184_p5 = pnand %p11995_p0, %p8528_p2  ;;  %s6547_s9 = sshll.u32 %s11997_s15, 1 }
  0x67   : > { %s660_s27 = scalar_lea.sflag [#allocation4], %s659_s18  ;;  %s11998_s24 = smov 8  }
  0x68   : > { %s11999_s8 = smov 128   ;;  %s6548_s14 = sshll.u32 %s8221_s28, 1 }
  0x69   : > { %7192 = dma.hbm_to_vmem [thread:$0]  (!%p8472_p12), %s8489_s7, 4096, %s718_s20, %s8481_s12, %s11999_s8, %s11999_s8, %s11998_s24  }
  0x6a   : > { %s12000_s19 = sld [smem:[#allocation83_spill]]  ;;  %s12001_s18 = sand.u32 1, %s8225_s4  }
  0x6b   : > { %s670_s6 = scalar_lea.hbm %s11996_s5, %s6540_s1  ;;  %s728_s15 = scalar_lea.sflag [#allocation10], %s12001_s18 }
  0x6c   : > { %s671_s25 = sshll.u32 %s670_s6, 4  ;;  %s731_s6 = scalar_lea.vmem [#allocation9], %s6547_s9  ;;  %s672_s25 = int_to_ptr.hbm [resolvable:$true] %s671_s25 }
  0x6d   : > { %7186 = dma.hbm_to_vmem [thread:$0]  (!%p7184_p5), %s672_s25, 2048, %s674_s3, %s660_s27, %s11999_s8, %s11999_s8, %s11998_s24  }
  0x6e   : > { %s739_s1 = sshll.u32 %s731_s6, 4  ;;  %748 = sbr.rel (%p8414_p3) target bundleno = 3257 (0xcb9), region = 100  ;;  %s740_s1 = int_to_ptr.vmem [resolvable:$true] %s739_s1 }
  0x70   : > { %s735_s17 = scalar_lea.hbm %s12000_s19, %s6548_s14 }
  0x71   : > { %s737_s13 = sshll.u32 %s735_s17, 4  ;;  %s738_s13 = int_to_ptr.hbm [resolvable:$true] %s737_s13 }
  0x72   : > { %7195 = dma.hbm_to_vmem [thread:$0]  (!%p8472_p12), %s738_s13, 32, %s740_s1, %s728_s15  }
  0x73   : > { %s8596_s7 = sand.u32 1, %s8201_s2  }
  0x74   : > { %s6550_s24 = sshll.u32 %s8596_s7, 7  ;;  %s751_s25 = scalar_lea.sflag [#allocation4], %s8596_s7 }
  0x75   : > { %s8602_s27 = scalar_lea.vmem [#allocation3], %s6550_s24 }
  0x76   : > { %8152 = dma.done.wait (%p8539_p10), %s751_s25, 2048  }
  0x77   : > { %8154 = vsyncadd (%p8539_p10), %s751_s25, 4294965248  ;;  %s760_s26 = sand.u32 1, %s8406_s29   ;;  %s762_s12 = sand.u32 1, %s8189_s22  }
  0x78   : > { %s6551_s20 = sshll.u32 %s762_s12, 8  ;;  %s761_s3 = scalar_lea.sflag [#allocation7], %s760_s26 }
  0x79   : > { %s8610_s9 = scalar_lea.vmem [#allocation6], %s6551_s20 }
  0x7a   : > { %8156 = dma.done.wait (%p8458_p11), %s761_s3, 8192  }
  0x7b   : > { %8158 = vsyncadd (%p8458_p11), %s761_s3, 4294959104  ;;  %s8616_s0 = sshll.u32 %s762_s12, 1  ;;  %s8618_s10 = scalar_lea.vmem [#allocation8], %s6551_s20 }
  0x7c   : > { %s781_s5 = scalar_lea.sflag [#allocation10], %s760_s26  ;;  %s784_s8 = scalar_lea.vmem [#allocation9], %s8616_s0 }
  0x7d   : > { %8160 = dma.done.wait (%p8458_p11), %s781_s5, 32  }
  0x7e   : > { %8162 = vsyncadd (%p8458_p11), %s781_s5, 4294967264 }
  0x7f   : > { %8164 = dma.done.wait (%p80_p1), [#allocation10], 1024  }
  0x80   : > { %8166 = vsyncadd (%p80_p1), [#allocation10], 4294966272 }
  0x81   : > { %8168 = dma.done.wait (%p80_p1), [#allocation13], 2048  }
  0x82   : > { %8170 = vsyncadd (%p80_p1), [#allocation13], 4294965248 }
  0x83   : > { %8172 = dma.done.wait (%p80_p1), [#allocation16], 5120  }
  0x84   : > { %8174 = vsyncadd (%p80_p1), [#allocation16], 4294962176 }
  0x85   : > { %8176 = dma.done.wait (%p80_p1), [#allocation19], 4096  }
  0x86   : > { %8178 = vsyncadd (%p80_p1), [#allocation19], 4294963200  ;;  %v7025_v0 = vld [vmem:[#allocation11 + $0x38] sm:$0xff]  ;;  %v7024_v2 = vld [vmem:[#allocation11 + $0x30] sm:$0xff]  ;;  %s12003_s16 = sld [smem:[#allocation85_spill]]  ;;  %s8239_s6 = smov 64  }
  0x87   : > { %v7033_v1 = vld [vmem:[#allocation12 + $0x38] sm:$0xff]  ;;  %1077 = vmatpush.bf16.msra.mxu0 %v7025_v0  ;;  %7114 = vmatpush.bf16.msra.mxu2 %v7025_v0  ;;  %v7032_v3 = vld [vmem:[#allocation12 + $0x30] sm:$0xff]  ;;  %v7023_v4 = vld [vmem:[#allocation11 + $0x28] sm:$0xff]  ;;  %s12004_s17 = sld [smem:[#allocation87_spill]]  ;;  %s8240_s1 = smov 96   ;;  %vm1662_vm0 = vcmask 261120  }
  0x88   : > { %1210 = vmatpush.bf16.msra.mxu1 %v7033_v1  ;;  %7122 = vmatpush.bf16.msra.mxu3 %v7033_v1  ;;  %v7031_v5 = vld [vmem:[#allocation12 + $0x28] sm:$0xff]  ;;  %v7022_v6 = vld [vmem:[#allocation11 + $0x20] sm:$0xff]  ;;  %v7021_v8 = vld [vmem:[#allocation11 + $0x18] sm:$0xff]  ;;  %s8241_s13 = smov 32   ;;  %s12013_s25 = sld [smem:[#allocation89_spill]]  ;;  %vm2983_vm1 = vcmask 523520  }
  0x89   : > { %v7030_v7 = vld [vmem:[#allocation12 + $0x20] sm:$0xff]  ;;  %v7029_v9 = vld [vmem:[#allocation12 + $0x18] sm:$0xff]  ;;  %v7020_v10 = vld [vmem:[#allocation11 + $0x10] sm:$0xff]  ;;  %vm3684_vm2 = vcmask 785920   ;;  %vm4385_vm3 = vcmask 1048320   ;;  %s12182_s20 = sld [smem:[#allocation91_spill]] }
  0x8a   : > { %v7028_v11 = vld [vmem:[#allocation12 + $0x10] sm:$0xff]  ;;  %v7019_v12 = vld [vmem:[#allocation11 + $0x8] sm:$0xff]  ;;  %v7018_v14 = vld [vmem:[#allocation11] sm:$0xff]  ;;  %s12184_s29 = sld [smem:[#allocation93_spill]]  ;;  %s11701_s26 = scalar_lea.vmem [#allocation20], %s6550_s24 }
  0x8b   : > { %1078 = vmatpush.bf16.msra.mxu0 %v7024_v2  ;;  %7115 = vmatpush.bf16.msra.mxu2 %v7024_v2  ;;  %v7027_v13 = vld [vmem:[#allocation12 + $0x8] sm:$0xff]  ;;  %v7026_v15 = vld [vmem:[#allocation12] sm:$0xff]  ;;  %v7041_v28 = vld [vmem:[#allocation14 + $0x38] sm:$0xff]  ;;  %s12185_s30 = sld [smem:[#allocation95_spill]]  ;;  %s6295_s14 = scalar_lea.sflag [#allocation5], %s8596_s7 }
  0x8c   : > { %1211 = vmatpush.bf16.msra.mxu1 %v7032_v3  ;;  %7123 = vmatpush.bf16.msra.mxu3 %v7032_v3  ;;  %v889_v16 = vld [vmem:[%s8602_s27] sm:$0xff]  ;;  %v890_v17 = vld [vmem:[%s8602_s27 + $0x8] sm:$0xff]  ;;  %v7040_v29 = vld [vmem:[#allocation14 + $0x30] sm:$0xff]  ;;  %s12187_s18 = sld [smem:[#allocation98_spill]] }
  0x8d   : > { %v897_v18 = vld [vmem:[%s8602_s27 + $0x40] sm:$0xff]  ;;  %v898_v19 = vld [vmem:[%s8602_s27 + $0x48] sm:$0xff]  ;;  %v905_v24 = vpack.c.bf16 %v890_v17, %v889_v16  ;;  %v891_v31 = vld [vmem:[%s8602_s27 + $0x10] sm:$0xff]  ;;  %s12189_s24 = sld [smem:[#allocation32_spill]] }
  0x8e   : > { %v913_v20 = vld [vmem:[%s8610_s9] sm:$0xff]  ;;  %v914_v21 = vld [vmem:[%s8610_s9 + $0x8] sm:$0xff]  ;;  %v909_v25 = vpack.c.bf16 %v898_v19, %v897_v18  ;;  %v892_v32 = vld [vmem:[%s8602_s27 + $0x18] sm:$0xff] }
  0x8f   : > { %1079 = vmatpush.bf16.msra.mxu0 %v7023_v4  ;;  %7116 = vmatpush.bf16.msra.mxu2 %v7023_v4  ;;  %v937_v22 = vld [vmem:[%s8610_s9 + $0xc0] sm:$0xff]  ;;  %v938_v23 = vld [vmem:[%s8610_s9 + $0xc8] sm:$0xff]  ;;  %v945_v26 = vpack.c.bf16 %v914_v21, %v913_v20  ;;  %v899_v33 = vld [vmem:[%s8602_s27 + $0x50] sm:$0xff]  ;;  %v906_v40 = vpack.c.bf16 %v892_v32, %v891_v31 }
  0x90   : > { %1212 = vmatpush.bf16.msra.mxu1 %v7031_v5  ;;  %7124 = vmatpush.bf16.msra.mxu3 %v7031_v5  ;;  %v957_v27 = vpack.c.bf16 %v938_v23, %v937_v22  ;;  %v7039_v30 = vld [vmem:[#allocation14 + $0x28] sm:$0xff]  ;;  %v900_v34 = vld [vmem:[%s8602_s27 + $0x58] sm:$0xff]  ;;  %v7038_v39 = vld [vmem:[#allocation14 + $0x20] sm:$0xff] }
  0x91   : > { %v915_v35 = vld [vmem:[%s8610_s9 + $0x10] sm:$0xff]  ;;  %v916_v36 = vld [vmem:[%s8610_s9 + $0x18] sm:$0xff]  ;;  %v910_v41 = vpack.c.bf16 %v900_v34, %v899_v33  ;;  %v901_v47 = vld [vmem:[%s8602_s27 + $0x60] sm:$0xff] }
  0x92   : > { %v939_v37 = vld [vmem:[%s8610_s9 + $0xd0] sm:$0xff]  ;;  %v940_v38 = vld [vmem:[%s8610_s9 + $0xd8] sm:$0xff]  ;;  %v946_v42 = vpack.c.bf16 %v916_v36, %v915_v35  ;;  %v902_v48 = vld [vmem:[%s8602_s27 + $0x68] sm:$0xff] }
  0x93   : > { %1080 = vmatpush.bf16.msra.mxu0 %v7022_v6  ;;  %7117 = vmatpush.bf16.msra.mxu2 %v7022_v6  ;;  %v958_v43 = vpack.c.bf16 %v940_v38, %v939_v37  ;;  %v7037_v44 = vld [vmem:[#allocation14 + $0x18] sm:$0xff]  ;;  %v7036_v45 = vld [vmem:[#allocation14 + $0x10] sm:$0xff]  ;;  %v7035_v46 = vld [vmem:[#allocation14 + $0x8] sm:$0xff]  ;;  %v911_v56 = vpack.c.bf16 %v902_v48, %v901_v47 }
  0x94   : > { %1213 = vmatpush.bf16.msra.mxu1 %v7030_v7  ;;  %7125 = vmatpush.bf16.msra.mxu3 %v7030_v7  ;;  %v917_v49 = vld [vmem:[%s8610_s9 + $0x20] sm:$0xff]  ;;  %v918_v50 = vld [vmem:[%s8610_s9 + $0x28] sm:$0xff]  ;;  %v903_v60 = vld [vmem:[%s8602_s27 + $0x70] sm:$0xff] }
  0x95   : > { %v893_v51 = vld [vmem:[%s8602_s27 + $0x20] sm:$0xff]  ;;  %v894_v52 = vld [vmem:[%s8602_s27 + $0x28] sm:$0xff]  ;;  %v947_v58 = vpack.c.bf16 %v918_v50, %v917_v49  ;;  %v904_v61 = vld [vmem:[%s8602_s27 + $0x78] sm:$0xff] }
  0x96   : > { %v941_v53 = vld [vmem:[%s8610_s9 + $0xe0] sm:$0xff]  ;;  %v942_v54 = vld [vmem:[%s8610_s9 + $0xe8] sm:$0xff]  ;;  %v907_v57 = vpack.c.bf16 %v894_v52, %v893_v51  ;;  %v919_v62 = vld [vmem:[%s8610_s9 + $0x30] sm:$0xff]  ;;  %v912_v2 = vpack.c.bf16 %v904_v61, %v903_v60 }
  0x97   : > { %1081 = vmatpush.bf16.msra.mxu0 %v7021_v8  ;;  %7118 = vmatpush.bf16.msra.mxu2 %v7021_v8  ;;  %v7034_v55 = vld [vmem:[#allocation14] sm:$0xff]  ;;  %v959_v59 = vpack.c.bf16 %v942_v54, %v941_v53  ;;  %v920_v63 = vld [vmem:[%s8610_s9 + $0x38] sm:$0xff]  ;;  %v943_v0 = vld [vmem:[%s8610_s9 + $0xf0] sm:$0xff] }
  0x98   : > { %1214 = vmatpush.bf16.msra.mxu1 %v7029_v9  ;;  %7126 = vmatpush.bf16.msra.mxu3 %v7029_v9  ;;  %v944_v1 = vld [vmem:[%s8610_s9 + $0xf8] sm:$0xff]  ;;  %v948_v3 = vpack.c.bf16 %v920_v63, %v919_v62  ;;  %v895_v5 = vld [vmem:[%s8602_s27 + $0x30] sm:$0xff]  ;;  %v961_v8 = vld [vmem:[%s8618_s10] sm:$0xff] }
  0x99   : > { %v960_v4 = vpack.c.bf16 %v944_v1, %v943_v0  ;;  %v896_v6 = vld [vmem:[%s8602_s27 + $0x38] sm:$0xff]  ;;  %v962_v9 = vld [vmem:[%s8618_s10 + $0x8] sm:$0xff]  ;;  %v923_v16 = vld [vmem:[%s8610_s9 + $0x50] sm:$0xff]  ;;  %s12180_s27 = sld [smem:[#allocation31_spill]] }
  0x9a   : > { %v908_v7 = vpack.c.bf16 %v896_v6, %v895_v5  ;;  %v924_v17 = vld [vmem:[%s8610_s9 + $0x58] sm:$0xff]  ;;  %v965_v20 = vld [vmem:[%s8618_s10 + $0x20] sm:$0xff]  ;;  %v966_v21 = vld [vmem:[%s8618_s10 + $0x28] sm:$0xff] }
  0x9b   : > { %1082 = vmatpush.bf16.msra.mxu0 %v7020_v10  ;;  %7119 = vmatpush.bf16.msra.mxu2 %v7020_v10  ;;  %v921_v10 = vld [vmem:[%s8610_s9 + $0x40] sm:$0xff]  ;;  %v950_v19 = vpack.c.bf16 %v924_v17, %v923_v16  ;;  %v926_v23 = vld [vmem:[%s8610_s9 + $0x68] sm:$0xff] }
  0x9c   : > { %1215 = vmatpush.bf16.msra.mxu1 %v7028_v11  ;;  %7127 = vmatpush.bf16.msra.mxu3 %v7028_v11  ;;  %v922_v11 = vld [vmem:[%s8610_s9 + $0x48] sm:$0xff]  ;;  %v925_v22 = vld [vmem:[%s8610_s9 + $0x60] sm:$0xff] }
  0x9d   : > { %v969_v32 = vld [vmem:[%s8618_s10 + $0x40] sm:$0xff]  ;;  %v970_v33 = vld [vmem:[%s8618_s10 + $0x48] sm:$0xff] }
  0x9e   : > { %v929_v34 = vld [vmem:[%s8610_s9 + $0x80] sm:$0xff]  ;;  %v930_v35 = vld [vmem:[%s8610_s9 + $0x88] sm:$0xff]  ;;  %v997_v36 = vpack.c.bf16 %v970_v33, %v969_v32 }
  0x9f   : > { %1083 = vmatpush.bf16.msra.mxu0 %v7019_v12  ;;  %7120 = vmatpush.bf16.msra.mxu2 %v7019_v12  ;;  %v993_v12 = vpack.c.bf16 %v962_v9, %v961_v8  ;;  %v953_v38 = vpack.c.bf16 %v930_v35, %v929_v34  ;;  %v933_v32 = vld [vmem:[%s8610_s9 + $0xa0] sm:$0xff]  ;;  %v934_v33 = vld [vmem:[%s8610_s9 + $0xa8] sm:$0xff]  ;;  %s6753_s11 = sshll.u32 %s12180_s27, 7  ;;  %s7011_s12 = sshll.u32 %s12180_s27, 4 }
  0xa0   : > { %1216 = vmatpush.bf16.msra.mxu1 %v7027_v13  ;;  %7128 = vmatpush.bf16.msra.mxu3 %v7027_v13  ;;  %v949_v13 = vpack.c.bf16 %v922_v11, %v921_v10  ;;  %s11081_s3 = scalar_lea.vmem %s8618_s10, %s6753_s11 [#allocation8]  ;;  %s12188_s11 = sld [smem:[#allocation99_spill]] }
  0xa3   : > { %1084 = vmatpush.bf16.msra.mxu0 %v7018_v14  ;;  %7121 = vmatpush.bf16.msra.mxu2 %v7018_v14  ;;  %v963_v14 = vld [vmem:[%s8618_s10 + $0x10] sm:$0xff] }
  0xa4   : > { %1217 = vmatpush.bf16.msra.mxu1 %v7026_v15  ;;  %7129 = vmatpush.bf16.msra.mxu3 %v7026_v15  ;;  %v964_v15 = vld [vmem:[%s8618_s10 + $0x18] sm:$0xff] }
  0xa5   : > { %v994_v18 = vpack.c.bf16 %v964_v15, %v963_v14 }
  0xa6   : > { %1085 = vmatmul.bf16.vlgmr.msra.gmra.mxu0 %v905_v24  ;;  %1105 = vmatmul.bf16.vlgmr.msra.gmra.mxu2 %v909_v25  ;;  %v995_v24 = vpack.c.bf16 %v966_v21, %v965_v20  ;;  %v951_v25 = vpack.c.bf16 %v926_v23, %v925_v22 }
  0xa7   : > { %1218 = vmatmul.bf16.vlgmr.msra.gmra.mxu1 %v945_v26  ;;  %1278 = vmatmul.bf16.vlgmr.msra.gmra.mxu3 %v957_v27  ;;  %v967_v26 = vld [vmem:[%s8618_s10 + $0x30] sm:$0xff]  ;;  %v968_v27 = vld [vmem:[%s8618_s10 + $0x38] sm:$0xff] }
  0xa8   : > { %1367 = vmatpush.bf16.msrb.mxu2 %v7041_v28  ;;  %v927_v28 = vld [vmem:[%s8610_s9 + $0x70] sm:$0xff] }
  0xac   : > { %1368 = vmatpush.bf16.msrb.mxu2 %v7040_v29  ;;  %v928_v29 = vld [vmem:[%s8610_s9 + $0x78] sm:$0xff] }
  0xad   : > { %v952_v31 = vpack.c.bf16 %v928_v29, %v927_v28  ;;  %v973_v28 = vld [vmem:[%s8618_s10 + $0x60] sm:$0xff]  ;;  %v974_v29 = vld [vmem:[%s8618_s10 + $0x68] sm:$0xff] }
  0xb0   : > { %1369 = vmatpush.bf16.msrb.mxu2 %v7039_v30  ;;  %v996_v30 = vpack.c.bf16 %v968_v27, %v967_v26 }
  0xb4   : > { %1370 = vmatpush.bf16.msrb.mxu2 %v7038_v39  ;;  %v8696_v39 = vld [vmem:[%s12003_s16] ss:$0 sm:$0xff] }
  0xb6   : > { %1090 = vmatmul.bf16.gmra.mxu0 %v906_v40  ;;  %1110 = vmatmul.bf16.gmra.mxu2 %v910_v41  ;;  %v8701_v41 = vld [vmem:[%s12004_s17] ss:$0 sm:$0xff] }
  0xb7   : > { %1223 = vmatmul.bf16.gmra.mxu1 %v946_v42  ;;  %1283 = vmatmul.bf16.gmra.mxu3 %v958_v43 }
  0xb8   : > { %1371 = vmatpush.bf16.msrb.mxu2 %v7037_v44 }
  0xbc   : > { %1372 = vmatpush.bf16.msrb.mxu2 %v7036_v45 }
  0xc0   : > { %1373 = vmatpush.bf16.msrb.mxu2 %v7035_v46 }
  0xc4   : > { %1374 = vmatpush.bf16.msrb.mxu2 %v7034_v55  ;;  %v971_v55 = vld [vmem:[%s8618_s10 + $0x50] sm:$0xff] }
  0xc6   : > { %1115 = vmatmul.bf16.gmra.mxu2 %v911_v56  ;;  %1095 = vmatmul.bf16.gmra.mxu0 %v907_v57  ;;  %v972_v56 = vld [vmem:[%s8618_s10 + $0x58] sm:$0xff] }
  0xc7   : > { %1228 = vmatmul.bf16.gmra.mxu1 %v947_v58  ;;  %1288 = vmatmul.bf16.gmra.mxu3 %v959_v59  ;;  %v931_v58 = vld [vmem:[%s8610_s9 + $0x90] sm:$0xff]  ;;  %v932_v59 = vld [vmem:[%s8610_s9 + $0x98] sm:$0xff] }
  0xc8   : > { %v954_v6 = vpack.c.bf16 %v932_v59, %v931_v58 }
  0xd6   : > { %1120 = vmatmul.bf16.gmra.mxu2 %v912_v2  ;;  %1100 = vmatmul.bf16.gmra.mxu0 %v908_v7  ;;  %v998_v2 = vpack.c.bf16 %v972_v56, %v971_v55 }
  0xd7   : > { %1233 = vmatmul.bf16.gmra.mxu1 %v948_v3  ;;  %1293 = vmatmul.bf16.gmra.mxu3 %v960_v4 }
  0xe6   : > { %1375 = vmatmul.bf16.vlgmr.msrb.gmra.mxu2 %v993_v12 }
  0xe7   : > { %1238 = vmatmul.bf16.gmra.mxu1 %v949_v13 }
  0xf6   : > { %1380 = vmatmul.bf16.gmra.mxu2 %v994_v18 }
  0xf7   : > { %1243 = vmatmul.bf16.gmra.mxu1 %v950_v19 }
 0x106   : > { %1385 = vmatmul.bf16.gmra.mxu2 %v995_v24 }
 0x107   : > { %1248 = vmatmul.bf16.gmra.mxu1 %v951_v25 }
 0x116   : > { %1390 = vmatmul.bf16.gmra.mxu2 %v996_v30 }
 0x117   : > { %1253 = vmatmul.bf16.gmra.mxu1 %v952_v31 }
 0x123   : > { %v1086_v37 = vpop.f32.mrf.mxu0 }
 0x124   : > { %v1219_v40 = vpop.f32.mrf.mxu1  ;;  %v1087_v42 = vadd.f32 %v8696_v39, %v1086_v37 }
 0x125   : > { %v1220_v43 = vadd.f32 %v8701_v41, %v1219_v40  ;;  %v999_v40 = vpack.c.bf16 %v974_v29, %v973_v28 }
 0x126   : > { %1395 = vmatmul.bf16.gmra.mxu2 %v997_v36  ;;  %v1126_v47 = vmul.f32 0.17677669, %v1087_v42  ;;  %v955_v42 = vpack.c.bf16 %v934_v33, %v933_v32 }
 0x127   : > { %1258 = vmatmul.bf16.gmra.mxu1 %v953_v38  ;;  %v1472_v50 = vpack.c.bf16 %v1220_v43, %v1220_v43 }
 0x128   : > { %v1456_v57 = vpack.c.bf16 %v1126_v47, %v1126_v47 }
 0x129   : > { %v1106_v44 = vpop.f32.mrf.mxu2  ;;  %v1614_v60 = vunpack.c.l.b16 %v1472_v50 }
 0x12a   : > { %v1279_v45 = vpop.f32.mrf.mxu3  ;;  %v1558_v9 = vunpack.c.l.b16 %v1456_v57  ;;  %v1107_v15 = vadd.f32 %v8696_v39, %v1106_v44 }
 0x12b   : > { %v1088_v46 = vpop.f32.mrf.mxu0  ;;  %v1280_v51 = vadd.f32 %v8701_v41, %v1279_v45 }
 0x12c   : > { %v1089_v48 = vadd.f32 %v8696_v39, %v1088_v46  ;;  %v1221_v49 = vpop.f32.mrf.mxu1  ;;  %v1134_v25 = vmul.f32 0.17677669, %v1107_v15 }
 0x12d   : > { %v1222_v52 = vadd.f32 %v8701_v41, %v1221_v49  ;;  %v1496_v61 = vpack.c.bf16 %v1280_v51, %v1280_v51 }
 0x12e   : > { %v1127_v53 = vmul.f32 0.17677669, %v1089_v48  ;;  %v1464_v34 = vpack.c.bf16 %v1134_v25, %v1134_v25 }
 0x12f   : > { %v1473_v54 = vpack.c.bf16 %v1222_v52, %v1222_v52  ;;  %v1638_v10 = vunpack.c.l.b16 %v1496_v61 }
 0x130   : > { %v1457_v62 = vpack.c.bf16 %v1127_v53, %v1127_v53  ;;  %v1566_v45 = vunpack.c.l.b16 %v1464_v34 }
 0x131   : > { %v1615_v63 = vunpack.c.l.b16 %v1473_v54  ;;  %v1108_v0 = vpop.f32.mrf.mxu2 }
 0x132   : > { %v1281_v1 = vpop.f32.mrf.mxu3  ;;  %v1559_v11 = vunpack.c.l.b16 %v1457_v62  ;;  %v1109_v17 = vadd.f32 %v8696_v39, %v1108_v0 }
 0x133   : > { %v8712_v3 = vpack.c.b16 %v1615_v63, %v1614_v60  ;;  %v1282_v4 = vadd.f32 %v8701_v41, %v1281_v1  ;;  %v1091_v5 = vpop.f32.mrf.mxu0 }
 0x134   : > { %v1092_v7 = vadd.f32 %v8696_v39, %v1091_v5  ;;  %v1224_v8 = vpop.f32.mrf.mxu1  ;;  %v8721_v16 = vpack.c.b16 %v1559_v11, %v1558_v9  ;;  %v1135_v26 = vmul.f32 0.17677669, %v1109_v17  ;;  %v976_v5 = vld [vmem:[%s8618_s10 + $0x78] sm:$0xff] }
 0x135   : > { %12005 = vst [vmem:[#allocation40_spill] sm:$0xff] %v8712_v3  ;;  %v1497_v12 = vpack.c.bf16 %v1282_v4, %v1282_v4  ;;  %3016 = vrot.lane.b32.xlu1 %v8712_v3, %s8239_s6  ;;  %2315 = vrot.lane.b32.xlu0 %v8712_v3, %s8240_s1  ;;  %v1225_v51 = vadd.f32 %v8701_v41, %v1224_v8  ;;  %v975_v4 = vld [vmem:[%s8618_s10 + $0x70] sm:$0xff] }
 0x136   : > { %1400 = vmatmul.bf16.gmra.mxu2 %v998_v2  ;;  %v1128_v14 = vmul.f32 0.17677669, %v1092_v7  ;;  %12006 = vst [vmem:[#allocation41_spill] sm:$0xff] %v8721_v16  ;;  %v1465_v35 = vpack.c.bf16 %v1135_v26, %v1135_v26  ;;  %v936_v7 = vld [vmem:[%s8610_s9 + $0xb8] sm:$0xff] }
 0x137   : > { %v1639_v13 = vunpack.c.l.b16 %v1497_v12  ;;  %1263 = vmatmul.bf16.gmra.mxu1 %v954_v6  ;;  %v1474_v61 = vpack.c.bf16 %v1225_v51, %v1225_v51  ;;  %v935_v6 = vld [vmem:[%s8610_s9 + $0xb0] sm:$0xff] }
 0x138   : > { %v1458_v22 = vpack.c.bf16 %v1128_v14, %v1128_v14  ;;  %v1567_v46 = vunpack.c.l.b16 %v1465_v35  ;;  %v1000_v14 = vpack.c.bf16 %v976_v5, %v975_v4  ;;  %v956_v17 = vpack.c.bf16 %v936_v7, %v935_v6 }
 0x139   : > { %v8724_v18 = vpack.c.b16 %v1639_v13, %v1638_v10  ;;  %v1111_v19 = vpop.f32.mrf.mxu2  ;;  %v1616_v8 = vunpack.c.l.b16 %v1474_v61 }
 0x13a   : > { %v1284_v20 = vpop.f32.mrf.mxu3  ;;  %v1560_v30 = vunpack.c.l.b16 %v1458_v22  ;;  %v8748_v50 = vpack.c.b16 %v1567_v46, %v1566_v45  ;;  %v1112_v52 = vadd.f32 %v8696_v39, %v1111_v19 }
 0x13b   : > { %v1093_v21 = vpop.f32.mrf.mxu0  ;;  %3741 = vrot.lane.b32.xlu2 %v8724_v18, %s8241_s13  ;;  %v1285_v47 = vadd.f32 %v8701_v41, %v1284_v20 }
 0x13c   : > { %v1094_v23 = vadd.f32 %v8696_v39, %v1093_v21  ;;  %v1226_v24 = vpop.f32.mrf.mxu1  ;;  %12008 = vst [vmem:[#allocation43_spill] sm:$0xff] %v8748_v50  ;;  %v1136_v62 = vmul.f32 0.17677669, %v1112_v52 }
 0x13d   : > { %3000 = vrot.lane.b32.xlu0 %v8721_v16, %s8239_s6  ;;  %2299 = vrot.lane.b32.xlu1 %v8721_v16, %s8240_s1  ;;  %v1227_v49 = vadd.f32 %v8701_v41, %v1226_v24  ;;  %v1498_v55 = vpack.c.bf16 %v1285_v47, %v1285_v47 }
 0x13e   : > { %v1129_v27 = vmul.f32 0.17677669, %v1094_v23  ;;  %v1466_v9 = vpack.c.bf16 %v1136_v62, %v1136_v62 }
 0x13f   : > { %v1475_v58 = vpack.c.bf16 %v1227_v49, %v1227_v49  ;;  %v1640_v0 = vunpack.c.l.b16 %v1498_v55 }
 0x140   : > { %v1459_v31 = vpack.c.bf16 %v1129_v27, %v1129_v27  ;;  %v1568_v20 = vunpack.c.l.b16 %v1466_v9 }
 0x141   : > { %v1113_v36 = vpop.f32.mrf.mxu2  ;;  %v1617_v2 = vunpack.c.l.b16 %v1475_v58 }
 0x142   : > { %v1561_v37 = vunpack.c.l.b16 %v1459_v31  ;;  %v1286_v38 = vpop.f32.mrf.mxu3  ;;  %v1114_v53 = vadd.f32 %v8696_v39, %v1113_v36 }
 0x143   : > { %v1287_v48 = vadd.f32 %v8701_v41, %v1286_v38  ;;  %v1096_v60 = vpop.f32.mrf.mxu0  ;;  %v8767_v15 = vpack.c.b16 %v1617_v2, %v1616_v8  ;;  %v978_v38 = vld [vmem:[%s8618_s10 + $0x88] sm:$0xff] }
 0x144   : > { %v8737_v43 = vpack.c.b16 %v1561_v37, %v1560_v30  ;;  %v1229_v44 = vpop.f32.mrf.mxu1  ;;  %v1137_v63 = vmul.f32 0.17677669, %v1114_v53  ;;  %v1097_v24 = vadd.f32 %v8696_v39, %v1096_v60  ;;  %v977_v37 = vld [vmem:[%s8618_s10 + $0x80] sm:$0xff] }
 0x145   : > { %2339 = vrot.lane.b32.xlu0 %v8724_v18, %s8240_s1  ;;  %3040 = vrot.lane.b32.xlu1 %v8724_v18, %s8239_s6  ;;  %v1499_v56 = vpack.c.bf16 %v1287_v48, %v1287_v48  ;;  %v1230_v26 = vadd.f32 %v8701_v41, %v1229_v44  ;;  %v1001_v51 = vpack.c.bf16 %v978_v38, %v977_v37 }
 0x146   : > { %12007 = vst [vmem:[#allocation42_spill] sm:$0xff] %v8737_v43  ;;  %1405 = vmatmul.bf16.gmra.mxu2 %v999_v40  ;;  %2301 = vrot.lane.b32.xlu2 %v8737_v43, %s8240_s1  ;;  %v1467_v10 = vpack.c.bf16 %v1137_v63, %v1137_v63  ;;  %v1130_v31 = vmul.f32 0.17677669, %v1097_v24 }
 0x147   : > { %1268 = vmatmul.bf16.gmra.mxu1 %v955_v42  ;;  %v1641_v1 = vunpack.c.l.b16 %v1499_v56  ;;  %v1476_v33 = vpack.c.bf16 %v1230_v26, %v1230_v26 }
 0x148   : > { %v1569_v21 = vunpack.c.l.b16 %v1467_v10  ;;  %v1460_v42 = vpack.c.bf16 %v1130_v31, %v1130_v31 }
 0x149   : > { %v8753_v54 = vpop.f32.mrf.mxu2  ;;  %v8765_v12 = vpack.c.b16 %v1641_v1, %v1640_v0  ;;  %v1618_v44 = vunpack.c.l.b16 %v1476_v33 }
 0x14a   : > { %v1289_v57 = vpop.f32.mrf.mxu3  ;;  %v8779_v25 = vpack.c.b16 %v1569_v21, %v1568_v20  ;;  %v1117_v52 = vadd.f32 %v8696_v39, %v8753_v54  ;;  %v1562_v58 = vunpack.c.l.b16 %v1460_v42 }
 0x14b   : > { %v1098_v22 = vpop.f32.mrf.mxu0  ;;  %v1290_v40 = vadd.f32 %v8701_v41, %v1289_v57  ;;  %v1727_v42 = vsel %vm1662_vm0, %v8765_v12, 0 }
 0x14c   : > { %v1231_v59 = vpop.f32.mrf.mxu1  ;;  %12009 = vst [vmem:[#allocation44_spill] sm:$0xff] %v8779_v25  ;;  %v1099_v27 = vadd.f32 %v8696_v39, %v1098_v22  ;;  %v1138_v54 = vmul.f32 0.17677669, %v1117_v52  ;;  %v979_v22 = vld [vmem:[%s8618_s10 + $0x90] sm:$0xff] }
 0x14d   : > { %3008 = vrot.lane.b32.xlu0 %v8748_v50, %s8239_s6  ;;  %2307 = vrot.lane.b32.xlu1 %v8748_v50, %s8240_s1  ;;  %v1232_v23 = vadd.f32 %v8701_v41, %v1231_v59  ;;  %v1500_v57 = vpack.c.bf16 %v1290_v40, %v1290_v40 }
 0x14e   : > { %3002 = vrot.lane.b32.xlu2 %v8737_v43, %s8239_s6  ;;  %v1131_v34 = vmul.f32 0.17677669, %v1099_v27  ;;  %v1468_v8 = vpack.c.bf16 %v1138_v54, %v1138_v54 }
 0x14f   : > { %v1477_v30 = vpack.c.bf16 %v1232_v23, %v1232_v23  ;;  %v1642_v2 = vunpack.c.l.b16 %v1500_v57  ;;  %v980_v23 = vld [vmem:[%s8618_s10 + $0x98] sm:$0xff] }
 0x150   : > { %v1461_v46 = vpack.c.bf16 %v1131_v34, %v1131_v34 }
 0x151   : > { %v1118_v11 = vpop.f32.mrf.mxu2  ;;  %v1619_v36 = vunpack.c.l.b16 %v1477_v30 }
 0x152   : > { %v1291_v13 = vpop.f32.mrf.mxu3  ;;  %v1119_v55 = vadd.f32 %v8696_v39, %v1118_v11  ;;  %v1563_v61 = vunpack.c.l.b16 %v1461_v46 }
 0x153   : > { %v1292_v45 = vadd.f32 %v8701_v41, %v1291_v13  ;;  %v8800_v53 = vpack.c.b16 %v1619_v36, %v1618_v44  ;;  %v1101_v13 = vpop.f32.mrf.mxu0 }
 0x154   : > { %v8769_v19 = vpop.f32.mrf.mxu1  ;;  %v1139_v0 = vmul.f32 0.17677669, %v1119_v55  ;;  %v8812_v5 = vpack.c.b16 %v1563_v61, %v1562_v58  ;;  %v1102_v36 = vadd.f32 %v8696_v39, %v1101_v13  ;;  %v1724_v58 = vsel %vm1662_vm0, %v8724_v18, 0  ;;  %v984_v13 = vld [vmem:[%s8618_s10 + $0xb8] sm:$0xff] }
 0x155   : > { %3719 = vrot.lane.b32.xlu0 %v8767_v15, %s8241_s13  ;;  %2317 = vrot.lane.b32.xlu1 %v8767_v15, %s8240_s1  ;;  %v1501_v60 = vpack.c.bf16 %v1292_v45, %v1292_v45  ;;  %v1235_v24 = vadd.f32 %v8701_v41, %v8769_v19 }
 0x156   : > { %1410 = vmatmul.bf16.gmra.mxu2 %v1000_v14  ;;  %2341 = vrot.lane.b32.xlu2 %v8765_v12, %s8240_s1  ;;  %12010 = vst [vmem:[#allocation45_spill] sm:$0xff] %v8812_v5  ;;  %v1469_v9 = vpack.c.bf16 %v1139_v0, %v1139_v0  ;;  %v1132_v45 = vmul.f32 0.17677669, %v1102_v36 }
 0x157   : > { %1273 = vmatmul.bf16.gmra.mxu1 %v956_v17  ;;  %v1643_v4 = vunpack.c.l.b16 %v1501_v60  ;;  %v1570_v17 = vunpack.c.l.b16 %v1468_v8  ;;  %v1478_v34 = vpack.c.bf16 %v1235_v24, %v1235_v24 }
 0x158   : > { %v1571_v20 = vunpack.c.l.b16 %v1469_v9 }
 0x159   : > { %v8783_v28 = vpop.f32.mrf.mxu2  ;;  %v1660_v14 = vpack.c.b16 %v1643_v4, %v1642_v2  ;;  %v8879_v2 = vld [vmem:[%s12013_s25] ss:$0 sm:$0xff] }
 0x15a   : > { %v1294_v29 = vpop.f32.mrf.mxu3  ;;  %v8834_v30 = vpack.c.b16 %v1571_v20, %v1570_v17 }
 0x15b   : > { %v1295_v35 = vadd.f32 %v8701_v41, %v1294_v29  ;;  %v1730_v27 = vsel %vm1662_vm0, %v1660_v14, 0  ;;  %v1002_v29 = vpack.c.bf16 %v980_v23, %v979_v22  ;;  %v1103_v19 = vpop.f32.mrf.mxu0 }
 0x15c   : > { %v1236_v32 = vpop.f32.mrf.mxu1  ;;  %12011 = vst [vmem:[#allocation46_spill] sm:$0xff] %v8834_v30  ;;  %v1104_v38 = vadd.f32 %v8696_v39, %v1103_v19 }
 0x15d   : > { %2309 = vrot.lane.b32.xlu0 %v8779_v25, %s8240_s1  ;;  %3018 = vrot.lane.b32.xlu1 %v8767_v15, %s8239_s6  ;;  %v1502_v47 = vpack.c.bf16 %v1295_v35, %v1295_v35  ;;  %v1237_v21 = vadd.f32 %v8701_v41, %v1236_v32  ;;  %v1620_v35 = vunpack.c.l.b16 %v1478_v34 }
 0x15e   : > { %3042 = vrot.lane.b32.xlu2 %v8765_v12, %s8239_s6  ;;  %v1133_v46 = vmul.f32 0.17677669, %v1104_v38 }
 0x15f   : > { %v1644_v62 = vunpack.c.l.b16 %v1502_v47  ;;  %v1479_v31 = vpack.c.bf16 %v1237_v21, %v1237_v21  ;;  %v981_v47 = vld [vmem:[%s8618_s10 + $0xa0] sm:$0xff] }
 0x160   : > { %v1463_v52 = vpack.c.bf16 %v1133_v46, %v1133_v46 }
 0x161   : > { %v8796_v48 = vpop.f32.mrf.mxu2  ;;  %v1621_v32 = vunpack.c.l.b16 %v1479_v31 }
 0x162   : > { %v1296_v49 = vpop.f32.mrf.mxu3  ;;  %v1124_v57 = vadd.f32 %v8696_v39, %v8796_v48 }
 0x163   : > { %v1297_v56 = vadd.f32 %v8701_v41, %v1296_v49  ;;  %v8847_v40 = vpack.c.b16 %v1621_v32, %v1620_v35  ;;  %v982_v49 = vld [vmem:[%s8618_s10 + $0xa8] sm:$0xff] }
 0x164   : > { %v8804_v59 = vpop.f32.mrf.mxu1 }
 0x165   : > { %v1503_v63 = vpack.c.bf16 %v1297_v56, %v1297_v56  ;;  %3010 = vrot.lane.b32.xlu0 %v8779_v25, %s8239_s6  ;;  %3020 = vrot.lane.b32.xlu1 %v8800_v53, %s8239_s6  ;;  %v1003_v56 = vpack.c.bf16 %v982_v49, %v981_v47  ;;  %v1240_v54 = vadd.f32 %v8701_v41, %v8804_v59 }
 0x166   : > { %1415 = vmatmul.bf16.gmra.mxu2 %v1001_v51  ;;  %3743 = vrot.lane.b32.xlu2 %v8765_v12, %s8241_s13  ;;  %v1462_v51 = vpack.c.bf16 %v1132_v45, %v1132_v45  ;;  %v1122_v12 = vadd.f32 %v8696_v39, %v8783_v28 }
 0x167   : > { %v1645_v1 = vunpack.c.l.b16 %v1503_v63  ;;  %v1141_v63 = vmul.f32 0.17677669, %v1124_v57  ;;  %v1480_v9 = vpack.c.bf16 %v1240_v54, %v1240_v54 }
 0x168   : > { %v1564_v61 = vunpack.c.l.b16 %v1462_v51  ;;  %v1140_v28 = vmul.f32 0.17677669, %v1122_v12 }
 0x169   : > { %v8814_v6 = vpack.c.b16 %v1645_v1, %v1644_v62  ;;  %v8816_v7 = vpop.f32.mrf.mxu2  ;;  %v1565_v62 = vunpack.c.l.b16 %v1463_v52  ;;  %v1471_v1 = vpack.c.bf16 %v1141_v63, %v1141_v63  ;;  %v1622_v22 = vunpack.c.l.b16 %v1480_v9 }
 0x16a   : > { %v1470_v0 = vpack.c.bf16 %v1140_v28, %v1140_v28 }
 0x16b   : > { %v1733_v10 = vsel %vm1662_vm0, %v8814_v6, 0  ;;  %v8872_v18 = vpack.c.b16 %v1565_v62, %v1564_v61  ;;  %v985_v61 = vld [vmem:[%s8618_s10 + $0xc0] sm:$0xff]  ;;  %v986_v62 = vld [vmem:[%s8618_s10 + $0xc8] sm:$0xff] }
 0x16c   : > { %v1241_v11 = vpop.f32.mrf.mxu1  ;;  %1784 = vmatpush.bf16.xpose.msrb.mxu0 %v1733_v10  ;;  %v1572_v59 = vunpack.c.l.b16 %v1470_v0  ;;  %v1573_v10 = vunpack.c.l.b16 %v1471_v1 }
 0x16d   : > { %2303 = vrot.lane.b32.xlu0 %v8812_v5, %s8240_s1  ;;  %3004 = vrot.lane.b32.xlu1 %v8812_v5, %s8239_s6  ;;  %v1242_v39 = vadd.f32 %v8701_v41, %v1241_v11  ;;  %12012 = vst [vmem:[#allocation47_spill] sm:$0xff] %v8872_v18  ;;  %v983_v11 = vld [vmem:[%s8618_s10 + $0xb0] sm:$0xff] }
 0x16e   : > { %2319 = vrot.lane.b32.xlu2 %v8800_v53, %s8240_s1  ;;  %v1004_v23 = vpack.c.bf16 %v984_v13, %v983_v11  ;;  %v8893_v24 = vpack.c.b16 %v1573_v10, %v1572_v59 }
 0x16f   : > { %v1481_v4 = vpack.c.bf16 %v1242_v39, %v1242_v39 }
 0x170   : > { %12014 = vst [vmem:[#allocation48_spill] sm:$0xff] %v8893_v24 }
 0x171   : > { %v8831_v26 = vpop.f32.mrf.mxu2  ;;  %v1623_v17 = vunpack.c.l.b16 %v1481_v4 }
 0x172   : > { %v1379_v20 = vadd.f32 %v8879_v2, %v8831_v26 }
 0x174   : > { %v8836_v33 = vpop.f32.mrf.mxu1  ;;  %1785 = vmatpush.bf16.xpose.msrb.mxu0 %v1730_v27  ;;  %v1505_v31 = vpack.c.bf16 %v1379_v20, %v1379_v20 }
 0x175   : > { %3012 = vrot.lane.b32.xlu0 %v8834_v30, %s8239_s6  ;;  %2343 = vrot.lane.b32.xlu1 %v1660_v14, %s8240_s1  ;;  %v1245_v45 = vadd.f32 %v8701_v41, %v8836_v33 }
 0x176   : > { %1420 = vmatmul.bf16.gmra.mxu2 %v1002_v29  ;;  %3721 = vrot.lane.b32.xlu2 %v8800_v53, %s8241_s13  ;;  %v8895_v29 = vpack.c.b16 %v1623_v17, %v1622_v22  ;;  %v2122_v32 = vunpack.c.l.b16 %v1505_v31 }
 0x177   : > { %v1482_v33 = vpack.c.bf16 %v1245_v45, %v1245_v45 }
 0x179   : > { %v8844_v37 = vpop.f32.mrf.mxu2 }
 0x17c   : > { %v1246_v44 = vpop.f32.mrf.mxu1  ;;  %1786 = vmatpush.bf16.xpose.msrb.mxu0 %v1727_v42 }
 0x17d   : > { %2321 = vrot.lane.b32.xlu0 %v8847_v40, %s8240_s1  ;;  %3745 = vrot.lane.b32.xlu1 %v1660_v14, %s8241_s13  ;;  %v1247_v35 = vadd.f32 %v8701_v41, %v1246_v44 }
 0x17e   : > { %3044 = vrot.lane.b32.xlu2 %v1660_v14, %s8239_s6  ;;  %v1377_v14 = vadd.f32 %v8879_v2, %v8816_v7 }
 0x17f   : > { %v1483_v49 = vpack.c.bf16 %v1247_v35, %v1247_v35 }
 0x180   : > { %v1504_v27 = vpack.c.bf16 %v1377_v14, %v1377_v14 }
 0x181   : > { %v8857_v55 = vpop.f32.mrf.mxu2  ;;  %v1625_v28 = vunpack.c.l.b16 %v1483_v49 }
 0x182   : > { %v2121_v19 = vunpack.c.l.b16 %v1504_v27 }
 0x184   : > { %v1249_v60 = vpop.f32.mrf.mxu1  ;;  %1787 = vmatpush.bf16.xpose.msrb.mxu0 %v1724_v58  ;;  %v8913_v47 = vpack.c.b16 %v2122_v32, %v2121_v19  ;;  %v1384_v19 = vadd.f32 %v8879_v2, %v8857_v55 }
 0x185   : > { %3723 = vrot.lane.b32.xlu0 %v8847_v40, %s8241_s13  ;;  %2311 = vrot.lane.b32.xlu1 %v8834_v30, %s8240_s1  ;;  %v1250_v36 = vadd.f32 %v8701_v41, %v1249_v60 }
 0x186   : > { %1425 = vmatmul.bf16.gmra.mxu2 %v1003_v56  ;;  %3022 = vrot.lane.b32.xlu2 %v8847_v40, %s8239_s6  ;;  %12015 = vst [vmem:[#allocation49_spill] sm:$0xff] %v8913_v47 }
 0x187   : > { %v1484_v51 = vpack.c.bf16 %v1250_v36, %v1250_v36  ;;  %v987_v36 = vld [vmem:[%s8618_s10 + $0xd0] sm:$0xff] }
 0x189   : > { %v1386_v48 = vpop.f32.mrf.mxu2  ;;  %v1626_v63 = vunpack.c.l.b16 %v1484_v51 }
 0x18a   : > { %v1387_v52 = vadd.f32 %v8879_v2, %v1386_v48 }
 0x18c   : > { %v1251_v8 = vpop.f32.mrf.mxu1  ;;  %v1508_v48 = vpack.c.bf16 %v1387_v52, %v1387_v52 }
 0x18d   : > { %2345 = vrot.lane.b32.xlu0 %v8814_v6, %s8240_s1  ;;  %2305 = vrot.lane.b32.xlu1 %v8872_v18, %s8240_s1  ;;  %v1252_v26 = vadd.f32 %v8701_v41, %v1251_v8  ;;  %v1005_v8 = vpack.c.bf16 %v986_v62, %v985_v61 }
 0x18e   : > { %3006 = vrot.lane.b32.xlu2 %v8872_v18, %s8239_s6  ;;  %v2125_v13 = vunpack.c.l.b16 %v1508_v48 }
 0x18f   : > { %v1485_v46 = vpack.c.bf16 %v1252_v26, %v1252_v26  ;;  %v1382_v26 = vadd.f32 %v8879_v2, %v8844_v37 }
 0x191   : > { %v1388_v21 = vpop.f32.mrf.mxu2  ;;  %v1627_v58 = vunpack.c.l.b16 %v1485_v46  ;;  %v1506_v52 = vpack.c.bf16 %v1382_v26, %v1382_v26 }
 0x192   : > { %v1389_v44 = vadd.f32 %v8879_v2, %v1388_v21 }
 0x193   : > { %v8930_v9 = vpack.c.b16 %v1627_v58, %v1626_v63 }
 0x194   : > { %v1254_v34 = vpop.f32.mrf.mxu1  ;;  %v1509_v54 = vpack.c.bf16 %v1389_v44, %v1389_v44 }
 0x195   : > { %2313 = vrot.lane.b32.xlu0 %v8893_v24, %s8240_s1  ;;  %3046 = vrot.lane.b32.xlu1 %v8814_v6, %s8239_s6  ;;  %v8901_v7 = vpop.permute.xlu2 %3741  ;;  %v1255_v38 = vadd.f32 %v8701_v41, %v1254_v34  ;;  %v1706_v34 = vsel %vm1662_vm0, %v8930_v9, 0 }
 0x196   : > { %1430 = vmatmul.bf16.gmra.mxu2 %v1004_v23  ;;  %3725 = vrot.lane.b32.xlu2 %v8895_v29, %s8241_s13  ;;  %v2126_v14 = vunpack.c.l.b16 %v1509_v54 }
 0x197   : > { %v1486_v12 = vpack.c.bf16 %v1255_v38, %v1255_v38  ;;  %v988_v38 = vld [vmem:[%s8618_s10 + $0xd8] sm:$0xff] }
 0x198   : > { %v8947_v23 = vpack.c.b16 %v2126_v14, %v2125_v13  ;;  %v1006_v51 = vpack.c.bf16 %v988_v38, %v987_v36 }
 0x199   : > { %v8909_v42 = vpop.f32.mrf.mxu2  ;;  %v1628_v0 = vunpack.c.l.b16 %v1486_v12 }
 0x19a   : > { %12017 = vst [vmem:[#allocation51_spill] sm:$0xff] %v8947_v23 }
 0x19c   : > { %v1256_v56 = vpop.f32.mrf.mxu1 }
 0x19d   : > { %v1257_v57 = vadd.f32 %v8701_v41, %v1256_v56  ;;  %3014 = vrot.lane.b32.xlu0 %v8893_v24, %s8239_s6  ;;  %3747 = vrot.lane.b32.xlu1 %v8814_v6, %s8241_s13  ;;  %v1624_v6 = vunpack.c.l.b16 %v1482_v33  ;;  %v1507_v56 = vpack.c.bf16 %v1384_v19, %v1384_v19 }
 0x19e   : > { %2773 = vrot.lane.b32.xlu2 %v8913_v47, %s8240_s1 }
 0x19f   : > { %v1487_v60 = vpack.c.bf16 %v1257_v57, %v1257_v57  ;;  %v1651_v11 = vpack.c.b16 %v1625_v28, %v1624_v6  ;;  %v2123_v57 = vunpack.c.l.b16 %v1506_v52  ;;  %v2124_v33 = vunpack.c.l.b16 %v1507_v56 }
 0x1a0   : > { %v8926_v39 = vpop.permute.xlu2 %2301 }
 0x1a1   : > { %v1629_v1 = vunpack.c.l.b16 %v1487_v60  ;;  %v8928_v4 = vpop.f32.mrf.mxu2  ;;  %v1703_v12 = vsel %vm1662_vm0, %v1651_v11, 0  ;;  %v8985_v54 = vpack.c.b16 %v2124_v33, %v2123_v57 }
 0x1a3   : > { %v8932_v59 = vpack.c.b16 %v1629_v1, %v1628_v0  ;;  %12019 = vst [vmem:[#allocation53_spill] sm:$0xff] %v8985_v54 }
 0x1a4   : > { %v1259_v10 = vpop.f32.mrf.mxu1 }
 0x1a5   : > { %2323 = vrot.lane.b32.xlu1 %v8895_v29, %s8240_s1  ;;  %v1709_v17 = vsel %vm1662_vm0, %v8932_v59, 0  ;;  %3028 = vrot.lane.b32.xlu0 %v8930_v9, %s8239_s6  ;;  %v1260_v37 = vadd.f32 %v8701_v41, %v1259_v10 }
 0x1a6   : > { %1735 = vmatpush.bf16.xpose.msrb.mxu3 %v1709_v17  ;;  %1435 = vmatmul.bf16.gmra.mxu2 %v1005_v8 }
 0x1a7   : > { %v8940_v20 = vpop.permute.xlu1 %3016  ;;  %v8942_v21 = vpop.permute.xlu0 %2315  ;;  %2325 = vrot.lane.b32.xlu2 %v1651_v11, %s8240_s1  ;;  %v1488_v58 = vpack.c.bf16 %v1260_v37, %v1260_v37 }
 0x1a8   : > { %v8945_v22 = vpop.permute.xlu2 %3002 }
 0x1a9   : > { %12016 = vst [vmem:[#allocation50_spill] sm:$0xff] %v8945_v22  ;;  %v1396_v27 = vpop.f32.mrf.mxu2  ;;  %v1630_v0 = vunpack.c.l.b16 %v1488_v58 }
 0x1aa   : > { %v1397_v19 = vadd.f32 %v8879_v2, %v1396_v27  ;;  %v1392_v27 = vadd.f32 %v8879_v2, %v8909_v42 }
 0x1ac   : > { %v1261_v31 = vpop.f32.mrf.mxu1  ;;  %v1512_v37 = vpack.c.bf16 %v1397_v19, %v1397_v19  ;;  %v992_v19 = vld [vmem:[%s8618_s10 + $0xf8] sm:$0xff] }
 0x1ad   : > { %3024 = vrot.lane.b32.xlu1 %v8895_v29, %s8239_s6  ;;  %2777 = vrot.lane.b32.xlu0 %v8947_v23, %s8240_s1  ;;  %v1262_v46 = vadd.f32 %v8701_v41, %v1261_v31  ;;  %v989_v31 = vld [vmem:[%s8618_s10 + $0xe0] sm:$0xff] }
 0x1ae   : > { %1736 = vmatpush.bf16.xpose.msrb.mxu3 %v1706_v34  ;;  %v990_v34 = vld [vmem:[%s8618_s10 + $0xe8] sm:$0xff] }
 0x1af   : > { %3727 = vrot.lane.b32.xlu2 %v1651_v11, %s8241_s13  ;;  %v8960_v32 = vpop.permute.xlu0 %3000  ;;  %v8962_v35 = vpop.permute.xlu1 %2299  ;;  %v1489_v55 = vpack.c.bf16 %v1262_v46, %v1262_v46 }
 0x1b0   : > { %12018 = vst [vmem:[#allocation52_spill] sm:$0xff] %v8960_v32  ;;  %v8966_v45 = vpop.permute.xlu2 %2341 }
 0x1b1   : > { %v1398_v49 = vpop.f32.mrf.mxu2  ;;  %v1631_v28 = vunpack.c.l.b16 %v1489_v55  ;;  %v1697_v55 = vsel %vm1662_vm0, %v8847_v40, 0  ;;  %v2129_v40 = vunpack.c.l.b16 %v1512_v37 }
 0x1b3   : > { %v8987_v8 = vpack.c.b16 %v1631_v28, %v1630_v0  ;;  %v1510_v28 = vpack.c.bf16 %v1392_v27, %v1392_v27 }
 0x1b4   : > { %v1264_v44 = vpop.f32.mrf.mxu1 }
 0x1b5   : > { %3026 = vrot.lane.b32.xlu1 %v1651_v11, %s8239_s6  ;;  %2329 = vrot.lane.b32.xlu0 %v8932_v59, %s8240_s1  ;;  %v1265_v63 = vadd.f32 %v8701_v41, %v1264_v44  ;;  %12020 = vst [vmem:[#allocation54_spill] sm:$0xff] %v8987_v8  ;;  %v1700_v11 = vsel %vm1662_vm0, %v8895_v29, 0  ;;  %v1399_v29 = vadd.f32 %v8879_v2, %v1398_v49 }
 0x1b6   : > { %1737 = vmatpush.bf16.xpose.msrb.mxu3 %v1703_v12  ;;  %1440 = vmatmul.bf16.gmra.mxu2 %v1006_v51  ;;  %v1007_v51 = vpack.c.bf16 %v990_v34, %v989_v31  ;;  %v1394_v49 = vadd.f32 %v8879_v2, %v8928_v4  ;;  %v991_v34 = vld [vmem:[%s8618_s10 + $0xf0] sm:$0xff]  ;;  %s12183_s10 = sld [smem:[#allocation92_spill]] }
 0x1b7   : > { %3729 = vrot.lane.b32.xlu2 %v8930_v9, %s8241_s13  ;;  %v8976_v60 = vpop.permute.xlu0 %2339  ;;  %v8978_v61 = vpop.permute.xlu1 %3040  ;;  %v1490_v6 = vpack.c.bf16 %v1265_v63, %v1265_v63  ;;  %v1513_v44 = vpack.c.bf16 %v1399_v29, %v1399_v29 }
 0x1b8   : > { %v8980_v62 = vpop.permute.xlu2 %3042  ;;  %v1511_v63 = vpack.c.bf16 %v1394_v49, %v1394_v49 }
 0x1b9   : > { %v8983_v48 = vpop.f32.mrf.mxu2  ;;  %v1632_v36 = vunpack.c.l.b16 %v1490_v6  ;;  %v2130_v33 = vunpack.c.l.b16 %v1513_v44  ;;  %v2127_v6 = vunpack.c.l.b16 %v1510_v28 }
 0x1bb   : > { %v9029_v4 = vpack.c.b16 %v2130_v33, %v2129_v40  ;;  %v1691_v33 = vsel %vm1662_vm0, %v8767_v15, 0 }
 0x1bc   : > { %v1266_v1 = vpop.f32.mrf.mxu1 }
 0x1bd   : > { %v1267_v10 = vadd.f32 %v8701_v41, %v1266_v1  ;;  %2775 = vrot.lane.b32.xlu1 %v8985_v54, %s8240_s1  ;;  %3731 = vrot.lane.b32.xlu0 %v8932_v59, %s8241_s13  ;;  %12023 = vst [vmem:[#allocation57_spill] sm:$0xff] %v9029_v4  ;;  %v1694_v1 = vsel %vm1662_vm0, %v8800_v53, 0 }
 0x1be   : > { %1738 = vmatpush.bf16.xpose.msrb.mxu3 %v1700_v11 }
 0x1bf   : > { %v1491_v13 = vpack.c.bf16 %v1267_v10, %v1267_v10  ;;  %2331 = vrot.lane.b32.xlu2 %v8987_v8, %s8240_s1  ;;  %v8998_v14 = vpop.permute.xlu0 %3008  ;;  %v9000_v17 = vpop.permute.xlu1 %2307  ;;  %v2128_v10 = vunpack.c.l.b16 %v1511_v63 }
 0x1c0   : > { %12021 = vst [vmem:[#allocation55_spill] sm:$0xff] %v8998_v14  ;;  %v9004_v26 = vpop.permute.xlu2 %3743 }
 0x1c1   : > { %v1633_v38 = vunpack.c.l.b16 %v1491_v13  ;;  %v1403_v46 = vpop.f32.mrf.mxu2  ;;  %v9048_v37 = vpack.c.b16 %v2128_v10, %v2127_v6 }
 0x1c2   : > { %v1404_v15 = vadd.f32 %v8879_v2, %v1403_v46 }
 0x1c3   : > { %v9008_v52 = vpack.c.b16 %v1633_v38, %v1632_v36  ;;  %12025 = vst [vmem:[#allocation59_spill] sm:$0xff] %v9048_v37 }
 0x1c4   : > { %v1269_v56 = vpop.f32.mrf.mxu1 }
 0x1c5   : > { %2327 = vrot.lane.b32.xlu1 %v8930_v9, %s8240_s1  ;;  %2333 = vrot.lane.b32.xlu0 %v9008_v52, %s8240_s1 }
 0x1c6   : > { %1739 = vmatpush.bf16.xpose.msrb.mxu3 %v1697_v55  ;;  %1445 = vmatmul.bf16.gmra.mxu2 %v1007_v51  ;;  %v1008_v51 = vpack.c.bf16 %v992_v19, %v991_v34 }
 0x1c7   : > { %3032 = vrot.lane.b32.xlu2 %v8987_v8, %s8239_s6  ;;  %v9022_v12 = vpop.permute.xlu0 %3719  ;;  %v9024_v9 = vpop.permute.xlu1 %2317 }
 0x1c8   : > { %12022 = vst [vmem:[#allocation56_spill] sm:$0xff] %v9022_v12  ;;  %v9026_v57 = vpop.permute.xlu2 %2319 }
 0x1c9   : > { %v1406_v58 = vpop.f32.mrf.mxu2 }
 0x1ca   : > { %v1407_v42 = vadd.f32 %v8879_v2, %v1406_v58 }
 0x1cc   : > { %v1271_v0 = vpop.f32.mrf.mxu1  ;;  %v1516_v29 = vpack.c.bf16 %v1407_v42, %v1407_v42 }
 0x1cd   : > { %3030 = vrot.lane.b32.xlu1 %v8932_v59, %s8239_s6  ;;  %v1272_v11 = vadd.f32 %v8701_v41, %v1271_v0  ;;  %v1270_v59 = vadd.f32 %v8701_v41, %v1269_v56 }
 0x1ce   : > { %1740 = vmatpush.bf16.xpose.msrb.mxu3 %v1694_v1  ;;  %v2133_v55 = vunpack.c.l.b16 %v1516_v29  ;;  %v1402_v1 = vadd.f32 %v8879_v2, %v8983_v48 }
 0x1cf   : > { %2781 = vrot.lane.b32.xlu2 %v9029_v4, %s8240_s1  ;;  %v9038_v13 = vpop.permute.xlu0 %2309  ;;  %v9040_v31 = vpop.permute.xlu1 %3018  ;;  %v1493_v44 = vpack.c.bf16 %v1272_v11, %v1272_v11  ;;  %v1492_v40 = vpack.c.bf16 %v1270_v59, %v1270_v59  ;;  %v1688_v59 = vsel %vm1662_vm0, %v8712_v3, 0 }
 0x1d0   : > { %v9044_v36 = vpop.permute.xlu2 %3721 }
 0x1d1   : > { %12024 = vst [vmem:[#allocation58_spill] sm:$0xff] %v9044_v36  ;;  %v1408_v53 = vpop.f32.mrf.mxu2  ;;  %v1635_v56 = vunpack.c.l.b16 %v1493_v44  ;;  %v1634_v6 = vunpack.c.l.b16 %v1492_v40 }
 0x1d2   : > { %v1409_v38 = vadd.f32 %v8879_v2, %v1408_v53  ;;  %v1514_v53 = vpack.c.bf16 %v1402_v1, %v1402_v1 }
 0x1d3   : > { %v1656_v34 = vpack.c.b16 %v1635_v56, %v1634_v6 }
 0x1d4   : > { %v1517_v27 = vpack.c.bf16 %v1409_v38, %v1409_v38  ;;  %v1274_v49 = vpop.f32.mrf.mxu1  ;;  %v1515_v38 = vpack.c.bf16 %v1404_v15, %v1404_v15  ;;  %v2131_v40 = vunpack.c.l.b16 %v1514_v53 }
 0x1d5   : > { %2779 = vrot.lane.b32.xlu1 %v9048_v37, %s8240_s1  ;;  %v1275_v10 = vadd.f32 %v8701_v41, %v1274_v49 }
 0x1d6   : > { %v2134_v58 = vunpack.c.l.b16 %v1517_v27  ;;  %1741 = vmatpush.bf16.xpose.msrb.mxu3 %v1691_v33  ;;  %1450 = vmatmul.bf16.gmra.mxu2 %v1008_v51  ;;  %v2132_v33 = vunpack.c.l.b16 %v1515_v38 }
 0x1d7   : > { %3034 = vrot.lane.b32.xlu2 %v9008_v52, %s8239_s6  ;;  %v9056_v28 = vpop.permute.xlu0 %3010  ;;  %v9058_v63 = vpop.permute.xlu1 %3020  ;;  %v1494_v51 = vpack.c.bf16 %v1275_v10, %v1275_v10 }
 0x1d8   : > { %12026 = vst [vmem:[#allocation60_spill] sm:$0xff] %v9056_v28  ;;  %v9060_v42 = vpack.c.b16 %v2134_v58, %v2133_v55  ;;  %v9062_v0 = vpop.permute.xlu2 %3044 }
 0x1d9   : > { %v1411_v11 = vpop.f32.mrf.mxu2  ;;  %v1636_v58 = vunpack.c.l.b16 %v1494_v51 }
 0x1da   : > { %12027 = vst [vmem:[#allocation61_spill] sm:$0xff] %v9060_v42  ;;  %2785 = vrot.lane.b32.xlu0 %v9060_v42, %s8240_s1  ;;  %v1412_v19 = vadd.f32 %v8879_v2, %v1411_v11  ;;  %v9084_v11 = vpack.c.b16 %v2132_v33, %v2131_v40 }
 0x1dc   : > { %v1276_v29 = vpop.f32.mrf.mxu1  ;;  %v1518_v27 = vpack.c.bf16 %v1412_v19, %v1412_v19  ;;  %12029 = vst [vmem:[#allocation63_spill] sm:$0xff] %v9084_v11 }
 0x1dd   : > { %v1277_v48 = vadd.f32 %v8701_v41, %v1276_v29  ;;  %2335 = vrot.lane.b32.xlu1 %v1656_v34, %s8240_s1 }
 0x1de   : > { %1742 = vmatpush.bf16.xpose.msrb.mxu3 %v1688_v59  ;;  %v2135_v6 = vunpack.c.l.b16 %v1518_v27 }
 0x1df   : > { %v1495_v46 = vpack.c.bf16 %v1277_v48, %v1277_v48  ;;  %3735 = vrot.lane.b32.xlu2 %v9008_v52, %s8241_s13  ;;  %v9077_v44 = vpop.permute.xlu0 %2303  ;;  %v9079_v55 = vpop.permute.xlu1 %3004 }
 0x1e0   : > { %12028 = vst [vmem:[#allocation62_spill] sm:$0xff] %v9079_v55  ;;  %v9081_v49 = vpop.permute.xlu2 %3022 }
 0x1e1   : > { %v1637_v56 = vunpack.c.l.b16 %v1495_v46  ;;  %v1413_v1 = vpop.f32.mrf.mxu2  ;;  %v1718_v46 = vsel %vm1662_vm0, %v1656_v34, 0 }
 0x1e2   : > { %v1414_v41 = vadd.f32 %v8879_v2, %v1413_v1 }
 0x1e3   : > { %v1657_v15 = vpack.c.b16 %v1637_v56, %v1636_v58  ;;  %v1715_v56 = vsel %vm1662_vm0, %v9008_v52, 0 }
 0x1e4   : > { %v1519_v10 = vpack.c.bf16 %v1414_v41, %v1414_v41 }
 0x1e5   : > { %3737 = vrot.lane.b32.xlu1 %v1656_v34, %s8241_s13  ;;  %6657 = vmatmul.msk.bf16.vlgmr.msrb.gmra.mxu3 %vm1662_vm0, %v8721_v16  ;;  %v1721_v19 = vsel %vm1662_vm0, %v1657_v15, 0 }
 0x1e6   : > { %v2136_v29 = vunpack.c.l.b16 %v1519_v10  ;;  %1788 = vmatpush.bf16.xpose.msrb.mxu0 %v1721_v19  ;;  %3038 = vrot.lane.b32.xlu0 %v1657_v15, %s8239_s6  ;;  %v1712_v10 = vsel %vm1662_vm0, %v8987_v8, 0 }
 0x1e7   : > { %2783 = vrot.lane.b32.xlu2 %v9084_v11, %s8240_s1  ;;  %v9093_v59 = vpop.permute.xlu0 %3012  ;;  %v2344_v53 = vpop.permute.xlu1 %2343 }
 0x1e8   : > { %12030 = vst [vmem:[#allocation64_spill] sm:$0xff] %v9093_v59  ;;  %v9095_v38 = vpack.c.b16 %v2136_v29, %v2135_v6  ;;  %v9097_v51 = vpop.permute.xlu2 %3006 }
 0x1e9   : > { %12032 = vst [vmem:[#allocation66_spill] sm:$0xff] %v9097_v51  ;;  %v9099_v48 = vpop.f32.mrf.mxu2 }
 0x1ea   : > { %12031 = vst [vmem:[#allocation65_spill] sm:$0xff] %v9095_v38  ;;  %2185 = vmatpush.bf16.msra.mxu3 %v9095_v38 }
 0x1ed   : > { %3739 = vrot.lane.b32.xlu1 %v1657_v15, %s8241_s13 }
 0x1ee   : > { %1789 = vmatpush.bf16.xpose.msrb.mxu0 %v1718_v46  ;;  %2186 = vmatpush.bf16.msra.mxu3 %v9060_v42 }
 0x1ef   : > { %3036 = vrot.lane.b32.xlu2 %v1656_v34, %s8239_s6  ;;  %v9106_v27 = vpop.permute.xlu0 %2321  ;;  %v9108_v40 = vpop.permute.xlu1 %3745 }
 0x1f0   : > { %v9110_v33 = vpop.permute.xlu2 %3725 }
 0x1f1   : > { %v9112_v58 = vpop.f32.mrf.mxu2 }
 0x1f2   : > { %2187 = vmatpush.bf16.msra.mxu3 %v9084_v11 }
 0x1f5   : > { %2787 = vrot.lane.b32.xlu1 %v9095_v38, %s8240_s1  ;;  %6658 = vmatmul.msk.bf16.gmra.mxu3 %vm1662_vm0, %v8737_v43 }
 0x1f6   : > { %1790 = vmatpush.bf16.xpose.msrb.mxu0 %v1715_v56  ;;  %2188 = vmatpush.bf16.msra.mxu3 %v9029_v4 }
 0x1f7   : > { %2337 = vrot.lane.b32.xlu2 %v1657_v15, %s8240_s1  ;;  %v9123_v34 = vpop.permute.xlu0 %3723  ;;  %v9125_v1 = vpop.permute.xlu1 %2311 }
 0x1f8   : > { %12033 = vst [vmem:[#allocation67_spill] sm:$0xff] %v9125_v1  ;;  %v9127_v41 = vpop.permute.xlu2 %2773 }
 0x1f9   : > { %v9129_v6 = vpop.f32.mrf.mxu2 }
 0x1fa   : > { %2189 = vmatpush.bf16.msra.mxu3 %v9048_v37 }
 0x1fe   : > { %1791 = vmatpush.bf16.xpose.msrb.mxu0 %v1712_v10  ;;  %2190 = vmatpush.bf16.msra.mxu3 %v8947_v23 }
 0x1ff   : > { %v2346_v52 = vpop.permute.xlu0 %2345  ;;  %v9135_v19 = vpop.permute.xlu1 %2305 }
 0x200   : > { %v2417_v15 = vsel %vm1662_vm0, %v2346_v52, 0  ;;  %v2414_v52 = vsel %vm1662_vm0, %v2344_v53, 0 }
 0x201   : > { %v9138_v29 = vpop.permute.xlu2 %2325  ;;  %2468 = vmatpush.bf16.xpose.msra.mxu2 %v2417_v15  ;;  %v9140_v46 = vpop.f32.mrf.mxu2 }
 0x202   : > { %2191 = vmatpush.bf16.msra.mxu3 %v8985_v54 }
 0x205   : > { %6659 = vmatmul.msk.bf16.gmra.mxu3 %vm1662_vm0, %v8812_v5  ;;  %6665 = vmatmul.msk.bf16.vlgmr.msrb.gmra.mxu0 %vm1662_vm0, %v8721_v16 }
 0x206   : > { %2192 = vmatpush.bf16.msra.mxu3 %v8913_v47  ;;  %v2411_v47 = vsel %vm1662_vm0, %v8966_v45, 0 }
 0x207   : > { %v9148_v56 = vpop.permute.xlu0 %2313  ;;  %v9150_v10 = vpop.permute.xlu1 %3046 }
 0x208   : > { %12034 = vst [vmem:[#allocation68_spill] sm:$0xff] %v9148_v56 }
 0x209   : > { %v9153_v23 = vpop.permute.xlu2 %3727  ;;  %2469 = vmatpush.bf16.xpose.msra.mxu2 %v2414_v52  ;;  %v1426_v15 = vpop.f32.mrf.mxu2 }
 0x20a   : > { %v1427_v54 = vadd.f32 %v8879_v2, %v1426_v15 }
 0x20c   : > { %v1524_v11 = vpack.c.bf16 %v1427_v54, %v1427_v54 }
 0x20e   : > { %v2141_v16 = vunpack.c.l.b16 %v1524_v11 }
 0x20f   : > { %v9156_v37 = vpop.permute.xlu0 %3014  ;;  %v9158_v4 = vpop.permute.xlu1 %3747 }
 0x210   : > { %12035 = vst [vmem:[#allocation69_spill] sm:$0xff] %v9156_v37 }
 0x211   : > { %v9162_v42 = vpop.permute.xlu2 %3729  ;;  %2470 = vmatpush.bf16.xpose.msra.mxu2 %v2411_v47  ;;  %v1428_v38 = vpop.f32.mrf.mxu2  ;;  %v2408_v47 = vsel %vm1662_vm0, %v8976_v60, 0 }
 0x212   : > { %v1429_v53 = vadd.f32 %v8879_v2, %v1428_v38 }
 0x214   : > { %v1525_v8 = vpack.c.bf16 %v1429_v53, %v1429_v53 }
 0x215   : > { %6660 = vmatmul.msk.bf16.gmra.mxu3 %vm1662_vm0, %v8872_v18  ;;  %6666 = vmatmul.msk.bf16.gmra.mxu0 %vm1662_vm0, %v8737_v43 }
 0x216   : > { %v2142_v52 = vunpack.c.l.b16 %v1525_v8 }
 0x217   : > { %v2324_v15 = vpop.permute.xlu1 %2323  ;;  %v9169_v54 = vpop.permute.xlu0 %3028 }
 0x218   : > { %v9171_v37 = vpack.c.b16 %v2142_v52, %v2141_v16 }
 0x219   : > { %v9175_v45 = vpop.permute.xlu2 %2331  ;;  %2471 = vmatpush.bf16.xpose.msra.mxu2 %v2408_v47  ;;  %v1431_v11 = vpop.f32.mrf.mxu2 }
 0x21a   : > { %12036 = vst [vmem:[#allocation70_spill] sm:$0xff] %v9171_v37  ;;  %2793 = vrot.lane.b32.xlu0 %v9171_v37, %s8240_s1  ;;  %v1432_v38 = vadd.f32 %v8879_v2, %v1431_v11 }
 0x21c   : > { %v1526_v43 = vpack.c.bf16 %v1432_v38, %v1432_v38 }
 0x21e   : > { %v2143_v60 = vunpack.c.l.b16 %v1526_v43 }
 0x21f   : > { %v9180_v53 = vpop.permute.xlu1 %3024  ;;  %v9182_v8 = vpop.permute.xlu0 %2777 }
 0x221   : > { %v9184_v3 = vpop.permute.xlu2 %3032  ;;  %v1433_v16 = vpop.f32.mrf.mxu2 }
 0x222   : > { %v1434_v52 = vadd.f32 %v8879_v2, %v1433_v16 }
 0x224   : > { %v1527_v59 = vpack.c.bf16 %v1434_v52, %v1434_v52 }
 0x225   : > { %6661 = vmatmul.msk.bf16.gmra.mxu3 %vm1662_vm0, %v8748_v50  ;;  %6667 = vmatmul.msk.bf16.gmra.mxu0 %vm1662_vm0, %v8812_v5 }
 0x226   : > { %v2144_v47 = vunpack.c.l.b16 %v1527_v59 }
 0x227   : > { %v9191_v11 = vpop.permute.xlu1 %3026  ;;  %v2330_v28 = vpop.permute.xlu0 %2329 }
 0x228   : > { %v9193_v14 = vpack.c.b16 %v2144_v47, %v2143_v60  ;;  %v2393_v38 = vsel %vm1662_vm0, %v2330_v28, 0 }
 0x229   : > { %v9196_v51 = vpop.permute.xlu2 %2781  ;;  %v1436_v55 = vpop.f32.mrf.mxu2  ;;  %2419 = vmatpush.bf16.xpose.msrb.mxu1 %v2393_v38 }
 0x22a   : > { %12037 = vst [vmem:[#allocation71_spill] sm:$0xff] %v9193_v14  ;;  %2795 = vrot.lane.b32.xlu0 %v9193_v14, %s8240_s1  ;;  %v1437_v43 = vadd.f32 %v8879_v2, %v1436_v55 }
 0x22c   : > { %v1528_v52 = vpack.c.bf16 %v1437_v43, %v1437_v43 }
 0x22e   : > { %v2145_v47 = vunpack.c.l.b16 %v1528_v52 }
 0x22f   : > { %v9201_v16 = vpop.permute.xlu1 %2775  ;;  %v9241_v36 = vpop.permute.xlu0 %3731 }
 0x231   : > { %v9203_v59 = vpop.permute.xlu2 %3034  ;;  %v1438_v5 = vpop.f32.mrf.mxu2 }
 0x232   : > { %v1439_v60 = vadd.f32 %v8879_v2, %v1438_v5 }
 0x234   : > { %v1529_v22 = vpack.c.bf16 %v1439_v60, %v1439_v60 }
 0x235   : > { %6662 = vmatmul.msk.bf16.gmra.mxu3 %vm1662_vm0, %v8779_v25  ;;  %6668 = vmatmul.msk.bf16.gmra.mxu0 %vm1662_vm0, %v8872_v18  ;;  %v2387_v18 = vsel %vm1662_vm0, %v9138_v29, 0  ;;  %v2384_v29 = vsel %vm1662_vm0, %v2324_v15, 0 }
 0x236   : > { %v2146_v28 = vunpack.c.l.b16 %v1529_v22 }
 0x237   : > { %v2328_v38 = vpop.permute.xlu1 %2327 }
 0x238   : > { %v9210_v32 = vpack.c.b16 %v2146_v28, %v2145_v47  ;;  %v2390_v55 = vsel %vm1662_vm0, %v2328_v38, 0 }
 0x239   : > { %v9213_v43 = vpop.permute.xlu2 %3735  ;;  %2420 = vmatpush.bf16.xpose.msrb.mxu1 %v2390_v55  ;;  %v1441_v56 = vpop.f32.mrf.mxu2 }
 0x23a   : > { %12038 = vst [vmem:[#allocation72_spill] sm:$0xff] %v9210_v32  ;;  %2797 = vrot.lane.b32.xlu1 %v9210_v32, %s8240_s1  ;;  %v1442_v5 = vadd.f32 %v8879_v2, %v1441_v56 }
 0x23b   : > { %12039 = vst [vmem:[#allocation73_spill] sm:$0xff] %v9213_v43 }
 0x23c   : > { %v1530_v60 = vpack.c.bf16 %v1442_v5, %v1442_v5 }
 0x23e   : > { %v2147_v38 = vunpack.c.l.b16 %v1530_v60 }
 0x23f   : > { %v3031_v52 = vpop.permute.xlu1 %3030 }
 0x241   : > { %v9220_v22 = vpop.permute.xlu2 %2783  ;;  %2421 = vmatpush.bf16.xpose.msrb.mxu1 %v2387_v18  ;;  %v1443_v47 = vpop.f32.mrf.mxu2 }
 0x242   : > { %v1444_v28 = vadd.f32 %v8879_v2, %v1443_v47 }
 0x244   : > { %v1531_v43 = vpack.c.bf16 %v1444_v28, %v1444_v28 }
 0x245   : > { %6663 = vmatmul.msk.bf16.gmra.mxu3 %vm1662_vm0, %v8834_v30  ;;  %6669 = vmatmul.msk.bf16.gmra.mxu0 %vm1662_vm0, %v8748_v50 }
 0x246   : > { %v2148_v56 = vunpack.c.l.b16 %v1531_v43  ;;  %v2381_v43 = vsel %vm1662_vm0, %v9106_v27, 0 }
 0x247   : > { %v9227_v55 = vpop.permute.xlu1 %2779 }
 0x248   : > { %v9229_v5 = vpack.c.b16 %v2148_v56, %v2147_v38 }
 0x249   : > { %v9232_v12 = vpop.permute.xlu2 %3036  ;;  %2422 = vmatpush.bf16.xpose.msrb.mxu1 %v2384_v29  ;;  %v1446_v18 = vpop.f32.mrf.mxu2 }
 0x24a   : > { %12040 = vst [vmem:[#allocation74_spill] sm:$0xff] %v9229_v5  ;;  %2799 = vrot.lane.b32.xlu1 %v9229_v5, %s8240_s1  ;;  %v1447_v60 = vadd.f32 %v8879_v2, %v1446_v18 }
 0x24c   : > { %v1532_v28 = vpack.c.bf16 %v1447_v60, %v1447_v60 }
 0x24e   : > { %v2149_v29 = vunpack.c.l.b16 %v1532_v28 }
 0x24f   : > { %v2336_v47 = vpop.permute.xlu1 %2335 }
 0x250   : > { %v2402_v28 = vsel %vm1662_vm0, %v2336_v47, 0 }
 0x251   : > { %v2338_v50 = vpop.permute.xlu2 %2337  ;;  %2423 = vmatpush.bf16.xpose.msrb.mxu1 %v2381_v43  ;;  %v1448_v38 = vpop.f32.mrf.mxu2  ;;  %v2378_v43 = vsel %vm1662_vm0, %v9026_v57, 0 }
 0x252   : > { %v1449_v56 = vadd.f32 %v8879_v2, %v1448_v38  ;;  %v2405_v15 = vsel %vm1662_vm0, %v2338_v50, 0 }
 0x253   : > { %2472 = vmatpush.bf16.xpose.msra.mxu2 %v2405_v15 }
 0x254   : > { %v1533_v1 = vpack.c.bf16 %v1449_v56, %v1449_v56 }
 0x255   : > { %6664 = vmatmul.msk.bf16.gmra.mxu3 %vm1662_vm0, %v8893_v24  ;;  %6670 = vmatmul.msk.bf16.gmra.mxu0 %vm1662_vm0, %v8779_v25 }
 0x256   : > { %v2150_v18 = vunpack.c.l.b16 %v1533_v1  ;;  %v2334_v1 = vpop.permute.xlu0 %2333 }
 0x257   : > { %v9247_v27 = vpop.permute.xlu1 %3737 }
 0x258   : > { %12041 = vst [vmem:[#allocation75_spill] sm:$0xff] %v9247_v27  ;;  %v9249_v60 = vpack.c.b16 %v2150_v18, %v2149_v29  ;;  %v2375_v29 = vsel %vm1662_vm0, %v9024_v9, 0  ;;  %v2372_v9 = vsel %vm1662_vm0, %v8942_v21, 0 }
 0x259   : > { %2424 = vmatpush.bf16.xpose.msrb.mxu1 %v2378_v43  ;;  %v1451_v50 = vpop.f32.mrf.mxu2  ;;  %v2399_v43 = vsel %vm1662_vm0, %v2334_v1, 0  ;;  %v2396_v1 = vsel %vm1662_vm0, %v9175_v45, 0  ;;  %v3091_v45 = vsel %vm1662_vm0, %v9169_v54, 0 }
 0x25a   : > { %12042 = vst [vmem:[#allocation76_spill] sm:$0xff] %v9249_v60  ;;  %2801 = vrot.lane.b32.xlu0 %v9249_v60, %s8240_s1  ;;  %v1452_v38 = vadd.f32 %v8879_v2, %v1451_v50 }
 0x25b   : > { %2473 = vmatpush.bf16.xpose.msra.mxu2 %v2402_v28 }
 0x25c   : > { %v1534_v15 = vpack.c.bf16 %v1452_v38, %v1452_v38 }
 0x25e   : > { %v2151_v47 = vunpack.c.l.b16 %v1534_v15  ;;  %v2786_v15 = vpop.permute.xlu0 %2785 }
 0x25f   : > { %v9257_v56 = vpop.permute.xlu1 %3739 }
 0x261   : > { %2425 = vmatpush.bf16.xpose.msrb.mxu1 %v2375_v29  ;;  %v1453_v18 = vpop.f32.mrf.mxu2  ;;  %v3094_v29 = vsel %vm1662_vm0, %v3031_v52, 0  ;;  %v1422_v52 = vadd.f32 %v8879_v2, %v9129_v6  ;;  %v3088_v6 = vsel %vm1662_vm0, %v9191_v11, 0 }
 0x262   : > { %v1454_v57 = vadd.f32 %v8879_v2, %v1453_v18 }
 0x263   : > { %2474 = vmatpush.bf16.xpose.msra.mxu2 %v2399_v43 }
 0x264   : > { %v1535_v25 = vpack.c.bf16 %v1454_v57, %v1454_v57  ;;  %v1536_v57 = vld [vmem:[%s784_s8] sm:$0x3]  ;;  %s6309_s8 = sshll.u32 %s11701_s26, 4  ;;  %s6310_s8 = int_to_ptr.vmem [resolvable:$true] %s6309_s8 }
 0x265   : > { %6671 = vmatmul.msk.bf16.gmra.mxu0 %vm1662_vm0, %v8834_v30  ;;  %v9314_v11 = vperm.slane %v1536_v57, 1 }
 0x266   : > { %v2152_v50 = vunpack.c.l.b16 %v1535_v25  ;;  %v3118_v25 = vsel %vm1662_vm0, %v9150_v10, 0  ;;  %v3115_v10 = vsel %vm1662_vm0, %v9062_v0, 0  ;;  %v1419_v0 = vadd.f32 %v8879_v2, %v9112_v58 }
 0x267   : > { %v2788_v28 = vpop.permute.xlu1 %2787  ;;  %v9311_v58 = vperm.slane %v1536_v57, 0 }
 0x268   : > { %v9265_v27 = vpack.c.b16 %v2152_v50, %v2151_v47  ;;  %v1744_v38 = vpop.f32.mrf.mxu3  ;;  %2821 = vmatpush.bf16.msrb.mxu3 %v2788_v28  ;;  %v3085_v28 = vsel %vm1662_vm0, %v9180_v53, 0 }
 0x269   : > { %2426 = vmatpush.bf16.xpose.msrb.mxu1 %v2372_v9 }
 0x26a   : > { %12043 = vst [vmem:[#allocation77_spill] sm:$0xff] %v9265_v27  ;;  %2234 = vmatpush.bf16.msra.mxu0 %v9265_v27  ;;  %2803 = vrot.lane.b32.xlu0 %v9265_v27, %s8240_s1 }
 0x26b   : > { %2475 = vmatpush.bf16.xpose.msra.mxu2 %v2396_v1 }
 0x26c   : > { %2822 = vmatpush.bf16.msrb.mxu3 %v2786_v15 }
 0x26e   : > { %2235 = vmatpush.bf16.msra.mxu0 %v9249_v60 }
 0x270   : > { %v9278_v21 = vpop.f32.mrf.mxu3  ;;  %6673 = vmatmul.msk.bf16.vlgmr.msrb.gmra.mxu1 %vm1662_vm0, %v8962_v35  ;;  %2823 = vmatpush.bf16.msrb.mxu3 %v9220_v22  ;;  %v1424_v22 = vadd.f32 %v8879_v2, %v9140_v46  ;;  %v3112_v46 = vsel %vm1662_vm0, %v8980_v62, 0 }
 0x271   : > { %3120 = vmatpush.bf16.xpose.msra.mxu1 %v3094_v29  ;;  %v9326_v29 = vadd.f32 %v1744_v38, %v9311_v58  ;;  %v3039_v38 = vpop.permute.xlu0 %3038 }
 0x272   : > { %6681 = vmatmul.msk.bf16.vlgmr.msra.gmra.mxu2 %vm1662_vm0, %v8962_v35  ;;  %2236 = vmatpush.bf16.msra.mxu0 %v9229_v5  ;;  %v1417_v35 = vadd.f32 %v8879_v2, %v9099_v48  ;;  %v1523_v18 = vpack.c.bf16 %v1424_v22, %v1424_v22 }
 0x273   : > { %3169 = vmatpush.bf16.xpose.msrb.mxu2 %v3118_v25  ;;  %v3082_v25 = vsel %vm1662_vm0, %v9081_v49, 0 }
 0x274   : > { %2824 = vmatpush.bf16.msrb.mxu3 %v9196_v51  ;;  %v1522_v51 = vpack.c.bf16 %v1422_v52, %v1422_v52  ;;  %v1520_v48 = vpack.c.bf16 %v1417_v35, %v1417_v35  ;;  %v2140_v2 = vunpack.c.l.b16 %v1523_v18  ;;  %v3079_v52 = vsel %vm1662_vm0, %v9058_v63, 0 }
 0x275   : > { %6672 = vmatmul.msk.bf16.gmra.mxu0 %vm1662_vm0, %v8893_v24 }
 0x276   : > { %2237 = vmatpush.bf16.msra.mxu0 %v9210_v32  ;;  %v2139_v43 = vunpack.c.l.b16 %v1522_v51  ;;  %v2137_v62 = vunpack.c.l.b16 %v1520_v48  ;;  %v3795_v48 = vsel %vm1662_vm0, %v9241_v36, 0 }
 0x278   : > { %v1749_v54 = vpop.f32.mrf.mxu3  ;;  %2825 = vmatpush.bf16.msrb.mxu3 %v9227_v55  ;;  %v1521_v55 = vpack.c.bf16 %v1419_v0, %v1419_v0  ;;  %v3103_v0 = vsel %vm1662_vm0, %v9232_v12, 0 }
 0x279   : > { %3121 = vmatpush.bf16.xpose.msra.mxu1 %v3091_v45  ;;  %v9357_v22 = vadd.f32 %v1749_v54, %v9311_v58 }
 0x27a   : > { %2238 = vmatpush.bf16.msra.mxu0 %v9193_v14  ;;  %v2138_v50 = vunpack.c.l.b16 %v1521_v55 }
 0x27b   : > { %3170 = vmatpush.bf16.xpose.msrb.mxu2 %v3115_v10  ;;  %v9350_v10 = vadd.f32 %v9278_v21, %v9311_v58 }
 0x27c   : > { %2826 = vmatpush.bf16.msrb.mxu3 %v9182_v8  ;;  %v9319_v8 = vpack.c.b16 %v2140_v2, %v2139_v43  ;;  %v9335_v53 = vpack.c.b16 %v2138_v50, %v2137_v62  ;;  %v3097_v2 = vsel %vm1662_vm0, %v9184_v3, 0  ;;  %v3792_v62 = vsel %vm1662_vm0, %v9162_v42, 0 }
 0x27d   : > { %v3816_v3 = vsel %vm1662_vm0, %v9108_v40, 0 }
 0x27e   : > { %2239 = vmatpush.bf16.msra.mxu0 %v9171_v37  ;;  %12044 = vst [vmem:[#allocation78_spill] sm:$0xff] %v9319_v8 }
 0x27f   : > { %12045 = vst [vmem:[#allocation79_spill] sm:$0xff] %v9335_v53 }
 0x280   : > { %v1751_v47 = vpop.f32.mrf.mxu3  ;;  %6674 = vmatmul.msk.bf16.gmra.mxu1 %vm1662_vm0, %v8926_v39  ;;  %2827 = vmatpush.bf16.msrb.mxu3 %v9201_v16  ;;  %v3109_v16 = vsel %vm1662_vm0, %v8978_v61, 0  ;;  %v3106_v61 = vsel %vm1662_vm0, %v3039_v38, 0  ;;  %v3813_v38 = vsel %vm1662_vm0, %v9004_v26, 0  ;;  %v3810_v26 = vsel %vm1662_vm0, %v8901_v7, 0 }
 0x281   : > { %3122 = vmatpush.bf16.xpose.msra.mxu1 %v3088_v6  ;;  %v9371_v18 = vadd.f32 %v1751_v47, %v9311_v58  ;;  %v3100_v6 = vsel %vm1662_vm0, %v9203_v59, 0 }
 0x282   : > { %v1793_v9 = vpop.f32.mrf.mxu0  ;;  %6682 = vmatmul.msk.bf16.gmra.mxu2 %vm1662_vm0, %v8926_v39  ;;  %2240 = vmatpush.bf16.msra.mxu0 %v9319_v8 }
 0x283   : > { %3171 = vmatpush.bf16.xpose.msrb.mxu2 %v3112_v46  ;;  %v9329_v1 = vadd.f32 %v1793_v9, %v9314_v11 }
 0x284   : > { %2828 = vmatpush.bf16.msrb.mxu3 %v9127_v41 }
 0x285   : > { %v1833_v39 = vmax.f32 %v9326_v29, %v9329_v1 }
 0x286   : > { %2241 = vmatpush.bf16.msra.mxu0 %v9335_v53 }
 0x287   : > { %1834 = vmax.xlane.f32.xlu2 %v1833_v39 }
 0x288   : > { %v1754_v15 = vpop.f32.mrf.mxu3 }
 0x289   : > { %3123 = vmatpush.bf16.xpose.msra.mxu1 %v3085_v28  ;;  %v9389_v59 = vadd.f32 %v1754_v15, %v9311_v58 }
 0x28a   : > { %v1795_v45 = vpop.f32.mrf.mxu0 }
 0x28b   : > { %3172 = vmatpush.bf16.xpose.msrb.mxu2 %v3109_v16  ;;  %v9344_v41 = vadd.f32 %v1795_v45, %v9314_v11  ;;  %v3789_v16 = vsel %vm1662_vm0, %v9153_v23, 0 }
 0x28d   : > { %v1836_v21 = vmax.f32 %v9350_v10, %v9344_v41 }
 0x290   : > { %6675 = vmatmul.msk.bf16.gmra.mxu1 %vm1662_vm0, %v9077_v44  ;;  %v1756_v51 = vpop.f32.mrf.mxu3 }
 0x291   : > { %3124 = vmatpush.bf16.xpose.msra.mxu1 %v3082_v25  ;;  %v9403_v50 = vadd.f32 %v1756_v51, %v9311_v58  ;;  %v3807_v51 = vsel %vm1662_vm0, %v9257_v56, 0 }
 0x292   : > { %v1798_v49 = vpop.f32.mrf.mxu0  ;;  %6683 = vmatmul.msk.bf16.gmra.mxu2 %vm1662_vm0, %v9077_v44  ;;  %v3076_v44 = vsel %vm1662_vm0, %v9040_v31, 0  ;;  %v3073_v31 = vsel %vm1662_vm0, %v8940_v20, 0  ;;  %v3819_v20 = vsel %vm1662_vm0, %v9158_v4, 0 }
 0x293   : > { %3173 = vmatpush.bf16.xpose.msrb.mxu2 %v3106_v61  ;;  %v9360_v35 = vadd.f32 %v1798_v49, %v9314_v11  ;;  %v3783_v49 = vsel %vm1662_vm0, %v9123_v34, 0 }
 0x294   : > { %1837 = vmax.xlane.f32.xlu0 %v1836_v21  ;;  %v2794_v21 = vpop.permute.xlu0 %2793 }
 0x295   : > { %v1839_v63 = vmax.f32 %v9357_v22, %v9360_v35 }
 0x297   : > { %1840 = vmax.xlane.f32.xlu1 %v1839_v63 }
 0x298   : > { %v1759_v57 = vpop.f32.mrf.mxu3 }
 0x299   : > { %3125 = vmatpush.bf16.xpose.msra.mxu1 %v3079_v52  ;;  %v9419_v39 = vadd.f32 %v1759_v57, %v9311_v58 }
 0x29a   : > { %v1800_v54 = vpop.f32.mrf.mxu0 }
 0x29b   : > { %3174 = vmatpush.bf16.xpose.msrb.mxu2 %v3103_v0  ;;  %v9374_v12 = vadd.f32 %v1800_v54, %v9314_v11  ;;  %v12046_v54 = vld [vmem:[#allocation58_spill] sm:$0xff] }
 0x29c   : > { %v3780_v34 = vsel %vm1662_vm0, %v12046_v54, 0  ;;  %v2796_v57 = vpop.permute.xlu0 %2795 }
 0x29d   : > { %v1842_v46 = vmax.f32 %v9371_v18, %v9374_v12 }
 0x29f   : > { %1843 = vmax.xlane.f32.xlu2 %v1842_v46 }
 0x2a0   : > { %6676 = vmatmul.msk.bf16.gmra.mxu1 %vm1662_vm0, %v9135_v19 }
 0x2a1   : > { %3126 = vmatpush.bf16.xpose.msra.mxu1 %v3076_v44 }
 0x2a2   : > { %v1803_v55 = vpop.f32.mrf.mxu0  ;;  %6684 = vmatmul.msk.bf16.gmra.mxu2 %vm1662_vm0, %v9135_v19  ;;  %v1761_v19 = vpop.f32.mrf.mxu3 }
 0x2a3   : > { %3175 = vmatpush.bf16.xpose.msrb.mxu2 %v3100_v6  ;;  %v9392_v43 = vadd.f32 %v1803_v55, %v9314_v11  ;;  %v9431_v23 = vadd.f32 %v1761_v19, %v9311_v58 }
 0x2a5   : > { %v1845_v36 = vmax.f32 %v9389_v59, %v9392_v43 }
 0x2a7   : > { %1846 = vmax.xlane.f32.xlu0 %v1845_v36  ;;  %v12049_v36 = vld [vmem:[#allocation56_spill] sm:$0xff] }
 0x2a8   : > { %v3777_v19 = vsel %vm1662_vm0, %v12049_v36, 0 }
 0x2a9   : > { %3127 = vmatpush.bf16.xpose.msra.mxu1 %v3073_v31  ;;  %v12047_v31 = vld [vmem:[#allocation75_spill] sm:$0xff] }
 0x2aa   : > { %v1805_v47 = vpop.f32.mrf.mxu0  ;;  %v1764_v9 = vpop.f32.mrf.mxu3  ;;  %v3804_v56 = vsel %vm1662_vm0, %v12047_v31, 0 }
 0x2ab   : > { %3176 = vmatpush.bf16.xpose.msrb.mxu2 %v3097_v2  ;;  %v9406_v28 = vadd.f32 %v1805_v47, %v9314_v11  ;;  %v9447_v0 = vadd.f32 %v1764_v9, %v9311_v58  ;;  %v12048_v2 = vld [vmem:[#allocation67_spill] sm:$0xff] }
 0x2ad   : > { %v1848_v4 = vmax.f32 %v9403_v50, %v9406_v28 }
 0x2af   : > { %1849 = vmax.xlane.f32.xlu2 %v1848_v4  ;;  %v12050_v4 = vld [vmem:[#allocation73_spill] sm:$0xff] }
 0x2b0   : > { %6677 = vmatmul.msk.bf16.gmra.mxu1 %vm1662_vm0, %v9000_v17  ;;  %v3801_v9 = vsel %vm1662_vm0, %v12050_v4, 0 }
 0x2b1   : > { %3821 = vmatpush.bf16.xpose.msrb.mxu1 %v3795_v48 }
 0x2b2   : > { %v1808_v42 = vpop.f32.mrf.mxu0  ;;  %6685 = vmatmul.msk.bf16.gmra.mxu2 %vm1662_vm0, %v9000_v17  ;;  %v3786_v17 = vsel %vm1662_vm0, %v9110_v33, 0  ;;  %v1766_v61 = vpop.f32.mrf.mxu3 }
 0x2b3   : > { %3870 = vmatpush.bf16.xpose.msra.mxu2 %v3819_v20  ;;  %v9422_v40 = vadd.f32 %v1808_v42, %v9314_v11  ;;  %v9459_v6 = vadd.f32 %v1766_v61, %v9311_v58 }
 0x2b5   : > { %v1851_v25 = vmax.f32 %v9419_v39, %v9422_v40 }
 0x2b7   : > { %1852 = vmax.xlane.f32.xlu1 %v1851_v25 }
 0x2b9   : > { %3822 = vmatpush.bf16.xpose.msrb.mxu1 %v3792_v62 }
 0x2ba   : > { %v1810_v15 = vpop.f32.mrf.mxu0  ;;  %v1769_v44 = vpop.f32.mrf.mxu3 }
 0x2bb   : > { %3871 = vmatpush.bf16.xpose.msra.mxu2 %v3816_v3  ;;  %v9434_v45 = vadd.f32 %v1810_v15, %v9314_v11  ;;  %v9475_v47 = vadd.f32 %v1769_v44, %v9311_v58 }
 0x2bd   : > { %v1854_v52 = vmax.f32 %v9431_v23, %v9434_v45 }
 0x2bf   : > { %1855 = vmax.xlane.f32.xlu0 %v1854_v52  ;;  %v12051_v52 = vld [vmem:[#allocation68_spill] sm:$0xff] }
 0x2c0   : > { %6678 = vmatmul.msk.bf16.gmra.mxu1 %vm1662_vm0, %v9038_v13 }
 0x2c1   : > { %3823 = vmatpush.bf16.xpose.msrb.mxu1 %v3789_v16 }
 0x2c2   : > { %v1813_v33 = vpop.f32.mrf.mxu0  ;;  %6686 = vmatmul.msk.bf16.gmra.mxu2 %vm1662_vm0, %v9038_v13  ;;  %v1771_v55 = vpop.f32.mrf.mxu3 }
 0x2c3   : > { %3872 = vmatpush.bf16.xpose.msra.mxu2 %v3813_v38  ;;  %v9450_v7 = vadd.f32 %v1813_v33, %v9314_v11  ;;  %v9485_v25 = vadd.f32 %v1771_v55, %v9311_v58 }
 0x2c5   : > { %v1857_v63 = vmax.f32 %v9447_v0, %v9450_v7 }
 0x2c7   : > { %1858 = vmax.xlane.f32.xlu0 %v1857_v63 }
 0x2c9   : > { %3824 = vmatpush.bf16.xpose.msrb.mxu1 %v3786_v17 }
 0x2ca   : > { %v1815_v13 = vpop.f32.mrf.mxu0  ;;  %v1774_v16 = vpop.f32.mrf.mxu3 }
 0x2cb   : > { %3873 = vmatpush.bf16.xpose.msra.mxu2 %v3810_v26  ;;  %v9462_v46 = vadd.f32 %v1815_v13, %v9314_v11  ;;  %v2798_v26 = vpop.permute.xlu1 %2797 }
 0x2cc   : > { %v2802_v3 = vpop.permute.xlu0 %2801 }
 0x2cd   : > { %v1860_v48 = vmax.f32 %v9459_v6, %v9462_v46 }
 0x2cf   : > { %1861 = vmax.xlane.f32.xlu1 %v1860_v48 }
 0x2d0   : > { %6679 = vmatmul.msk.bf16.gmra.mxu1 %vm1662_vm0, %v12048_v2 }
 0x2d1   : > { %3825 = vmatpush.bf16.xpose.msrb.mxu1 %v3783_v49  ;;  %v9497_v49 = vadd.f32 %v1774_v16, %v9311_v58 }
 0x2d2   : > { %v1818_v20 = vpop.f32.mrf.mxu0  ;;  %6687 = vmatmul.msk.bf16.gmra.mxu2 %vm1662_vm0, %v12048_v2  ;;  %v1776_v63 = vpop.f32.mrf.mxu3  ;;  %v12052_v2 = vld [vmem:[#allocation52_spill] sm:$0xff] }
 0x2d3   : > { %3874 = vmatpush.bf16.xpose.msra.mxu2 %v3807_v51  ;;  %v9478_v62 = vadd.f32 %v1818_v20, %v9314_v11  ;;  %v2800_v13 = vpop.permute.xlu1 %2799 }
 0x2d5   : > { %v1863_v42 = vmax.f32 %v9475_v47, %v9478_v62 }
 0x2d7   : > { %1864 = vmax.xlane.f32.xlu2 %v1863_v42 }
 0x2d9   : > { %3826 = vmatpush.bf16.xpose.msrb.mxu1 %v3780_v34  ;;  %v9505_v34 = vadd.f32 %v1776_v63, %v9311_v58 }
 0x2da   : > { %v1820_v38 = vpop.f32.mrf.mxu0  ;;  %v1779_v55 = vpop.f32.mrf.mxu3 }
 0x2db   : > { %3875 = vmatpush.bf16.xpose.msra.mxu2 %v3804_v56  ;;  %v9488_v15 = vadd.f32 %v1820_v38, %v9314_v11  ;;  %v9517_v36 = vadd.f32 %v1779_v55, %v9311_v58 }
 0x2dc   : > { %v2804_v61 = vpop.permute.xlu0 %2803 }
 0x2dd   : > { %v1866_v17 = vmax.f32 %v9485_v25, %v9488_v15  ;;  %2870 = vmatpush.bf16.msrb.mxu0 %v2804_v61 }
 0x2df   : > { %1867 = vmax.xlane.f32.xlu0 %v1866_v17 }
 0x2e0   : > { %6680 = vmatmul.msk.bf16.gmra.mxu1 %vm1662_vm0, %v12051_v52 }
 0x2e1   : > { %3827 = vmatpush.bf16.xpose.msrb.mxu1 %v3777_v19  ;;  %2871 = vmatpush.bf16.msrb.mxu0 %v2802_v3 }
 0x2e2   : > { %v1823_v33 = vpop.f32.mrf.mxu0  ;;  %6688 = vmatmul.msk.bf16.gmra.mxu2 %vm1662_vm0, %v12051_v52 }
 0x2e3   : > { %3876 = vmatpush.bf16.xpose.msra.mxu2 %v3801_v9  ;;  %v9500_v51 = vadd.f32 %v1823_v33, %v9314_v11  ;;  %v1781_v9 = vpop.f32.mrf.mxu3 }
 0x2e4   : > { %v9525_v38 = vadd.f32 %v1781_v9, %v9311_v58 }
 0x2e5   : > { %v1869_v44 = vmax.f32 %v9497_v49, %v9500_v51  ;;  %2872 = vmatpush.bf16.msrb.mxu0 %v2800_v13  ;;  %v12053_v13 = vld [vmem:[#allocation50_spill] sm:$0xff] }
 0x2e7   : > { %1870 = vmax.xlane.f32.xlu2 %v1869_v44 }
 0x2e9   : > { %2873 = vmatpush.bf16.msrb.mxu0 %v2798_v26 }
 0x2ea   : > { %v1825_v54 = vpop.f32.mrf.mxu0 }
 0x2eb   : > { %v9508_v31 = vadd.f32 %v1825_v54, %v9314_v11 }
 0x2ed   : > { %v2428_v56 = vpop.f32.mrf.mxu1  ;;  %v1872_v48 = vmax.f32 %v9505_v34, %v9508_v31  ;;  %2874 = vmatpush.bf16.msrb.mxu0 %v2796_v57 }
 0x2ef   : > { %1873 = vmax.xlane.f32.xlu0 %v1872_v48 }
 0x2f0   : > { %6689 = vmatmul.msk.bf16.vlgmr.msra.gmra.mxu1 %vm1662_vm0, %v12052_v2 }
 0x2f1   : > { %2875 = vmatpush.bf16.msrb.mxu0 %v2794_v21 }
 0x2f2   : > { %v1828_v20 = vpop.f32.mrf.mxu0  ;;  %6697 = vmatmul.msk.bf16.vlgmr.msrb.gmra.mxu2 %vm1662_vm0, %v12052_v2 }
 0x2f3   : > { %v9520_v19 = vadd.f32 %v1828_v20, %v9314_v11 }
 0x2f5   : > { %v2430_v3 = vpop.f32.mrf.mxu1  ;;  %v2477_v4 = vpop.f32.mrf.mxu2  ;;  %v1875_v57 = vmax.f32 %v9517_v36, %v9520_v19 }
 0x2f6   : > { %v9537_v54 = vadd.f32 %v2477_v4, %v9314_v11 }
 0x2f7   : > { %1876 = vmax.xlane.f32.xlu0 %v1875_v57 }
 0x2fa   : > { %v1830_v42 = vpop.f32.mrf.mxu0  ;;  %v1835_v16 = vpop.xlane.xlu2 %1834 }
 0x2fb   : > { %v9528_v21 = vadd.f32 %v1830_v42, %v9314_v11  ;;  %v1881_v17 = vsub.f32 %v9326_v29, %v1835_v16  ;;  %v1882_v61 = vsub.f32 %v9329_v1, %v1835_v16  ;;  %v9542_v29 = vadd.f32 %v2428_v56, %v9311_v58 }
 0x2fc   : > { %v9558_v16 = vadd.f32 %v2430_v3, %v9311_v58 }
 0x2fd   : > { %v1913_v26 = vmul.f32 1.442695, %v1881_v17  ;;  %v1915_v52 = vmul.f32 1.442695, %v1882_v61  ;;  %v2433_v33 = vpop.f32.mrf.mxu1  ;;  %v2479_v63 = vpop.f32.mrf.mxu2  ;;  %v1878_v44 = vmax.f32 %v9525_v38, %v9528_v21  ;;  %v2517_v2 = vmax.f32 %v9542_v29, %v9537_v54 }
 0x2fe   : > { %v9553_v9 = vadd.f32 %v2479_v63, %v9314_v11 }
 0x2ff   : > { %7329 = vpow2.f32 %v1913_v26  ;;  %1879 = vmax.xlane.f32.xlu0 %v1878_v44 }
 0x300   : > { %7331 = vpow2.f32 %v1915_v52  ;;  %6690 = vmatmul.msk.bf16.gmra.mxu1 %vm1662_vm0, %v12053_v13 }
 0x302   : > { %6698 = vmatmul.msk.bf16.gmra.mxu2 %vm1662_vm0, %v12053_v13 }
 0x305   : > { %v9544_v1 = vpop.eup %7329  ;;  %v2435_v48 = vpop.f32.mrf.mxu1 }
 0x306   : > { %v2482_v55 = vpop.f32.mrf.mxu2  ;;  %v9548_v20 = vpop.eup %7331 }
 0x307   : > { %2518 = vmax.xlane.f32.xlu0 %v2517_v2  ;;  %v1977_v4 = vadd.f32 %v9548_v20, %v9544_v1  ;;  %v1838_v57 = vpop.xlane.xlu0 %1837  ;;  %v9567_v3 = vadd.f32 %v2482_v55, %v9314_v11 }
 0x308   : > { %v1883_v56 = vsub.f32 %v9350_v10, %v1838_v57  ;;  %v1884_v42 = vsub.f32 %v9344_v41, %v1838_v57  ;;  %v2520_v10 = vmax.f32 %v9558_v16, %v9553_v9  ;;  %v12054_v41 = vld [vmem:[#allocation62_spill] sm:$0xff] }
 0x309   : > { %1978 = vadd.xlane.f32.xlu2 %v1977_v4  ;;  %v9574_v4 = vadd.f32 %v2433_v33, %v9311_v58 }
 0x30a   : > { %v1841_v17 = vpop.xlane.xlu1 %1840  ;;  %v1917_v61 = vmul.f32 1.442695, %v1883_v56  ;;  %v1919_v26 = vmul.f32 1.442695, %v1884_v42 }
 0x30b   : > { %v1885_v52 = vsub.f32 %v9357_v22, %v1841_v17  ;;  %v1886_v44 = vsub.f32 %v9360_v35, %v1841_v17 }
 0x30c   : > { %7333 = vpow2.f32 %v1917_v61 }
 0x30d   : > { %v1921_v13 = vmul.f32 1.442695, %v1885_v52  ;;  %v1923_v2 = vmul.f32 1.442695, %v1886_v44  ;;  %v2438_v63 = vpop.f32.mrf.mxu1  ;;  %7335 = vpow2.f32 %v1919_v26  ;;  %v2523_v44 = vmax.f32 %v9574_v4, %v9567_v3 }
 0x30e   : > { %v2484_v37 = vpop.f32.mrf.mxu2 }
 0x30f   : > { %7337 = vpow2.f32 %v1921_v13  ;;  %2521 = vmax.xlane.f32.xlu0 %v2520_v10  ;;  %v9594_v10 = vadd.f32 %v2438_v63, %v9311_v58 }
 0x310   : > { %7339 = vpow2.f32 %v1923_v2  ;;  %6691 = vmatmul.msk.bf16.gmra.mxu1 %vm1662_vm0, %v12054_v41 }
 0x312   : > { %6699 = vmatmul.msk.bf16.gmra.mxu2 %vm1662_vm0, %v12054_v41  ;;  %v1844_v22 = vpop.xlane.xlu2 %1843  ;;  %v9571_v35 = vpop.eup %7333  ;;  %v9597_v41 = vadd.f32 %v2484_v37, %v9314_v11 }
 0x313   : > { %v1887_v57 = vsub.f32 %v9371_v18, %v1844_v22  ;;  %v1888_v56 = vsub.f32 %v9374_v12, %v1844_v22  ;;  %v9578_v42 = vpop.eup %7335 }
 0x314   : > { %v1980_v52 = vadd.f32 %v9578_v42, %v9571_v35 }
 0x315   : > { %v9580_v17 = vpop.eup %7337  ;;  %v1925_v61 = vmul.f32 1.442695, %v1887_v57  ;;  %v1927_v55 = vmul.f32 1.442695, %v1888_v56  ;;  %v2440_v33 = vpop.f32.mrf.mxu1 }
 0x316   : > { %v2487_v26 = vpop.f32.mrf.mxu2  ;;  %v9586_v13 = vpop.eup %7339  ;;  %1981 = vadd.xlane.f32.xlu1 %v1980_v52 }
 0x317   : > { %7341 = vpow2.f32 %v1925_v61  ;;  %2524 = vmax.xlane.f32.xlu0 %v2523_v44  ;;  %v1983_v18 = vadd.f32 %v9586_v13, %v9580_v17  ;;  %v9591_v12 = vadd.f32 %v2487_v26, %v9314_v11  ;;  %v9604_v61 = vadd.f32 %v2435_v48, %v9311_v58 }
 0x318   : > { %7343 = vpow2.f32 %v1927_v55 }
 0x319   : > { %12055 = vst [vmem:[#allocation58_spill] sm:$0xff] %v9591_v12  ;;  %1984 = vadd.xlane.f32.xlu2 %v1983_v18  ;;  %v2529_v44 = vmax.f32 %v9594_v10, %v9591_v12  ;;  %v2526_v37 = vmax.f32 %v9604_v61, %v9597_v41 }
 0x31a   : > { %v1847_v2 = vpop.xlane.xlu0 %1846 }
 0x31b   : > { %v1889_v22 = vsub.f32 %v9389_v59, %v1847_v2  ;;  %v1890_v57 = vsub.f32 %v9392_v43, %v1847_v2  ;;  %v12056_v43 = vld [vmem:[#allocation66_spill] sm:$0xff] }
 0x31d   : > { %v9601_v56 = vpop.eup %7341  ;;  %v1929_v55 = vmul.f32 1.442695, %v1889_v22  ;;  %v1931_v26 = vmul.f32 1.442695, %v1890_v57  ;;  %v2443_v48 = vpop.f32.mrf.mxu1 }
 0x31e   : > { %v2489_v52 = vpop.f32.mrf.mxu2  ;;  %v9608_v63 = vpop.eup %7343  ;;  %2530 = vmax.xlane.f32.xlu1 %v2529_v44 }
 0x31f   : > { %7345 = vpow2.f32 %v1929_v55  ;;  %v1986_v59 = vadd.f32 %v9608_v63, %v9601_v56  ;;  %v9619_v2 = vadd.f32 %v2489_v52, %v9314_v11 }
 0x320   : > { %7347 = vpow2.f32 %v1931_v26  ;;  %6692 = vmatmul.msk.bf16.gmra.mxu1 %vm1662_vm0, %v12056_v43  ;;  %v9626_v26 = vadd.f32 %v2440_v33, %v9311_v58 }
 0x321   : > { %2527 = vmax.xlane.f32.xlu2 %v2526_v37  ;;  %1987 = vadd.xlane.f32.xlu0 %v1986_v59  ;;  %12057 = vst [vmem:[#allocation75_spill] sm:$0xff] %v9619_v2 }
 0x322   : > { %6700 = vmatmul.msk.bf16.gmra.mxu2 %vm1662_vm0, %v12056_v43  ;;  %v1850_v18 = vpop.xlane.xlu2 %1849  ;;  %12058 = vst [vmem:[#allocation67_spill] sm:$0xff] %v9626_v26  ;;  %v2532_v52 = vmax.f32 %v9626_v26, %v9619_v2 }
 0x323   : > { %v1891_v22 = vsub.f32 %v9403_v50, %v1850_v18  ;;  %v1892_v57 = vsub.f32 %v9406_v28, %v1850_v18 }
 0x325   : > { %v9623_v55 = vpop.eup %7345  ;;  %v1933_v44 = vmul.f32 1.442695, %v1891_v22  ;;  %v1935_v32 = vmul.f32 1.442695, %v1892_v57  ;;  %v2445_v28 = vpop.f32.mrf.mxu1 }
 0x326   : > { %v2492_v37 = vpop.f32.mrf.mxu2  ;;  %v9628_v59 = vpop.eup %7347  ;;  %v9641_v24 = vadd.f32 %v2445_v28, %v9311_v58 }
 0x327   : > { %7349 = vpow2.f32 %v1933_v44  ;;  %v1989_v43 = vadd.f32 %v9628_v59, %v9623_v55 }
 0x328   : > { %7351 = vpow2.f32 %v1935_v32 }
 0x329   : > { %1990 = vadd.xlane.f32.xlu1 %v1989_v43  ;;  %2533 = vmax.xlane.f32.xlu0 %v2532_v52 }
 0x32a   : > { %v1853_v50 = vpop.xlane.xlu1 %1852 }
 0x32b   : > { %v1893_v33 = vsub.f32 %v9419_v39, %v1853_v50  ;;  %v1894_v18 = vsub.f32 %v9422_v40, %v1853_v50  ;;  %v12059_v39 = vld [vmem:[#allocation55_spill] sm:$0xff]  ;;  %v9655_v50 = vadd.f32 %v2492_v37, %v9314_v11 }
 0x32d   : > { %v9636_v22 = vpop.eup %7349  ;;  %v1937_v57 = vmul.f32 1.442695, %v1893_v33  ;;  %v1939_v14 = vmul.f32 1.442695, %v1894_v18  ;;  %v9662_v18 = vadd.f32 %v2443_v48, %v9311_v58 }
 0x32e   : > { %v2494_v44 = vpop.f32.mrf.mxu2  ;;  %v9638_v5 = vpop.eup %7351 }
 0x32f   : > { %v9644_v32 = vadd.f32 %v2494_v44, %v9314_v11  ;;  %7353 = vpow2.f32 %v1937_v57  ;;  %v1992_v43 = vadd.f32 %v9638_v5, %v9636_v22  ;;  %v2535_v37 = vmax.f32 %v9662_v18, %v9655_v50 }
 0x330   : > { %7355 = vpow2.f32 %v1939_v14  ;;  %6693 = vmatmul.msk.bf16.gmra.mxu1 %vm1662_vm0, %v12059_v39 }
 0x331   : > { %v2538_v40 = vmax.f32 %v9641_v24, %v9644_v32  ;;  %1993 = vadd.xlane.f32.xlu2 %v1992_v43 }
 0x332   : > { %6701 = vmatmul.msk.bf16.gmra.mxu2 %vm1662_vm0, %v12059_v39  ;;  %v1856_v52 = vpop.xlane.xlu0 %1855 }
 0x333   : > { %2539 = vmax.xlane.f32.xlu0 %v2538_v40  ;;  %v1895_v28 = vsub.f32 %v9431_v23, %v1856_v52  ;;  %v1896_v33 = vsub.f32 %v9434_v45, %v1856_v52  ;;  %v2448_v45 = vpop.f32.mrf.mxu1 }
 0x335   : > { %v9659_v14 = vpop.eup %7353  ;;  %v1941_v57 = vmul.f32 1.442695, %v1895_v28  ;;  %v1943_v44 = vmul.f32 1.442695, %v1896_v33 }
 0x336   : > { %v9664_v43 = vpop.eup %7355  ;;  %v2497_v23 = vpop.f32.mrf.mxu2 }
 0x337   : > { %7357 = vpow2.f32 %v1941_v57  ;;  %v1995_v39 = vadd.f32 %v9664_v43, %v9659_v14  ;;  %v9671_v48 = vadd.f32 %v2497_v23, %v9314_v11  ;;  %v9678_v57 = vadd.f32 %v2448_v45, %v9311_v58 }
 0x338   : > { %7359 = vpow2.f32 %v1943_v44 }
 0x339   : > { %1996 = vadd.xlane.f32.xlu1 %v1995_v39  ;;  %2536 = vmax.xlane.f32.xlu2 %v2535_v37  ;;  %12060 = vst [vmem:[#allocation56_spill] sm:$0xff] %v9671_v48  ;;  %v2541_v37 = vmax.f32 %v9678_v57, %v9671_v48  ;;  %v12068_v48 = vld [vmem:[#allocation54_spill] sm:$0xff] }
 0x33a   : > { %v1859_v40 = vpop.xlane.xlu0 %1858  ;;  %12061 = vst [vmem:[#allocation73_spill] sm:$0xff] %v9678_v57 }
 0x33b   : > { %v1897_v52 = vsub.f32 %v9447_v0, %v1859_v40  ;;  %v1898_v28 = vsub.f32 %v9450_v7, %v1859_v40  ;;  %v12062_v0 = vld [vmem:[#allocation60_spill] sm:$0xff] }
 0x33d   : > { %v9675_v33 = vpop.eup %7357  ;;  %v1945_v60 = vmul.f32 1.442695, %v1897_v52  ;;  %v1947_v30 = vmul.f32 1.442695, %v1898_v28 }
 0x33e   : > { %v9680_v44 = vpop.eup %7359 }
 0x33f   : > { %7361 = vpow2.f32 %v1945_v60  ;;  %v1998_v39 = vadd.f32 %v9680_v44, %v9675_v33 }
 0x340   : > { %7363 = vpow2.f32 %v1947_v30  ;;  %6694 = vmatmul.msk.bf16.gmra.mxu1 %vm1662_vm0, %v12062_v0 }
 0x341   : > { %1999 = vadd.xlane.f32.xlu0 %v1998_v39  ;;  %2542 = vmax.xlane.f32.xlu2 %v2541_v37 }
 0x342   : > { %6702 = vmatmul.msk.bf16.gmra.mxu2 %vm1662_vm0, %v12062_v0  ;;  %v1862_v7 = vpop.xlane.xlu1 %1861 }
 0x343   : > { %v1899_v23 = vsub.f32 %v9459_v6, %v1862_v7  ;;  %v1900_v60 = vsub.f32 %v9462_v46, %v1862_v7 }
 0x345   : > { %v9692_v45 = vpop.eup %7361  ;;  %v1949_v40 = vmul.f32 1.442695, %v1899_v23  ;;  %v1951_v52 = vmul.f32 1.442695, %v1900_v60  ;;  %v12063_v60 = vld [vmem:[#allocation64_spill] sm:$0xff] }
 0x346   : > { %v9694_v28 = vpop.eup %7363 }
 0x347   : > { %7365 = vpow2.f32 %v1949_v40  ;;  %v2001_v30 = vadd.f32 %v9694_v28, %v9692_v45 }
 0x348   : > { %7367 = vpow2.f32 %v1951_v52  ;;  %v2499_v52 = vpop.f32.mrf.mxu2 }
 0x349   : > { %2002 = vadd.xlane.f32.xlu0 %v2001_v30  ;;  %v12066_v30 = vld [vmem:[#allocation40_spill] sm:$0xff] }
 0x34a   : > { %v1865_v39 = vpop.xlane.xlu2 %1864 }
 0x34b   : > { %v1901_v37 = vsub.f32 %v9475_v47, %v1865_v39  ;;  %v1902_v0 = vsub.f32 %v9478_v62, %v1865_v39  ;;  %v2450_v39 = vpop.f32.mrf.mxu1 }
 0x34d   : > { %v9700_v6 = vpop.eup %7365  ;;  %v1953_v46 = vmul.f32 1.442695, %v1901_v37  ;;  %v1955_v7 = vmul.f32 1.442695, %v1902_v0  ;;  %v9719_v0 = vadd.f32 %v2499_v52, %v9314_v11 }
 0x34e   : > { %v9702_v27 = vpop.eup %7367 }
 0x34f   : > { %7369 = vpow2.f32 %v1953_v46  ;;  %v2004_v23 = vadd.f32 %v9702_v27, %v9700_v6  ;;  %v9722_v46 = vadd.f32 %v2450_v39, %v9311_v58 }
 0x350   : > { %7371 = vpow2.f32 %v1955_v7  ;;  %6695 = vmatmul.msk.bf16.gmra.mxu1 %vm1662_vm0, %v12063_v60 }
 0x351   : > { %2005 = vadd.xlane.f32.xlu1 %v2004_v23  ;;  %v2544_v7 = vmax.f32 %v9722_v46, %v9719_v0  ;;  %v12067_v23 = vld [vmem:[#allocation69_spill] sm:$0xff] }
 0x352   : > { %6703 = vmatmul.msk.bf16.gmra.mxu2 %vm1662_vm0, %v12063_v60  ;;  %v1868_v37 = vpop.xlane.xlu0 %1867 }
 0x353   : > { %v1903_v52 = vsub.f32 %v9485_v25, %v1868_v37 }
 0x355   : > { %v9710_v47 = vpop.eup %7369  ;;  %v1957_v39 = vmul.f32 1.442695, %v1903_v52 }
 0x356   : > { %12064 = vst [vmem:[#allocation68_spill] sm:$0xff] %v9710_v47  ;;  %v9712_v62 = vpop.eup %7371 }
 0x357   : > { %12065 = vst [vmem:[#allocation52_spill] sm:$0xff] %v9712_v62  ;;  %v2007_v40 = vadd.f32 %v9712_v62, %v9710_v47  ;;  %v12069_v47 = vld [vmem:[#allocation41_spill] sm:$0xff]  ;;  %7373 = vpow2.f32 %v1957_v39 }
 0x359   : > { %3717 = vrot.lane.b32.xlu2 %v12066_v30, %s8241_s13  ;;  %2008 = vadd.xlane.f32.xlu0 %v2007_v40  ;;  %v1904_v30 = vsub.f32 %v9488_v15, %v1868_v37 }
 0x35b   : > { %v1959_v62 = vmul.f32 1.442695, %v1904_v30  ;;  %v9751_v30 = vpop.f32.mrf.mxu2 }
 0x35d   : > { %7375 = vpow2.f32 %v1959_v62  ;;  %v9746_v37 = vpop.eup %7373  ;;  %v9756_v62 = vpop.f32.mrf.mxu1 }
 0x35e   : > { %12070 = vst [vmem:[#allocation50_spill] sm:$0xff] %v9746_v37 }
 0x360   : > { %6696 = vmatmul.msk.bf16.gmra.mxu1 %vm1662_vm0, %v12067_v23 }
 0x361   : > { %2545 = vmax.xlane.f32.xlu0 %v2544_v7  ;;  %v1871_v7 = vpop.xlane.xlu2 %1870 }
 0x362   : > { %6704 = vmatmul.msk.bf16.gmra.mxu2 %vm1662_vm0, %v12067_v23  ;;  %v1874_v60 = vpop.xlane.xlu0 %1873  ;;  %v1905_v23 = vsub.f32 %v9497_v49, %v1871_v7 }
 0x363   : > { %v9748_v52 = vpop.eup %7375 }
 0x364   : > { %v1961_v25 = vmul.f32 1.442695, %v1905_v23  ;;  %12071 = vst [vmem:[#allocation62_spill] sm:$0xff] %v9748_v52 }
 0x366   : > { %7377 = vpow2.f32 %v1961_v25 }
 0x36a   : > { %2791 = vrot.lane.b32.xlu1 %v9319_v8, %s8240_s1  ;;  %v1877_v40 = vpop.xlane.xlu0 %1876  ;;  %v1906_v8 = vsub.f32 %v9500_v51, %v1871_v7  ;;  %v2010_v51 = vadd.f32 %v9748_v52, %v9746_v37  ;;  %v9770_v52 = vpop.f32.mrf.mxu1 }
 0x36b   : > { %v1910_v49 = vsub.f32 %v9520_v19, %v1877_v40 }
 0x36c   : > { %v9758_v23 = vpop.eup %7377 }
 0x36d   : > { %v1971_v7 = vmul.f32 1.442695, %v1910_v49  ;;  %12072 = vst [vmem:[#allocation66_spill] sm:$0xff] %v9758_v23 }
 0x372   : > { %3733 = vrot.lane.b32.xlu1 %v12068_v48, %s8241_s13  ;;  %v9736_v57 = vpop.xlane.xlu0 %1879  ;;  %v1963_v48 = vmul.f32 1.442695, %v1906_v8 }
 0x374   : > { %7379 = vpow2.f32 %v1963_v48  ;;  %v9766_v48 = vpop.f32.mrf.mxu2 }
 0x375   : > { %3701 = vrot.lane.b32.xlu0 %v12069_v47, %s8241_s13  ;;  %v1909_v47 = vsub.f32 %v9517_v36, %v1877_v40 }
 0x377   : > { %v1969_v39 = vmul.f32 1.442695, %v1909_v47 }
 0x379   : > { %7381 = vpow2.f32 %v1969_v39 }
 0x37a   : > { %2789 = vrot.lane.b32.xlu1 %v9335_v53, %s8240_s1  ;;  %v9744_v15 = vpop.xlane.xlu0 %2518  ;;  %v9760_v25 = vpop.eup %7379  ;;  %7383 = vpow2.f32 %v1971_v7 }
 0x37b   : > { %12073 = vst [vmem:[#allocation55_spill] sm:$0xff] %v9760_v25  ;;  %v2013_v40 = vadd.f32 %v9760_v25, %v9758_v23 }
 0x37c   : > { %v1979_v53 = vpop.xlane.xlu2 %1978 }
 0x37d   : > { %7385 = vrcp.f32 %v1979_v53 }
 0x37f   : > { %v9772_v39 = vpop.eup %7381 }
 0x380   : > { %v9774_v7 = vpop.eup %7383 }
 0x381   : > { %12074 = vst [vmem:[#allocation60_spill] sm:$0xff] %v9774_v7 }
 0x382   : > { %2011 = vadd.xlane.f32.xlu2 %v2010_v51  ;;  %v2522_v8 = vpop.xlane.xlu0 %2521 }
 0x383   : > { %v2567_v36 = vsub.f32 %v9558_v16, %v2522_v8  ;;  %v2568_v19 = vsub.f32 %v9553_v9, %v2522_v8  ;;  %v1907_v9 = vsub.f32 %v9505_v34, %v1874_v60  ;;  %v1908_v8 = vsub.f32 %v9508_v31, %v1874_v60  ;;  %v7386_v53 = vpop.eup %7385  ;;  %v2507_v34 = vpop.f32.mrf.mxu2 }
 0x385   : > { %v2601_v47 = vmul.f32 1.442695, %v2567_v36  ;;  %v2603_v37 = vmul.f32 1.442695, %v2568_v19  ;;  %v2019_v36 = vadd.f32 %v9774_v7, %v9772_v39  ;;  %v1965_v25 = vmul.f32 1.442695, %v1907_v9  ;;  %v2458_v9 = vpop.f32.mrf.mxu1 }
 0x386   : > { %v1967_v23 = vmul.f32 1.442695, %v1908_v8  ;;  %v2041_v19 = vmul.f32 %v7386_v53, %v9544_v1 }
 0x389   : > { %v1982_v51 = vpop.xlane.xlu1 %1981 }
 0x38a   : > { %2014 = vadd.xlane.f32.xlu2 %v2013_v40  ;;  %v9768_v49 = vpop.xlane.xlu0 %2524  ;;  %7387 = vrcp.f32 %v1982_v51  ;;  %v2042_v51 = vmul.f32 %v7386_v53, %v9548_v20 }
 0x38b   : > { %7389 = vpow2.f32 %v2601_v47 }
 0x38c   : > { %v1985_v16 = vpop.xlane.xlu2 %1984  ;;  %7391 = vpow2.f32 %v2603_v37 }
 0x38d   : > { %7393 = vpow2.f32 %v1965_v25  ;;  %v9796_v25 = vadd.f32 %v9751_v30, %v9314_v11 }
 0x38e   : > { %7395 = vpow2.f32 %v1967_v23 }
 0x390   : > { %v7388_v40 = vpop.eup %7387 }
 0x391   : > { %v2043_v2 = vmul.f32 %v7388_v40, %v9571_v35  ;;  %v2044_v26 = vmul.f32 %v7388_v40, %v9578_v42  ;;  %v9784_v31 = vpop.eup %7389  ;;  %v1911_v42 = vsub.f32 %v9525_v38, %v9736_v57  ;;  %v9804_v38 = vadd.f32 %v9756_v62, %v9311_v58 }
 0x392   : > { %2020 = vadd.xlane.f32.xlu2 %v2019_v36  ;;  %v9786_v7 = vpop.eup %7391  ;;  %v2509_v36 = vpop.f32.mrf.mxu2 }
 0x393   : > { %v2073_v60 = vpack.c.bf16 %v2043_v2, %v2041_v19  ;;  %v2074_v37 = vpack.c.bf16 %v2044_v26, %v2042_v51  ;;  %v2664_v26 = vadd.f32 %v9786_v7, %v9784_v31  ;;  %v1973_v23 = vmul.f32 1.442695, %v1911_v42  ;;  %v2460_v19 = vpop.f32.mrf.mxu1 }
 0x394   : > { %v1988_v47 = vpop.xlane.xlu0 %1987  ;;  %v2528_v12 = vpop.xlane.xlu2 %2527  ;;  %v2547_v30 = vmax.f32 %v9804_v38, %v9796_v25  ;;  %v2566_v51 = vsub.f32 %v9537_v54, %v9744_v15  ;;  %v9832_v54 = vadd.f32 %v2458_v9, %v9311_v58 }
 0x395   : > { %v2571_v1 = vsub.f32 %v9604_v61, %v2528_v12  ;;  %v2572_v20 = vsub.f32 %v9597_v41, %v2528_v12  ;;  %2193 = vmatmul.bf16.vlgmr.msra.gmra.mxu3 %v2073_v60  ;;  %2242 = vmatmul.bf16.vlgmr.msra.gmra.mxu0 %v2074_v37  ;;  %7397 = vrcp.f32 %v1988_v47  ;;  %v1912_v61 = vsub.f32 %v9528_v21, %v9736_v57  ;;  %v9800_v12 = vpop.eup %7393  ;;  %v9812_v57 = vpop.xlane.xlu1 %2530 }
 0x396   : > { %7399 = vrcp.f32 %v1985_v16  ;;  %v9806_v41 = vpop.eup %7395  ;;  %v2565_v21 = vsub.f32 %v9542_v29, %v9744_v15  ;;  %v9823_v47 = vadd.f32 %v2507_v34, %v9314_v11 }
 0x397   : > { %v2609_v35 = vmul.f32 1.442695, %v2571_v1  ;;  %v2611_v2 = vmul.f32 1.442695, %v2572_v20  ;;  %v1975_v8 = vmul.f32 1.442695, %v1912_v61  ;;  %v2016_v20 = vadd.f32 %v9806_v41, %v9800_v12 }
 0x398   : > { %v2597_v1 = vmul.f32 1.442695, %v2565_v21 }
 0x399   : > { %7401 = vpow2.f32 %v2609_v35 }
 0x39a   : > { %7403 = vpow2.f32 %v2611_v2  ;;  %2665 = vadd.xlane.f32.xlu2 %v2664_v26  ;;  %v9838_v26 = vadd.f32 %v9766_v48, %v9314_v11  ;;  %v9852_v48 = vpop.f32.mrf.mxu2 }
 0x39b   : > { %v7398_v16 = vpop.eup %7397  ;;  %7405 = vpow2.f32 %v1973_v23  ;;  %v9848_v23 = vadd.f32 %v9770_v52, %v9311_v58 }
 0x39c   : > { %v7400_v53 = vpop.eup %7399  ;;  %v2047_v60 = vmul.f32 %v7398_v16, %v9601_v56  ;;  %v2048_v37 = vmul.f32 %v7398_v16, %v9608_v63  ;;  %7407 = vpow2.f32 %v1975_v8  ;;  %v9834_v56 = vpop.xlane.xlu0 %2533  ;;  %v2599_v63 = vmul.f32 1.442695, %v2566_v51 }
 0x39d   : > { %v2045_v35 = vmul.f32 %v7400_v53, %v9580_v17  ;;  %v2046_v42 = vmul.f32 %v7400_v53, %v9586_v13  ;;  %v2553_v17 = vmax.f32 %v9832_v54, %v9823_v47  ;;  %7409 = vpow2.f32 %v2597_v1  ;;  %v1991_v13 = vpop.xlane.xlu1 %1990 }
 0x39e   : > { %v2569_v16 = vsub.f32 %v9574_v4, %v9768_v49  ;;  %v2570_v8 = vsub.f32 %v9567_v3, %v9768_v49  ;;  %v2550_v53 = vmax.f32 %v9848_v23, %v9838_v26  ;;  %v9865_v3 = vadd.f32 %v2509_v36, %v9314_v11 }
 0x39f   : > { %v9814_v40 = vpop.eup %7401  ;;  %2548 = vmax.xlane.f32.xlu0 %v2547_v30  ;;  %v2075_v34 = vpack.c.bf16 %v2047_v60, %v2045_v35  ;;  %v2076_v2 = vpack.c.bf16 %v2048_v37, %v2046_v42  ;;  %v9856_v30 = vpop.f32.mrf.mxu1 }
 0x3a0   : > { %v9816_v62 = vpop.eup %7403  ;;  %v2605_v21 = vmul.f32 1.442695, %v2569_v16  ;;  %v2607_v60 = vmul.f32 1.442695, %v2570_v8 }
 0x3a1   : > { %v2670_v29 = vadd.f32 %v9816_v62, %v9814_v40  ;;  %v9842_v61 = vpop.eup %7405 }
 0x3a2   : > { %v9844_v9 = vpop.eup %7407 }
 0x3a3   : > { %2671 = vadd.xlane.f32.xlu2 %v2670_v29  ;;  %v2022_v52 = vadd.f32 %v9844_v9, %v9842_v61  ;;  %v9862_v4 = vpop.eup %7409 }
 0x3a4   : > { %2017 = vadd.xlane.f32.xlu1 %v2016_v20  ;;  %v1994_v15 = vpop.xlane.xlu2 %1993 }
 0x3a5   : > { %2198 = vmatmul.bf16.gmra.mxu3 %v2075_v34  ;;  %2247 = vmatmul.bf16.gmra.mxu0 %v2076_v2  ;;  %7411 = vrcp.f32 %v1994_v15 }
 0x3a6   : > { %7413 = vpow2.f32 %v2599_v63  ;;  %v2540_v51 = vpop.xlane.xlu0 %2539  ;;  %v9873_v63 = vadd.f32 %v2460_v19, %v9311_v58 }
 0x3a7   : > { %2554 = vmax.xlane.f32.xlu0 %v2553_v17  ;;  %7415 = vrcp.f32 %v1991_v13  ;;  %v2579_v35 = vsub.f32 %v9641_v24, %v2540_v51  ;;  %v2580_v2 = vsub.f32 %v9644_v32, %v2540_v51  ;;  %v2514_v17 = vpop.f32.mrf.mxu2  ;;  %v2465_v8 = vpop.f32.mrf.mxu1 }
 0x3a8   : > { %7417 = vpow2.f32 %v2605_v21  ;;  %v9889_v51 = vadd.f32 %v2514_v17, %v9314_v11 }
 0x3a9   : > { %7419 = vpow2.f32 %v2607_v60  ;;  %v2625_v19 = vmul.f32 1.442695, %v2579_v35  ;;  %v2627_v32 = vmul.f32 1.442695, %v2580_v2  ;;  %v9910_v2 = vadd.f32 %v9852_v48, %v9314_v11 }
 0x3ab   : > { %2551 = vmax.xlane.f32.xlu2 %v2550_v53  ;;  %v7412_v29 = vpop.eup %7411 }
 0x3ac   : > { %2023 = vadd.xlane.f32.xlu1 %v2022_v52  ;;  %v2537_v37 = vpop.xlane.xlu2 %2536  ;;  %v9869_v20 = vpop.eup %7413  ;;  %v2051_v36 = vmul.f32 %v7412_v29, %v9636_v22 }
 0x3ad   : > { %v2577_v49 = vsub.f32 %v9662_v18, %v2537_v37  ;;  %v2578_v1 = vsub.f32 %v9655_v50, %v2537_v37  ;;  %v7416_v42 = vpop.eup %7415  ;;  %v2052_v18 = vmul.f32 %v7412_v29, %v9638_v5  ;;  %v2556_v50 = vmax.f32 %v9873_v63, %v9865_v3 }
 0x3ae   : > { %v2661_v24 = vadd.f32 %v9869_v20, %v9862_v4  ;;  %v2049_v13 = vmul.f32 %v7416_v42, %v9623_v55  ;;  %v2050_v16 = vmul.f32 %v7416_v42, %v9628_v59  ;;  %v9886_v21 = vpop.eup %7417  ;;  %v1997_v55 = vpop.xlane.xlu1 %1996  ;;  %v9896_v37 = vadd.f32 %v2465_v8, %v9311_v58 }
 0x3af   : > { %v2621_v15 = vmul.f32 1.442695, %v2577_v49  ;;  %v2623_v34 = vmul.f32 1.442695, %v2578_v1  ;;  %v9891_v60 = vpop.eup %7419 }
 0x3b0   : > { %v2077_v53 = vpack.c.bf16 %v2051_v36, %v2049_v13  ;;  %v2078_v52 = vpack.c.bf16 %v2052_v18, %v2050_v16  ;;  %v2562_v49 = vmax.f32 %v9896_v37, %v9889_v51  ;;  %v2667_v35 = vadd.f32 %v9891_v60, %v9886_v21  ;;  %v3178_v16 = vpop.f32.mrf.mxu2 }
 0x3b1   : > { %7421 = vpow2.f32 %v2621_v15 }
 0x3b2   : > { %7423 = vpow2.f32 %v2623_v34 }
 0x3b3   : > { %2557 = vmax.xlane.f32.xlu2 %v2556_v50  ;;  %7425 = vpow2.f32 %v2625_v19 }
 0x3b4   : > { %2662 = vadd.xlane.f32.xlu1 %v2661_v24  ;;  %v2000_v22 = vpop.xlane.xlu0 %1999  ;;  %v9884_v5 = vpop.xlane.xlu2 %2542  ;;  %v9917_v24 = vadd.f32 %v9856_v30, %v9311_v58 }
 0x3b5   : > { %2203 = vmatmul.bf16.gmra.mxu3 %v2077_v53  ;;  %2252 = vmatmul.bf16.gmra.mxu0 %v2078_v52  ;;  %7427 = vrcp.f32 %v2000_v22  ;;  %v3129_v22 = vpop.f32.mrf.mxu1 }
 0x3b6   : > { %7429 = vpow2.f32 %v2627_v32  ;;  %v2559_v48 = vmax.f32 %v9917_v24, %v9910_v2 }
 0x3b7   : > { %v9893_v59 = vpop.eup %7421  ;;  %7431 = vrcp.f32 %v1997_v55  ;;  %v9931_v55 = vadd.f32 %v3129_v22, %v9311_v58 }
 0x3b8   : > { %v9898_v29 = vpop.eup %7423 }
 0x3b9   : > { %v2679_v1 = vadd.f32 %v9898_v29, %v9893_v59  ;;  %v9906_v42 = vpop.eup %7425 }
 0x3bb   : > { %2563 = vmax.xlane.f32.xlu2 %v2562_v49  ;;  %2680 = vadd.xlane.f32.xlu0 %v2679_v1  ;;  %v7428_v34 = vpop.eup %7427 }
 0x3bc   : > { %2668 = vadd.xlane.f32.xlu1 %v2667_v35  ;;  %v3718_v15 = vpop.permute.xlu2 %3717  ;;  %v9913_v18 = vpop.eup %7429  ;;  %v2055_v17 = vmul.f32 %v7428_v34, %v9675_v33  ;;  %v2056_v19 = vmul.f32 %v7428_v34, %v9680_v44  ;;  %v9928_v44 = vadd.f32 %v3178_v16, %v9314_v11  ;;  %v12075_v16 = vld [vmem:[#allocation42_spill] sm:$0xff] }
 0x3bd   : > { %v3774_v36 = vsel %vm1662_vm0, %v3718_v15, 0  ;;  %v7432_v50 = vpop.eup %7431  ;;  %v2682_v13 = vadd.f32 %v9913_v18, %v9906_v42  ;;  %v2003_v30 = vpop.xlane.xlu0 %2002 }
 0x3be   : > { %3828 = vmatpush.bf16.xpose.msrb.mxu1 %v3774_v36  ;;  %v2053_v8 = vmul.f32 %v7432_v50, %v9659_v14  ;;  %v2054_v32 = vmul.f32 %v7432_v50, %v9664_v43  ;;  %v3218_v14 = vmax.f32 %v9931_v55, %v9928_v44  ;;  %v3131_v22 = vpop.f32.mrf.mxu1 }
 0x3c0   : > { %v2079_v52 = vpack.c.bf16 %v2055_v17, %v2053_v8  ;;  %v2080_v33 = vpack.c.bf16 %v2056_v19, %v2054_v32 }
 0x3c3   : > { %2683 = vadd.xlane.f32.xlu2 %v2682_v13  ;;  %2560 = vmax.xlane.f32.xlu0 %v2559_v48 }
 0x3c4   : > { %v2006_v53 = vpop.xlane.xlu1 %2005 }
 0x3c5   : > { %2208 = vmatmul.bf16.gmra.mxu3 %v2079_v52  ;;  %2257 = vmatmul.bf16.gmra.mxu0 %v2080_v33  ;;  %7433 = vrcp.f32 %v2006_v53  ;;  %v9956_v33 = vadd.f32 %v3131_v22, %v9311_v58  ;;  %v12081_v22 = vld [vmem:[#allocation68_spill] sm:$0xff] }
 0x3c6   : > { %7435 = vrcp.f32 %v2003_v30 }
 0x3cb   : > { %3219 = vmax.xlane.f32.xlu0 %v3218_v14  ;;  %v7434_v49 = vpop.eup %7433 }
 0x3cc   : > { %v2009_v43 = vpop.xlane.xlu0 %2008  ;;  %v7436_v1 = vpop.eup %7435  ;;  %v2059_v35 = vmul.f32 %v7434_v49, %v9700_v6  ;;  %v2060_v15 = vmul.f32 %v7434_v49, %v9702_v27  ;;  %v12076_v27 = vld [vmem:[#allocation47_spill] sm:$0xff] }
 0x3cd   : > { %v2057_v34 = vmul.f32 %v7436_v1, %v9692_v45  ;;  %v2058_v36 = vmul.f32 %v7436_v1, %v9694_v28  ;;  %v2573_v1 = vsub.f32 %v9594_v10, %v9812_v57 }
 0x3cf   : > { %v2081_v17 = vpack.c.bf16 %v2059_v35, %v2057_v34  ;;  %v2082_v19 = vpack.c.bf16 %v2060_v15, %v2058_v36  ;;  %v12078_v35 = vld [vmem:[#allocation58_spill] sm:$0xff]  ;;  %v2613_v36 = vmul.f32 1.442695, %v2573_v1 }
 0x3d0   : > { %v2574_v15 = vsub.f32 %v12078_v35, %v9812_v57 }
 0x3d4   : > { %v2546_v50 = vpop.xlane.xlu0 %2545 }
 0x3d5   : > { %v2583_v13 = vsub.f32 %v9722_v46, %v2546_v50  ;;  %v2584_v48 = vsub.f32 %v9719_v0, %v2546_v50  ;;  %3703 = vrot.lane.b32.xlu1 %v12075_v16, %s8241_s13  ;;  %2213 = vmatmul.bf16.gmra.mxu3 %v2081_v17  ;;  %v3180_v46 = vpop.f32.mrf.mxu2  ;;  %v2615_v50 = vmul.f32 1.442695, %v2574_v15  ;;  %v12079_v17 = vld [vmem:[#allocation67_spill] sm:$0xff] }
 0x3d6   : > { %2262 = vmatmul.bf16.gmra.mxu0 %v2082_v19  ;;  %v9952_v53 = vadd.f32 %v3180_v46, %v9314_v11  ;;  %v2575_v19 = vsub.f32 %v12079_v17, %v9834_v56 }
 0x3d7   : > { %v2633_v8 = vmul.f32 1.442695, %v2583_v13  ;;  %v2635_v6 = vmul.f32 1.442695, %v2584_v48  ;;  %v12080_v13 = vld [vmem:[#allocation75_spill] sm:$0xff] }
 0x3d8   : > { %v3221_v49 = vmax.f32 %v9956_v33, %v9952_v53  ;;  %v2576_v48 = vsub.f32 %v12080_v13, %v9834_v56  ;;  %v2617_v16 = vmul.f32 1.442695, %v2575_v19  ;;  %v12082_v56 = vld [vmem:[#allocation50_spill] sm:$0xff] }
 0x3d9   : > { %7437 = vpow2.f32 %v2633_v8 }
 0x3da   : > { %7439 = vpow2.f32 %v2635_v6  ;;  %v2619_v8 = vmul.f32 1.442695, %v2576_v48 }
 0x3db   : > { %3707 = vrot.lane.b32.xlu2 %v12076_v27, %s8241_s13  ;;  %7441 = vpow2.f32 %v2613_v36 }
 0x3dc   : > { %v2792_v45 = vpop.permute.xlu1 %2791  ;;  %7443 = vpow2.f32 %v2615_v50 }
 0x3dd   : > { %2876 = vmatpush.bf16.msrb.mxu0 %v2792_v45  ;;  %7445 = vrcp.f32 %v2009_v43 }
 0x3df   : > { %v9945_v28 = vpop.eup %7437 }
 0x3e0   : > { %v9947_v32 = vpop.eup %7439 }
 0x3e1   : > { %12077 = vst [vmem:[#allocation64_spill] sm:$0xff] %v9947_v32  ;;  %v2688_v0 = vadd.f32 %v9947_v32, %v9945_v28  ;;  %v9970_v57 = vpop.eup %7441 }
 0x3e2   : > { %v9972_v6 = vpop.eup %7443 }
 0x3e3   : > { %2689 = vadd.xlane.f32.xlu0 %v2688_v0  ;;  %v7446_v27 = vpop.eup %7445  ;;  %v2673_v0 = vadd.f32 %v9972_v6, %v9970_v57 }
 0x3e4   : > { %v3734_v30 = vpop.permute.xlu1 %3733 }
 0x3e5   : > { %v3798_v52 = vsel %vm1662_vm0, %v3734_v30, 0  ;;  %v2061_v30 = vmul.f32 %v7446_v27, %v12081_v22 }
 0x3e6   : > { %3877 = vmatpush.bf16.xpose.msra.mxu2 %v3798_v52  ;;  %v12083_v52 = vld [vmem:[#allocation52_spill] sm:$0xff] }
 0x3e7   : > { %v3702_v14 = vpop.permute.xlu0 %3701 }
 0x3e8   : > { %6705 = vmatmul.msk.bf16.vlgmr.msrb.gmra.mxu1 %vm1662_vm0, %v3702_v14 }
 0x3eb   : > { %3222 = vmax.xlane.f32.xlu0 %v3221_v49  ;;  %v12084_v49 = vld [vmem:[#allocation62_spill] sm:$0xff] }
 0x3ec   : > { %v2790_v34 = vpop.permute.xlu1 %2789 }
 0x3ed   : > { %2877 = vmatpush.bf16.msrb.mxu0 %v2790_v34  ;;  %6713 = vmatmul.msk.bf16.vlgmr.msra.gmra.mxu2 %vm1662_vm0, %v3702_v14  ;;  %v2062_v14 = vmul.f32 %v7446_v27, %v12083_v52 }
 0x3f5   : > { %v2012_v10 = vpop.xlane.xlu2 %2011 }
 0x3f6   : > { %7447 = vrcp.f32 %v2012_v10 }
 0x3f7   : > { %7449 = vpow2.f32 %v2617_v16 }
 0x3f8   : > { %7451 = vpow2.f32 %v2619_v8 }
 0x3fc   : > { %v7448_v45 = vpop.eup %7447 }
 0x3fd   : > { %v2015_v46 = vpop.xlane.xlu2 %2014  ;;  %v2063_v43 = vmul.f32 %v7448_v45, %v12082_v56  ;;  %v2064_v1 = vmul.f32 %v7448_v45, %v12084_v49  ;;  %v9980_v34 = vpop.eup %7449 }
 0x3fe   : > { %v9982_v36 = vpop.eup %7451  ;;  %v9990_v45 = vpop.f32.mrf.mxu2  ;;  %7453 = vrcp.f32 %v2015_v46 }
 0x3ff   : > { %2674 = vadd.xlane.f32.xlu1 %v2673_v0  ;;  %v2083_v35 = vpack.c.bf16 %v2063_v43, %v2061_v30  ;;  %v2084_v15 = vpack.c.bf16 %v2064_v1, %v2062_v14  ;;  %v2676_v17 = vadd.f32 %v9982_v36, %v9980_v34  ;;  %v9994_v30 = vpop.f32.mrf.mxu1 }
 0x401   : > { %2218 = vmatmul.bf16.gmra.mxu3 %v2083_v35  ;;  %2267 = vmatmul.bf16.gmra.mxu0 %v2084_v15 }
 0x405   : > { %v2021_v50 = vpop.xlane.xlu2 %2020 }
 0x407   : > { %2677 = vadd.xlane.f32.xlu1 %v2676_v17  ;;  %v10005_v17 = vpop.f32.mrf.mxu2 }
 0x40d   : > { %v9986_v19 = vpop.xlane.xlu2 %2665 }
 0x412   : > { %v2549_v13 = vpop.xlane.xlu0 %2548  ;;  %v2243_v16 = vpop.f32.mrf.mxu0 }
 0x413   : > { %v2585_v48 = vsub.f32 %v9804_v38, %v2549_v13  ;;  %v2586_v10 = vsub.f32 %v9796_v25, %v2549_v13  ;;  %v7454_v38 = vpop.eup %7453  ;;  %v12087_v13 = vld [vmem:[#allocation45_spill] sm:$0xff] }
 0x415   : > { %v2637_v8 = vmul.f32 1.442695, %v2585_v48  ;;  %v2639_v27 = vmul.f32 1.442695, %v2586_v10 }
 0x416   : > { %v9992_v0 = vpop.xlane.xlu2 %2671 }
 0x417   : > { %7455 = vpow2.f32 %v2637_v8  ;;  %v2018_v22 = vpop.xlane.xlu1 %2017  ;;  %v12088_v8 = vld [vmem:[#allocation66_spill] sm:$0xff] }
 0x418   : > { %7457 = vpow2.f32 %v2639_v27  ;;  %v2194_v56 = vpop.f32.mrf.mxu3  ;;  %v2065_v27 = vmul.f32 %v7454_v38, %v12088_v8 }
 0x419   : > { %7459 = vrcp.f32 %v2018_v22  ;;  %v2244_v43 = vadd.f32 %v2243_v16, %v2194_v56  ;;  %v12089_v56 = vld [vmem:[#allocation55_spill] sm:$0xff] }
 0x41a   : > { %v2245_v52 = vpop.f32.mrf.mxu0 }
 0x41b   : > { %2283 = vst.msk [vmem:[#allocation2] sm:$0xff] %vm1662_vm0, %v2244_v43  ;;  %v2066_v43 = vmul.f32 %v7454_v38, %v12089_v56  ;;  %v3188_v38 = vpop.f32.mrf.mxu2 }
 0x41d   : > { %v9997_v25 = vpop.eup %7455 }
 0x41e   : > { %12085 = vst [vmem:[#allocation40_spill] sm:$0xff] %v9997_v25  ;;  %v9999_v14 = vpop.eup %7457  ;;  %v2552_v49 = vpop.xlane.xlu2 %2551 }
 0x41f   : > { %12086 = vst [vmem:[#allocation69_spill] sm:$0xff] %v9999_v14  ;;  %v2587_v46 = vsub.f32 %v9848_v23, %v2552_v49  ;;  %v2588_v1 = vsub.f32 %v9838_v26, %v2552_v49  ;;  %v2691_v35 = vadd.f32 %v9999_v14, %v9997_v25  ;;  %v7460_v15 = vpop.eup %7459  ;;  %v10011_v23 = vpop.f32.mrf.mxu1 }
 0x420   : > { %3705 = vrot.lane.b32.xlu1 %v12087_v13, %s8241_s13  ;;  %v2196_v16 = vpop.f32.mrf.mxu3  ;;  %v2067_v22 = vmul.f32 %v7460_v15, %v9800_v12  ;;  %v2068_v49 = vmul.f32 %v7460_v15, %v9806_v41  ;;  %v2024_v14 = vpop.xlane.xlu1 %2023 }
 0x421   : > { %v2641_v48 = vmul.f32 1.442695, %v2587_v46  ;;  %v2643_v10 = vmul.f32 1.442695, %v2588_v1  ;;  %2692 = vadd.xlane.f32.xlu0 %v2691_v35  ;;  %v2246_v26 = vadd.f32 %v2245_v52, %v2196_v16 }
 0x422   : > { %v2085_v25 = vpack.c.bf16 %v2067_v22, %v2065_v27  ;;  %v2248_v32 = vpop.f32.mrf.mxu0  ;;  %v2086_v46 = vpack.c.bf16 %v2068_v49, %v2066_v43  ;;  %v12090_v22 = vld [vmem:[#allocation60_spill] sm:$0xff] }
 0x423   : > { %7461 = vpow2.f32 %v2641_v48  ;;  %2284 = vst.msk [vmem:[#allocation2 + $0x8] sm:$0xff] %vm1662_vm0, %v2246_v26 }
 0x424   : > { %7463 = vpow2.f32 %v2643_v10  ;;  %2223 = vmatmul.bf16.gmra.mxu3 %v2085_v25  ;;  %2272 = vmatmul.bf16.gmra.mxu0 %v2086_v46 }
 0x425   : > { %7465 = vrcp.f32 %v2024_v14  ;;  %v10024_v14 = vadd.f32 %v3188_v38, %v9314_v11  ;;  %v12091_v38 = vld [vmem:[#allocation73_spill] sm:$0xff] }
 0x426   : > { %7467 = vrcp.f32 %v2021_v50 }
 0x427   : > { %v3139_v48 = vpop.f32.mrf.mxu1 }
 0x428   : > { %v2199_v1 = vpop.f32.mrf.mxu3  ;;  %v10029_v16 = vadd.f32 %v3139_v48, %v9311_v58  ;;  %v2663_v56 = vpop.xlane.xlu1 %2662 }
 0x429   : > { %v10016_v12 = vpop.eup %7461  ;;  %v2249_v35 = vadd.f32 %v2248_v32, %v2199_v1  ;;  %v3190_v1 = vpop.f32.mrf.mxu2  ;;  %7469 = vrcp.f32 %v2663_v56 }
 0x42a   : > { %v10018_v52 = vpop.eup %7463  ;;  %v2250_v41 = vpop.f32.mrf.mxu0  ;;  %v3230_v46 = vmax.f32 %v10029_v16, %v10024_v14  ;;  %7471 = vrcp.f32 %v9986_v19 }
 0x42b   : > { %v2694_v15 = vadd.f32 %v10018_v52, %v10016_v12  ;;  %v7466_v13 = vpop.eup %7465  ;;  %2285 = vst.msk [vmem:[#allocation2 + $0x10] sm:$0xff] %vm1662_vm0, %v2249_v35  ;;  %v2581_v35 = vsub.f32 %v12091_v38, %v9884_v5 }
 0x42c   : > { %v7468_v25 = vpop.eup %7467  ;;  %v2071_v50 = vmul.f32 %v7466_v13, %v9842_v61  ;;  %v2072_v10 = vmul.f32 %v7466_v13, %v9844_v9 }
 0x42d   : > { %2695 = vadd.xlane.f32.xlu2 %v2694_v15  ;;  %v2069_v8 = vmul.f32 %v7468_v25, %v9772_v39  ;;  %v2070_v26 = vmul.f32 %v7468_v25, %v12090_v22  ;;  %v12092_v39 = vld [vmem:[#allocation43_spill] sm:$0xff]  ;;  %v12093_v15 = vld [vmem:[#allocation56_spill] sm:$0xff] }
 0x42e   : > { %v2582_v13 = vsub.f32 %v12093_v15, %v9884_v5 }
 0x42f   : > { %v2087_v43 = vpack.c.bf16 %v2071_v50, %v2069_v8  ;;  %v2088_v61 = vpack.c.bf16 %v2072_v10, %v2070_v26  ;;  %v3141_v9 = vpop.f32.mrf.mxu1  ;;  %v2629_v50 = vmul.f32 1.442695, %v2581_v35  ;;  %v7470_v22 = vpop.eup %7469 }
 0x430   : > { %v2201_v32 = vpop.f32.mrf.mxu3  ;;  %v10047_v48 = vadd.f32 %v3141_v9, %v9311_v58  ;;  %v7472_v26 = vpop.eup %7471  ;;  %v2725_v5 = vmul.f32 %v7470_v22, %v9862_v4  ;;  %v2726_v56 = vmul.f32 %v7470_v22, %v9869_v20 }
 0x431   : > { %v2251_v27 = vadd.f32 %v2250_v41, %v2201_v32  ;;  %v10041_v41 = vadd.f32 %v3190_v1, %v9314_v11  ;;  %v2631_v32 = vmul.f32 1.442695, %v2582_v13  ;;  %7473 = vpow2.f32 %v2629_v50  ;;  %v2669_v19 = vpop.xlane.xlu1 %2668  ;;  %v2558_v4 = vpop.xlane.xlu2 %2557 }
 0x432   : > { %v2253_v49 = vpop.f32.mrf.mxu0  ;;  %v10068_v50 = vadd.f32 %v9990_v45, %v9314_v11  ;;  %v2591_v22 = vsub.f32 %v9873_v63, %v2558_v4 }
 0x433   : > { %2286 = vst.msk [vmem:[#allocation2 + $0x18] sm:$0xff] %vm1662_vm0, %v2251_v27  ;;  %v3233_v27 = vmax.f32 %v10047_v48, %v10041_v41  ;;  %7475 = vpow2.f32 %v2631_v32 }
 0x434   : > { %2228 = vmatmul.bf16.gmra.mxu3 %v2087_v43  ;;  %2277 = vmatmul.bf16.gmra.mxu0 %v2088_v61  ;;  %v2727_v43 = vmul.f32 %v7472_v26, %v9784_v31  ;;  %7477 = vrcp.f32 %v2669_v19  ;;  %v2555_v31 = vpop.xlane.xlu0 %2554 }
 0x435   : > { %3231 = vmax.xlane.f32.xlu2 %v3230_v46  ;;  %3709 = vrot.lane.b32.xlu0 %v12092_v39, %s8241_s13  ;;  %v2728_v46 = vmul.f32 %v7472_v26, %v9786_v7  ;;  %7479 = vrcp.f32 %v9992_v0  ;;  %v2590_v0 = vsub.f32 %v9823_v47, %v2555_v31  ;;  %v2592_v26 = vsub.f32 %v9865_v3, %v2558_v4 }
 0x436   : > { %v2757_v61 = vpack.c.bf16 %v2727_v43, %v2725_v5 }
 0x437   : > { %v10056_v38 = vpop.eup %7473  ;;  %v2758_v35 = vpack.c.bf16 %v2728_v46, %v2726_v56  ;;  %v2647_v56 = vmul.f32 1.442695, %v2590_v0  ;;  %v2649_v46 = vmul.f32 1.442695, %v2591_v22 }
 0x438   : > { %v2204_v25 = vpop.f32.mrf.mxu3 }
 0x439   : > { %v2254_v10 = vadd.f32 %v2253_v49, %v2204_v25  ;;  %v10059_v39 = vpop.eup %7475  ;;  %v2564_v47 = vpop.xlane.xlu2 %2563 }
 0x43a   : > { %v2255_v8 = vpop.f32.mrf.mxu0  ;;  %v2685_v7 = vadd.f32 %v10059_v39, %v10056_v38  ;;  %v7478_v25 = vpop.eup %7477 }
 0x43b   : > { %2287 = vst.msk [vmem:[#allocation2 + $0x20] sm:$0xff] %vm1662_vm0, %v2254_v10  ;;  %v2589_v10 = vsub.f32 %v9832_v54, %v2555_v31  ;;  %v2729_v5 = vmul.f32 %v7478_v25, %v9886_v21  ;;  %v2730_v19 = vmul.f32 %v7478_v25, %v9891_v60  ;;  %v10087_v21 = vadd.f32 %v10005_v17, %v9314_v11 }
 0x43d   : > { %3234 = vmax.xlane.f32.xlu2 %v3233_v27  ;;  %v10075_v27 = vadd.f32 %v9994_v30, %v9311_v58  ;;  %v2645_v45 = vmul.f32 1.442695, %v2589_v10  ;;  %v2681_v10 = vpop.xlane.xlu0 %2680 }
 0x43f   : > { %v3224_v54 = vmax.f32 %v10075_v27, %v10068_v50  ;;  %7481 = vpow2.f32 %v2645_v45  ;;  %v12096_v45 = vld [vmem:[#allocation46_spill] sm:$0xff] }
 0x440   : > { %v2206_v49 = vpop.f32.mrf.mxu3  ;;  %7483 = vpow2.f32 %v2647_v56  ;;  %v12097_v56 = vld [vmem:[#allocation76_spill] sm:$0xff] }
 0x441   : > { %v2256_v1 = vadd.f32 %v2255_v8, %v2206_v49  ;;  %v7480_v8 = vpop.eup %7479  ;;  %7485 = vpow2.f32 %v2649_v46  ;;  %v12098_v46 = vld [vmem:[#allocation44_spill] sm:$0xff] }
 0x442   : > { %v2258_v9 = vpop.f32.mrf.mxu0  ;;  %v2731_v49 = vmul.f32 %v7480_v8, %v9814_v40  ;;  %v2732_v63 = vmul.f32 %v7480_v8, %v9816_v62  ;;  %v2596_v40 = vsub.f32 %v9889_v51, %v2564_v47  ;;  %v10096_v62 = vadd.f32 %v10011_v23, %v9311_v58 }
 0x443   : > { %2288 = vst.msk [vmem:[#allocation2 + $0x28] sm:$0xff] %vm1662_vm0, %v2256_v1  ;;  %v2651_v1 = vmul.f32 1.442695, %v2592_v26 }
 0x444   : > { %2829 = vmatmul.bf16.vlgmr.msrb.gmra.mxu3 %v2757_v61  ;;  %2878 = vmatmul.bf16.vlgmr.msrb.gmra.mxu0 %v2758_v35  ;;  %v2759_v3 = vpack.c.bf16 %v2731_v49, %v2729_v5  ;;  %v2595_v61 = vsub.f32 %v9896_v37, %v2564_v47  ;;  %v2760_v60 = vpack.c.bf16 %v2732_v63, %v2730_v19  ;;  %v2659_v4 = vmul.f32 1.442695, %v2596_v40 }
 0x445   : > { %7487 = vpow2.f32 %v2651_v1  ;;  %v3227_v37 = vmax.f32 %v10096_v62, %v10087_v21  ;;  %v2561_v19 = vpop.xlane.xlu0 %2560 }
 0x446   : > { %v2657_v35 = vmul.f32 1.442695, %v2595_v61 }
 0x447   : > { %v3704_v20 = vpop.permute.xlu1 %3703 }
 0x448   : > { %6706 = vmatmul.msk.bf16.gmra.mxu1 %vm1662_vm0, %v3704_v20  ;;  %6714 = vmatmul.msk.bf16.gmra.mxu2 %vm1662_vm0, %v3704_v20  ;;  %v2209_v15 = vpop.f32.mrf.mxu3  ;;  %7489 = vpow2.f32 %v2657_v35 }
 0x449   : > { %v2259_v13 = vadd.f32 %v2258_v9, %v2209_v15  ;;  %v12094_v9 = vld [vmem:[#allocation65_spill] sm:$0xff]  ;;  %7491 = vpow2.f32 %v2659_v4  ;;  %v2684_v4 = vpop.xlane.xlu2 %2683 }
 0x44a   : > { %2686 = vadd.xlane.f32.xlu1 %v2685_v7  ;;  %v2260_v32 = vpop.f32.mrf.mxu0  ;;  %v10100_v7 = vpop.eup %7481 }
 0x44b   : > { %2289 = vst.msk [vmem:[#allocation2 + $0x30] sm:$0xff] %vm1662_vm0, %v2259_v13  ;;  %v10102_v31 = vpop.eup %7483  ;;  %v12095_v13 = vld [vmem:[#allocation77_spill] sm:$0xff] }
 0x44c   : > { %v10104_v15 = vpop.eup %7485  ;;  %v2697_v25 = vadd.f32 %v10102_v31, %v10100_v7 }
 0x44d   : > { %v10107_v23 = vpop.eup %7487 }
 0x44e   : > { %v2700_v0 = vadd.f32 %v10107_v23, %v10104_v15  ;;  %v10115_v22 = vpop.eup %7489 }
 0x44f   : > { %v10117_v5 = vpop.eup %7491 }
 0x450   : > { %v2211_v43 = vpop.f32.mrf.mxu3 }
 0x451   : > { %v2261_v30 = vadd.f32 %v2260_v32, %v2211_v43  ;;  %v10126_v43 = vpop.xlane.xlu0 %3219 }
 0x452   : > { %3225 = vmax.xlane.f32.xlu1 %v3224_v54  ;;  %v2706_v54 = vadd.f32 %v10117_v5, %v10115_v22 }
 0x453   : > { %2290 = vst.msk [vmem:[#allocation2 + $0x38] sm:$0xff] %vm1662_vm0, %v2261_v30  ;;  %v2263_v17 = vpop.f32.mrf.mxu0  ;;  %v12099_v30 = vld [vmem:[#allocation61_spill] sm:$0xff] }
 0x454   : > { %2834 = vmatmul.bf16.gmra.mxu3 %v2759_v3  ;;  %2883 = vmatmul.bf16.gmra.mxu0 %v2760_v60 }
 0x455   : > { %3488 = vrot.lane.b32.xlu2 %v12094_v9, %s8239_s6 }
 0x458   : > { %v2214_v20 = vpop.f32.mrf.mxu3 }
 0x459   : > { %v2264_v51 = vadd.f32 %v2263_v17, %v2214_v20  ;;  %v10132_v63 = vpop.xlane.xlu0 %2689  ;;  %v12100_v20 = vld [vmem:[#allocation63_spill] sm:$0xff] }
 0x45a   : > { %3228 = vmax.xlane.f32.xlu1 %v3227_v37  ;;  %v10138_v37 = vpop.f32.mrf.mxu2 }
 0x45b   : > { %2291 = vst.msk [vmem:[#allocation2 + $0x40] sm:$0xff] %vm1662_vm0, %v2264_v51  ;;  %v2265_v32 = vpop.f32.mrf.mxu0 }
 0x45d   : > { %3504 = vrot.lane.b32.xlu2 %v12095_v13, %s8239_s6 }
 0x45f   : > { %2698 = vadd.xlane.f32.xlu0 %v2697_v25 }
 0x460   : > { %v2216_v8 = vpop.f32.mrf.mxu3 }
 0x461   : > { %v2266_v26 = vadd.f32 %v2265_v32, %v2216_v8  ;;  %v10142_v32 = vpop.f32.mrf.mxu1 }
 0x462   : > { %2701 = vadd.xlane.f32.xlu1 %v2700_v0 }
 0x463   : > { %2292 = vst.msk [vmem:[#allocation2 + $0x48] sm:$0xff] %vm1662_vm0, %v2266_v26 }
 0x465   : > { %3713 = vrot.lane.b32.xlu2 %v12096_v45, %s8241_s13 }
 0x467   : > { %2707 = vadd.xlane.f32.xlu0 %v2706_v54  ;;  %v3195_v54 = vpop.f32.mrf.mxu2 }
 0x46d   : > { %3502 = vrot.lane.b32.xlu2 %v12097_v56, %s8239_s6 }
 0x472   : > { %v2675_v47 = vpop.xlane.xlu1 %2674 }
 0x473   : > { %7493 = vrcp.f32 %v2675_v47 }
 0x479   : > { %v7494_v1 = vpop.eup %7493 }
 0x47a   : > { %v2678_v49 = vpop.xlane.xlu1 %2677  ;;  %v2733_v60 = vmul.f32 %v7494_v1, %v9970_v57  ;;  %v2734_v17 = vmul.f32 %v7494_v1, %v9972_v6  ;;  %v3223_v57 = vpop.xlane.xlu0 %3222 }
 0x47b   : > { %7495 = vrcp.f32 %v2678_v49  ;;  %3711 = vrot.lane.b32.xlu1 %v12098_v46, %s8241_s13  ;;  %3486 = vrot.lane.b32.xlu0 %v12099_v30, %s8239_s6  ;;  %v3268_v6 = vsub.f32 %v9956_v33, %v3223_v57  ;;  %v3146_v1 = vpop.f32.mrf.mxu1  ;;  %v2593_v33 = vsub.f32 %v9917_v24, %v2561_v19 }
 0x47c   : > { %7497 = vrcp.f32 %v2684_v4 }
 0x47d   : > { %7499 = vrcp.f32 %v2681_v10  ;;  %v3302_v49 = vmul.f32 1.442695, %v3268_v6  ;;  %v2653_v4 = vmul.f32 1.442695, %v2593_v33  ;;  %v3266_v6 = vsub.f32 %v9931_v55, %v10126_v43 }
 0x47e   : > { %v2268_v61 = vpop.f32.mrf.mxu0 }
 0x47f   : > { %7501 = vpow2.f32 %v3302_v49 }
 0x481   : > { %v7496_v3 = vpop.eup %7495 }
 0x482   : > { %v2735_v40 = vmul.f32 %v7496_v3, %v9980_v34  ;;  %v2736_v35 = vmul.f32 %v7496_v3, %v9982_v36  ;;  %v3269_v34 = vsub.f32 %v9952_v53, %v3223_v57  ;;  %v7498_v45 = vpop.eup %7497 }
 0x483   : > { %3484 = vrot.lane.b32.xlu0 %v12100_v20, %s8239_s6  ;;  %v7500_v46 = vpop.eup %7499  ;;  %v2739_v10 = vmul.f32 %v7498_v45, %v9906_v42  ;;  %v2740_v53 = vmul.f32 %v7498_v45, %v9913_v18  ;;  %v3298_v45 = vmul.f32 1.442695, %v3266_v6 }
 0x484   : > { %v2219_v51 = vpop.f32.mrf.mxu3  ;;  %v2761_v25 = vpack.c.bf16 %v2735_v40, %v2733_v60  ;;  %v2762_v0 = vpack.c.bf16 %v2736_v35, %v2734_v17  ;;  %v3304_v3 = vmul.f32 1.442695, %v3269_v34  ;;  %v10155_v60 = vadd.f32 %v3146_v1, %v9311_v58 }
 0x485   : > { %v2269_v8 = vadd.f32 %v2268_v61, %v2219_v51  ;;  %v10149_v61 = vadd.f32 %v3195_v54, %v9314_v11  ;;  %v2594_v40 = vsub.f32 %v9910_v2, %v2561_v19  ;;  %v2737_v35 = vmul.f32 %v7500_v46, %v9893_v59  ;;  %v10164_v2 = vpop.eup %7501  ;;  %v3708_v59 = vpop.permute.xlu2 %3707 }
 0x486   : > { %2839 = vmatmul.bf16.gmra.mxu3 %v2761_v25  ;;  %2888 = vmatmul.bf16.gmra.mxu0 %v2762_v0  ;;  %v2270_v36 = vpop.f32.mrf.mxu0  ;;  %7503 = vpow2.f32 %v3304_v3  ;;  %v2738_v42 = vmul.f32 %v7500_v46, %v9898_v29  ;;  %v3267_v34 = vsub.f32 %v9928_v44, %v10126_v43  ;;  %v10192_v44 = vadd.f32 %v10142_v32, %v9311_v58 }
 0x487   : > { %2293 = vst.msk [vmem:[#allocation2 + $0x50] sm:$0xff] %vm1662_vm0, %v2269_v8  ;;  %v3239_v24 = vmax.f32 %v10155_v60, %v10149_v61  ;;  %v2763_v18 = vpack.c.bf16 %v2739_v10, %v2737_v35  ;;  %v2655_v25 = vmul.f32 1.442695, %v2594_v40  ;;  %7505 = vpow2.f32 %v2653_v4 }
 0x488   : > { %v2764_v51 = vpack.c.bf16 %v2740_v53, %v2738_v42  ;;  %v3300_v54 = vmul.f32 1.442695, %v3267_v34  ;;  %v12101_v42 = vld [vmem:[#allocation48_spill] sm:$0xff] }
 0x489   : > { %7507 = vpow2.f32 %v2655_v25 }
 0x48a   : > { %7509 = vpow2.f32 %v3298_v45 }
 0x48b   : > { %7511 = vpow2.f32 %v3300_v54 }
 0x48c   : > { %v2221_v26 = vpop.f32.mrf.mxu3  ;;  %v10166_v19 = vpop.eup %7503  ;;  %7513 = vrcp.f32 %v10132_v63 }
 0x48d   : > { %v2271_v47 = vadd.f32 %v2270_v36, %v2221_v26  ;;  %v3365_v29 = vadd.f32 %v10166_v19, %v10164_v2  ;;  %v10170_v0 = vpop.eup %7505 }
 0x48f   : > { %2294 = vst.msk [vmem:[#allocation2 + $0x58] sm:$0xff] %vm1662_vm0, %v2271_v47  ;;  %v10172_v8 = vpop.eup %7507  ;;  %v10186_v47 = vadd.f32 %v10138_v37, %v9314_v11 }
 0x490   : > { %v2703_v26 = vadd.f32 %v10172_v8, %v10170_v0  ;;  %v10197_v37 = vpop.eup %7509 }
 0x491   : > { %v3236_v3 = vmax.f32 %v10192_v44, %v10186_v47  ;;  %v10199_v33 = vpop.eup %7511 }
 0x492   : > { %v3706_v17 = vpop.permute.xlu1 %3705  ;;  %v3362_v35 = vadd.f32 %v10199_v33, %v10197_v37 }
 0x493   : > { %6715 = vmatmul.msk.bf16.gmra.mxu2 %vm1662_vm0, %v3706_v17  ;;  %6707 = vmatmul.msk.bf16.gmra.mxu1 %vm1662_vm0, %v3706_v17 }
 0x494   : > { %v2693_v43 = vpop.xlane.xlu0 %2692 }
 0x496   : > { %3240 = vmax.xlane.f32.xlu2 %v3239_v24  ;;  %2844 = vmatmul.bf16.gmra.mxu3 %v2763_v18 }
 0x497   : > { %2893 = vmatmul.bf16.gmra.mxu0 %v2764_v51 }
 0x49e   : > { %3366 = vadd.xlane.f32.xlu2 %v3365_v29 }
 0x4a0   : > { %v10174_v57 = vpop.xlane.xlu2 %2695 }
 0x4a1   : > { %v2273_v36 = vpop.f32.mrf.mxu0 }
 0x4a3   : > { %6708 = vmatmul.msk.bf16.gmra.mxu1 %vm1662_vm0, %v3708_v59  ;;  %6716 = vmatmul.msk.bf16.gmra.mxu2 %vm1662_vm0, %v3708_v59  ;;  %v12102_v59 = vld [vmem:[#allocation57_spill] sm:$0xff] }
 0x4a5   : > { %2704 = vadd.xlane.f32.xlu1 %v2703_v26 }
 0x4a7   : > { %v2224_v49 = vpop.f32.mrf.mxu3  ;;  %v3710_v32 = vpop.permute.xlu0 %3709 }
 0x4a8   : > { %v2274_v55 = vadd.f32 %v2273_v36, %v2224_v49  ;;  %v10188_v46 = vpop.xlane.xlu2 %3231  ;;  %v7514_v36 = vpop.eup %7513 }
 0x4a9   : > { %v2275_v1 = vpop.f32.mrf.mxu0  ;;  %v2743_v63 = vmul.f32 %v7514_v36, %v9945_v28  ;;  %v12106_v28 = vld [vmem:[#allocation71_spill] sm:$0xff] }
 0x4aa   : > { %2295 = vst.msk [vmem:[#allocation2 + $0x60] sm:$0xff] %vm1662_vm0, %v2274_v55 }
 0x4ad   : > { %3237 = vmax.xlane.f32.xlu0 %v3236_v3 }
 0x4af   : > { %v2226_v10 = vpop.f32.mrf.mxu3 }
 0x4b0   : > { %v2276_v53 = vadd.f32 %v2275_v1, %v2226_v10  ;;  %v10201_v40 = vpop.xlane.xlu2 %3234  ;;  %v12103_v1 = vld [vmem:[#allocation64_spill] sm:$0xff]  ;;  %v10221_v10 = vpop.f32.mrf.mxu2 }
 0x4b1   : > { %v2278_v17 = vpop.f32.mrf.mxu0  ;;  %v2744_v3 = vmul.f32 %v7514_v36, %v12103_v1  ;;  %v12113_v1 = vld [vmem:[#allocation72_spill] sm:$0xff] }
 0x4b2   : > { %2296 = vst.msk [vmem:[#allocation2 + $0x68] sm:$0xff] %vm1662_vm0, %v2276_v53  ;;  %v12104_v53 = vld [vmem:[#allocation74_spill] sm:$0xff] }
 0x4b3   : > { %6709 = vmatmul.msk.bf16.gmra.mxu1 %vm1662_vm0, %v3710_v32  ;;  %6717 = vmatmul.msk.bf16.gmra.mxu2 %vm1662_vm0, %v3710_v32 }
 0x4b5   : > { %3363 = vadd.xlane.f32.xlu0 %v3362_v35  ;;  %v10225_v35 = vpop.f32.mrf.mxu1 }
 0x4b6   : > { %3715 = vrot.lane.b32.xlu2 %v12101_v42, %s8241_s13 }
 0x4b7   : > { %v2229_v24 = vpop.f32.mrf.mxu3 }
 0x4b8   : > { %v2279_v18 = vadd.f32 %v2278_v17, %v2229_v24  ;;  %v3489_v4 = vpop.permute.xlu2 %3488 }
 0x4b9   : > { %3522 = vmatpush.bf16.msra.mxu3 %v3489_v4  ;;  %v2280_v51 = vpop.f32.mrf.mxu0  ;;  %v12108_v4 = vld [vmem:[#allocation59_spill] sm:$0xff] }
 0x4ba   : > { %2297 = vst.msk [vmem:[#allocation2 + $0x70] sm:$0xff] %vm1662_vm0, %v2279_v18 }
 0x4bd   : > { %v2687_v25 = vpop.xlane.xlu1 %2686  ;;  %v3151_v36 = vpop.f32.mrf.mxu1 }
 0x4be   : > { %7515 = vrcp.f32 %v2687_v25  ;;  %3482 = vrot.lane.b32.xlu1 %v12102_v59, %s8239_s6  ;;  %v3200_v25 = vpop.f32.mrf.mxu2 }
 0x4bf   : > { %v2231_v29 = vpop.f32.mrf.mxu3  ;;  %7517 = vrcp.f32 %v10174_v57  ;;  %v12110_v57 = vld [vmem:[#allocation49_spill] sm:$0xff] }
 0x4c0   : > { %v2281_v6 = vadd.f32 %v2280_v51, %v2231_v29  ;;  %v3505_v34 = vpop.permute.xlu2 %3504  ;;  %7519 = vrcp.f32 %v2693_v43 }
 0x4c1   : > { %3571 = vmatpush.bf16.msra.mxu0 %v3505_v34  ;;  %v2879_v45 = vpop.f32.mrf.mxu0 }
 0x4c2   : > { %2298 = vst.msk [vmem:[#allocation2 + $0x78] sm:$0xff] %vm1662_vm0, %v2281_v6 }
 0x4c4   : > { %v7516_v26 = vpop.eup %7515 }
 0x4c5   : > { %v10215_v54 = vpop.xlane.xlu1 %3225  ;;  %v2741_v49 = vmul.f32 %v7516_v26, %v10056_v38  ;;  %v2742_v55 = vmul.f32 %v7516_v26, %v10059_v39  ;;  %v7518_v51 = vpop.eup %7517 }
 0x4c6   : > { %3500 = vrot.lane.b32.xlu1 %v12104_v53, %s8239_s6  ;;  %v7520_v34 = vpop.eup %7519  ;;  %v2747_v43 = vmul.f32 %v7518_v51, %v10016_v12  ;;  %v2748_v26 = vmul.f32 %v7518_v51, %v10018_v52  ;;  %v3203_v12 = vpop.f32.mrf.mxu2  ;;  %v12115_v52 = vld [vmem:[#allocation78_spill] sm:$0xff]  ;;  %v10258_v51 = vadd.f32 %v3151_v36, %v9311_v58 }
 0x4c7   : > { %v2765_v32 = vpack.c.bf16 %v2743_v63, %v2741_v49  ;;  %v2766_v17 = vpack.c.bf16 %v2744_v3, %v2742_v55  ;;  %v2830_v42 = vpop.f32.mrf.mxu3  ;;  %v12112_v63 = vld [vmem:[#allocation69_spill] sm:$0xff]  ;;  %v10269_v36 = vadd.f32 %v3203_v12, %v9314_v11 }
 0x4c8   : > { %v10227_v24 = vadd.f32 %v2879_v45, %v2830_v42  ;;  %v10229_v18 = vpop.permute.xlu2 %3713  ;;  %v12111_v45 = vld [vmem:[#allocation40_spill] sm:$0xff]  ;;  %v2746_v55 = vmul.f32 %v7520_v34, %v12112_v63 }
 0x4c9   : > { %2849 = vmatmul.bf16.gmra.mxu3 %v2765_v32  ;;  %2898 = vmatmul.bf16.gmra.mxu0 %v2766_v17  ;;  %v10236_v39 = vpop.f32.mrf.mxu0  ;;  %v2745_v49 = vmul.f32 %v7520_v34, %v12111_v45  ;;  %v3274_v34 = vsub.f32 %v10029_v16, %v10188_v46  ;;  %v12117_v16 = vld [vmem:[#allocation79_spill] sm:$0xff] }
 0x4ca   : > { %12105 = vst [vmem:[#allocation54_spill] sm:$0xff] %v10227_v24  ;;  %3496 = vrot.lane.b32.xlu0 %v12106_v28, %s8239_s6  ;;  %v2768_v17 = vpack.c.bf16 %v2748_v26, %v2746_v55  ;;  %v12116_v26 = vld [vmem:[#allocation51_spill] sm:$0xff] }
 0x4cb   : > { %12107 = vst [vmem:[#allocation41_spill] sm:$0xff] %v10236_v39  ;;  %v2767_v32 = vpack.c.bf16 %v2747_v43, %v2745_v49  ;;  %v3154_v43 = vpop.f32.mrf.mxu1  ;;  %v3314_v45 = vmul.f32 1.442695, %v3274_v34 }
 0x4cd   : > { %v10234_v38 = vpop.xlane.xlu1 %3228 }
 0x4ce   : > { %3480 = vrot.lane.b32.xlu1 %v12108_v4, %s8239_s6 }
 0x4cf   : > { %v10240_v29 = vpop.f32.mrf.mxu3 }
 0x4d0   : > { %12109 = vst [vmem:[#allocation42_spill] sm:$0xff] %v10240_v29  ;;  %v3503_v6 = vpop.permute.xlu2 %3502 }
 0x4d1   : > { %3572 = vmatpush.bf16.msra.mxu0 %v3503_v6  ;;  %v2884_v42 = vpop.f32.mrf.mxu0  ;;  %v10251_v6 = vadd.f32 %v3200_v25, %v9314_v11  ;;  %v3275_v25 = vsub.f32 %v10024_v14, %v10188_v46  ;;  %v10274_v14 = vadd.f32 %v3154_v43, %v9311_v58  ;;  %v12118_v43 = vld [vmem:[#allocation53_spill] sm:$0xff] }
 0x4d2   : > { %3474 = vrot.lane.b32.xlu0 %v12110_v57, %s8239_s6  ;;  %v2699_v29 = vpop.xlane.xlu0 %2698 }
 0x4d3   : > { %v3316_v63 = vmul.f32 1.442695, %v3275_v25  ;;  %v10284_v12 = vpop.f32.mrf.mxu1 }
 0x4d5   : > { %v2702_v3 = vpop.xlane.xlu1 %2701 }
 0x4d6   : > { %3498 = vrot.lane.b32.xlu1 %v12113_v1, %s8239_s6  ;;  %7521 = vrcp.f32 %v2702_v3  ;;  %v10278_v3 = vpop.f32.mrf.mxu2 }
 0x4d7   : > { %v2835_v39 = vpop.f32.mrf.mxu3  ;;  %7523 = vrcp.f32 %v2699_v29 }
 0x4d8   : > { %v10253_v24 = vadd.f32 %v2884_v42, %v2835_v39  ;;  %v3245_v39 = vmax.f32 %v10258_v51, %v10251_v6  ;;  %7525 = vpow2.f32 %v3314_v45 }
 0x4d9   : > { %2854 = vmatmul.bf16.gmra.mxu3 %v2767_v32  ;;  %2903 = vmatmul.bf16.gmra.mxu0 %v2768_v17  ;;  %7527 = vpow2.f32 %v3316_v63  ;;  %v3248_v32 = vmax.f32 %v10274_v14, %v10269_v36  ;;  %v12119_v63 = vld [vmem:[#allocation70_spill] sm:$0xff] }
 0x4da   : > { %12114 = vst [vmem:[#allocation47_spill] sm:$0xff] %v10253_v24  ;;  %3492 = vrot.lane.b32.xlu0 %v12115_v52, %s8239_s6  ;;  %v10286_v34 = vpop.xlane.xlu0 %2707  ;;  %v3273_v24 = vsub.f32 %v10087_v21, %v10234_v38 }
 0x4dc   : > { %v7522_v49 = vpop.eup %7521 }
 0x4dd   : > { %v7524_v55 = vpop.eup %7523  ;;  %v2751_v46 = vmul.f32 %v7522_v49, %v10104_v15  ;;  %v2752_v29 = vmul.f32 %v7522_v49, %v10107_v23 }
 0x4de   : > { %3478 = vrot.lane.b32.xlu1 %v12116_v26, %s8239_s6  ;;  %v2749_v17 = vmul.f32 %v7524_v55, %v10100_v7  ;;  %v2750_v42 = vmul.f32 %v7524_v55, %v10102_v31  ;;  %v10290_v25 = vpop.eup %7525  ;;  %v3208_v31 = vpop.f32.mrf.mxu2 }
 0x4df   : > { %3246 = vmax.xlane.f32.xlu2 %v3245_v39  ;;  %v10292_v39 = vpop.eup %7527  ;;  %v3159_v55 = vpop.f32.mrf.mxu1 }
 0x4e0   : > { %v2769_v15 = vpack.c.bf16 %v2751_v46, %v2749_v17  ;;  %v2770_v23 = vpack.c.bf16 %v2752_v29, %v2750_v42  ;;  %v3374_v7 = vadd.f32 %v10292_v39, %v10290_v25  ;;  %v10301_v46 = vadd.f32 %v3208_v31, %v9314_v11  ;;  %v10318_v31 = vpop.f32.mrf.mxu3 }
 0x4e1   : > { %v10304_v29 = vadd.f32 %v3159_v55, %v9311_v58  ;;  %v3270_v42 = vsub.f32 %v10075_v27, %v10215_v54  ;;  %12121 = vst [vmem:[#allocation67_spill] sm:$0xff] %v10318_v31 }
 0x4e2   : > { %3490 = vrot.lane.b32.xlu0 %v12117_v16, %s8239_s6 }
 0x4e6   : > { %3476 = vrot.lane.b32.xlu1 %v12118_v43, %s8239_s6 }
 0x4e7   : > { %3249 = vmax.xlane.f32.xlu2 %v3248_v32  ;;  %v3254_v32 = vmax.f32 %v10304_v29, %v10301_v46 }
 0x4e9   : > { %2859 = vmatmul.bf16.gmra.mxu3 %v2769_v15  ;;  %2908 = vmatmul.bf16.gmra.mxu0 %v2770_v23  ;;  %v3271_v15 = vsub.f32 %v10068_v50, %v10215_v54  ;;  %v3306_v23 = vmul.f32 1.442695, %v3270_v42  ;;  %v3210_v50 = vpop.f32.mrf.mxu2 }
 0x4ea   : > { %v10335_v28 = vadd.f32 %v3210_v50, %v9314_v11 }
 0x4eb   : > { %7529 = vpow2.f32 %v3306_v23  ;;  %v3161_v23 = vpop.f32.mrf.mxu1 }
 0x4ed   : > { %v3712_v45 = vpop.permute.xlu1 %3711  ;;  %v3487_v49 = vpop.permute.xlu0 %3486 }
 0x4ee   : > { %3494 = vrot.lane.b32.xlu1 %v12119_v63, %s8239_s6  ;;  %6710 = vmatmul.msk.bf16.gmra.mxu1 %vm1662_vm0, %v3712_v45 }
 0x4ef   : > { %3375 = vadd.xlane.f32.xlu2 %v3374_v7  ;;  %3523 = vmatpush.bf16.msra.mxu3 %v3487_v49  ;;  %v3308_v7 = vmul.f32 1.442695, %v3271_v15 }
 0x4f0   : > { %6718 = vmatmul.msk.bf16.gmra.mxu2 %vm1662_vm0, %v3712_v45  ;;  %v10312_v45 = vpop.f32.mrf.mxu0 }
 0x4f1   : > { %12120 = vst [vmem:[#allocation58_spill] sm:$0xff] %v10312_v45  ;;  %7531 = vpow2.f32 %v3308_v7  ;;  %v10320_v55 = vpop.eup %7529  ;;  %v3272_v7 = vsub.f32 %v10096_v62, %v10234_v38  ;;  %v3213_v38 = vpop.f32.mrf.mxu2 }
 0x4f3   : > { %v3164_v50 = vpop.f32.mrf.mxu1 }
 0x4f5   : > { %v3485_v17 = vpop.permute.xlu0 %3484 }
 0x4f6   : > { %3524 = vmatpush.bf16.msra.mxu3 %v3485_v17 }
 0x4f7   : > { %3255 = vmax.xlane.f32.xlu2 %v3254_v32  ;;  %v10322_v27 = vpop.eup %7531 }
 0x4fe   : > { %6711 = vmatmul.msk.bf16.gmra.mxu1 %vm1662_vm0, %v10229_v18 }
 0x500   : > { %6719 = vmatmul.msk.bf16.gmra.mxu2 %vm1662_vm0, %v10229_v18  ;;  %v3368_v18 = vadd.f32 %v10322_v27, %v10320_v55 }
 0x503   : > { %v2889_v49 = vpop.f32.mrf.mxu0 }
 0x509   : > { %v3241_v54 = vpop.xlane.xlu2 %3240  ;;  %v2840_v32 = vpop.f32.mrf.mxu3 }
 0x50a   : > { %v3280_v17 = vsub.f32 %v10155_v60, %v3241_v54  ;;  %v3281_v42 = vsub.f32 %v10149_v61, %v3241_v54  ;;  %v10326_v15 = vadd.f32 %v2889_v49, %v2840_v32  ;;  %v10340_v60 = vadd.f32 %v3161_v23, %v9311_v58 }
 0x50b   : > { %v10337_v61 = vpop.f32.mrf.mxu0  ;;  %v3310_v49 = vmul.f32 1.442695, %v3272_v7  ;;  %v3312_v54 = vmul.f32 1.442695, %v3273_v24  ;;  %v10368_v23 = vadd.f32 %v3164_v50, %v9311_v58 }
 0x50c   : > { %12122 = vst [vmem:[#allocation75_spill] sm:$0xff] %v10326_v15  ;;  %v3326_v45 = vmul.f32 1.442695, %v3280_v17  ;;  %v3328_v31 = vmul.f32 1.442695, %v3281_v42  ;;  %3369 = vadd.xlane.f32.xlu0 %v3368_v18  ;;  %v10348_v17 = vadd.f32 %v10221_v10, %v9314_v11  ;;  %v3257_v21 = vmax.f32 %v10340_v60, %v10335_v28 }
 0x50d   : > { %12123 = vst [vmem:[#allocation68_spill] sm:$0xff] %v10337_v61  ;;  %v10363_v42 = vadd.f32 %v3213_v38, %v9314_v11 }
 0x50e   : > { %7533 = vpow2.f32 %v3326_v45 }
 0x50f   : > { %7535 = vpow2.f32 %v3328_v31  ;;  %v10356_v31 = vadd.f32 %v10225_v35, %v9311_v58  ;;  %v3260_v38 = vmax.f32 %v10368_v23, %v10363_v42 }
 0x510   : > { %7537 = vpow2.f32 %v3310_v49 }
 0x511   : > { %v10342_v32 = vpop.xlane.xlu2 %3366  ;;  %v10344_v62 = vpop.f32.mrf.mxu3  ;;  %7539 = vpow2.f32 %v3312_v54  ;;  %v3242_v10 = vmax.f32 %v10356_v31, %v10348_v17 }
 0x512   : > { %12124 = vst [vmem:[#allocation50_spill] sm:$0xff] %v10344_v62  ;;  %7541 = vrcp.f32 %v10286_v34  ;;  %v3276_v34 = vsub.f32 %v10047_v48, %v10201_v40 }
 0x514   : > { %v10352_v45 = vpop.eup %7533  ;;  %3258 = vmax.xlane.f32.xlu0 %v3257_v21  ;;  %v2894_v35 = vpop.f32.mrf.mxu0  ;;  %v3318_v15 = vmul.f32 1.442695, %v3276_v34  ;;  %v10397_v34 = vadd.f32 %v10284_v12, %v9311_v58 }
 0x515   : > { %v10358_v24 = vpop.eup %7535 }
 0x516   : > { %v3383_v18 = vadd.f32 %v10358_v24, %v10352_v45  ;;  %v10371_v21 = vpop.eup %7537 }
 0x517   : > { %v10379_v61 = vpop.eup %7539 }
 0x518   : > { %3384 = vadd.xlane.f32.xlu2 %v3383_v18  ;;  %3243 = vmax.xlane.f32.xlu1 %v3242_v10  ;;  %v2705_v7 = vpop.xlane.xlu1 %2704  ;;  %v3277_v10 = vsub.f32 %v10041_v41, %v10201_v40  ;;  %v7542_v18 = vpop.eup %7541  ;;  %v3371_v62 = vadd.f32 %v10379_v61, %v10371_v21  ;;  %v10393_v41 = vadd.f32 %v10278_v3, %v9314_v11 }
 0x519   : > { %v3716_v49 = vpop.permute.xlu2 %3715  ;;  %v2845_v54 = vpop.f32.mrf.mxu3  ;;  %7543 = vrcp.f32 %v2705_v7  ;;  %v2756_v48 = vmul.f32 %v7542_v18, %v10117_v5 }
 0x51a   : > { %6712 = vmatmul.msk.bf16.gmra.mxu1 %vm1662_vm0, %v3716_v49  ;;  %6720 = vmatmul.msk.bf16.gmra.mxu2 %vm1662_vm0, %v3716_v49  ;;  %v10377_v50 = vadd.f32 %v2894_v35, %v2845_v54  ;;  %v3320_v57 = vmul.f32 1.442695, %v3277_v10  ;;  %v2755_v54 = vmul.f32 %v7542_v18, %v10115_v22  ;;  %7545 = vpow2.f32 %v3318_v15  ;;  %v3215_v10 = vpop.f32.mrf.mxu2 }
 0x51b   : > { %v3251_v5 = vmax.f32 %v10397_v34, %v10393_v41 }
 0x51c   : > { %12125 = vst [vmem:[#allocation52_spill] sm:$0xff] %v10377_v50  ;;  %3261 = vmax.xlane.f32.xlu0 %v3260_v38  ;;  %7547 = vpow2.f32 %v3320_v57 }
 0x51f   : > { %v7544_v7 = vpop.eup %7543 }
 0x520   : > { %3372 = vadd.xlane.f32.xlu1 %v3371_v62  ;;  %v3238_v49 = vpop.xlane.xlu0 %3237  ;;  %v2753_v35 = vmul.f32 %v7544_v7, %v10170_v0  ;;  %v2754_v50 = vmul.f32 %v7544_v7, %v10172_v8  ;;  %v10403_v3 = vpop.eup %7545 }
 0x521   : > { %v3278_v62 = vsub.f32 %v10192_v44, %v3238_v49  ;;  %v3279_v22 = vsub.f32 %v10186_v47, %v3238_v49  ;;  %v3166_v7 = vpop.f32.mrf.mxu1  ;;  %v10416_v49 = vadd.f32 %v3215_v10, %v9314_v11 }
 0x522   : > { %v2771_v40 = vpack.c.bf16 %v2755_v54, %v2753_v35  ;;  %v2772_v38 = vpack.c.bf16 %v2756_v48, %v2754_v50  ;;  %v10405_v50 = vpop.eup %7547  ;;  %v10419_v35 = vadd.f32 %v3166_v7, %v9311_v58  ;;  %v10423_v48 = vpop.f32.mrf.mxu0 }
 0x523   : > { %v3322_v0 = vmul.f32 1.442695, %v3278_v62  ;;  %v3324_v8 = vmul.f32 1.442695, %v3279_v22  ;;  %v3377_v44 = vadd.f32 %v10405_v50, %v10403_v3  ;;  %12126 = vst [vmem:[#allocation62_spill] sm:$0xff] %v10423_v48 }
 0x524   : > { %2864 = vmatmul.bf16.gmra.mxu3 %v2771_v40  ;;  %2913 = vmatmul.bf16.gmra.mxu0 %v2772_v38  ;;  %v3263_v54 = vmax.f32 %v10419_v35, %v10416_v49  ;;  %v3879_v40 = vpop.f32.mrf.mxu2 }
 0x525   : > { %7549 = vpow2.f32 %v3322_v0  ;;  %v10426_v22 = vadd.f32 %v3879_v40, %v9314_v11 }
 0x526   : > { %7551 = vpow2.f32 %v3324_v8  ;;  %v10431_v8 = vpop.f32.mrf.mxu3 }
 0x527   : > { %12127 = vst [vmem:[#allocation45_spill] sm:$0xff] %v10431_v8 }
 0x528   : > { %3252 = vmax.xlane.f32.xlu1 %v3251_v5  ;;  %v3364_v5 = vpop.xlane.xlu0 %3363 }
 0x529   : > { %v3830_v62 = vpop.f32.mrf.mxu1  ;;  %7553 = vrcp.f32 %v3364_v5 }
 0x52a   : > { %v10429_v0 = vadd.f32 %v3830_v62, %v9311_v58  ;;  %7555 = vrcp.f32 %v10342_v32 }
 0x52b   : > { %v10409_v47 = vpop.eup %7549 }
 0x52c   : > { %v10411_v12 = vpop.eup %7551 }
 0x52d   : > { %v3380_v15 = vadd.f32 %v10411_v12, %v10409_v47 }
 0x530   : > { %v3483_v57 = vpop.permute.xlu1 %3482  ;;  %3378 = vadd.xlane.f32.xlu1 %v3377_v44  ;;  %v3919_v44 = vmax.f32 %v10429_v0, %v10426_v22 }
 0x531   : > { %3525 = vmatpush.bf16.msra.mxu3 %v3483_v57 }
 0x538   : > { %v3501_v18 = vpop.permute.xlu1 %3500  ;;  %3381 = vadd.xlane.f32.xlu1 %v3380_v15 }
 0x539   : > { %3573 = vmatpush.bf16.msra.mxu0 %v3501_v18 }
 0x53c   : > { %v3497_v10 = vpop.permute.xlu0 %3496 }
 0x540   : > { %v3481_v38 = vpop.permute.xlu1 %3480  ;;  %3264 = vmax.xlane.f32.xlu1 %v3263_v54 }
 0x541   : > { %3526 = vmatpush.bf16.msra.mxu3 %v3481_v38 }
 0x544   : > { %v3475_v8 = vpop.permute.xlu0 %3474 }
 0x546   : > { %v2899_v57 = vpop.f32.mrf.mxu0 }
 0x548   : > { %v3499_v15 = vpop.permute.xlu1 %3498  ;;  %3920 = vmax.xlane.f32.xlu1 %v3919_v44 }
 0x549   : > { %3574 = vmatpush.bf16.msra.mxu0 %v3499_v15 }
 0x54c   : > { %v2850_v18 = vpop.f32.mrf.mxu3  ;;  %v3493_v26 = vpop.permute.xlu0 %3492 }
 0x54d   : > { %v10435_v7 = vadd.f32 %v2899_v57, %v2850_v18  ;;  %3575 = vmatpush.bf16.msra.mxu0 %v3497_v10  ;;  %v10444_v57 = vpop.f32.mrf.mxu2  ;;  %v7554_v10 = vpop.eup %7553 }
 0x54e   : > { %v10437_v54 = vpop.f32.mrf.mxu0  ;;  %v10446_v18 = vpop.f32.mrf.mxu1 }
 0x54f   : > { %12128 = vst [vmem:[#allocation66_spill] sm:$0xff] %v10435_v7 }
 0x550   : > { %12129 = vst [vmem:[#allocation55_spill] sm:$0xff] %v10437_v54  ;;  %v3479_v40 = vpop.permute.xlu1 %3478  ;;  %v7556_v54 = vpop.eup %7555 }
 0x551   : > { %3527 = vmatpush.bf16.msra.mxu3 %v3479_v40 }
 0x552   : > { %v3247_v38 = vpop.xlane.xlu2 %3246 }
 0x553   : > { %v3284_v62 = vsub.f32 %v10258_v51, %v3247_v38  ;;  %v3285_v48 = vsub.f32 %v10251_v6, %v3247_v38  ;;  %v3426_v51 = vmul.f32 %v7554_v10, %v10197_v37 }
 0x554   : > { %v10442_v44 = vpop.f32.mrf.mxu3 }
 0x555   : > { %12130 = vst [vmem:[#allocation60_spill] sm:$0xff] %v10442_v44  ;;  %v3334_v15 = vmul.f32 1.442695, %v3284_v62  ;;  %v3336_v43 = vmul.f32 1.442695, %v3285_v48  ;;  %v3428_v48 = vmul.f32 %v7556_v54, %v10164_v2 }
 0x556   : > { %v2904_v5 = vpop.f32.mrf.mxu0 }
 0x557   : > { %7557 = vpow2.f32 %v3334_v15  ;;  %v3458_v37 = vpack.c.bf16 %v3428_v48, %v3426_v51  ;;  %v3491_v48 = vpop.permute.xlu0 %3490 }
 0x558   : > { %7559 = vpow2.f32 %v3336_v43  ;;  %v3477_v40 = vpop.permute.xlu1 %3476 }
 0x559   : > { %3528 = vmatpush.bf16.msra.mxu3 %v3477_v40  ;;  %v10458_v40 = vpop.f32.mrf.mxu2 }
 0x55a   : > { %v3250_v32 = vpop.xlane.xlu2 %3249 }
 0x55b   : > { %v3286_v6 = vsub.f32 %v10274_v14, %v3250_v32  ;;  %v3287_v38 = vsub.f32 %v10269_v36, %v3250_v32  ;;  %v10462_v14 = vpop.f32.mrf.mxu1 }
 0x55c   : > { %v2855_v62 = vpop.f32.mrf.mxu3 }
 0x55d   : > { %v10452_v44 = vpop.eup %7557  ;;  %v3338_v7 = vmul.f32 1.442695, %v3286_v6  ;;  %v3340_v16 = vmul.f32 1.442695, %v3287_v38  ;;  %v10454_v15 = vadd.f32 %v2904_v5, %v2855_v62  ;;  %3529 = vmatpush.bf16.msra.mxu3 %v3475_v8 }
 0x55e   : > { %v10456_v43 = vpop.eup %7559  ;;  %v10464_v5 = vpop.f32.mrf.mxu0 }
 0x55f   : > { %12131 = vst [vmem:[#allocation73_spill] sm:$0xff] %v10454_v15  ;;  %7561 = vpow2.f32 %v3338_v7  ;;  %v3389_v36 = vadd.f32 %v10456_v43, %v10452_v44  ;;  %v3427_v7 = vmul.f32 %v7554_v10, %v10199_v33 }
 0x560   : > { %7563 = vpow2.f32 %v3340_v16  ;;  %v3495_v2 = vpop.permute.xlu1 %3494  ;;  %3530 = vmatmul.bf16.vlgmr.msra.gmra.mxu3 %v3458_v37  ;;  %12132 = vst [vmem:[#allocation43_spill] sm:$0xff] %v10464_v5  ;;  %v3429_v16 = vmul.f32 %v7556_v54, %v10166_v19 }
 0x561   : > { %3390 = vadd.xlane.f32.xlu0 %v3389_v36  ;;  %3576 = vmatpush.bf16.msra.mxu0 %v3495_v2  ;;  %v3886_v38 = vpop.f32.mrf.mxu2 }
 0x562   : > { %v3459_v37 = vpack.c.bf16 %v3429_v16, %v3427_v7  ;;  %v10477_v36 = vadd.f32 %v3886_v38, %v9314_v11 }
 0x563   : > { %v3837_v62 = vpop.f32.mrf.mxu1 }
 0x564   : > { %v10466_v8 = vpop.f32.mrf.mxu3  ;;  %12134 = vst [vmem:[#allocation65_spill] sm:$0xff] %v10477_v36  ;;  %v10480_v5 = vadd.f32 %v3837_v62, %v9311_v58 }
 0x565   : > { %12133 = vst [vmem:[#allocation56_spill] sm:$0xff] %v10466_v8  ;;  %v10468_v32 = vpop.eup %7561  ;;  %3577 = vmatpush.bf16.msra.mxu0 %v3493_v26 }
 0x566   : > { %v10470_v51 = vpop.eup %7563  ;;  %v2909_v2 = vpop.f32.mrf.mxu0  ;;  %12135 = vst [vmem:[#allocation77_spill] sm:$0xff] %v10480_v5  ;;  %v3928_v10 = vmax.f32 %v10480_v5, %v10477_v36 }
 0x567   : > { %v3392_v6 = vadd.f32 %v10470_v51, %v10468_v32 }
 0x569   : > { %3393 = vadd.xlane.f32.xlu0 %v3392_v6  ;;  %3578 = vmatpush.bf16.msra.mxu0 %v3491_v48  ;;  %v3889_v19 = vpop.f32.mrf.mxu2 }
 0x56a   : > { %v10487_v6 = vadd.f32 %v3889_v19, %v9314_v11 }
 0x56b   : > { %v3840_v54 = vpop.f32.mrf.mxu1 }
 0x56c   : > { %v2860_v26 = vpop.f32.mrf.mxu3  ;;  %3579 = vmatmul.bf16.vlgmr.msra.gmra.mxu0 %v3459_v37  ;;  %12137 = vst [vmem:[#allocation76_spill] sm:$0xff] %v10487_v6  ;;  %v10490_v7 = vadd.f32 %v3840_v54, %v9311_v58 }
 0x56d   : > { %v10482_v33 = vadd.f32 %v2909_v2, %v2860_v26  ;;  %v3376_v26 = vpop.xlane.xlu2 %3375 }
 0x56e   : > { %12138 = vst [vmem:[#allocation44_spill] sm:$0xff] %v10490_v7  ;;  %v3931_v38 = vmax.f32 %v10490_v7, %v10487_v6 }
 0x56f   : > { %12136 = vst [vmem:[#allocation46_spill] sm:$0xff] %v10482_v33 }
 0x571   : > { %3929 = vmax.xlane.f32.xlu0 %v3928_v10 }
 0x579   : > { %3932 = vmax.xlane.f32.xlu0 %v3931_v38 }
 0x57f   : > { %v3370_v16 = vpop.xlane.xlu0 %3369 }
 0x587   : > { %v3259_v48 = vpop.xlane.xlu0 %3258 }
 0x588   : > { %v3292_v6 = vsub.f32 %v10340_v60, %v3259_v48 }
 0x58a   : > { %v3350_v60 = vmul.f32 1.442695, %v3292_v6 }
 0x58b   : > { %v3244_v62 = vpop.xlane.xlu1 %3243 }
 0x58c   : > { %v3282_v37 = vsub.f32 %v10356_v31, %v3244_v62  ;;  %v3283_v2 = vsub.f32 %v10348_v17, %v3244_v62 }
 0x58e   : > { %v3330_v10 = vmul.f32 1.442695, %v3282_v37  ;;  %v3332_v8 = vmul.f32 1.442695, %v3283_v2  ;;  %v3256_v37 = vpop.xlane.xlu2 %3255 }
 0x58f   : > { %v3262_v33 = vpop.xlane.xlu0 %3261 }
 0x590   : > { %v3294_v19 = vsub.f32 %v10368_v23, %v3262_v33  ;;  %v3295_v54 = vsub.f32 %v10363_v42, %v3262_v33  ;;  %7565 = vpow2.f32 %v3330_v10 }
 0x591   : > { %7567 = vpow2.f32 %v3332_v8  ;;  %v10510_v8 = vadd.f32 %v10444_v57, %v9314_v11 }
 0x592   : > { %v3354_v15 = vmul.f32 1.442695, %v3294_v19  ;;  %v3356_v36 = vmul.f32 1.442695, %v3295_v54  ;;  %7569 = vrcp.f32 %v3370_v16 }
 0x593   : > { %v3373_v38 = vpop.xlane.xlu1 %3372 }
 0x594   : > { %7571 = vpow2.f32 %v3354_v15 }
 0x595   : > { %7573 = vpow2.f32 %v3356_v36  ;;  %v3290_v36 = vsub.f32 %v10304_v29, %v3256_v37  ;;  %v3291_v29 = vsub.f32 %v10301_v46, %v3256_v37  ;;  %v10536_v37 = vadd.f32 %v10458_v40, %v9314_v11 }
 0x596   : > { %7575 = vrcp.f32 %v3373_v38  ;;  %v10498_v31 = vpop.eup %7565 }
 0x597   : > { %v10500_v17 = vpop.eup %7567  ;;  %v3348_v46 = vmul.f32 1.442695, %v3291_v29 }
 0x598   : > { %v7570_v62 = vpop.eup %7569  ;;  %v3386_v23 = vadd.f32 %v10500_v17, %v10498_v31 }
 0x599   : > { %v3430_v10 = vmul.f32 %v7570_v62, %v10320_v55  ;;  %v3431_v19 = vmul.f32 %v7570_v62, %v10322_v27 }
 0x59a   : > { %v10504_v2 = vpop.eup %7571  ;;  %3387 = vadd.xlane.f32.xlu2 %v3386_v23  ;;  %v10523_v23 = vadd.f32 %v10446_v18, %v9311_v58 }
 0x59b   : > { %v10506_v42 = vpop.eup %7573  ;;  %v3253_v33 = vpop.xlane.xlu1 %3252 }
 0x59c   : > { %12139 = vst [vmem:[#allocation61_spill] sm:$0xff] %v10506_v42  ;;  %v7576_v15 = vpop.eup %7575  ;;  %v3404_v16 = vadd.f32 %v10506_v42, %v10504_v2  ;;  %v3288_v54 = vsub.f32 %v10397_v34, %v3253_v33  ;;  %v3289_v38 = vsub.f32 %v10393_v41, %v3253_v33  ;;  %v3346_v34 = vmul.f32 1.442695, %v3290_v36  ;;  %v10527_v42 = vpop.f32.mrf.mxu0 }
 0x59d   : > { %v3432_v5 = vmul.f32 %v7576_v15, %v10371_v21  ;;  %v3433_v57 = vmul.f32 %v7576_v15, %v10379_v61  ;;  %12140 = vst [vmem:[#allocation63_spill] sm:$0xff] %v10527_v42  ;;  %v10529_v41 = vpop.f32.mrf.mxu3  ;;  %v3293_v61 = vsub.f32 %v10335_v28, %v3259_v48  ;;  %v3922_v21 = vmax.f32 %v10523_v23, %v10510_v8 }
 0x59e   : > { %3405 = vadd.xlane.f32.xlu0 %v3404_v16  ;;  %v3342_v55 = vmul.f32 1.442695, %v3288_v54  ;;  %v3344_v7 = vmul.f32 1.442695, %v3289_v38  ;;  %12141 = vst [vmem:[#allocation48_spill] sm:$0xff] %v10529_v41  ;;  %v10542_v48 = vadd.f32 %v10462_v14, %v9311_v58 }
 0x59f   : > { %v3460_v27 = vpack.c.bf16 %v3432_v5, %v3430_v10  ;;  %v3461_v62 = vpack.c.bf16 %v3433_v57, %v3431_v19  ;;  %v3352_v18 = vmul.f32 1.442695, %v3293_v61  ;;  %v3385_v61 = vpop.xlane.xlu2 %3384 }
 0x5a0   : > { %7577 = vpow2.f32 %v3342_v55  ;;  %v3925_v36 = vmax.f32 %v10542_v48, %v10536_v37 }
 0x5a1   : > { %3535 = vmatmul.bf16.gmra.mxu3 %v3460_v27  ;;  %3584 = vmatmul.bf16.gmra.mxu0 %v3461_v62  ;;  %7579 = vpow2.f32 %v3344_v7 }
 0x5a2   : > { %7581 = vrcp.f32 %v3376_v26  ;;  %3923 = vmax.xlane.f32.xlu2 %v3922_v21 }
 0x5a3   : > { %7583 = vpow2.f32 %v3346_v34  ;;  %v3379_v5 = vpop.xlane.xlu1 %3378 }
 0x5a4   : > { %7585 = vrcp.f32 %v3379_v5  ;;  %v2914_v6 = vpop.f32.mrf.mxu0 }
 0x5a5   : > { %7587 = vpow2.f32 %v3348_v46 }
 0x5a6   : > { %v10538_v28 = vpop.eup %7577  ;;  %7589 = vpow2.f32 %v3350_v60 }
 0x5a7   : > { %v10544_v7 = vpop.eup %7579  ;;  %7591 = vpow2.f32 %v3352_v18  ;;  %v2865_v26 = vpop.f32.mrf.mxu3 }
 0x5a8   : > { %v7582_v15 = vpop.eup %7581  ;;  %v10548_v40 = vadd.f32 %v2914_v6, %v2865_v26  ;;  %v3395_v33 = vadd.f32 %v10544_v7, %v10538_v28 }
 0x5a9   : > { %v10552_v16 = vpop.eup %7583  ;;  %v3434_v54 = vmul.f32 %v7582_v15, %v10290_v25  ;;  %v3435_v57 = vmul.f32 %v7582_v15, %v10292_v39  ;;  %v3842_v39 = vpop.f32.mrf.mxu1 }
 0x5aa   : > { %v7586_v10 = vpop.eup %7585  ;;  %3396 = vadd.xlane.f32.xlu1 %v3395_v33  ;;  %3926 = vmax.xlane.f32.xlu2 %v3925_v36  ;;  %v10576_v5 = vadd.f32 %v3842_v39, %v9311_v58 }
 0x5ab   : > { %v10554_v14 = vpop.eup %7587  ;;  %v3382_v19 = vpop.xlane.xlu1 %3381  ;;  %v3436_v38 = vmul.f32 %v7586_v10, %v10403_v3  ;;  %v3437_v29 = vmul.f32 %v7586_v10, %v10405_v50 }
 0x5ac   : > { %v10560_v55 = vpop.eup %7589  ;;  %v3398_v25 = vadd.f32 %v10554_v14, %v10552_v16  ;;  %v3891_v3 = vpop.f32.mrf.mxu2  ;;  %7593 = vrcp.f32 %v3382_v19 }
 0x5ad   : > { %v10562_v27 = vpop.eup %7591  ;;  %v3462_v62 = vpack.c.bf16 %v3436_v38, %v3434_v54  ;;  %v3463_v34 = vpack.c.bf16 %v3437_v29, %v3435_v57  ;;  %7595 = vrcp.f32 %v3385_v61  ;;  %v10571_v46 = vadd.f32 %v3891_v3, %v9314_v11 }
 0x5ae   : > { %v3401_v21 = vadd.f32 %v10562_v27, %v10560_v55 }
 0x5b1   : > { %3540 = vmatmul.bf16.gmra.mxu3 %v3462_v62  ;;  %3589 = vmatmul.bf16.gmra.mxu0 %v3463_v34  ;;  %v3845_v62 = vpop.f32.mrf.mxu1 }
 0x5b2   : > { %4187 = vrot.lane.b32.xlu0 %v12099_v30, %s8241_s13  ;;  %3402 = vadd.xlane.f32.xlu2 %v3401_v21  ;;  %v7594_v15 = vpop.eup %7593  ;;  %v3934_v30 = vmax.f32 %v10576_v5, %v10571_v46 }
 0x5b3   : > { %3399 = vadd.xlane.f32.xlu1 %v3398_v25  ;;  %v3265_v50 = vpop.xlane.xlu1 %3264  ;;  %v7596_v36 = vpop.eup %7595 }
 0x5b4   : > { %v3296_v60 = vsub.f32 %v10419_v35, %v3265_v50  ;;  %v3297_v18 = vsub.f32 %v10416_v49, %v3265_v50  ;;  %v3438_v35 = vmul.f32 %v7594_v15, %v10409_v47  ;;  %v3439_v49 = vmul.f32 %v7594_v15, %v10411_v12 }
 0x5b5   : > { %v3440_v33 = vmul.f32 %v7596_v36, %v10352_v45  ;;  %v3441_v10 = vmul.f32 %v7596_v36, %v10358_v24  ;;  %v10608_v45 = vpop.f32.mrf.mxu3 }
 0x5b6   : > { %v3358_v6 = vmul.f32 1.442695, %v3296_v60  ;;  %v3360_v26 = vmul.f32 1.442695, %v3297_v18  ;;  %12143 = vst [vmem:[#allocation64_spill] sm:$0xff] %v10608_v45  ;;  %v10630_v60 = vadd.f32 %v3845_v62, %v9311_v58 }
 0x5b7   : > { %v3464_v54 = vpack.c.bf16 %v3440_v33, %v3438_v35  ;;  %v3465_v38 = vpack.c.bf16 %v3441_v10, %v3439_v49 }
 0x5b8   : > { %7597 = vpow2.f32 %v3358_v6 }
 0x5b9   : > { %7599 = vpow2.f32 %v3360_v26 }
 0x5ba   : > { %4183 = vrot.lane.b32.xlu0 %v12102_v59, %s8241_s13 }
 0x5bb   : > { %3935 = vmax.xlane.f32.xlu1 %v3934_v30 }
 0x5be   : > { %v10586_v19 = vpop.eup %7597 }
 0x5bf   : > { %v10588_v57 = vpop.eup %7599 }
 0x5c0   : > { %v3407_v59 = vadd.f32 %v10588_v57, %v10586_v19 }
 0x5c1   : > { %3545 = vmatmul.bf16.gmra.mxu3 %v3464_v54  ;;  %3594 = vmatmul.bf16.gmra.mxu0 %v3465_v38 }
 0x5c2   : > { %4201 = vrot.lane.b32.xlu0 %v12104_v53, %s8241_s13  ;;  %v10606_v53 = vpop.f32.mrf.mxu0 }
 0x5c3   : > { %3408 = vadd.xlane.f32.xlu1 %v3407_v59  ;;  %12142 = vst [vmem:[#allocation57_spill] sm:$0xff] %v10606_v53 }
 0x5ca   : > { %4181 = vrot.lane.b32.xlu0 %v12108_v4, %s8241_s13  ;;  %4189 = vrot.lane.b32.xlu2 %v12094_v9, %s8241_s13  ;;  %v3921_v4 = vpop.xlane.xlu1 %3920 }
 0x5cb   : > { %v3967_v24 = vsub.f32 %v10429_v0, %v3921_v4  ;;  %v3968_v9 = vsub.f32 %v10426_v22, %v3921_v4  ;;  %v3847_v22 = vpop.f32.mrf.mxu1 }
 0x5cc   : > { %v10627_v39 = vadd.f32 %v3847_v22, %v9311_v58 }
 0x5cd   : > { %v4001_v29 = vmul.f32 1.442695, %v3968_v9 }
 0x5d2   : > { %4199 = vrot.lane.b32.xlu0 %v12113_v1, %s8241_s13  ;;  %4185 = vrot.lane.b32.xlu2 %v12100_v20, %s8241_s13  ;;  %v3999_v20 = vmul.f32 1.442695, %v3967_v24 }
 0x5d4   : > { %7601 = vpow2.f32 %v3999_v20  ;;  %v3391_v34 = vpop.xlane.xlu0 %3390 }
 0x5d5   : > { %7603 = vpow2.f32 %v4001_v29 }
 0x5d6   : > { %7605 = vrcp.f32 %v3391_v34 }
 0x5da   : > { %4203 = vrot.lane.b32.xlu2 %v12097_v56, %s8241_s13  ;;  %v3894_v56 = vpop.f32.mrf.mxu2 }
 0x5db   : > { %v10624_v3 = vadd.f32 %v3894_v56, %v9314_v11 }
 0x5dc   : > { %4205 = vrot.lane.b32.xlu1 %v12095_v13, %s8241_s13  ;;  %v10614_v13 = vpop.eup %7601  ;;  %v3394_v50 = vpop.xlane.xlu0 %3393 }
 0x5dd   : > { %v10616_v61 = vpop.eup %7603  ;;  %v3937_v6 = vmax.f32 %v10630_v60, %v10624_v3 }
 0x5de   : > { %v4063_v0 = vadd.f32 %v10616_v61, %v10614_v13  ;;  %v7606_v30 = vpop.eup %7605 }
 0x5df   : > { %v3444_v54 = vmul.f32 %v7606_v30, %v10452_v44  ;;  %v3445_v59 = vmul.f32 %v7606_v30, %v10456_v43  ;;  %v12144_v43 = vld [vmem:[#allocation51_spill] sm:$0xff] }
 0x5e2   : > { %v3896_v21 = vpop.f32.mrf.mxu2 }
 0x5e3   : > { %v3531_v47 = vpop.f32.mrf.mxu3  ;;  %v10621_v25 = vadd.f32 %v3896_v21, %v9314_v11 }
 0x5e4   : > { %v10636_v26 = vpop.xlane.xlu0 %3929 }
 0x5e5   : > { %v3940_v18 = vmax.f32 %v10627_v39, %v10621_v25 }
 0x5e9   : > { %v3580_v1 = vpop.f32.mrf.mxu0 }
 0x5ea   : > { %v10612_v12 = vadd.f32 %v3580_v1, %v3531_v47 }
 0x5ec   : > { %v10640_v36 = vpop.xlane.xlu0 %3932 }
 0x5f1   : > { %v10642_v49 = vpop.f32.mrf.mxu0 }
 0x5fc   : > { %4064 = vadd.xlane.f32.xlu0 %v4063_v0  ;;  %v12146_v0 = vld [vmem:[#allocation53_spill] sm:$0xff] }
 0x603   : > { %3941 = vmax.xlane.f32.xlu2 %v3940_v18 }
 0x606   : > { %3938 = vmax.xlane.f32.xlu1 %v3937_v6 }
 0x60d   : > { %v3388_v15 = vpop.xlane.xlu2 %3387 }
 0x60e   : > { %7607 = vrcp.f32 %v3388_v15 }
 0x610   : > { %4195 = vrot.lane.b32.xlu0 %v12119_v63, %s8241_s13 }
 0x611   : > { %v10654_v44 = vpop.xlane.xlu0 %3405 }
 0x614   : > { %v7608_v35 = vpop.eup %7607 }
 0x615   : > { %v3924_v33 = vpop.xlane.xlu2 %3923  ;;  %v3442_v10 = vmul.f32 %v7608_v35, %v10498_v31  ;;  %v3443_v38 = vmul.f32 %v7608_v35, %v10500_v17  ;;  %v10652_v31 = vpop.f32.mrf.mxu3 }
 0x616   : > { %v3969_v4 = vsub.f32 %v10523_v23, %v3924_v33  ;;  %v3970_v24 = vsub.f32 %v10510_v8, %v3924_v33  ;;  %v12145_v23 = vld [vmem:[#allocation79_spill] sm:$0xff] }
 0x617   : > { %v3466_v63 = vpack.c.bf16 %v3444_v54, %v3442_v10  ;;  %v3467_v9 = vpack.c.bf16 %v3445_v59, %v3443_v38 }
 0x618   : > { %4193 = vrot.lane.b32.xlu0 %v12115_v52, %s8241_s13  ;;  %v4003_v47 = vmul.f32 1.442695, %v3969_v4  ;;  %v4005_v1 = vmul.f32 1.442695, %v3970_v24  ;;  %v12147_v4 = vld [vmem:[#allocation49_spill] sm:$0xff] }
 0x619   : > { %3550 = vmatmul.bf16.gmra.mxu3 %v3466_v63  ;;  %3599 = vmatmul.bf16.gmra.mxu0 %v3467_v9 }
 0x61a   : > { %7609 = vpow2.f32 %v4003_v47 }
 0x61b   : > { %7611 = vpow2.f32 %v4005_v1  ;;  %4179 = vrot.lane.b32.xlu2 %v12144_v43, %s8241_s13 }
 0x61c   : > { %7613 = vrcp.f32 %v3394_v50 }
 0x61d   : > { %v3397_v17 = vpop.xlane.xlu1 %3396  ;;  %v3927_v52 = vpop.xlane.xlu2 %3926 }
 0x61e   : > { %v3585_v8 = vpop.f32.mrf.mxu0  ;;  %7615 = vrcp.f32 %v3397_v17 }
 0x620   : > { %4191 = vrot.lane.b32.xlu0 %v12145_v23, %s8241_s13  ;;  %v10660_v20 = vpop.eup %7609 }
 0x621   : > { %v10662_v29 = vpop.eup %7611 }
 0x622   : > { %v7614_v56 = vpop.eup %7613  ;;  %v4066_v62 = vadd.f32 %v10662_v29, %v10660_v20 }
 0x623   : > { %4177 = vrot.lane.b32.xlu2 %v12146_v0, %s8241_s13  ;;  %v3446_v15 = vmul.f32 %v7614_v56, %v10468_v32  ;;  %v3447_v35 = vmul.f32 %v7614_v56, %v10470_v51  ;;  %v3971_v56 = vsub.f32 %v10542_v48, %v3927_v52  ;;  %v3899_v48 = vpop.f32.mrf.mxu2 }
 0x624   : > { %v4188_v34 = vpop.permute.xlu0 %4187  ;;  %v3536_v21 = vpop.f32.mrf.mxu3  ;;  %4067 = vadd.xlane.f32.xlu1 %v4066_v62  ;;  %v3972_v62 = vsub.f32 %v10536_v37, %v3927_v52  ;;  %v12148_v37 = vld [vmem:[#allocation71_spill] sm:$0xff] }
 0x625   : > { %v7616_v22 = vpop.eup %7615  ;;  %v10668_v50 = vadd.f32 %v3585_v8, %v3536_v21  ;;  %v3403_v10 = vpop.xlane.xlu2 %3402 }
 0x626   : > { %v10670_v18 = vpop.f32.mrf.mxu0  ;;  %v3400_v6 = vpop.xlane.xlu1 %3399  ;;  %v3448_v30 = vmul.f32 %v7616_v22, %v10538_v28  ;;  %v3449_v33 = vmul.f32 %v7616_v22, %v10544_v7 }
 0x627   : > { %7617 = vrcp.f32 %v3400_v6  ;;  %v4007_v6 = vmul.f32 1.442695, %v3971_v56  ;;  %v3850_v52 = vpop.f32.mrf.mxu1 }
 0x628   : > { %v3468_v54 = vpack.c.bf16 %v3448_v30, %v3446_v15  ;;  %v3469_v38 = vpack.c.bf16 %v3449_v33, %v3447_v35  ;;  %7619 = vrcp.f32 %v3403_v10 }
 0x62a   : > { %3555 = vmatmul.bf16.gmra.mxu3 %v3468_v54  ;;  %3604 = vmatmul.bf16.gmra.mxu0 %v3469_v38 }
 0x62b   : > { %4175 = vrot.lane.b32.xlu2 %v12147_v4, %s8241_s13 }
 0x62c   : > { %v4184_v59 = vpop.permute.xlu0 %4183  ;;  %v10678_v24 = vpop.f32.mrf.mxu3 }
 0x62d   : > { %v4190_v28 = vpop.permute.xlu2 %4189  ;;  %v7618_v63 = vpop.eup %7617 }
 0x62e   : > { %v10680_v32 = vpop.xlane.xlu1 %3935  ;;  %v3590_v51 = vpop.f32.mrf.mxu0  ;;  %4223 = vmatpush.bf16.msrb.mxu3 %v4190_v28  ;;  %v3450_v47 = vmul.f32 %v7618_v63, %v10552_v16  ;;  %v3451_v43 = vmul.f32 %v7618_v63, %v10554_v14  ;;  %v4009_v14 = vmul.f32 1.442695, %v3972_v62  ;;  %v12149_v28 = vld [vmem:[#allocation61_spill] sm:$0xff] }
 0x62f   : > { %v7620_v7 = vpop.eup %7619 }
 0x630   : > { %v3452_v1 = vmul.f32 %v7620_v7, %v10560_v55  ;;  %v3453_v17 = vmul.f32 %v7620_v7, %v10562_v27 }
 0x632   : > { %4224 = vmatpush.bf16.msrb.mxu3 %v4188_v34  ;;  %v3470_v34 = vpack.c.bf16 %v3452_v1, %v3450_v47  ;;  %v3471_v22 = vpack.c.bf16 %v3453_v17, %v3451_v43  ;;  %v3852_v1 = vpop.f32.mrf.mxu1  ;;  %v12150_v17 = vld [vmem:[#allocation44_spill] sm:$0xff] }
 0x633   : > { %v3975_v56 = vsub.f32 %v12150_v17, %v10640_v36 }
 0x634   : > { %v3541_v9 = vpop.f32.mrf.mxu3  ;;  %v4202_v8 = vpop.permute.xlu0 %4201 }
 0x635   : > { %v10686_v23 = vadd.f32 %v3590_v51, %v3541_v9  ;;  %v4186_v0 = vpop.permute.xlu2 %4185  ;;  %v3901_v51 = vpop.f32.mrf.mxu2 }
 0x636   : > { %v3409_v21 = vpop.xlane.xlu1 %3408  ;;  %4225 = vmatpush.bf16.msrb.mxu3 %v4186_v0  ;;  %v10690_v16 = vpop.f32.mrf.mxu0  ;;  %v10710_v43 = vadd.f32 %v3901_v51, %v9314_v11  ;;  %v12151_v0 = vld [vmem:[#allocation76_spill] sm:$0xff] }
 0x637   : > { %7621 = vrcp.f32 %v3409_v21  ;;  %v3976_v21 = vsub.f32 %v12151_v0, %v10640_v36  ;;  %v3978_v0 = vsub.f32 %v10571_v46, %v10680_v32 }
 0x638   : > { %7623 = vrcp.f32 %v10654_v44 }
 0x639   : > { %7625 = vpow2.f32 %v4007_v6  ;;  %v4015_v6 = vmul.f32 1.442695, %v3975_v56 }
 0x63a   : > { %3560 = vmatmul.bf16.gmra.mxu3 %v3470_v34  ;;  %3609 = vmatmul.bf16.gmra.mxu0 %v3471_v22  ;;  %7627 = vpow2.f32 %v4009_v14  ;;  %v3855_v62 = vpop.f32.mrf.mxu1  ;;  %v4017_v14 = vmul.f32 1.442695, %v3976_v21 }
 0x63b   : > { %4226 = vmatpush.bf16.msrb.mxu3 %v4184_v59  ;;  %7629 = vpow2.f32 %v4015_v6 }
 0x63c   : > { %v10692_v55 = vpop.f32.mrf.mxu3  ;;  %v4182_v27 = vpop.permute.xlu0 %4181  ;;  %7631 = vpow2.f32 %v4017_v14 }
 0x63d   : > { %4197 = vrot.lane.b32.xlu1 %v12148_v37, %s8241_s13  ;;  %v7622_v15 = vpop.eup %7621  ;;  %v4204_v34 = vpop.permute.xlu2 %4203 }
 0x63e   : > { %v7624_v30 = vpop.eup %7623  ;;  %v3595_v33 = vpop.f32.mrf.mxu0  ;;  %v3456_v54 = vmul.f32 %v7622_v15, %v10586_v19  ;;  %v3457_v59 = vmul.f32 %v7622_v15, %v10588_v57 }
 0x63f   : > { %4227 = vmatpush.bf16.msrb.mxu3 %v4182_v27  ;;  %v10697_v35 = vpop.eup %7625  ;;  %v3454_v4 = vmul.f32 %v7624_v30, %v10504_v2  ;;  %v3455_v63 = vmul.f32 %v7624_v30, %v12149_v28  ;;  %v3904_v57 = vpop.f32.mrf.mxu2  ;;  %v10713_v2 = vadd.f32 %v3852_v1, %v9311_v58  ;;  %v10725_v27 = vadd.f32 %v3855_v62, %v9311_v58 }
 0x640   : > { %v10700_v38 = vpop.eup %7627  ;;  %v10722_v37 = vadd.f32 %v3904_v57, %v9314_v11  ;;  %v3977_v62 = vsub.f32 %v10576_v5, %v10680_v32 }
 0x641   : > { %v4069_v7 = vadd.f32 %v10700_v38, %v10697_v35  ;;  %v3472_v9 = vpack.c.bf16 %v3456_v54, %v3454_v4  ;;  %v3473_v47 = vpack.c.bf16 %v3457_v59, %v3455_v63  ;;  %v3946_v22 = vmax.f32 %v10713_v2, %v10710_v43  ;;  %v12153_v59 = vld [vmem:[#allocation65_spill] sm:$0xff] }
 0x642   : > { %v3949_v36 = vmax.f32 %v10725_v27, %v10722_v37  ;;  %v3974_v4 = vsub.f32 %v12153_v59, %v10636_v26 }
 0x644   : > { %v3546_v10 = vpop.f32.mrf.mxu3  ;;  %v4200_v30 = vpop.permute.xlu0 %4199  ;;  %v4013_v51 = vmul.f32 1.442695, %v3974_v4 }
 0x645   : > { %v10702_v44 = vadd.f32 %v3595_v33, %v3546_v10  ;;  %v3857_v33 = vpop.f32.mrf.mxu1  ;;  %v12152_v10 = vld [vmem:[#allocation77_spill] sm:$0xff] }
 0x646   : > { %v3973_v54 = vsub.f32 %v12152_v10, %v10636_v26  ;;  %v10769_v14 = vadd.f32 %v3857_v33, %v9311_v58 }
 0x647   : > { %v3906_v15 = vpop.f32.mrf.mxu2 }
 0x648   : > { %v4011_v63 = vmul.f32 1.442695, %v3973_v54  ;;  %v10766_v6 = vadd.f32 %v3906_v15, %v9314_v11 }
 0x64a   : > { %4070 = vadd.xlane.f32.xlu0 %v4069_v7  ;;  %3565 = vmatmul.bf16.gmra.mxu3 %v3472_v9  ;;  %v10738_v7 = vadd.f32 %v3899_v48, %v9314_v11  ;;  %7633 = vpow2.f32 %v4011_v63  ;;  %v3952_v5 = vmax.f32 %v10769_v14, %v10766_v6 }
 0x64b   : > { %3614 = vmatmul.bf16.gmra.mxu0 %v3473_v47  ;;  %v10743_v47 = vadd.f32 %v3850_v52, %v9311_v58  ;;  %7635 = vpow2.f32 %v4013_v51 }
 0x64d   : > { %v3943_v26 = vmax.f32 %v10743_v47, %v10738_v7 }
 0x64e   : > { %v4206_v19 = vpop.permute.xlu1 %4205 }
 0x64f   : > { %4272 = vmatpush.bf16.msrb.mxu0 %v4206_v19  ;;  %v3909_v1 = vpop.f32.mrf.mxu2  ;;  %v3860_v19 = vpop.f32.mrf.mxu1 }
 0x650   : > { %v10748_v57 = vadd.f32 %v3909_v1, %v9314_v11  ;;  %v10751_v48 = vadd.f32 %v3860_v19, %v9311_v58 }
 0x652   : > { %v3955_v52 = vmax.f32 %v10751_v48, %v10748_v57 }
 0x653   : > { %4273 = vmatpush.bf16.msrb.mxu0 %v4204_v34  ;;  %v4019_v34 = vmul.f32 1.442695, %v3977_v62 }
 0x654   : > { %3947 = vmax.xlane.f32.xlu2 %v3946_v22  ;;  %v4021_v22 = vmul.f32 1.442695, %v3978_v0 }
 0x655   : > { %7637 = vpow2.f32 %v4019_v34 }
 0x656   : > { %7639 = vpow2.f32 %v4021_v22 }
 0x657   : > { %4274 = vmatpush.bf16.msrb.mxu0 %v4202_v8  ;;  %v10733_v8 = vpop.eup %7629  ;;  %v3862_v46 = vpop.f32.mrf.mxu1 }
 0x658   : > { %v10735_v28 = vpop.eup %7631  ;;  %v10793_v0 = vadd.f32 %v3862_v46, %v9311_v58 }
 0x659   : > { %v4075_v9 = vadd.f32 %v10735_v28, %v10733_v8  ;;  %v10753_v17 = vpop.eup %7633 }
 0x65a   : > { %v10755_v56 = vpop.eup %7635 }
 0x65b   : > { %4275 = vmatpush.bf16.msrb.mxu0 %v4200_v30  ;;  %v4072_v21 = vadd.f32 %v10755_v56, %v10753_v17  ;;  %v3911_v30 = vpop.f32.mrf.mxu2  ;;  %v10775_v59 = vpop.eup %7637 }
 0x65c   : > { %3950 = vmax.xlane.f32.xlu2 %v3949_v36  ;;  %v10779_v51 = vpop.eup %7639 }
 0x664   : > { %4076 = vadd.xlane.f32.xlu2 %v4075_v9 }
 0x667   : > { %3944 = vmax.xlane.f32.xlu1 %v3943_v26  ;;  %v3914_v26 = vpop.f32.mrf.mxu2 }
 0x668   : > { %v10804_v46 = vadd.f32 %v3914_v26, %v9314_v11 }
 0x66c   : > { %3956 = vmax.xlane.f32.xlu2 %v3955_v52 }
 0x66f   : > { %4073 = vadd.xlane.f32.xlu1 %v4072_v21 }
 0x676   : > { %v3942_v32 = vpop.xlane.xlu2 %3941 }
 0x677   : > { %3953 = vmax.xlane.f32.xlu1 %v3952_v5  ;;  %v3981_v36 = vsub.f32 %v10627_v39, %v3942_v32  ;;  %v3982_v10 = vsub.f32 %v10621_v25, %v3942_v32  ;;  %v4078_v25 = vadd.f32 %v10779_v51, %v10775_v59  ;;  %v3865_v39 = vpop.f32.mrf.mxu1  ;;  %v3916_v5 = vpop.f32.mrf.mxu2 }
 0x679   : > { %v3939_v54 = vpop.xlane.xlu1 %3938  ;;  %v4027_v15 = vmul.f32 1.442695, %v3981_v36  ;;  %v4029_v4 = vmul.f32 1.442695, %v3982_v10  ;;  %v10807_v10 = vadd.f32 %v3916_v5, %v9314_v11 }
 0x67a   : > { %v3979_v33 = vsub.f32 %v10630_v60, %v3939_v54  ;;  %v3980_v63 = vsub.f32 %v10624_v3, %v3939_v54  ;;  %v10786_v3 = vadd.f32 %v3911_v30, %v9314_v11  ;;  %v10810_v54 = vadd.f32 %v3865_v39, %v9311_v58  ;;  %v4065_v11 = vpop.xlane.xlu0 %4064 }
 0x67b   : > { %7641 = vpow2.f32 %v4027_v15 }
 0x67c   : > { %v4023_v9 = vmul.f32 1.442695, %v3979_v33  ;;  %v4025_v1 = vmul.f32 1.442695, %v3980_v63  ;;  %7643 = vpow2.f32 %v4029_v4  ;;  %v3958_v22 = vmax.f32 %v10793_v0, %v10786_v3  ;;  %v10819_v63 = vpop.f32.mrf.mxu0 }
 0x67d   : > { %v3961_v4 = vmax.f32 %v10810_v54, %v10804_v46 }
 0x67e   : > { %7645 = vpow2.f32 %v4023_v9  ;;  %v4180_v19 = vpop.permute.xlu2 %4179 }
 0x67f   : > { %7647 = vpow2.f32 %v4025_v1  ;;  %4079 = vadd.xlane.f32.xlu1 %v4078_v25  ;;  %4228 = vmatpush.bf16.msrb.mxu3 %v4180_v19  ;;  %v3867_v36 = vpop.f32.mrf.mxu1  ;;  %v10821_v1 = vpop.f32.mrf.mxu3 }
 0x680   : > { %v10813_v15 = vadd.f32 %v3867_v36, %v9311_v58  ;;  %7649 = vrcp.f32 %v4065_v11 }
 0x681   : > { %v10783_v52 = vpop.eup %7641 }
 0x682   : > { %v10788_v60 = vpop.eup %7643  ;;  %v3964_v33 = vmax.f32 %v10813_v15, %v10807_v10 }
 0x683   : > { %v4084_v21 = vadd.f32 %v10788_v60, %v10783_v52 }
 0x684   : > { %v10790_v62 = vpop.eup %7645 }
 0x685   : > { %v10797_v34 = vpop.eup %7647  ;;  %4085 = vadd.xlane.f32.xlu2 %v4084_v21 }
 0x686   : > { %v4081_v30 = vadd.f32 %v10797_v34, %v10790_v62  ;;  %v4178_v32 = vpop.permute.xlu2 %4177  ;;  %v7650_v58 = vpop.eup %7649 }
 0x687   : > { %3959 = vmax.xlane.f32.xlu1 %v3958_v22  ;;  %4229 = vmatpush.bf16.msrb.mxu3 %v4178_v32 }
 0x688   : > { %4082 = vadd.xlane.f32.xlu0 %v4081_v30  ;;  %v4127_v30 = vmul.f32 %v7650_v58, %v10614_v13 }
 0x68e   : > { %v4176_v9 = vpop.permute.xlu2 %4175 }
 0x68f   : > { %3962 = vmax.xlane.f32.xlu1 %v3961_v4  ;;  %4230 = vmatpush.bf16.msrb.mxu3 %v4176_v9 }
 0x690   : > { %3965 = vmax.xlane.f32.xlu0 %v3964_v33  ;;  %v4196_v33 = vpop.permute.xlu0 %4195 }
 0x696   : > { %v3600_v26 = vpop.f32.mrf.mxu0 }
 0x697   : > { %v4068_v25 = vpop.xlane.xlu1 %4067 }
 0x698   : > { %7651 = vrcp.f32 %v4068_v25 }
 0x69c   : > { %v3551_v39 = vpop.f32.mrf.mxu3 }
 0x69d   : > { %v10823_v19 = vadd.f32 %v3600_v26, %v3551_v39  ;;  %v4194_v39 = vpop.permute.xlu0 %4193 }
 0x69e   : > { %v7652_v21 = vpop.eup %7651  ;;  %v10825_v22 = vpop.f32.mrf.mxu0 }
 0x69f   : > { %v4129_v5 = vmul.f32 %v7652_v21, %v10660_v20  ;;  %v4130_v20 = vmul.f32 %v7652_v21, %v10662_v29 }
 0x6a1   : > { %v4159_v32 = vpack.c.bf16 %v4129_v5, %v4127_v30  ;;  %v4128_v30 = vmul.f32 %v7650_v58, %v10616_v61 }
 0x6a3   : > { %4231 = vmatmul.bf16.vlgmr.msrb.gmra.mxu3 %v4159_v32  ;;  %v4160_v45 = vpack.c.bf16 %v4130_v20, %v4128_v30 }
 0x6a4   : > { %v10829_v36 = vpop.f32.mrf.mxu3 }
 0x6a5   : > { %v4192_v5 = vpop.permute.xlu0 %4191 }
 0x6a7   : > { %v3605_v4 = vpop.f32.mrf.mxu0 }
 0x6ad   : > { %v3556_v9 = vpop.f32.mrf.mxu3 }
 0x6ae   : > { %v10831_v11 = vadd.f32 %v3605_v4, %v3556_v9 }
 0x6af   : > { %v10833_v25 = vpop.f32.mrf.mxu0  ;;  %v4198_v26 = vpop.permute.xlu1 %4197 }
 0x6b0   : > { %4276 = vmatpush.bf16.msrb.mxu0 %v4198_v26 }
 0x6b4   : > { %4277 = vmatpush.bf16.msrb.mxu0 %v4196_v33 }
 0x6b5   : > { %v10835_v53 = vpop.f32.mrf.mxu3 }
 0x6b7   : > { %v3610_v13 = vpop.f32.mrf.mxu0 }
 0x6b8   : > { %4278 = vmatpush.bf16.msrb.mxu0 %v4194_v39 }
 0x6bc   : > { %4279 = vmatpush.bf16.msrb.mxu0 %v4192_v5 }
 0x6bd   : > { %v3561_v32 = vpop.f32.mrf.mxu3 }
 0x6be   : > { %v10839_v4 = vadd.f32 %v3610_v13, %v3561_v32 }
 0x6bf   : > { %4280 = vmatmul.bf16.vlgmr.msrb.gmra.mxu0 %v4160_v45  ;;  %v10841_v9 = vpop.f32.mrf.mxu0 }
 0x6c0   : > { %12154 = vst [vmem:[#allocation74_spill] sm:$0xff] %v10839_v4 }
 0x6c5   : > { %v10843_v26 = vpop.f32.mrf.mxu3 }
 0x6c7   : > { %v3948_v33 = vpop.xlane.xlu2 %3947 }
 0x6c8   : > { %v3985_v42 = vsub.f32 %v10713_v2, %v3948_v33  ;;  %v3986_v39 = vsub.f32 %v10710_v43, %v3948_v33  ;;  %v3615_v21 = vpop.f32.mrf.mxu0 }
 0x6ca   : > { %v4035_v41 = vmul.f32 1.442695, %v3985_v42  ;;  %v4037_v29 = vmul.f32 1.442695, %v3986_v39 }
 0x6cc   : > { %7653 = vpow2.f32 %v4035_v41 }
 0x6cd   : > { %v3566_v61 = vpop.f32.mrf.mxu3  ;;  %7655 = vpow2.f32 %v4037_v29 }
 0x6ce   : > { %v10847_v58 = vadd.f32 %v3615_v21, %v3566_v61 }
 0x6cf   : > { %v3951_v13 = vpop.xlane.xlu2 %3950 }
 0x6d0   : > { %12155 = vst [vmem:[#allocation59_spill] sm:$0xff] %v10847_v58  ;;  %v3987_v45 = vsub.f32 %v10725_v27, %v3951_v13  ;;  %v3988_v20 = vsub.f32 %v10722_v37, %v3951_v13  ;;  %v4071_v13 = vpop.xlane.xlu0 %4070 }
 0x6d2   : > { %v10851_v30 = vpop.eup %7653  ;;  %v4039_v5 = vmul.f32 1.442695, %v3987_v45  ;;  %v4041_v32 = vmul.f32 1.442695, %v3988_v20 }
 0x6d3   : > { %v10853_v2 = vpop.eup %7655 }
 0x6d4   : > { %7657 = vpow2.f32 %v4039_v5  ;;  %v4090_v42 = vadd.f32 %v10853_v2, %v10851_v30 }
 0x6d5   : > { %7659 = vpow2.f32 %v4041_v32 }
 0x6d6   : > { %4091 = vadd.xlane.f32.xlu1 %v4090_v42 }
 0x6d7   : > { %v4077_v41 = vpop.xlane.xlu2 %4076 }
 0x6da   : > { %v10857_v43 = vpop.eup %7657  ;;  %v3945_v33 = vpop.xlane.xlu1 %3944 }
 0x6db   : > { %v10859_v39 = vpop.eup %7659  ;;  %v3983_v37 = vsub.f32 %v10743_v47, %v3945_v33  ;;  %v3984_v27 = vsub.f32 %v10738_v7, %v3945_v33 }
 0x6dc   : > { %v4093_v29 = vadd.f32 %v10859_v39, %v10857_v43 }
 0x6dd   : > { %v4031_v21 = vmul.f32 1.442695, %v3983_v37  ;;  %v4033_v61 = vmul.f32 1.442695, %v3984_v27 }
 0x6de   : > { %4094 = vadd.xlane.f32.xlu0 %v4093_v29 }
 0x6df   : > { %7661 = vpow2.f32 %v4031_v21  ;;  %v3957_v45 = vpop.xlane.xlu2 %3956 }
 0x6e0   : > { %7663 = vpow2.f32 %v4033_v61  ;;  %v3991_v20 = vsub.f32 %v10751_v48, %v3957_v45  ;;  %v3992_v5 = vsub.f32 %v10748_v57, %v3957_v45 }
 0x6e1   : > { %7665 = vrcp.f32 %v4071_v13 }
 0x6e2   : > { %v4047_v32 = vmul.f32 1.442695, %v3991_v20  ;;  %v4049_v42 = vmul.f32 1.442695, %v3992_v5  ;;  %v4074_v47 = vpop.xlane.xlu1 %4073 }
 0x6e3   : > { %7667 = vrcp.f32 %v4074_v47 }
 0x6e4   : > { %7669 = vpow2.f32 %v4047_v32 }
 0x6e5   : > { %v10867_v7 = vpop.eup %7661  ;;  %7671 = vpow2.f32 %v4049_v42 }
 0x6e6   : > { %v10869_v33 = vpop.eup %7663 }
 0x6e7   : > { %v7666_v37 = vpop.eup %7665  ;;  %v4087_v27 = vadd.f32 %v10869_v33, %v10867_v7 }
 0x6e8   : > { %v4131_v21 = vmul.f32 %v7666_v37, %v10697_v35  ;;  %v4132_v13 = vmul.f32 %v7666_v37, %v10700_v38 }
 0x6e9   : > { %v7668_v29 = vpop.eup %7667  ;;  %4088 = vadd.xlane.f32.xlu2 %v4087_v27 }
 0x6ea   : > { %v10873_v48 = vpop.eup %7669  ;;  %v3954_v57 = vpop.xlane.xlu1 %3953  ;;  %v4133_v61 = vmul.f32 %v7668_v29, %v10753_v17  ;;  %v4134_v45 = vmul.f32 %v7668_v29, %v10755_v56 }
 0x6eb   : > { %v10879_v20 = vpop.eup %7671  ;;  %v3989_v5 = vsub.f32 %v10769_v14, %v3954_v57  ;;  %v3990_v32 = vsub.f32 %v10766_v6, %v3954_v57 }
 0x6ec   : > { %v4161_v42 = vpack.c.bf16 %v4133_v61, %v4131_v21  ;;  %v4162_v47 = vpack.c.bf16 %v4134_v45, %v4132_v13  ;;  %v4099_v27 = vadd.f32 %v10879_v20, %v10873_v48 }
 0x6ed   : > { %v4043_v58 = vmul.f32 1.442695, %v3989_v5  ;;  %v4045_v4 = vmul.f32 1.442695, %v3990_v32 }
 0x6ee   : > { %4236 = vmatmul.bf16.gmra.mxu3 %v4161_v42  ;;  %4285 = vmatmul.bf16.gmra.mxu0 %v4162_v47 }
 0x6ef   : > { %7673 = vpow2.f32 %v4043_v58  ;;  %4100 = vadd.xlane.f32.xlu1 %v4099_v27 }
 0x6f0   : > { %7675 = vpow2.f32 %v4045_v4 }
 0x6f1   : > { %7677 = vrcp.f32 %v4077_v41 }
 0x6f2   : > { %v4080_v35 = vpop.xlane.xlu1 %4079 }
 0x6f3   : > { %7679 = vrcp.f32 %v4080_v35 }
 0x6f5   : > { %v10885_v38 = vpop.eup %7673 }
 0x6f6   : > { %v10887_v17 = vpop.eup %7675 }
 0x6f7   : > { %v7678_v56 = vpop.eup %7677  ;;  %v4096_v6 = vadd.f32 %v10887_v17, %v10885_v38 }
 0x6f8   : > { %v4135_v57 = vmul.f32 %v7678_v56, %v10733_v8  ;;  %v4136_v4 = vmul.f32 %v7678_v56, %v10735_v28  ;;  %v4086_v42 = vpop.xlane.xlu2 %4085 }
 0x6f9   : > { %v7680_v14 = vpop.eup %7679  ;;  %4097 = vadd.xlane.f32.xlu2 %v4096_v6 }
 0x6fa   : > { %v3960_v37 = vpop.xlane.xlu1 %3959  ;;  %v4137_v58 = vmul.f32 %v7680_v14, %v10775_v59  ;;  %v4138_v41 = vmul.f32 %v7680_v14, %v10779_v51 }
 0x6fb   : > { %v4083_v29 = vpop.xlane.xlu0 %4082  ;;  %v3993_v21 = vsub.f32 %v10793_v0, %v3960_v37  ;;  %v3994_v61 = vsub.f32 %v10786_v3, %v3960_v37 }
 0x6fc   : > { %v4163_v13 = vpack.c.bf16 %v4137_v58, %v4135_v57  ;;  %v4164_v45 = vpack.c.bf16 %v4138_v41, %v4136_v4  ;;  %7681 = vrcp.f32 %v4083_v29 }
 0x6fd   : > { %v4051_v5 = vmul.f32 1.442695, %v3993_v21  ;;  %v4053_v32 = vmul.f32 1.442695, %v3994_v61 }
 0x6fe   : > { %4241 = vmatmul.bf16.gmra.mxu3 %v4163_v13  ;;  %4290 = vmatmul.bf16.gmra.mxu0 %v4164_v45  ;;  %v3583_v13 = vadd.f32 %v10642_v49, %v10652_v31  ;;  %v12157_v45 = vld [vmem:[#allocation42_spill] sm:$0xff]  ;;  %v3588_v49 = vadd.f32 %v10670_v18, %v10678_v24  ;;  %v3593_v18 = vadd.f32 %v10690_v16, %v10692_v55  ;;  %v12163_v24 = vld [vmem:[#allocation52_spill] sm:$0xff] }
 0x6ff   : > { %7683 = vpow2.f32 %v4051_v5  ;;  %v12158_v5 = vld [vmem:[#allocation41_spill] sm:$0xff]  ;;  %v12164_v16 = vld [vmem:[#allocation66_spill] sm:$0xff] }
 0x700   : > { %7685 = vpow2.f32 %v4053_v32  ;;  %v2882_v32 = vadd.f32 %v12158_v5, %v12157_v45  ;;  %v12165_v45 = vld [vmem:[#allocation73_spill] sm:$0xff] }
 0x701   : > { %7687 = vrcp.f32 %v4086_v42  ;;  %v10933_v42 = vpop.f32.mrf.mxu3 }
 0x702   : > { %v3963_v8 = vpop.xlane.xlu1 %3962  ;;  %v7682_v47 = vpop.eup %7681 }
 0x703   : > { %v3966_v59 = vpop.xlane.xlu0 %3965  ;;  %v3995_v28 = vsub.f32 %v10810_v54, %v3963_v8  ;;  %v3996_v51 = vsub.f32 %v10804_v46, %v3963_v8  ;;  %v4139_v46 = vmul.f32 %v7682_v47, %v10790_v62  ;;  %v10935_v8 = vpop.f32.mrf.mxu0 }
 0x704   : > { %v3997_v0 = vsub.f32 %v10813_v15, %v3966_v59  ;;  %v3998_v3 = vsub.f32 %v10807_v10, %v3966_v59  ;;  %v4140_v15 = vmul.f32 %v7682_v47, %v10797_v34  ;;  %v12159_v59 = vld [vmem:[#allocation47_spill] sm:$0xff] }
 0x705   : > { %v10901_v27 = vpop.eup %7683  ;;  %v4055_v35 = vmul.f32 1.442695, %v3995_v28  ;;  %v4057_v56 = vmul.f32 1.442695, %v3996_v51  ;;  %v12161_v47 = vld [vmem:[#allocation67_spill] sm:$0xff] }
 0x706   : > { %v4059_v6 = vmul.f32 1.442695, %v3997_v0  ;;  %v10903_v14 = vpop.eup %7685  ;;  %v4061_v37 = vmul.f32 1.442695, %v3998_v3 }
 0x707   : > { %v7688_v29 = vpop.eup %7687  ;;  %7689 = vpow2.f32 %v4055_v35  ;;  %v4102_v54 = vadd.f32 %v10903_v14, %v10901_v27  ;;  %v12162_v35 = vld [vmem:[#allocation58_spill] sm:$0xff] }
 0x708   : > { %7691 = vpow2.f32 %v4057_v56  ;;  %v4141_v10 = vmul.f32 %v7688_v29, %v10783_v52  ;;  %v4142_v57 = vmul.f32 %v7688_v29, %v10788_v60  ;;  %v12156_v60 = vld [vmem:[#allocation54_spill] sm:$0xff]  ;;  %v2887_v56 = vadd.f32 %v12162_v35, %v12161_v47 }
 0x709   : > { %7693 = vpow2.f32 %v4059_v6  ;;  %4103 = vadd.xlane.f32.xlu0 %v4102_v54  ;;  %v3598_v29 = vadd.f32 %v10819_v63, %v10821_v1 }
 0x70a   : > { %7695 = vpow2.f32 %v4061_v37  ;;  %v4165_v58 = vpack.c.bf16 %v4141_v10, %v4139_v46  ;;  %v4166_v4 = vpack.c.bf16 %v4142_v57, %v4140_v15 }
 0x70d   : > { %v10911_v41 = vpop.eup %7689 }
 0x70e   : > { %v10913_v21 = vpop.eup %7691  ;;  %4246 = vmatmul.bf16.gmra.mxu3 %v4165_v58  ;;  %4295 = vmatmul.bf16.gmra.mxu0 %v4166_v4  ;;  %v3603_v4 = vadd.f32 %v10825_v22, %v10829_v36 }
 0x70f   : > { %v10915_v61 = vpop.eup %7693  ;;  %v4105_v62 = vadd.f32 %v10913_v21, %v10911_v41 }
 0x710   : > { %v10919_v34 = vpop.eup %7695 }
 0x711   : > { %4106 = vadd.xlane.f32.xlu2 %v4105_v62  ;;  %v4108_v52 = vadd.f32 %v10919_v34, %v10915_v61 }
 0x713   : > { %4109 = vadd.xlane.f32.xlu1 %v4108_v52 }
 0x71d   : > { %2935 = vrot.lane.b32.xlu0 %v12156_v60, %s8241_s13 }
 0x725   : > { %3638 = vrot.lane.b32.xlu0 %v3583_v13, %s8239_s6 }
 0x726   : > { %v4232_v31 = vpop.f32.mrf.mxu3 }
 0x729   : > { %2937 = vrot.lane.b32.xlu2 %v2882_v32, %s8241_s13 }
 0x72c   : > { %3636 = vrot.lane.b32.xlu1 %v10612_v12, %s8239_s6  ;;  %v12160_v12 = vld [vmem:[#allocation75_spill] sm:$0xff] }
 0x72e   : > { %v4234_v0 = vpop.f32.mrf.mxu3 }
 0x734   : > { %2939 = vrot.lane.b32.xlu1 %v12159_v59, %s8241_s13 }
 0x73c   : > { %3642 = vrot.lane.b32.xlu1 %v3588_v49, %s8239_s6  ;;  %v4281_v28 = vpop.f32.mrf.mxu0 }
 0x73d   : > { %v4282_v51 = vadd.f32 %v4281_v28, %v4232_v31  ;;  %v12166_v28 = vld [vmem:[#allocation50_spill] sm:$0xff] }
 0x73f   : > { %4337 = vrot.lane.b32.xlu2 %v4282_v51, %s8240_s1  ;;  %v12167_v51 = vld [vmem:[#allocation68_spill] sm:$0xff] }
 0x744   : > { %2943 = vrot.lane.b32.xlu1 %v12160_v12, %s8241_s13  ;;  %v4283_v3 = vpop.f32.mrf.mxu0 }
 0x745   : > { %v4284_v6 = vadd.f32 %v4283_v3, %v4234_v0  ;;  %v3608_v0 = vadd.f32 %v10833_v25, %v10835_v53 }
 0x747   : > { %2941 = vrot.lane.b32.xlu2 %v2887_v56, %s8241_s13  ;;  %4339 = vrot.lane.b32.xlu0 %v4284_v6, %s8240_s1  ;;  %v12168_v6 = vld [vmem:[#allocation46_spill] sm:$0xff] }
 0x749   : > { %v4092_v37 = vpop.xlane.xlu1 %4091 }
 0x74a   : > { %7697 = vrcp.f32 %v4092_v37 }
 0x74c   : > { %3646 = vrot.lane.b32.xlu1 %v3593_v18, %s8239_s6 }
 0x74f   : > { %3640 = vrot.lane.b32.xlu0 %v10668_v50, %s8239_s6 }
 0x750   : > { %v7698_v46 = vpop.eup %7697 }
 0x751   : > { %v4145_v50 = vmul.f32 %v7698_v46, %v10851_v30  ;;  %v4146_v57 = vmul.f32 %v7698_v46, %v10853_v2  ;;  %v4095_v1 = vpop.xlane.xlu0 %4094 }
 0x754   : > { %2947 = vrot.lane.b32.xlu1 %v12163_v24, %s8241_s13 }
 0x75c   : > { %3650 = vrot.lane.b32.xlu1 %v3598_v29, %s8239_s6  ;;  %v4089_v54 = vpop.xlane.xlu2 %4088 }
 0x75d   : > { %7699 = vrcp.f32 %v4089_v54 }
 0x75e   : > { %7701 = vrcp.f32 %v4095_v1 }
 0x762   : > { %v4101_v49 = vpop.xlane.xlu1 %4100 }
 0x763   : > { %v7700_v15 = vpop.eup %7699 }
 0x764   : > { %2951 = vrot.lane.b32.xlu1 %v12164_v16, %s8241_s13  ;;  %v4143_v55 = vmul.f32 %v7700_v15, %v10867_v7  ;;  %v4144_v10 = vmul.f32 %v7700_v15, %v10869_v33  ;;  %v7702_v7 = vpop.eup %7701  ;;  %v7048_v16 = vld [vmem:[#allocation15 + $0x30] sm:$0xff] }
 0x765   : > { %v4147_v2 = vmul.f32 %v7702_v7, %v10857_v43  ;;  %v4148_v36 = vmul.f32 %v7702_v7, %v10859_v39  ;;  %v2892_v43 = vadd.f32 %v12167_v51, %v12166_v28 }
 0x766   : > { %v4167_v58 = vpack.c.bf16 %v4145_v50, %v4143_v55  ;;  %v4168_v63 = vpack.c.bf16 %v4146_v57, %v4144_v10  ;;  %v12169_v55 = vld [vmem:[#allocation45_spill] sm:$0xff] }
 0x768   : > { %4251 = vmatmul.bf16.gmra.mxu3 %v4167_v58  ;;  %4300 = vmatmul.bf16.gmra.mxu0 %v4168_v63  ;;  %v7047_v58 = vld [vmem:[#allocation15 + $0x28] sm:$0xff] }
 0x76b   : > { %v4286_v62 = vpop.f32.mrf.mxu0 }
 0x76c   : > { %3654 = vrot.lane.b32.xlu1 %v3603_v4, %s8239_s6  ;;  %v4098_v52 = vpop.xlane.xlu2 %4097  ;;  %v7046_v4 = vld [vmem:[#allocation15 + $0x20] sm:$0xff] }
 0x76d   : > { %7703 = vrcp.f32 %v4098_v52 }
 0x76e   : > { %7705 = vrcp.f32 %v4101_v49  ;;  %v7042_v49 = vld [vmem:[#allocation15] sm:$0xff] }
 0x771   : > { %v4237_v30 = vpop.f32.mrf.mxu3 }
 0x772   : > { %v4287_v60 = vadd.f32 %v4286_v62, %v4237_v30 }
 0x773   : > { %v7704_v33 = vpop.eup %7703  ;;  %v4288_v13 = vpop.f32.mrf.mxu0 }
 0x774   : > { %2955 = vrot.lane.b32.xlu1 %v12165_v45, %s8241_s13  ;;  %4341 = vrot.lane.b32.xlu2 %v4287_v60, %s8240_s1  ;;  %v4149_v22 = vmul.f32 %v7704_v33, %v10885_v38  ;;  %v4150_v5 = vmul.f32 %v7704_v33, %v10887_v17  ;;  %v7706_v38 = vpop.eup %7705  ;;  %v7045_v33 = vld [vmem:[#allocation15 + $0x18] sm:$0xff] }
 0x775   : > { %v4151_v56 = vmul.f32 %v7706_v38, %v10873_v48  ;;  %v4152_v24 = vmul.f32 %v7706_v38, %v10879_v20  ;;  %v7049_v48 = vld [vmem:[#allocation15 + $0x38] sm:$0xff]  ;;  %v3613_v20 = vadd.f32 %v10841_v9, %v10843_v26 }
 0x776   : > { %v4169_v32 = vpack.c.bf16 %v4149_v22, %v4147_v2  ;;  %v4170_v59 = vpack.c.bf16 %v4150_v5, %v4148_v36  ;;  %4494 = vmatpush.bf16.msra.mxu1 %v7049_v48  ;;  %v12172_v45 = vld [vmem:[#allocation55_spill] sm:$0xff] }
 0x778   : > { %4256 = vmatmul.bf16.gmra.mxu3 %v4169_v32  ;;  %4305 = vmatmul.bf16.gmra.mxu0 %v4170_v59  ;;  %v7043_v32 = vld [vmem:[#allocation15 + $0x8] sm:$0xff] }
 0x779   : > { %v4239_v31 = vpop.f32.mrf.mxu3 }
 0x77a   : > { %v4289_v12 = vadd.f32 %v4288_v13, %v4239_v31  ;;  %4495 = vmatpush.bf16.msra.mxu1 %v7048_v16  ;;  %v12174_v16 = vld [vmem:[#allocation43_spill] sm:$0xff] }
 0x77b   : > { %v4291_v3 = vpop.f32.mrf.mxu0 }
 0x77c   : > { %3658 = vrot.lane.b32.xlu1 %v3608_v0, %s8239_s6  ;;  %v4104_v39 = vpop.xlane.xlu0 %4103  ;;  %2945 = vrot.lane.b32.xlu2 %v2892_v43, %s8241_s13 }
 0x77d   : > { %7707 = vrcp.f32 %v4104_v39  ;;  %4343 = vrot.lane.b32.xlu0 %v4289_v12, %s8240_s1 }
 0x77e   : > { %4496 = vmatpush.bf16.msra.mxu1 %v7047_v58 }
 0x781   : > { %v4242_v17 = vpop.f32.mrf.mxu3 }
 0x782   : > { %v4292_v47 = vadd.f32 %v4291_v3, %v4242_v17  ;;  %4497 = vmatpush.bf16.msra.mxu1 %v7046_v4 }
 0x783   : > { %v7708_v35 = vpop.eup %7707  ;;  %v4293_v53 = vpop.f32.mrf.mxu0 }
 0x784   : > { %2959 = vrot.lane.b32.xlu1 %v12168_v6, %s8241_s13  ;;  %v4107_v25 = vpop.xlane.xlu2 %4106  ;;  %4345 = vrot.lane.b32.xlu2 %v4292_v47, %s8240_s1  ;;  %v4153_v18 = vmul.f32 %v7708_v35, %v10901_v27  ;;  %v4154_v37 = vmul.f32 %v7708_v35, %v10903_v14  ;;  %v12170_v27 = vld [vmem:[#allocation62_spill] sm:$0xff] }
 0x785   : > { %3644 = vrot.lane.b32.xlu0 %v10686_v23, %s8239_s6  ;;  %7709 = vrcp.f32 %v4107_v25  ;;  %v2897_v50 = vadd.f32 %v12170_v27, %v12169_v55 }
 0x786   : > { %v4110_v29 = vpop.xlane.xlu1 %4109  ;;  %v4171_v54 = vpack.c.bf16 %v4153_v18, %v4151_v56  ;;  %v4172_v46 = vpack.c.bf16 %v4154_v37, %v4152_v24  ;;  %4498 = vmatpush.bf16.msra.mxu1 %v7045_v33 }
 0x787   : > { %7711 = vrcp.f32 %v4110_v29 }
 0x788   : > { %4261 = vmatmul.bf16.gmra.mxu3 %v4171_v54  ;;  %4310 = vmatmul.bf16.gmra.mxu0 %v4172_v46 }
 0x789   : > { %v4244_v15 = vpop.f32.mrf.mxu3 }
 0x78a   : > { %v4294_v14 = vadd.f32 %v4293_v53, %v4244_v15  ;;  %v12173_v15 = vld [vmem:[#allocation56_spill] sm:$0xff] }
 0x78b   : > { %v7710_v10 = vpop.eup %7709  ;;  %v4296_v57 = vpop.f32.mrf.mxu0  ;;  %v2907_v55 = vadd.f32 %v12174_v16, %v12173_v15 }
 0x78c   : > { %3662 = vrot.lane.b32.xlu1 %v3613_v20, %s8239_s6  ;;  %v2938_v23 = vpop.permute.xlu2 %2937  ;;  %2949 = vrot.lane.b32.xlu2 %v2897_v50, %s8241_s13  ;;  %v4155_v26 = vmul.f32 %v7710_v10, %v10911_v41  ;;  %v4156_v7 = vmul.f32 %v7710_v10, %v10913_v21 }
 0x78d   : > { %2985 = vst.msk [vmem:[#allocation2 + $0x8] sm:$0xff] %vm2983_vm1, %v2938_v23  ;;  %4347 = vrot.lane.b32.xlu0 %v4294_v14, %s8240_s1  ;;  %v7712_v63 = vpop.eup %7711 }
 0x78e   : > { %v4157_v52 = vmul.f32 %v7712_v63, %v10915_v61  ;;  %v4158_v30 = vmul.f32 %v7712_v63, %v10919_v34  ;;  %v12171_v34 = vld [vmem:[#allocation60_spill] sm:$0xff] }
 0x78f   : > { %v2936_v1 = vpop.permute.xlu0 %2935  ;;  %v2902_v22 = vadd.f32 %v12172_v45, %v12171_v34  ;;  %v12177_v34 = vld [vmem:[#allocation74_spill] sm:$0xff] }
 0x790   : > { %2984 = vst.msk [vmem:[#allocation2] sm:$0xff] %vm2983_vm1, %v2936_v1  ;;  %v4173_v41 = vpack.c.bf16 %v4157_v52, %v4155_v26  ;;  %v4174_v60 = vpack.c.bf16 %v4158_v30, %v4156_v7  ;;  %v12175_v52 = vld [vmem:[#allocation48_spill] sm:$0xff]  ;;  %v12176_v7 = vld [vmem:[#allocation63_spill] sm:$0xff] }
 0x791   : > { %v4247_v9 = vpop.f32.mrf.mxu3  ;;  %v2912_v30 = vadd.f32 %v12176_v7, %v12175_v52 }
 0x792   : > { %v4297_v62 = vadd.f32 %v4296_v57, %v4247_v9 }
 0x793   : > { %v4298_v2 = vpop.f32.mrf.mxu0 }
 0x794   : > { %2963 = vrot.lane.b32.xlu1 %v10548_v40, %s8241_s13  ;;  %4349 = vrot.lane.b32.xlu2 %v4297_v62, %s8240_s1  ;;  %v7044_v40 = vld [vmem:[#allocation15 + $0x10] sm:$0xff] }
 0x795   : > { %3648 = vrot.lane.b32.xlu0 %v10702_v44, %s8239_s6  ;;  %v3618_v44 = vadd.f32 %v10935_v8, %v10933_v42  ;;  %4499 = vmatpush.bf16.msra.mxu1 %v7044_v40 }
 0x797   : > { %v3639_v13 = vpop.permute.xlu0 %3638 }
 0x798   : > { %3686 = vst.msk [vmem:[#allocation2 + $0x8] sm:$0xff] %vm3684_vm2, %v3639_v13  ;;  %4266 = vmatmul.bf16.gmra.mxu3 %v4173_v41  ;;  %4315 = vmatmul.bf16.gmra.mxu0 %v4174_v60 }
 0x799   : > { %v4249_v21 = vpop.f32.mrf.mxu3  ;;  %v4338_v61 = vpop.permute.xlu2 %4337  ;;  %4500 = vmatpush.bf16.msra.mxu1 %v7043_v32 }
 0x79a   : > { %v4299_v36 = vadd.f32 %v4298_v2, %v4249_v21 }
 0x79c   : > { %3666 = vrot.lane.b32.xlu1 %v3618_v44, %s8239_s6  ;;  %2953 = vrot.lane.b32.xlu2 %v2902_v22, %s8241_s13 }
 0x79d   : > { %4351 = vrot.lane.b32.xlu0 %v4299_v36, %s8240_s1  ;;  %4501 = vmatpush.bf16.msra.mxu1 %v7042_v49  ;;  %v12178_v36 = vld [vmem:[#allocation64_spill] sm:$0xff] }
 0x79e   : > { %v3637_v5 = vpop.permute.xlu1 %3636 }
 0x79f   : > { %3685 = vst.msk [vmem:[#allocation2] sm:$0xff] %vm3684_vm2, %v3637_v5  ;;  %v12179_v5 = vld [vmem:[#allocation57_spill] sm:$0xff] }
 0x7a0   : > { %4386 = vst.msk [vmem:[#allocation2] sm:$0xff] %vm4385_vm3, %v4338_v61  ;;  %v2917_v32 = vadd.f32 %v12179_v5, %v12178_v36  ;;  %v4551_v36 = vld [vmem:[%s11081_s3 + $0x30] sm:$0xff] }
 0x7a1   : > { %v2942_v59 = vpop.permute.xlu2 %2941 }
 0x7a2   : > { %2987 = vst.msk [vmem:[#allocation2 + $0x18] sm:$0xff] %vm2983_vm1, %v2942_v59 }
 0x7a5   : > { %3652 = vrot.lane.b32.xlu0 %v10823_v19, %s8239_s6 }
 0x7a6   : > { %v2940_v42 = vpop.permute.xlu1 %2939 }
 0x7a7   : > { %2986 = vst.msk [vmem:[#allocation2 + $0x10] sm:$0xff] %vm2983_vm1, %v2940_v42  ;;  %v4402_v0 = vld [vmem:[#allocation2] sm:$0xff] }
 0x7ae   : > { %v3643_v8 = vpop.permute.xlu1 %3642 }
 0x7af   : > { %3688 = vst.msk [vmem:[#allocation2 + $0x18] sm:$0xff] %vm3684_vm2, %v3643_v8 }
 0x7b6   : > { %v2944_v31 = vpop.permute.xlu1 %2943 }
 0x7b7   : > { %2988 = vst.msk [vmem:[#allocation2 + $0x20] sm:$0xff] %vm2983_vm1, %v2944_v31 }
 0x7b9   : > { %v4340_v28 = vpop.permute.xlu0 %4339 }
 0x7ba   : > { %4387 = vst.msk [vmem:[#allocation2 + $0x8] sm:$0xff] %vm4385_vm3, %v4340_v28 }
 0x7be   : > { %v3647_v51 = vpop.permute.xlu1 %3646 }
 0x7c1   : > { %v3641_v43 = vpop.permute.xlu0 %3640  ;;  %v4403_v12 = vld [vmem:[#allocation2 + $0x8] sm:$0xff] }
 0x7c2   : > { %3687 = vst.msk [vmem:[#allocation2 + $0x10] sm:$0xff] %vm3684_vm2, %v3641_v43  ;;  %v4418_v19 = vpack.c.bf16 %v4403_v12, %v4402_v0  ;;  %v12181_v0 = vld [vmem:[#allocation59_spill] sm:$0xff] }
 0x7c4   : > { %4502 = vmatmul.bf16.vlgmr.msra.gmra.mxu1 %v4418_v19 }
 0x7c6   : > { %v2948_v3 = vpop.permute.xlu1 %2947 }
 0x7c7   : > { %2990 = vst.msk [vmem:[#allocation2 + $0x30] sm:$0xff] %vm2983_vm1, %v2948_v3 }
 0x7ce   : > { %v3651_v39 = vpop.permute.xlu1 %3650  ;;  %v4342_v38 = vpop.permute.xlu2 %4341 }
 0x7cf   : > { %4388 = vst.msk [vmem:[#allocation2 + $0x10] sm:$0xff] %vm4385_vm3, %v4342_v38 }
 0x7d6   : > { %v2952_v17 = vpop.permute.xlu1 %2951  ;;  %v2946_v47 = vpop.permute.xlu2 %2945  ;;  %v4404_v10 = vld [vmem:[#allocation2 + $0x10] sm:$0xff] }
 0x7d7   : > { %2992 = vst.msk [vmem:[#allocation2 + $0x40] sm:$0xff] %vm2983_vm1, %v2952_v17  ;;  %v4545_v17 = vld [vmem:[%s11081_s3] sm:$0xff] }
 0x7d8   : > { %2989 = vst.msk [vmem:[#allocation2 + $0x28] sm:$0xff] %vm2983_vm1, %v2946_v47 }
 0x7d9   : > { %3690 = vst.msk [vmem:[#allocation2 + $0x28] sm:$0xff] %vm3684_vm2, %v3647_v51 }
 0x7de   : > { %v3655_v35 = vpop.permute.xlu1 %3654  ;;  %v4346_v56 = vpop.permute.xlu2 %4345 }
 0x7e5   : > { %v4301_v6 = vpop.f32.mrf.mxu0 }
 0x7e6   : > { %v2956_v53 = vpop.permute.xlu1 %2955  ;;  %v2950_v25 = vpop.permute.xlu2 %2949 }
 0x7e7   : > { %2994 = vst.msk [vmem:[#allocation2 + $0x50] sm:$0xff] %vm2983_vm1, %v2956_v53  ;;  %v4546_v53 = vld [vmem:[%s11081_s3 + $0x8] sm:$0xff] }
 0x7e8   : > { %2991 = vst.msk [vmem:[#allocation2 + $0x38] sm:$0xff] %vm2983_vm1, %v2950_v25 }
 0x7e9   : > { %3692 = vst.msk [vmem:[#allocation2 + $0x38] sm:$0xff] %vm3684_vm2, %v3651_v39  ;;  %v11078_v39 = vld [vmem:[%s12182_s20] ss:$0 sm:$0xff]  ;;  %s7012_s20 = sshll.u32 %s12189_s24, 5 }
 0x7eb   : > { %v4252_v18 = vpop.f32.mrf.mxu3 }
 0x7ec   : > { %v4302_v24 = vadd.f32 %v4301_v6, %v4252_v18 }
 0x7ed   : > { %v4303_v37 = vpop.f32.mrf.mxu0 }
 0x7ee   : > { %v11035_v29 = vpop.permute.xlu1 %3658  ;;  %4353 = vrot.lane.b32.xlu2 %v4302_v24, %s8240_s1  ;;  %v4350_v54 = vpop.permute.xlu2 %4349 }
 0x7ef   : > { %v4344_v46 = vpop.permute.xlu0 %4343 }
 0x7f0   : > { %4389 = vst.msk [vmem:[#allocation2 + $0x18] sm:$0xff] %vm4385_vm3, %v4344_v46 }
 0x7f3   : > { %v4254_v48 = vpop.f32.mrf.mxu3 }
 0x7f4   : > { %v4304_v27 = vadd.f32 %v4303_v37, %v4254_v48 }
 0x7f5   : > { %v4306_v50 = vpop.f32.mrf.mxu0 }
 0x7f6   : > { %v2960_v20 = vpop.permute.xlu1 %2959  ;;  %2957 = vrot.lane.b32.xlu2 %v2907_v55, %s8241_s13  ;;  %4355 = vrot.lane.b32.xlu0 %v4304_v27, %s8240_s1  ;;  %v2954_v23 = vpop.permute.xlu2 %2953 }
 0x7f7   : > { %2996 = vst.msk [vmem:[#allocation2 + $0x60] sm:$0xff] %vm2983_vm1, %v2960_v20  ;;  %v3645_v14 = vpop.permute.xlu0 %3644  ;;  %v4405_v57 = vld [vmem:[#allocation2 + $0x18] sm:$0xff] }
 0x7f8   : > { %3689 = vst.msk [vmem:[#allocation2 + $0x20] sm:$0xff] %vm3684_vm2, %v3645_v14  ;;  %v4419_v58 = vpack.c.bf16 %v4405_v57, %v4404_v10  ;;  %v4547_v14 = vld [vmem:[%s11081_s3 + $0x10] sm:$0xff] }
 0x7f9   : > { %4390 = vst.msk [vmem:[#allocation2 + $0x20] sm:$0xff] %vm4385_vm3, %v4346_v56 }
 0x7fa   : > { %2993 = vst.msk [vmem:[#allocation2 + $0x48] sm:$0xff] %vm2983_vm1, %v2954_v23  ;;  %4507 = vmatmul.bf16.gmra.mxu1 %v4419_v58 }
 0x7fb   : > { %3694 = vst.msk [vmem:[#allocation2 + $0x48] sm:$0xff] %vm3684_vm2, %v3655_v35  ;;  %v4257_v63 = vpop.f32.mrf.mxu3 }
 0x7fc   : > { %v4307_v1 = vadd.f32 %v4306_v50, %v4257_v63  ;;  %v4548_v63 = vld [vmem:[%s11081_s3 + $0x18] sm:$0xff] }
 0x7fd   : > { %v4308_v9 = vpop.f32.mrf.mxu0 }
 0x7fe   : > { %v11048_v26 = vpop.permute.xlu1 %3662  ;;  %3656 = vrot.lane.b32.xlu0 %v10831_v11, %s8239_s6  ;;  %4357 = vrot.lane.b32.xlu2 %v4307_v1, %s8240_s1 }
 0x7ff   : > { %v4348_v4 = vpop.permute.xlu0 %4347 }
 0x800   : > { %4391 = vst.msk [vmem:[#allocation2 + $0x28] sm:$0xff] %vm4385_vm3, %v4348_v4  ;;  %v4406_v11 = vld [vmem:[#allocation2 + $0x20] sm:$0xff] }
 0x803   : > { %v4259_v62 = vpop.f32.mrf.mxu3 }
 0x804   : > { %v4309_v41 = vadd.f32 %v4308_v9, %v4259_v62 }
 0x805   : > { %v4311_v60 = vpop.f32.mrf.mxu0 }
 0x806   : > { %v2964_v33 = vpop.permute.xlu1 %2963  ;;  %2961 = vrot.lane.b32.xlu2 %v2912_v30, %s8241_s13  ;;  %4359 = vrot.lane.b32.xlu0 %v4309_v41, %s8240_s1  ;;  %v4549_v30 = vld [vmem:[%s11081_s3 + $0x20] sm:$0xff] }
 0x807   : > { %2998 = vst.msk [vmem:[#allocation2 + $0x70] sm:$0xff] %vm2983_vm1, %v2964_v33  ;;  %v3649_v13 = vpop.permute.xlu0 %3648  ;;  %v4407_v2 = vld [vmem:[#allocation2 + $0x28] sm:$0xff] }
 0x808   : > { %3691 = vst.msk [vmem:[#allocation2 + $0x30] sm:$0xff] %vm3684_vm2, %v3649_v13  ;;  %v4420_v21 = vpack.c.bf16 %v4407_v2, %v4406_v11  ;;  %v4550_v11 = vld [vmem:[%s11081_s3 + $0x28] sm:$0xff] }
 0x809   : > { %4392 = vst.msk [vmem:[#allocation2 + $0x30] sm:$0xff] %vm4385_vm3, %v4350_v54 }
 0x80a   : > { %4512 = vmatmul.bf16.gmra.mxu1 %v4420_v21 }
 0x80b   : > { %v4262_v61 = vpop.f32.mrf.mxu3 }
 0x80c   : > { %v4312_v40 = vadd.f32 %v4311_v60, %v4262_v61 }
 0x80d   : > { %v4313_v45 = vpop.f32.mrf.mxu0 }
 0x80e   : > { %3660 = vrot.lane.b32.xlu0 %v12177_v34, %s8239_s6  ;;  %4361 = vrot.lane.b32.xlu2 %v4312_v40, %s8240_s1  ;;  %v3667_v50 = vpop.permute.xlu1 %3666 }
 0x80f   : > { %v4352_v22 = vpop.permute.xlu0 %4351 }
 0x810   : > { %4393 = vst.msk [vmem:[#allocation2 + $0x38] sm:$0xff] %vm4385_vm3, %v4352_v22  ;;  %v4408_v42 = vld [vmem:[#allocation2 + $0x30] sm:$0xff] }
 0x813   : > { %v4264_v44 = vpop.f32.mrf.mxu3 }
 0x814   : > { %v4314_v59 = vadd.f32 %v4313_v45, %v4264_v44 }
 0x815   : > { %v4316_v28 = vpop.f32.mrf.mxu0 }
 0x816   : > { %2965 = vrot.lane.b32.xlu2 %v2917_v32, %s8241_s13  ;;  %4363 = vrot.lane.b32.xlu0 %v4314_v59, %s8240_s1 }
 0x817   : > { %v3653_v49 = vpop.permute.xlu0 %3652  ;;  %v4409_v8 = vld [vmem:[#allocation2 + $0x38] sm:$0xff] }
 0x818   : > { %3693 = vst.msk [vmem:[#allocation2 + $0x40] sm:$0xff] %vm3684_vm2, %v3653_v49  ;;  %v4421_v31 = vpack.c.bf16 %v4409_v8, %v4408_v42  ;;  %v8242_v49 = vmov 128.0  }
 0x819   : > { %7713 = vrcp.f32 %v8242_v49 }
 0x81a   : > { %4517 = vmatmul.bf16.gmra.mxu1 %v4421_v31 }
 0x81b   : > { %v4267_v51 = vpop.f32.mrf.mxu3 }
 0x81c   : > { %v4317_v43 = vadd.f32 %v4316_v28, %v4267_v51 }
 0x81d   : > { %v4318_v12 = vpop.f32.mrf.mxu0 }
 0x81e   : > { %3664 = vrot.lane.b32.xlu0 %v12181_v0, %s8239_s6  ;;  %4365 = vrot.lane.b32.xlu2 %v4317_v43, %s8240_s1  ;;  %s12186_s6 = sld [smem:[#allocation97_spill]] }
 0x81f   : > { %v7714_v28 = vpop.eup %7713 }
 0x820   : > { %v4610_v51 = vmul.f32 128.0, %v7714_v28  ;;  %vm4614_vm4 = vweird.f32 %v7714_v28 }
 0x822   : > { %v4611_v43 = vsub.f32 1.0, %v4610_v51  ;;  %v7080_v51 = vld [vmem:[#allocation17 + $0xec] sm:$0xf0] }
 0x823   : > { %v4269_v19 = vpop.f32.mrf.mxu3 }
 0x824   : > { %v4319_v3 = vadd.f32 %v4318_v12, %v4269_v19  ;;  %v4612_v0 = vmul.f32 %v7714_v28, %v4611_v43  ;;  %v7078_v43 = vld [vmem:[#allocation17 + $0xe4] sm:$0xf] }
 0x826   : > { %4367 = vrot.lane.b32.xlu0 %v4319_v3, %s8240_s1  ;;  %v4613_v12 = vadd.f32 %v7714_v28, %v4612_v0  ;;  %v6870_v0 = vld [vmem:[#allocation17 + $0xf0] sm:$0xf0] }
 0x828   : > { %v11137_v19 = vsel %vm4614_vm4, %v7714_v28, %v4613_v12  ;;  %v6868_v28 = vld [vmem:[#allocation17 + $0xe0] sm:$0xf]  ;;  %v6876_v12 = vld [vmem:[#allocation17 + $0xe8] sm:$0xf] }
 0x841   : > { %v4503_v38 = vpop.f32.mrf.mxu1 }
 0x842   : > { %v4504_v47 = vadd.f32 %v11078_v39, %v4503_v38 }
 0x844   : > { %v11085_v35 = vadd.f32 %v4545_v17, %v4504_v47 }
 0x846   : > { %4577 = vadd.xlane.f32.xlu1 %v11085_v35 }
 0x848   : > { %v4354_v56 = vpop.permute.xlu2 %4353 }
 0x849   : > { %4394 = vst.msk [vmem:[#allocation2 + $0x40] sm:$0xff] %vm4385_vm3, %v4354_v56  ;;  %v4505_v6 = vpop.f32.mrf.mxu1 }
 0x84a   : > { %v4506_v25 = vadd.f32 %v11078_v39, %v4505_v6 }
 0x84c   : > { %v11091_v18 = vadd.f32 %v4546_v53, %v4506_v25 }
 0x84e   : > { %4579 = vadd.xlane.f32.xlu2 %v11091_v18 }
 0x850   : > { %v2958_v24 = vpop.permute.xlu2 %2957  ;;  %v4410_v55 = vld [vmem:[#allocation2 + $0x40] sm:$0xff] }
 0x851   : > { %2995 = vst.msk [vmem:[#allocation2 + $0x58] sm:$0xff] %vm2983_vm1, %v2958_v24  ;;  %v4552_v24 = vld [vmem:[%s11081_s3 + $0x38] sm:$0xff] }
 0x852   : > { %3696 = vst.msk [vmem:[#allocation2 + $0x58] sm:$0xff] %vm3684_vm2, %v11035_v29 }
 0x858   : > { %v4358_v37 = vpop.permute.xlu2 %4357 }
 0x860   : > { %v2962_v54 = vpop.permute.xlu2 %2961 }
 0x861   : > { %2997 = vst.msk [vmem:[#allocation2 + $0x68] sm:$0xff] %vm2983_vm1, %v2962_v54 }
 0x862   : > { %3698 = vst.msk [vmem:[#allocation2 + $0x68] sm:$0xff] %vm3684_vm2, %v11048_v26 }
 0x868   : > { %v4356_v46 = vpop.permute.xlu0 %4355  ;;  %v4362_v48 = vpop.permute.xlu2 %4361 }
 0x869   : > { %4395 = vst.msk [vmem:[#allocation2 + $0x48] sm:$0xff] %vm4385_vm3, %v4356_v46 }
 0x870   : > { %v3657_v15 = vpop.permute.xlu0 %3656  ;;  %v2966_v16 = vpop.permute.xlu2 %2965  ;;  %v4411_v27 = vld [vmem:[#allocation2 + $0x48] sm:$0xff] }
 0x871   : > { %3695 = vst.msk [vmem:[#allocation2 + $0x50] sm:$0xff] %vm3684_vm2, %v3657_v15  ;;  %v4422_v29 = vpack.c.bf16 %v4411_v27, %v4410_v55 }
 0x872   : > { %4396 = vst.msk [vmem:[#allocation2 + $0x50] sm:$0xff] %vm4385_vm3, %v4358_v37 }
 0x873   : > { %2999 = vst.msk [vmem:[#allocation2 + $0x78] sm:$0xff] %vm2983_vm1, %v2966_v16  ;;  %4522 = vmatmul.bf16.gmra.mxu1 %v4422_v29  ;;  %v4553_v16 = vld [vmem:[%s11081_s3 + $0x40] sm:$0xff] }
 0x874   : > { %3700 = vst.msk [vmem:[#allocation2 + $0x78] sm:$0xff] %vm3684_vm2, %v3667_v50 }
 0x877   : > { %v4508_v20 = vpop.f32.mrf.mxu1 }
 0x878   : > { %v4509_v23 = vadd.f32 %v11078_v39, %v4508_v20  ;;  %v4360_v10 = vpop.permute.xlu0 %4359  ;;  %v4366_v34 = vpop.permute.xlu2 %4365 }
 0x879   : > { %4397 = vst.msk [vmem:[#allocation2 + $0x58] sm:$0xff] %vm4385_vm3, %v4360_v10  ;;  %v4412_v26 = vld [vmem:[#allocation2 + $0x50] sm:$0xff] }
 0x87a   : > { %v11108_v57 = vadd.f32 %v4547_v14, %v4509_v23  ;;  %v4554_v23 = vld [vmem:[%s11081_s3 + $0x48] sm:$0xff] }
 0x87c   : > { %4581 = vadd.xlane.f32.xlu0 %v11108_v57 }
 0x87f   : > { %v4510_v58 = vpop.f32.mrf.mxu1 }
 0x880   : > { %v4511_v1 = vadd.f32 %v11078_v39, %v4510_v58  ;;  %v3661_v9 = vpop.permute.xlu0 %3660  ;;  %v4413_v4 = vld [vmem:[#allocation2 + $0x58] sm:$0xff] }
 0x881   : > { %3697 = vst.msk [vmem:[#allocation2 + $0x60] sm:$0xff] %vm3684_vm2, %v3661_v9  ;;  %v4423_v62 = vpack.c.bf16 %v4413_v4, %v4412_v26  ;;  %v4555_v4 = vld [vmem:[%s11081_s3 + $0x50] sm:$0xff] }
 0x882   : > { %v11114_v52 = vadd.f32 %v4548_v63, %v4511_v1  ;;  %4398 = vst.msk [vmem:[#allocation2 + $0x60] sm:$0xff] %vm4385_vm3, %v4362_v48 }
 0x883   : > { %4527 = vmatmul.bf16.gmra.mxu1 %v4423_v62 }
 0x884   : > { %4583 = vadd.xlane.f32.xlu1 %v11114_v52 }
 0x887   : > { %v4513_v7 = vpop.f32.mrf.mxu1 }
 0x888   : > { %v4514_v41 = vadd.f32 %v11078_v39, %v4513_v7  ;;  %v4364_v60 = vpop.permute.xlu0 %4363 }
 0x889   : > { %4399 = vst.msk [vmem:[#allocation2 + $0x68] sm:$0xff] %vm4385_vm3, %v4364_v60  ;;  %v4414_v61 = vld [vmem:[#allocation2 + $0x60] sm:$0xff] }
 0x88a   : > { %v11121_v33 = vadd.f32 %v4549_v30, %v4514_v41 }
 0x88c   : > { %4585 = vadd.xlane.f32.xlu2 %v11121_v33 }
 0x88f   : > { %v4515_v13 = vpop.f32.mrf.mxu1 }
 0x890   : > { %v4516_v2 = vadd.f32 %v11078_v39, %v4515_v13  ;;  %v3665_v21 = vpop.permute.xlu0 %3664  ;;  %v4415_v40 = vld [vmem:[#allocation2 + $0x68] sm:$0xff] }
 0x891   : > { %3699 = vst.msk [vmem:[#allocation2 + $0x70] sm:$0xff] %vm3684_vm2, %v3665_v21  ;;  %v4424_v45 = vpack.c.bf16 %v4415_v40, %v4414_v61 }
 0x892   : > { %v11127_v22 = vadd.f32 %v4550_v11, %v4516_v2  ;;  %4400 = vst.msk [vmem:[#allocation2 + $0x70] sm:$0xff] %vm4385_vm3, %v4366_v34  ;;  %v4556_v11 = vld [vmem:[%s11081_s3 + $0x58] sm:$0xff] }
 0x893   : > { %4532 = vmatmul.bf16.gmra.mxu1 %v4424_v45 }
 0x894   : > { %4587 = vadd.xlane.f32.xlu0 %v11127_v22 }
 0x897   : > { %v4518_v44 = vpop.f32.mrf.mxu1 }
 0x898   : > { %v4519_v5 = vadd.f32 %v11078_v39, %v4518_v44  ;;  %v4368_v32 = vpop.permute.xlu0 %4367  ;;  %v4557_v44 = vld [vmem:[%s11081_s3 + $0x60] sm:$0xff] }
 0x899   : > { %4401 = vst.msk [vmem:[#allocation2 + $0x78] sm:$0xff] %vm4385_vm3, %v4368_v32  ;;  %v4416_v42 = vld [vmem:[#allocation2 + $0x70] sm:$0xff] }
 0x89a   : > { %v11134_v59 = vadd.f32 %v4551_v36, %v4519_v5 }
 0x89c   : > { %4589 = vadd.xlane.f32.xlu0 %v11134_v59 }
 0x89f   : > { %v4520_v56 = vpop.f32.mrf.mxu1 }
 0x8a0   : > { %v4417_v8 = vld [vmem:[#allocation2 + $0x78] sm:$0xff]  ;;  %v4521_v53 = vadd.f32 %v11078_v39, %v4520_v56  ;;  %v7079_v56 = vld [vmem:[#allocation17 + $0xec] sm:$0xf] }
 0x8a1   : > { %v4425_v31 = vpack.c.bf16 %v4417_v8, %v4416_v42  ;;  %v4558_v42 = vld [vmem:[%s11081_s3 + $0x68] sm:$0xff] }
 0x8a2   : > { %v11151_v54 = vadd.f32 %v4552_v24, %v4521_v53  ;;  %v4559_v53 = vld [vmem:[%s11081_s3 + $0x70] sm:$0xff]  ;;  %v6852_v24 = vld [vmem:[#allocation17 + $0xc0] sm:$0xf] }
 0x8a3   : > { %4537 = vmatmul.bf16.gmra.mxu1 %v4425_v31 }
 0x8b9   : > { %v4578_v3 = vpop.xlane.xlu1 %4577 }
 0x8ba   : > { %v4616_v38 = vmul.f32 %v11137_v19, %v4578_v3  ;;  %v7081_v3 = vld [vmem:[#allocation17 + $0xf4] sm:$0xf0] }
 0x8bc   : > { %v11141_v17 = vsub.f32 %v11085_v35, %v4616_v38  ;;  %v6873_v38 = vor.u32 %v7078_v43, %v6870_v0  ;;  %v6830_v43 = vld [vmem:[#allocation17 + $0x98] sm:$0xf0]  ;;  %v6804_v0 = vld [vmem:[#allocation17 + $0x60] sm:$0xf] }
 0x8be   : > { %v4648_v47 = vmul.f32 %v11141_v17, %v11141_v17  ;;  %5203 = vmatpush.bf16.msra.mxu3 %v6873_v38 }
 0x8c0   : > { %4664 = vadd.xlane.f32.xlu1 %v4648_v47  ;;  %v6877_v47 = vor.u32 %v7081_v3, %v6876_v12  ;;  %v7064_v12 = vld [vmem:[#allocation17 + $0x6c] sm:$0xf0]  ;;  %v7062_v3 = vld [vmem:[#allocation17 + $0x64] sm:$0xf] }
 0x8c1   : > { %v4580_v6 = vpop.xlane.xlu2 %4579  ;;  %v6805_v38 = vor.u32 %v7064_v12, %v6804_v0  ;;  %v7051_v0 = vld [vmem:[#allocation17 + $0xc] sm:$0xf]  ;;  %v6766_v12 = vld [vmem:[#allocation17 + $0x18] sm:$0xf0] }
 0x8c2   : > { %v4617_v25 = vmul.f32 %v11137_v19, %v4580_v6  ;;  %v6878_v6 = vld [vmem:[#allocation17 + $0xf8] sm:$0xf0]  ;;  %5252 = vmatpush.bf16.msra.mxu0 %v6877_v47  ;;  %v6806_v47 = vld [vmem:[#allocation17 + $0x70] sm:$0xf0] }
 0x8c4   : > { %v11149_v37 = vsub.f32 %v11091_v18, %v4617_v25  ;;  %v6881_v25 = vor.u32 %v7079_v56, %v6878_v6  ;;  %v6812_v56 = vld [vmem:[#allocation17 + $0x68] sm:$0xf]  ;;  %v7065_v6 = vld [vmem:[#allocation17 + $0x74] sm:$0xf0] }
 0x8c6   : > { %v4649_v35 = vmul.f32 %v11149_v37, %v11149_v37  ;;  %5301 = vmatpush.bf16.msrb.mxu1 %v6881_v25  ;;  %v6813_v25 = vor.u32 %v7065_v6, %v6812_v56 }
 0x8c8   : > { %4591 = vadd.xlane.f32.xlu1 %v11151_v54  ;;  %4666 = vadd.xlane.f32.xlu2 %v4649_v35  ;;  %v7076_v35 = vld [vmem:[#allocation17 + $0xcc] sm:$0xf0] }
 0x8ef   : > { %v4582_v46 = vpop.xlane.xlu0 %4581 }
 0x8f0   : > { %v4618_v48 = vmul.f32 %v11137_v19, %v4582_v46  ;;  %v4523_v15 = vpop.f32.mrf.mxu1  ;;  %v7074_v46 = vld [vmem:[#allocation17 + $0xc4] sm:$0xf] }
 0x8f1   : > { %v4524_v55 = vadd.f32 %v11078_v39, %v4523_v15  ;;  %v6853_v15 = vor.u32 %v7076_v35, %v6852_v24  ;;  %v7063_v24 = vld [vmem:[#allocation17 + $0x6c] sm:$0xf]  ;;  %v6814_v35 = vld [vmem:[#allocation17 + $0x78] sm:$0xf0] }
 0x8f2   : > { %v11160_v27 = vsub.f32 %v11108_v57, %v4618_v48 }
 0x8f3   : > { %v11162_v18 = vadd.f32 %v4553_v16, %v4524_v55  ;;  %v6854_v16 = vld [vmem:[#allocation17 + $0xd0] sm:$0xf0]  ;;  %v6860_v55 = vld [vmem:[#allocation17 + $0xc8] sm:$0xf] }
 0x8f4   : > { %v4650_v29 = vmul.f32 %v11160_v27, %v11160_v27 }
 0x8f5   : > { %4593 = vadd.xlane.f32.xlu1 %v11162_v18 }
 0x8f6   : > { %4668 = vadd.xlane.f32.xlu2 %v4650_v29  ;;  %v7077_v29 = vld [vmem:[#allocation17 + $0xd4] sm:$0xf0] }
 0x8f7   : > { %v4584_v50 = vpop.xlane.xlu1 %4583 }
 0x8f8   : > { %v4619_v20 = vmul.f32 %v11137_v19, %v4584_v50  ;;  %v4525_v14 = vpop.f32.mrf.mxu1 }
 0x8f9   : > { %v4526_v10 = vadd.f32 %v11078_v39, %v4525_v14  ;;  %v6861_v14 = vor.u32 %v7077_v29, %v6860_v55  ;;  %v6790_v29 = vld [vmem:[#allocation17 + $0x50] sm:$0xf0] }
 0x8fa   : > { %v11171_v58 = vsub.f32 %v11114_v52, %v4619_v20  ;;  %v6857_v20 = vor.u32 %v7074_v46, %v6854_v16  ;;  %v6817_v46 = vor.u32 %v7063_v24, %v6814_v35  ;;  %v7058_v16 = vld [vmem:[#allocation17 + $0x44] sm:$0xf] }
 0x8fb   : > { %v11173_v57 = vadd.f32 %v4554_v23, %v4526_v10  ;;  %v7075_v23 = vld [vmem:[#allocation17 + $0xcc] sm:$0xf]  ;;  %v6862_v10 = vld [vmem:[#allocation17 + $0xd8] sm:$0xf0]  ;;  %5253 = vmatpush.bf16.msra.mxu0 %v6861_v14  ;;  %v6793_v14 = vor.u32 %v7058_v16, %v6790_v29 }
 0x8fc   : > { %v4651_v63 = vmul.f32 %v11171_v58, %v11171_v58  ;;  %5204 = vmatpush.bf16.msra.mxu3 %v6857_v20  ;;  %v7061_v20 = vld [vmem:[#allocation17 + $0x54] sm:$0xf0] }
 0x8fe   : > { %4670 = vadd.xlane.f32.xlu0 %v4651_v63  ;;  %4595 = vadd.xlane.f32.xlu2 %v11173_v57  ;;  %v6865_v63 = vor.u32 %v7075_v23, %v6862_v10  ;;  %v7059_v10 = vld [vmem:[#allocation17 + $0x4c] sm:$0xf] }
 0x8ff   : > { %v4586_v1 = vpop.xlane.xlu2 %4585 }
 0x900   : > { %v4620_v9 = vmul.f32 %v11137_v19, %v4586_v1  ;;  %v4528_v26 = vpop.f32.mrf.mxu1  ;;  %5302 = vmatpush.bf16.msrb.mxu1 %v6865_v63  ;;  %v6798_v63 = vld [vmem:[#allocation17 + $0x58] sm:$0xf0] }
 0x901   : > { %v4529_v62 = vadd.f32 %v11078_v39, %v4528_v26  ;;  %v7072_v26 = vld [vmem:[#allocation17 + $0xac] sm:$0xf0] }
 0x902   : > { %v11182_v7 = vsub.f32 %v11121_v33, %v4620_v9  ;;  %v6836_v9 = vld [vmem:[#allocation17 + $0xa0] sm:$0xf] }
 0x903   : > { %v11184_v52 = vadd.f32 %v4555_v4, %v4529_v62  ;;  %v7070_v4 = vld [vmem:[#allocation17 + $0xa4] sm:$0xf]  ;;  %v6837_v62 = vor.u32 %v7072_v26, %v6836_v9  ;;  %v6801_v9 = vor.u32 %v7059_v10, %v6798_v63  ;;  %v11232_v63 = vld [vmem:[%s12183_s10] ss:$0 sm:$0xff]  ;;  %s12190_s10 = sld [smem:[#allocation100_spill]] }
 0x904   : > { %v4652_v30 = vmul.f32 %v11182_v7, %v11182_v7 }
 0x906   : > { %4597 = vadd.xlane.f32.xlu2 %v11184_v52  ;;  %4672 = vadd.xlane.f32.xlu0 %v4652_v30  ;;  %v6838_v30 = vld [vmem:[#allocation17 + $0xb0] sm:$0xf0] }
 0x907   : > { %v4588_v41 = vpop.xlane.xlu0 %4587 }
 0x908   : > { %v4621_v60 = vmul.f32 %v11137_v19, %v4588_v41  ;;  %v4530_v13 = vpop.f32.mrf.mxu1  ;;  %v6844_v41 = vld [vmem:[#allocation17 + $0xa8] sm:$0xf] }
 0x909   : > { %v4531_v2 = vadd.f32 %v11078_v39, %v4530_v13  ;;  %v6841_v13 = vor.u32 %v7070_v4, %v6838_v30  ;;  %v6772_v4 = vld [vmem:[#allocation17 + $0x20] sm:$0xf]  ;;  %v7054_v30 = vld [vmem:[#allocation17 + $0x24] sm:$0xf] }
 0x90a   : > { %v11193_v21 = vsub.f32 %v11127_v22, %v4621_v60  ;;  %v7073_v60 = vld [vmem:[#allocation17 + $0xb4] sm:$0xf0] }
 0x90b   : > { %v11195_v33 = vadd.f32 %v4556_v11, %v4531_v2  ;;  %v6845_v11 = vor.u32 %v7073_v60, %v6844_v41  ;;  %v7071_v2 = vld [vmem:[#allocation17 + $0xac] sm:$0xf]  ;;  %5205 = vmatpush.bf16.msra.mxu3 %v6841_v13  ;;  %v6774_v13 = vld [vmem:[#allocation17 + $0x30] sm:$0xf0] }
 0x90c   : > { %v4653_v61 = vmul.f32 %v11193_v21, %v11193_v21 }
 0x90d   : > { %5254 = vmatpush.bf16.msra.mxu0 %v6845_v11  ;;  %v6780_v11 = vld [vmem:[#allocation17 + $0x28] sm:$0xf] }
 0x90e   : > { %4674 = vadd.xlane.f32.xlu1 %v4653_v61  ;;  %4599 = vadd.xlane.f32.xlu0 %v11195_v33  ;;  %v6846_v61 = vld [vmem:[#allocation17 + $0xb8] sm:$0xf0] }
 0x90f   : > { %v4590_v40 = vpop.xlane.xlu0 %4589 }
 0x910   : > { %v4622_v34 = vmul.f32 %v11137_v19, %v4590_v40  ;;  %v4533_v45 = vpop.f32.mrf.mxu1  ;;  %v6849_v40 = vor.u32 %v7071_v2, %v6846_v61  ;;  %v7057_v2 = vld [vmem:[#allocation17 + $0x34] sm:$0xf0]  ;;  %v6777_v61 = vor.u32 %v7054_v30, %v6774_v13 }
 0x911   : > { %v4534_v36 = vadd.f32 %v11078_v39, %v4533_v45  ;;  %v7068_v45 = vld [vmem:[#allocation17 + $0x8c] sm:$0xf0] }
 0x912   : > { %v11204_v5 = vsub.f32 %v11134_v59, %v4622_v34  ;;  %v6869_v59 = vor.u32 %v7080_v51, %v6868_v28  ;;  %v6820_v34 = vld [vmem:[#allocation17 + $0x80] sm:$0xf]  ;;  %5303 = vmatpush.bf16.msrb.mxu1 %v6849_v40  ;;  %v7067_v51 = vld [vmem:[#allocation17 + $0x8c] sm:$0xf]  ;;  %v6781_v40 = vor.u32 %v7057_v2, %v6780_v11 }
 0x913   : > { %v11206_v22 = vadd.f32 %v4557_v44, %v4534_v36  ;;  %v7066_v44 = vld [vmem:[#allocation17 + $0x84] sm:$0xf]  ;;  %v6821_v36 = vor.u32 %v7068_v45, %v6820_v34  ;;  %v7055_v34 = vld [vmem:[#allocation17 + $0x2c] sm:$0xf]  ;;  %v6782_v45 = vld [vmem:[#allocation17 + $0x38] sm:$0xf0] }
 0x914   : > { %v4654_v32 = vmul.f32 %v11204_v5, %v11204_v5  ;;  %5154 = vmatpush.bf16.msrb.mxu2 %v6869_v59  ;;  %v6833_v59 = vor.u32 %v7067_v51, %v6830_v43  ;;  %v6764_v51 = vld [vmem:[#allocation17 + $0x8] sm:$0xf] }
 0x916   : > { %4676 = vadd.xlane.f32.xlu1 %v4654_v32  ;;  %4601 = vadd.xlane.f32.xlu0 %v11206_v22  ;;  %v6822_v32 = vld [vmem:[#allocation17 + $0x90] sm:$0xf0] }
 0x917   : > { %5304 = vmatpush.bf16.msrb.mxu1 %v6833_v59  ;;  %v7053_v59 = vld [vmem:[#allocation17 + $0x14] sm:$0xf0] }
 0x918   : > { %v4535_v49 = vpop.f32.mrf.mxu1  ;;  %5155 = vmatpush.bf16.msrb.mxu2 %v6853_v15  ;;  %v7060_v15 = vld [vmem:[#allocation17 + $0x4c] sm:$0xf0] }
 0x919   : > { %v4536_v8 = vadd.f32 %v11078_v39, %v4535_v49  ;;  %v6828_v49 = vld [vmem:[#allocation17 + $0x88] sm:$0xf] }
 0x91b   : > { %v11213_v31 = vadd.f32 %v4558_v42, %v4536_v8  ;;  %v7069_v42 = vld [vmem:[#allocation17 + $0x94] sm:$0xf0]  ;;  %v6825_v8 = vor.u32 %v7066_v44, %v6822_v32  ;;  %5305 = vmatpush.bf16.msrb.mxu1 %v6817_v46  ;;  %v6756_v32 = vld [vmem:[#allocation17] sm:$0xf] }
 0x91c   : > { %5156 = vmatpush.bf16.msrb.mxu2 %v6837_v62  ;;  %v6829_v28 = vor.u32 %v7069_v42, %v6828_v49  ;;  %v7056_v62 = vld [vmem:[#allocation17 + $0x2c] sm:$0xf0] }
 0x91d   : > { %5206 = vmatpush.bf16.msra.mxu3 %v6825_v8  ;;  %v6773_v60 = vor.u32 %v7056_v62, %v6772_v4  ;;  %v7052_v49 = vld [vmem:[#allocation17 + $0xc] sm:$0xf0]  ;;  %v7050_v8 = vld [vmem:[#allocation17 + $0x4] sm:$0xf]  ;;  %v11238_v62 = vld [vmem:[%s12184_s29] ss:$0 sm:$0xff] }
 0x91e   : > { %4603 = vadd.xlane.f32.xlu1 %v11213_v31  ;;  %5255 = vmatpush.bf16.msra.mxu0 %v6829_v28  ;;  %v6757_v42 = vor.u32 %v7052_v49, %v6756_v32  ;;  %v6758_v28 = vld [vmem:[#allocation17 + $0x10] sm:$0xf0] }
 0x91f   : > { %5306 = vmatpush.bf16.msrb.mxu1 %v6801_v9  ;;  %v6761_v43 = vor.u32 %v7050_v8, %v6758_v28  ;;  %v4560_v8 = vld [vmem:[%s11081_s3 + $0x78] sm:$0xff]  ;;  %s6306_s3 = sadd.s32 %s7012_s20, %s7011_s12 }
 0x920   : > { %v4538_v48 = vpop.f32.mrf.mxu1  ;;  %5157 = vmatpush.bf16.msrb.mxu2 %v6821_v36  ;;  %v6785_v36 = vor.u32 %v7055_v34, %v6782_v45  ;;  %s7013_s9 = sshll.u32 %s6306_s3, 3 }
 0x921   : > { %v4539_v50 = vadd.f32 %v11078_v39, %v4538_v48  ;;  %v6788_v48 = vld [vmem:[#allocation17 + $0x40] sm:$0xf]  ;;  %s6308_s5 = scalar_lea.hbm %s12190_s10, %s7013_s9 }
 0x922   : > { %5256 = vmatpush.bf16.msra.mxu0 %v6813_v25  ;;  %v6789_v55 = vor.u32 %v7060_v15, %v6788_v48  ;;  %s6311_s29 = sshll.u32 %s6308_s5, 4  ;;  %s6312_s29 = int_to_ptr.hbm [resolvable:$true] %s6311_s29 }
 0x923   : > { %v11218_v1 = vadd.f32 %v4559_v53, %v4539_v50  ;;  %v6809_v53 = vor.u32 %v7062_v3, %v6806_v47  ;;  %v6796_v50 = vld [vmem:[#allocation17 + $0x48] sm:$0xf]  ;;  %5307 = vmatpush.bf16.msrb.mxu1 %v6785_v36  ;;  %v6765_v3 = vor.u32 %v7053_v59, %v6764_v51  ;;  %s8093_s16 = sshra.s32 %s6312_s29, 4  ;;  %s8094_s16 = int_to_ptr.hbm [resolvable:$true] %s8093_s16 }
 0x924   : > { %5158 = vmatpush.bf16.msrb.mxu2 %v6805_v38  ;;  %v6797_v23 = vor.u32 %v7061_v20, %v6796_v50  ;;  %v6769_v38 = vor.u32 %v7051_v0, %v6766_v12  ;;  %p8100_p11 = scmp.lt.s32.totalorder %s8094_s16, %s12190_s10 }
 0x925   : > { %5207 = vmatpush.bf16.msra.mxu3 %v6809_v53 }
 0x926   : > { %4605 = vadd.xlane.f32.xlu1 %v11218_v1  ;;  %5257 = vmatpush.bf16.msra.mxu0 %v6797_v23 }
 0x927   : > { %5308 = vmatpush.bf16.msrb.mxu1 %v6769_v38 }
 0x928   : > { %5159 = vmatpush.bf16.msrb.mxu2 %v6789_v55  ;;  %v4540_v36 = vpop.f32.mrf.mxu1 }
 0x929   : > { %5208 = vmatpush.bf16.msra.mxu3 %v6793_v14  ;;  %v4541_v32 = vadd.f32 %v11078_v39, %v4540_v36 }
 0x92a   : > { %5258 = vmatpush.bf16.msra.mxu0 %v6781_v40 }
 0x92b   : > { %v11265_v0 = vadd.f32 %v4560_v8, %v4541_v32 }
 0x92c   : > { %5160 = vmatpush.bf16.msrb.mxu2 %v6773_v60 }
 0x92d   : > { %5209 = vmatpush.bf16.msra.mxu3 %v6777_v61 }
 0x92e   : > { %5259 = vmatpush.bf16.msra.mxu0 %v6765_v3 }
 0x930   : > { %5161 = vmatpush.bf16.msrb.mxu2 %v6757_v42 }
 0x931   : > { %5210 = vmatpush.bf16.msra.mxu3 %v6761_v43 }
 0x933   : > { %v4665_v26 = vpop.xlane.xlu1 %4664 }
 0x934   : > { %v4696_v41 = vmul.f32 %v4665_v26, %v11137_v19 }
 0x936   : > { %v4712_v44 = vadd.f32 1e-05, %v4696_v41 }
 0x938   : > { %7715 = vrsqrt.f32 %v4712_v44  ;;  %vm4734_vm6 = vweird.f32 %v4712_v44 }
 0x93b   : > { %v4592_v47 = vpop.xlane.xlu1 %4591  ;;  %v4667_v56 = vpop.xlane.xlu2 %4666 }
 0x93c   : > { %v4623_v6 = vmul.f32 %v11137_v19, %v4592_v47  ;;  %v4697_v53 = vmul.f32 %v4667_v56, %v11137_v19 }
 0x93e   : > { %v7716_v25 = vpop.eup %7715  ;;  %v11225_v24 = vsub.f32 %v11151_v54, %v4623_v6  ;;  %v4713_v35 = vadd.f32 1e-05, %v4697_v53 }
 0x93f   : > { %v4729_v46 = vmul.f32 %v7716_v25, %v4712_v44  ;;  %vm4735_vm5 = vweird.f32 %v7716_v25 }
 0x940   : > { %7717 = vrsqrt.f32 %v4713_v35  ;;  %v4655_v48 = vmul.f32 %v11225_v24, %v11225_v24  ;;  %vm4736_vm7 = vmor %vm4734_vm6, %vm4735_vm5  ;;  %vm4744_vm9 = vweird.f32 %v4713_v35 }
 0x941   : > { %v4730_v15 = vmul.f32 %v7716_v25, %v4729_v46 }
 0x942   : > { %4678 = vadd.xlane.f32.xlu2 %v4655_v48 }
 0x943   : > { %v4731_v16 = vmul.f32 0.5, %v4730_v15 }
 0x945   : > { %v4732_v55 = vsub.f32 1.5, %v4731_v16 }
 0x946   : > { %v7718_v29 = vpop.eup %7717 }
 0x947   : > { %v4733_v50 = vmul.f32 %v7716_v25, %v4732_v55  ;;  %v4739_v20 = vmul.f32 %v7718_v29, %v4713_v35  ;;  %vm4745_vm8 = vweird.f32 %v7718_v29 }
 0x948   : > { %vm4746_vm10 = vmor %vm4744_vm9, %vm4745_vm8 }
 0x949   : > { %v4740_v14 = vmul.f32 %v7718_v29, %v4739_v20  ;;  %v4737_v23 = vsel %vm4736_vm7, %v7716_v25, %v4733_v50 }
 0x94a   : > { %v4888_v9 = vmul.f32 %v4737_v23, %v11141_v17 }
 0x94b   : > { %v4741_v54 = vmul.f32 0.5, %v4740_v14 }
 0x94c   : > { %v4908_v30 = vmul.f32 %v11232_v63, %v4888_v9 }
 0x94d   : > { %v4742_v10 = vsub.f32 1.5, %v4741_v54 }
 0x94e   : > { %v11244_v13 = vadd.f32 %v11238_v62, %v4908_v30 }
 0x94f   : > { %v4743_v26 = vmul.f32 %v7718_v29, %v4742_v10 }
 0x951   : > { %v4747_v4 = vsel %vm4746_vm10, %v7718_v29, %v4743_v26 }
 0x952   : > { %v4889_v41 = vmul.f32 %v4747_v4, %v11149_v37 }
 0x954   : > { %v4909_v60 = vmul.f32 %v11232_v63, %v4889_v41 }
 0x956   : > { %v11247_v17 = vadd.f32 %v11238_v62, %v4909_v60 }
 0x958   : > { %v4944_v11 = vpack.c.bf16 %v11247_v17, %v11244_v13 }
 0x95a   : > { %5162 = vmatmul.bf16.vlgmr.msrb.gmra.mxu2 %v4944_v11  ;;  %5211 = vmatmul.bf16.vlgmr.msra.gmra.mxu3 %v4944_v11 }
 0x95b   : > { %5260 = vmatmul.bf16.vlgmr.msra.gmra.mxu0 %v4944_v11  ;;  %5309 = vmatmul.bf16.vlgmr.msrb.gmra.mxu1 %v4944_v11 }
 0x968   : > { %v4594_v2 = vpop.xlane.xlu1 %4593 }
 0x969   : > { %v4624_v61 = vmul.f32 %v11137_v19, %v4594_v2  ;;  %v4669_v37 = vpop.xlane.xlu2 %4668 }
 0x96a   : > { %v4698_v40 = vmul.f32 %v4669_v37, %v11137_v19 }
 0x96b   : > { %v11254_v34 = vsub.f32 %v11162_v18, %v4624_v61 }
 0x96c   : > { %v4714_v45 = vadd.f32 1e-05, %v4698_v40 }
 0x96d   : > { %v4656_v44 = vmul.f32 %v11254_v34, %v11254_v34 }
 0x96e   : > { %7719 = vrsqrt.f32 %v4714_v45  ;;  %vm4754_vm12 = vweird.f32 %v4714_v45 }
 0x96f   : > { %4680 = vadd.xlane.f32.xlu2 %v4656_v44 }
 0x971   : > { %v4671_v49 = vpop.xlane.xlu0 %4670  ;;  %v4596_v42 = vpop.xlane.xlu2 %4595 }
 0x972   : > { %v4699_v28 = vmul.f32 %v4671_v49, %v11137_v19  ;;  %v4625_v51 = vmul.f32 %v11137_v19, %v4596_v42 }
 0x974   : > { %v7720_v43 = vpop.eup %7719  ;;  %v4715_v59 = vadd.f32 1e-05, %v4699_v28  ;;  %v11263_v18 = vsub.f32 %v11173_v57, %v4625_v51 }
 0x975   : > { %v4749_v12 = vmul.f32 %v7720_v43, %v4714_v45  ;;  %vm4755_vm11 = vweird.f32 %v7720_v43 }
 0x976   : > { %7721 = vrsqrt.f32 %v4715_v59  ;;  %v4657_v3 = vmul.f32 %v11263_v18, %v11263_v18  ;;  %vm4756_vm13 = vmor %vm4754_vm12, %vm4755_vm11  ;;  %vm4764_vm15 = vweird.f32 %v4715_v59 }
 0x977   : > { %v4750_v39 = vmul.f32 %v7720_v43, %v4749_v12  ;;  %4607 = vadd.xlane.f32.xlu2 %v11265_v0 }
 0x978   : > { %4682 = vadd.xlane.f32.xlu0 %v4657_v3 }
 0x979   : > { %v4751_v38 = vmul.f32 0.5, %v4750_v39  ;;  %v4673_v47 = vpop.xlane.xlu0 %4672  ;;  %v4598_v56 = vpop.xlane.xlu2 %4597 }
 0x97a   : > { %v4700_v6 = vmul.f32 %v4673_v47, %v11137_v19  ;;  %v4626_v53 = vmul.f32 %v11137_v19, %v4598_v56 }
 0x97b   : > { %v4752_v57 = vsub.f32 1.5, %v4751_v38 }
 0x97c   : > { %v7722_v25 = vpop.eup %7721  ;;  %v4716_v35 = vadd.f32 1e-05, %v4700_v6  ;;  %v11273_v46 = vsub.f32 %v11184_v52, %v4626_v53 }
 0x97d   : > { %v4753_v48 = vmul.f32 %v7720_v43, %v4752_v57  ;;  %v4759_v15 = vmul.f32 %v7722_v25, %v4715_v59  ;;  %vm4765_vm14 = vweird.f32 %v7722_v25 }
 0x97e   : > { %7723 = vrsqrt.f32 %v4716_v35  ;;  %v4658_v16 = vmul.f32 %v11273_v46, %v11273_v46  ;;  %vm4766_vm0 = vmor %vm4764_vm15, %vm4765_vm14  ;;  %vm4774_vm2 = vweird.f32 %v4716_v35 }
 0x97f   : > { %v4760_v55 = vmul.f32 %v7722_v25, %v4759_v15  ;;  %v4757_v29 = vsel %vm4756_vm13, %v7720_v43, %v4753_v48 }
 0x980   : > { %4684 = vadd.xlane.f32.xlu0 %v4658_v16  ;;  %v4890_v9 = vmul.f32 %v4757_v29, %v11160_v27 }
 0x981   : > { %v4761_v50 = vmul.f32 0.5, %v4760_v55  ;;  %v4675_v20 = vpop.xlane.xlu1 %4674  ;;  %v4600_v14 = vpop.xlane.xlu0 %4599 }
 0x982   : > { %v4701_v23 = vmul.f32 %v4675_v20, %v11137_v19  ;;  %v4627_v52 = vmul.f32 %v11137_v19, %v4600_v14  ;;  %v4910_v37 = vmul.f32 %v11232_v63, %v4890_v9 }
 0x983   : > { %v4762_v54 = vsub.f32 1.5, %v4761_v50 }
 0x984   : > { %v7724_v10 = vpop.eup %7723  ;;  %v4717_v26 = vadd.f32 1e-05, %v4701_v23  ;;  %v11281_v4 = vsub.f32 %v11195_v33, %v4627_v52  ;;  %v11293_v42 = vadd.f32 %v11238_v62, %v4910_v37 }
 0x985   : > { %v4763_v30 = vmul.f32 %v7722_v25, %v4762_v54  ;;  %v4769_v41 = vmul.f32 %v7724_v10, %v4716_v35  ;;  %vm4775_vm1 = vweird.f32 %v7724_v10 }
 0x986   : > { %7725 = vrsqrt.f32 %v4717_v26  ;;  %v4659_v60 = vmul.f32 %v11281_v4, %v11281_v4  ;;  %vm4776_vm3 = vmor %vm4774_vm2, %vm4775_vm1  ;;  %vm4784_vm5 = vweird.f32 %v4717_v26 }
 0x987   : > { %v4767_v11 = vsel %vm4766_vm0, %v7722_v25, %v4763_v30  ;;  %v4770_v2 = vmul.f32 %v7724_v10, %v4769_v41 }
 0x988   : > { %v4891_v61 = vmul.f32 %v4767_v11, %v11171_v58  ;;  %4686 = vadd.xlane.f32.xlu1 %v4659_v60 }
 0x989   : > { %v4771_v27 = vmul.f32 0.5, %v4770_v2  ;;  %v4677_v40 = vpop.xlane.xlu1 %4676  ;;  %v4602_v45 = vpop.xlane.xlu0 %4601 }
 0x98a   : > { %v4628_v33 = vmul.f32 %v11137_v19, %v4602_v45  ;;  %v4911_v44 = vmul.f32 %v11232_v63, %v4891_v61  ;;  %v4702_v50 = vmul.f32 %v4677_v40, %v11137_v19 }
 0x98b   : > { %v4772_v36 = vsub.f32 1.5, %v4771_v27 }
 0x98c   : > { %v7726_v32 = vpop.eup %7725  ;;  %v11290_v49 = vsub.f32 %v11206_v22, %v4628_v33  ;;  %v11296_v58 = vadd.f32 %v11238_v62, %v4911_v44 }
 0x98d   : > { %v4773_v8 = vmul.f32 %v7724_v10, %v4772_v36  ;;  %v4779_v28 = vmul.f32 %v7726_v32, %v4717_v26  ;;  %vm4785_vm4 = vweird.f32 %v7726_v32 }
 0x98e   : > { %v4660_v51 = vmul.f32 %v11290_v49, %v11290_v49  ;;  %v4945_v43 = vpack.c.bf16 %v11296_v58, %v11293_v42  ;;  %vm4786_vm6 = vmor %vm4784_vm5, %vm4785_vm4 }
 0x98f   : > { %v4780_v59 = vmul.f32 %v7726_v32, %v4779_v28  ;;  %v4777_v22 = vsel %vm4776_vm3, %v7724_v10, %v4773_v8 }
 0x990   : > { %4688 = vadd.xlane.f32.xlu2 %v4660_v51  ;;  %5167 = vmatmul.bf16.gmra.mxu2 %v4945_v43  ;;  %v4892_v47 = vmul.f32 %v4777_v22, %v11182_v7 }
 0x991   : > { %v4781_v12 = vmul.f32 0.5, %v4780_v59  ;;  %5216 = vmatmul.bf16.gmra.mxu3 %v4945_v43  ;;  %5265 = vmatmul.bf16.gmra.mxu0 %v4945_v43  ;;  %v4604_v3 = vpop.xlane.xlu1 %4603 }
 0x992   : > { %5314 = vmatmul.bf16.gmra.mxu1 %v4945_v43  ;;  %v4629_v39 = vmul.f32 %v11137_v19, %v4604_v3  ;;  %v4912_v35 = vmul.f32 %v11232_v63, %v4892_v47 }
 0x993   : > { %v4782_v38 = vsub.f32 1.5, %v4781_v12 }
 0x994   : > { %v11305_v56 = vsub.f32 %v11213_v31, %v4629_v39  ;;  %v11317_v16 = vadd.f32 %v11238_v62, %v4912_v35 }
 0x995   : > { %v4783_v6 = vmul.f32 %v7726_v32, %v4782_v38 }
 0x996   : > { %v4661_v53 = vmul.f32 %v11305_v56, %v11305_v56 }
 0x997   : > { %v4787_v57 = vsel %vm4786_vm6, %v7726_v32, %v4783_v6 }
 0x998   : > { %v4893_v25 = vmul.f32 %v4787_v57, %v11193_v21  ;;  %4690 = vadd.xlane.f32.xlu0 %v4661_v53 }
 0x999   : > { %v4606_v48 = vpop.xlane.xlu1 %4605 }
 0x99a   : > { %v4630_v15 = vmul.f32 %v11137_v19, %v4606_v48  ;;  %v4913_v7 = vmul.f32 %v11232_v63, %v4893_v25 }
 0x99c   : > { %v11314_v31 = vsub.f32 %v11218_v1, %v4630_v15  ;;  %v11320_v55 = vadd.f32 %v11238_v62, %v4913_v7  ;;  %v4718_v1 = vadd.f32 1e-05, %v4702_v50 }
 0x99e   : > { %v4662_v21 = vmul.f32 %v11314_v31, %v11314_v31  ;;  %v4946_v29 = vpack.c.bf16 %v11320_v55, %v11317_v16  ;;  %7727 = vrsqrt.f32 %v4718_v1  ;;  %vm4794_vm8 = vweird.f32 %v4718_v1 }
 0x9a0   : > { %4692 = vadd.xlane.f32.xlu1 %v4662_v21  ;;  %5172 = vmatmul.bf16.gmra.mxu2 %v4946_v29 }
 0x9a1   : > { %5221 = vmatmul.bf16.gmra.mxu3 %v4946_v29  ;;  %5270 = vmatmul.bf16.gmra.mxu0 %v4946_v29 }
 0x9a2   : > { %5319 = vmatmul.bf16.gmra.mxu1 %v4946_v29 }
 0x9a4   : > { %v7728_v20 = vpop.eup %7727 }
 0x9a5   : > { %v4789_v14 = vmul.f32 %v7728_v20, %v4718_v1  ;;  %vm4795_vm7 = vweird.f32 %v7728_v20 }
 0x9a6   : > { %vm4796_vm9 = vmor %vm4794_vm8, %vm4795_vm7 }
 0x9a7   : > { %v4790_v23 = vmul.f32 %v7728_v20, %v4789_v14 }
 0x9a9   : > { %v4791_v9 = vmul.f32 0.5, %v4790_v23 }
 0x9ab   : > { %v4792_v26 = vsub.f32 1.5, %v4791_v9 }
 0x9ad   : > { %v4793_v41 = vmul.f32 %v7728_v20, %v4792_v26 }
 0x9af   : > { %v4797_v2 = vsel %vm4796_vm9, %v7728_v20, %v4793_v41 }
 0x9b0   : > { %v4894_v27 = vmul.f32 %v4797_v2, %v11204_v5 }
 0x9b2   : > { %v4914_v44 = vmul.f32 %v11232_v63, %v4894_v27 }
 0x9b4   : > { %v11333_v32 = vadd.f32 %v11238_v62, %v4914_v44 }
 0x9b5   : > { %v4679_v52 = vpop.xlane.xlu2 %4678 }
 0x9b6   : > { %v4703_v54 = vmul.f32 %v4679_v52, %v11137_v19 }
 0x9b8   : > { %v4719_v10 = vadd.f32 1e-05, %v4703_v54 }
 0x9ba   : > { %7729 = vrsqrt.f32 %v4719_v10  ;;  %vm4804_vm11 = vweird.f32 %v4719_v10 }
 0x9c0   : > { %v7730_v30 = vpop.eup %7729 }
 0x9c1   : > { %v4799_v60 = vmul.f32 %v7730_v30, %v4719_v10  ;;  %vm4805_vm10 = vweird.f32 %v7730_v30 }
 0x9c2   : > { %vm4806_vm12 = vmor %vm4804_vm11, %vm4805_vm10 }
 0x9c3   : > { %v4800_v11 = vmul.f32 %v7730_v30, %v4799_v60 }
 0x9c5   : > { %v4801_v61 = vmul.f32 0.5, %v4800_v11 }
 0x9c7   : > { %v4802_v37 = vsub.f32 1.5, %v4801_v61 }
 0x9c9   : > { %v4803_v40 = vmul.f32 %v7730_v30, %v4802_v37 }
 0x9cb   : > { %v4807_v45 = vsel %vm4806_vm12, %v7730_v30, %v4803_v40 }
 0x9cc   : > { %v4895_v33 = vmul.f32 %v4807_v45, %v11225_v24 }
 0x9ce   : > { %v4915_v36 = vmul.f32 %v11232_v63, %v4895_v33 }
 0x9d0   : > { %v11336_v8 = vadd.f32 %v11238_v62, %v4915_v36 }
 0x9d2   : > { %v4947_v28 = vpack.c.bf16 %v11336_v8, %v11333_v32 }
 0x9d4   : > { %5177 = vmatmul.bf16.gmra.mxu2 %v4947_v28  ;;  %5226 = vmatmul.bf16.gmra.mxu3 %v4947_v28 }
 0x9d5   : > { %5275 = vmatmul.bf16.gmra.mxu0 %v4947_v28  ;;  %5324 = vmatmul.bf16.gmra.mxu1 %v4947_v28 }
 0x9e2   : > { %v4681_v5 = vpop.xlane.xlu2 %4680 }
 0x9e3   : > { %v4704_v24 = vmul.f32 %v4681_v5, %v11137_v19 }
 0x9e5   : > { %v4720_v51 = vadd.f32 1e-05, %v4704_v24 }
 0x9e7   : > { %7731 = vrsqrt.f32 %v4720_v51  ;;  %vm4814_vm14 = vweird.f32 %v4720_v51 }
 0x9ea   : > { %v4608_v43 = vpop.xlane.xlu2 %4607 }
 0x9eb   : > { %v4631_v59 = vmul.f32 %v11137_v19, %v4608_v43  ;;  %v4683_v22 = vpop.xlane.xlu0 %4682 }
 0x9ec   : > { %v4705_v12 = vmul.f32 %v4683_v22, %v11137_v19 }
 0x9ed   : > { %v7732_v3 = vpop.eup %7731  ;;  %v11344_v39 = vsub.f32 %v11265_v0, %v4631_v59 }
 0x9ee   : > { %v4809_v38 = vmul.f32 %v7732_v3, %v4720_v51  ;;  %v4721_v47 = vadd.f32 1e-05, %v4705_v12  ;;  %vm4815_vm13 = vweird.f32 %v7732_v3 }
 0x9ef   : > { %v4663_v6 = vmul.f32 %v11344_v39, %v11344_v39  ;;  %vm4816_vm15 = vmor %vm4814_vm14, %vm4815_vm13 }
 0x9f0   : > { %v4810_v53 = vmul.f32 %v7732_v3, %v4809_v38  ;;  %7733 = vrsqrt.f32 %v4721_v47  ;;  %vm4824_vm1 = vweird.f32 %v4721_v47 }
 0x9f1   : > { %4694 = vadd.xlane.f32.xlu2 %v4663_v6 }
 0x9f2   : > { %v4811_v57 = vmul.f32 0.5, %v4810_v53 }
 0x9f3   : > { %v4685_v25 = vpop.xlane.xlu0 %4684 }
 0x9f4   : > { %v4812_v35 = vsub.f32 1.5, %v4811_v57  ;;  %v4706_v48 = vmul.f32 %v4685_v25, %v11137_v19 }
 0x9f6   : > { %v7734_v15 = vpop.eup %7733  ;;  %v4722_v7 = vadd.f32 1e-05, %v4706_v48  ;;  %v4813_v21 = vmul.f32 %v7732_v3, %v4812_v35 }
 0x9f7   : > { %v4819_v29 = vmul.f32 %v7734_v15, %v4721_v47  ;;  %vm4825_vm0 = vweird.f32 %v7734_v15 }
 0x9f8   : > { %7735 = vrsqrt.f32 %v4722_v7  ;;  %v4817_v50 = vsel %vm4816_vm15, %v7732_v3, %v4813_v21  ;;  %vm4826_vm2 = vmor %vm4824_vm1, %vm4825_vm0  ;;  %vm4834_vm4 = vweird.f32 %v4722_v7 }
 0x9f9   : > { %v4820_v0 = vmul.f32 %v7734_v15, %v4819_v29  ;;  %v4896_v54 = vmul.f32 %v4817_v50, %v11254_v34 }
 0x9fb   : > { %v4821_v1 = vmul.f32 0.5, %v4820_v0  ;;  %v4687_v20 = vpop.xlane.xlu1 %4686  ;;  %v4916_v11 = vmul.f32 %v11232_v63, %v4896_v54 }
 0x9fc   : > { %v4707_v14 = vmul.f32 %v4687_v20, %v11137_v19 }
 0x9fd   : > { %v4822_v23 = vsub.f32 1.5, %v4821_v1  ;;  %v11356_v33 = vadd.f32 %v11238_v62, %v4916_v11 }
 0x9fe   : > { %v7736_v52 = vpop.eup %7735  ;;  %v4723_v10 = vadd.f32 1e-05, %v4707_v14 }
 0x9ff   : > { %v4823_v9 = vmul.f32 %v7734_v15, %v4822_v23  ;;  %v4829_v26 = vmul.f32 %v7736_v52, %v4722_v7  ;;  %vm4835_vm3 = vweird.f32 %v7736_v52 }
 0xa00   : > { %7737 = vrsqrt.f32 %v4723_v10  ;;  %vm4836_vm5 = vmor %vm4834_vm4, %vm4835_vm3  ;;  %vm4844_vm7 = vweird.f32 %v4723_v10 }
 0xa01   : > { %v4827_v30 = vsel %vm4826_vm2, %v7734_v15, %v4823_v9  ;;  %v4830_v41 = vmul.f32 %v7736_v52, %v4829_v26 }
 0xa02   : > { %v4897_v60 = vmul.f32 %v4827_v30, %v11263_v18 }
 0xa03   : > { %v4831_v2 = vmul.f32 0.5, %v4830_v41  ;;  %v4689_v61 = vpop.xlane.xlu2 %4688 }
 0xa04   : > { %v4708_v37 = vmul.f32 %v4689_v61, %v11137_v19  ;;  %v4917_v27 = vmul.f32 %v11232_v63, %v4897_v60  ;;  %v7089_v61 = vld [vmem:[#allocation18 + $0x38] sm:$0xff] }
 0xa05   : > { %v4832_v40 = vsub.f32 1.5, %v4831_v2  ;;  %5706 = vmatpush.bf16.msra.mxu2 %v7089_v61  ;;  %v7090_v61 = vld [vmem:[#allocation18 + $0x40] sm:$0xff] }
 0xa06   : > { %v7738_v34 = vpop.eup %7737  ;;  %v4724_v45 = vadd.f32 1e-05, %v4708_v37  ;;  %v11359_v44 = vadd.f32 %v11238_v62, %v4917_v27  ;;  %v7097_v37 = vld [vmem:[#allocation18 + $0x78] sm:$0xff] }
 0xa07   : > { %v4839_v36 = vmul.f32 %v7738_v34, %v4723_v10  ;;  %v4833_v28 = vmul.f32 %v7736_v52, %v4832_v40  ;;  %vm4845_vm6 = vweird.f32 %v7738_v34  ;;  %v7105_v27 = vld [vmem:[#allocation18 + $0xb8] sm:$0xff]  ;;  %5755 = vmatpush.bf16.msrb.mxu3 %v7097_v37  ;;  %v7098_v37 = vld [vmem:[#allocation18 + $0x80] sm:$0xff] }
 0xa08   : > { %7739 = vrsqrt.f32 %v4724_v45  ;;  %v4948_v18 = vpack.c.bf16 %v11359_v44, %v11356_v33  ;;  %vm4846_vm8 = vmor %vm4844_vm7, %vm4845_vm6  ;;  %vm4854_vm10 = vweird.f32 %v4724_v45  ;;  %v7113_v40 = vld [vmem:[#allocation18 + $0xf8] sm:$0xff]  ;;  %5804 = vmatpush.bf16.msrb.mxu0 %v7105_v27  ;;  %v7106_v27 = vld [vmem:[#allocation18 + $0xc0] sm:$0xff] }
 0xa09   : > { %v4840_v5 = vmul.f32 %v7738_v34, %v4839_v36  ;;  %v4837_v43 = vsel %vm4836_vm5, %v7736_v52, %v4833_v28  ;;  %5853 = vmatpush.bf16.msra.mxu1 %v7113_v40  ;;  %v7104_v36 = vld [vmem:[#allocation18 + $0xb0] sm:$0xff] }
 0xa0a   : > { %5182 = vmatmul.bf16.gmra.mxu2 %v4948_v18  ;;  %5231 = vmatmul.bf16.gmra.mxu3 %v4948_v18  ;;  %v4898_v38 = vmul.f32 %v4837_v43, %v11273_v46  ;;  %v7112_v28 = vld [vmem:[#allocation18 + $0xf0] sm:$0xff] }
 0xa0b   : > { %v4841_v24 = vmul.f32 0.5, %v4840_v5  ;;  %5280 = vmatmul.bf16.gmra.mxu0 %v4948_v18  ;;  %5329 = vmatmul.bf16.gmra.mxu1 %v4948_v18  ;;  %v4691_v51 = vpop.xlane.xlu0 %4690  ;;  %v7087_v18 = vld [vmem:[#allocation18 + $0x28] sm:$0xff] }
 0xa0c   : > { %v4709_v59 = vmul.f32 %v4691_v51, %v11137_v19  ;;  %v4918_v48 = vmul.f32 %v11232_v63, %v4898_v38  ;;  %5805 = vmatpush.bf16.msrb.mxu0 %v7104_v36  ;;  %v7095_v5 = vld [vmem:[#allocation18 + $0x68] sm:$0xff] }
 0xa0d   : > { %v4842_v22 = vsub.f32 1.5, %v4841_v24  ;;  %5854 = vmatpush.bf16.msra.mxu1 %v7112_v28  ;;  %v7103_v24 = vld [vmem:[#allocation18 + $0xa8] sm:$0xff] }
 0xa0e   : > { %v7740_v12 = vpop.eup %7739  ;;  %v4725_v3 = vadd.f32 1e-05, %v4709_v59  ;;  %v11372_v50 = vadd.f32 %v11238_v62, %v4918_v48  ;;  %v7111_v51 = vld [vmem:[#allocation18 + $0xe8] sm:$0xff]  ;;  %v7086_v59 = vld [vmem:[#allocation18 + $0x20] sm:$0xff]  ;;  %v7109_v48 = vld [vmem:[#allocation18 + $0xd8] sm:$0xff] }
 0xa0f   : > { %v4843_v47 = vmul.f32 %v7738_v34, %v4842_v22  ;;  %v4849_v6 = vmul.f32 %v7740_v12, %v4724_v45  ;;  %vm4855_vm9 = vweird.f32 %v7740_v12  ;;  %v7096_v45 = vld [vmem:[#allocation18 + $0x70] sm:$0xff]  ;;  %v7094_v22 = vld [vmem:[#allocation18 + $0x60] sm:$0xff] }
 0xa10   : > { %7741 = vrsqrt.f32 %v4725_v3  ;;  %vm4856_vm11 = vmor %vm4854_vm10, %vm4855_vm9  ;;  %vm4864_vm13 = vweird.f32 %v4725_v3  ;;  %5756 = vmatpush.bf16.msrb.mxu3 %v7096_v45  ;;  %5806 = vmatpush.bf16.msrb.mxu0 %v7103_v24 }
 0xa11   : > { %v4847_v53 = vsel %vm4846_vm8, %v7738_v34, %v4843_v47  ;;  %v4850_v57 = vmul.f32 %v7740_v12, %v4849_v6  ;;  %v7088_v34 = vld [vmem:[#allocation18 + $0x30] sm:$0xff]  ;;  %5855 = vmatpush.bf16.msra.mxu1 %v7111_v51 }
 0xa12   : > { %v4899_v25 = vmul.f32 %v4847_v53, %v11281_v4  ;;  %5707 = vmatpush.bf16.msra.mxu2 %v7088_v34  ;;  %v7085_v53 = vld [vmem:[#allocation18 + $0x18] sm:$0xff] }
 0xa13   : > { %v4851_v35 = vmul.f32 0.5, %v4850_v57  ;;  %v7093_v57 = vld [vmem:[#allocation18 + $0x58] sm:$0xff] }
 0xa14   : > { %v4919_v15 = vmul.f32 %v11232_v63, %v4899_v25  ;;  %5757 = vmatpush.bf16.msrb.mxu3 %v7095_v5  ;;  %v7101_v25 = vld [vmem:[#allocation18 + $0x98] sm:$0xff] }
 0xa15   : > { %v4852_v7 = vsub.f32 1.5, %v4851_v35 }
 0xa16   : > { %v7742_v21 = vpop.eup %7741  ;;  %v11369_v29 = vadd.f32 %v11238_v62, %v4919_v15  ;;  %5708 = vmatpush.bf16.msra.mxu2 %v7087_v18 }
 0xa17   : > { %v4853_v46 = vmul.f32 %v7740_v12, %v4852_v7  ;;  %v4859_v0 = vmul.f32 %v7742_v21, %v4725_v3  ;;  %vm4865_vm12 = vweird.f32 %v7742_v21  ;;  %v7110_v3 = vld [vmem:[#allocation18 + $0xe0] sm:$0xff] }
 0xa18   : > { %v4949_v4 = vpack.c.bf16 %v11369_v29, %v11372_v50  ;;  %vm4866_vm14 = vmor %vm4864_vm13, %vm4865_vm12  ;;  %5758 = vmatpush.bf16.msrb.mxu3 %v7094_v22  ;;  %5856 = vmatpush.bf16.msra.mxu1 %v7110_v3 }
 0xa19   : > { %v4860_v1 = vmul.f32 %v7742_v21, %v4859_v0  ;;  %v4857_v20 = vsel %vm4856_vm11, %v7740_v12, %v4853_v46  ;;  %v7102_v12 = vld [vmem:[#allocation18 + $0xa0] sm:$0xff]  ;;  %v7092_v46 = vld [vmem:[#allocation18 + $0x50] sm:$0xff] }
 0xa1a   : > { %5187 = vmatmul.bf16.gmra.mxu2 %v4949_v4  ;;  %5236 = vmatmul.bf16.gmra.mxu3 %v4949_v4  ;;  %v4900_v52 = vmul.f32 %v4857_v20, %v11290_v49  ;;  %v4693_v49 = vpop.xlane.xlu1 %4692  ;;  %v7100_v0 = vld [vmem:[#allocation18 + $0x90] sm:$0xff]  ;;  %v11400_v20 = vpop.f32.mrf.mxu3 }
 0xa1b   : > { %v4861_v14 = vmul.f32 0.5, %v4860_v1  ;;  %5285 = vmatmul.bf16.gmra.mxu0 %v4949_v4  ;;  %5334 = vmatmul.bf16.gmra.mxu1 %v4949_v4  ;;  %v7108_v1 = vld [vmem:[#allocation18 + $0xd0] sm:$0xff]  ;;  %v11398_v4 = vpop.f32.mrf.mxu2 }
 0xa1c   : > { %v4920_v26 = vmul.f32 %v11232_v63, %v4900_v52  ;;  %5709 = vmatpush.bf16.msra.mxu2 %v7086_v59  ;;  %5807 = vmatpush.bf16.msrb.mxu0 %v7102_v12  ;;  %v7083_v52 = vld [vmem:[#allocation18 + $0x8] sm:$0xff] }
 0xa1d   : > { %v4862_v23 = vsub.f32 1.5, %v4861_v14  ;;  %5759 = vmatpush.bf16.msrb.mxu3 %v7093_v57  ;;  %5857 = vmatpush.bf16.msra.mxu1 %v7109_v48  ;;  %v11402_v14 = vpop.f32.mrf.mxu0 }
 0xa1e   : > { %v11381_v41 = vadd.f32 %v11238_v62, %v4920_v26  ;;  %v7107_v26 = vld [vmem:[#allocation18 + $0xc8] sm:$0xff] }
 0xa1f   : > { %v4863_v54 = vmul.f32 %v7742_v21, %v4862_v23  ;;  %v11404_v23 = vpop.f32.mrf.mxu1 }
 0xa20   : > { %5710 = vmatpush.bf16.msra.mxu2 %v7085_v53  ;;  %5808 = vmatpush.bf16.msrb.mxu0 %v7101_v25 }
 0xa21   : > { %v4867_v10 = vsel %vm4866_vm14, %v7742_v21, %v4863_v54  ;;  %v7084_v21 = vld [vmem:[#allocation18 + $0x10] sm:$0xff]  ;;  %5760 = vmatpush.bf16.msrb.mxu3 %v7092_v46  ;;  %5858 = vmatpush.bf16.msra.mxu1 %v7108_v1  ;;  %v7091_v54 = vld [vmem:[#allocation18 + $0x48] sm:$0xff] }
 0xa22   : > { %v4901_v9 = vmul.f32 %v4867_v10, %v11305_v56  ;;  %v4710_v56 = vmul.f32 %v4693_v49, %v11137_v19  ;;  %v7099_v10 = vld [vmem:[#allocation18 + $0x88] sm:$0xff]  ;;  %v5214_v45 = vpop.f32.mrf.mxu3 }
 0xa23   : > { %v5165_v34 = vpop.f32.mrf.mxu2 }
 0xa24   : > { %v4921_v30 = vmul.f32 %v11232_v63, %v4901_v9  ;;  %v11389_v2 = vadd.f32 1e-05, %v4710_v56  ;;  %5711 = vmatpush.bf16.msra.mxu2 %v7084_v21  ;;  %5809 = vmatpush.bf16.msrb.mxu0 %v7100_v0  ;;  %v7082_v56 = vld [vmem:[#allocation18] sm:$0xff] }
 0xa25   : > { %5761 = vmatpush.bf16.msrb.mxu3 %v7091_v54  ;;  %5859 = vmatpush.bf16.msra.mxu1 %v7107_v26  ;;  %v5263_v18 = vpop.f32.mrf.mxu0 }
 0xa26   : > { %v11384_v60 = vadd.f32 %v11238_v62, %v4921_v30  ;;  %7743 = vrsqrt.f32 %v11389_v2  ;;  %vm4874_vm0 = vweird.f32 %v11389_v2 }
 0xa27   : > { %v5312_v5 = vpop.f32.mrf.mxu1 }
 0xa28   : > { %v4950_v11 = vpack.c.bf16 %v11384_v60, %v11381_v41  ;;  %5712 = vmatpush.bf16.msra.mxu2 %v7083_v52  ;;  %5810 = vmatpush.bf16.msrb.mxu0 %v7099_v10 }
 0xa29   : > { %5762 = vmatpush.bf16.msrb.mxu3 %v7090_v61  ;;  %5860 = vmatpush.bf16.msra.mxu1 %v7106_v27 }
 0xa2a   : > { %5192 = vmatmul.bf16.gmra.mxu2 %v4950_v11  ;;  %5241 = vmatmul.bf16.gmra.mxu3 %v4950_v11 }
 0xa2b   : > { %5290 = vmatmul.bf16.gmra.mxu0 %v4950_v11  ;;  %5339 = vmatmul.bf16.gmra.mxu1 %v4950_v11  ;;  %v5168_v3 = vpop.f32.mrf.mxu2 }
 0xa2c   : > { %v11392_v43 = vpop.eup %7743  ;;  %5713 = vmatpush.bf16.msra.mxu2 %v7082_v56  ;;  %5811 = vmatpush.bf16.msrb.mxu0 %v7098_v37 }
 0xa2d   : > { %v4869_v38 = vmul.f32 %v11392_v43, %v11389_v2  ;;  %vm4875_vm15 = vweird.f32 %v11392_v43 }
 0xa2e   : > { %vm4876_vm1 = vmor %vm4874_vm0, %vm4875_vm15 }
 0xa2f   : > { %v4870_v47 = vmul.f32 %v11392_v43, %v4869_v38  ;;  %v5217_v38 = vpop.f32.mrf.mxu3 }
 0xa31   : > { %v4871_v7 = vmul.f32 0.5, %v4870_v47  ;;  %v5266_v47 = vpop.f32.mrf.mxu0 }
 0xa33   : > { %v4872_v9 = vsub.f32 1.5, %v4871_v7  ;;  %v5170_v25 = vpop.f32.mrf.mxu2 }
 0xa35   : > { %v4873_v11 = vmul.f32 %v11392_v43, %v4872_v9 }
 0xa37   : > { %v4877_v36 = vsel %vm4876_vm1, %v11392_v43, %v4873_v11 }
 0xa38   : > { %v4902_v51 = vmul.f32 %v4877_v36, %v11314_v31 }
 0xa3a   : > { %v4922_v12 = vmul.f32 %v11232_v63, %v4902_v51 }
 0xa3c   : > { %v11415_v53 = vadd.f32 %v11238_v62, %v4922_v12 }
 0xa64   : > { %v4695_v6 = vpop.xlane.xlu2 %4694 }
 0xa65   : > { %v4711_v35 = vmul.f32 %v4695_v6, %v11137_v19  ;;  %v5315_v6 = vpop.f32.mrf.mxu1 }
 0xa67   : > { %v4727_v15 = vadd.f32 1e-05, %v4711_v35  ;;  %v5219_v35 = vpop.f32.mrf.mxu3 }
 0xa69   : > { %7745 = vrsqrt.f32 %v4727_v15  ;;  %vm4884_vm3 = vweird.f32 %v4727_v15 }
 0xa6f   : > { %v7746_v30 = vpop.eup %7745 }
 0xa70   : > { %v4879_v49 = vmul.f32 %v7746_v30, %v4727_v15  ;;  %vm4885_vm2 = vweird.f32 %v7746_v30  ;;  %v5268_v15 = vpop.f32.mrf.mxu0 }
 0xa71   : > { %vm4886_vm4 = vmor %vm4884_vm3, %vm4885_vm2 }
 0xa72   : > { %v4880_v40 = vmul.f32 %v7746_v30, %v4879_v49 }
 0xa74   : > { %v4881_v28 = vmul.f32 0.5, %v4880_v40 }
 0xa76   : > { %v4882_v24 = vsub.f32 1.5, %v4881_v28 }
 0xa78   : > { %v4883_v59 = vmul.f32 %v7746_v30, %v4882_v24  ;;  %v5271_v28 = vpop.f32.mrf.mxu0 }
 0xa7a   : > { %v4887_v2 = vsel %vm4886_vm4, %v7746_v30, %v4883_v59 }
 0xa7b   : > { %v4903_v22 = vmul.f32 %v4887_v2, %v11344_v39  ;;  %v4984_v39 = vld [vmem:[%s12185_s30] sm:$0xf]  ;;  %s8095_s30 = scalar_lea.hbm %s8094_s16, 128 }
 0xa7c   : > { %v11427_v48 = vperm.slane %v4984_v39, 1  ;;  %v11429_v7 = vperm.slane %v4984_v39, 2  ;;  %v11431_v21 = vperm.slane %v4984_v39, 3  ;;  %p8096_p1 = scmp.ne.s32.totalorder %s8094_s16, %s8095_s30 }
 0xa7d   : > { %v4923_v43 = vmul.f32 %v11232_v63, %v4903_v22  ;;  %v11425_v63 = vperm.slane %v4984_v39, 0 }
 0xa7e   : > { %v5215_v0 = vadd.f32 %v5214_v45, %v11427_v48  ;;  %v5264_v1 = vadd.f32 %v5263_v18, %v11429_v7  ;;  %v5313_v52 = vadd.f32 %v5312_v5, %v11431_v21  ;;  %v5213_v10 = vadd.f32 %v11400_v20, %v11427_v48  ;;  %v5222_v45 = vpop.f32.mrf.mxu3  ;;  %p8097_p3 = pnand %p8096_p1, %p8543_p13 }
 0xa7f   : > { %v11418_v57 = vadd.f32 %v11238_v62, %v4923_v43  ;;  %v5317_v62 = vpop.f32.mrf.mxu1  ;;  %v5166_v46 = vadd.f32 %v5165_v34, %v11425_v63  ;;  %v5164_v54 = vadd.f32 %v11398_v4, %v11425_v63  ;;  %v5262_v9 = vadd.f32 %v11402_v14, %v11429_v7  ;;  %v5173_v34 = vpop.f32.mrf.mxu2 }
 0xa80   : > { %v5311_v26 = vadd.f32 %v11404_v23, %v11431_v21  ;;  %v5355_v11 = vmax.f32 %v5215_v0, 0.0  ;;  %v5356_v49 = vmax.f32 %v5264_v1, 0.0  ;;  %v5357_v56 = vmax.f32 %v5313_v52, 0.0  ;;  %v5273_v43 = vpop.f32.mrf.mxu0  ;;  %p8098_p9 = pneg %p8097_p3 }
 0xa81   : > { %v4951_v31 = vpack.c.bf16 %v11418_v57, %v11415_v53  ;;  %v5354_v30 = vmax.f32 %v5166_v46, 0.0  ;;  %v5350_v61 = vmax.f32 %v5164_v54, 0.0  ;;  %v5351_v37 = vmax.f32 %v5213_v10, 0.0 }
 0xa82   : > { %v5352_v27 = vmax.f32 %v5262_v9, 0.0  ;;  %v5353_v40 = vmax.f32 %v5311_v26, 0.0  ;;  %v5171_v14 = vadd.f32 %v5170_v25, %v11425_v63  ;;  %v5220_v23 = vadd.f32 %v5219_v35, %v11427_v48 }
 0xa83   : > { %5197 = vmatmul.bf16.gmra.mxu2 %v4951_v31  ;;  %5246 = vmatmul.bf16.gmra.mxu3 %v4951_v31  ;;  %v5414_v4 = vpack.c.bf16 %v5354_v30, %v5350_v61  ;;  %v5415_v36 = vpack.c.bf16 %v5355_v11, %v5351_v37  ;;  %v5269_v24 = vadd.f32 %v5268_v15, %v11429_v7 }
 0xa84   : > { %5295 = vmatmul.bf16.gmra.mxu0 %v4951_v31  ;;  %5344 = vmatmul.bf16.gmra.mxu1 %v4951_v31  ;;  %v5416_v18 = vpack.c.bf16 %v5356_v49, %v5352_v27  ;;  %v5417_v5 = vpack.c.bf16 %v5357_v56, %v5353_v40  ;;  %v5318_v51 = vadd.f32 %v5317_v62, %v11431_v21  ;;  %v5362_v0 = vmax.f32 %v5171_v14, 0.0 }
 0xa85   : > { %v5169_v22 = vadd.f32 %v5168_v3, %v11425_v63  ;;  %v5218_v12 = vadd.f32 %v5217_v38, %v11427_v48  ;;  %v5267_v39 = vadd.f32 %v5266_v47, %v11429_v7  ;;  %v5316_v46 = vadd.f32 %v5315_v6, %v11431_v21 }
 0xa86   : > { %v5224_v2 = vpop.f32.mrf.mxu3  ;;  %v5363_v25 = vmax.f32 %v5220_v23, 0.0  ;;  %v5364_v1 = vmax.f32 %v5269_v24, 0.0  ;;  %v5365_v35 = vmax.f32 %v5318_v51, 0.0  ;;  %v5274_v56 = vadd.f32 %v5273_v43, %v11429_v7 }
 0xa87   : > { %v5320_v20 = vpop.f32.mrf.mxu1  ;;  %v5175_v59 = vpop.f32.mrf.mxu2  ;;  %v5358_v52 = vmax.f32 %v5169_v22, 0.0  ;;  %v5359_v15 = vmax.f32 %v5218_v12, 0.0  ;;  %v5360_v54 = vmax.f32 %v5267_v39, 0.0  ;;  %v5361_v62 = vmax.f32 %v5316_v46, 0.0 }
 0xa88   : > { %v5276_v11 = vpop.f32.mrf.mxu0  ;;  %v5176_v47 = vadd.f32 %v5175_v59, %v11425_v63  ;;  %v5225_v6 = vadd.f32 %v5224_v2, %v11427_v48  ;;  %v5174_v37 = vadd.f32 %v5173_v34, %v11425_v63  ;;  %v5223_v27 = vadd.f32 %v5222_v45, %v11427_v48 }
 0xa89   : > { %v5418_v10 = vpack.c.bf16 %v5362_v0, %v5358_v52  ;;  %v5419_v9 = vpack.c.bf16 %v5363_v25, %v5359_v15  ;;  %v5420_v30 = vpack.c.bf16 %v5364_v1, %v5360_v54  ;;  %v5421_v38 = vpack.c.bf16 %v5365_v35, %v5361_v62 }
 0xa8a   : > { %v5272_v40 = vadd.f32 %v5271_v28, %v11429_v7  ;;  %v5371_v14 = vmax.f32 %v5225_v6, 0.0  ;;  %v5372_v51 = vmax.f32 %v5274_v56, 0.0  ;;  %v5366_v2 = vmax.f32 %v5174_v37, 0.0 }
 0xa8b   : > { %v5367_v22 = vmax.f32 %v5223_v27, 0.0  ;;  %v5277_v62 = vadd.f32 %v5276_v11, %v11429_v7 }
 0xa8c   : > { %v5368_v12 = vmax.f32 %v5272_v40, 0.0 }
 0xa8d   : > { %v5423_v34 = vpack.c.bf16 %v5371_v14, %v5367_v22 }
 0xa8e   : > { %v5227_v3 = vpop.f32.mrf.mxu3  ;;  %v5424_v39 = vpack.c.bf16 %v5372_v51, %v5368_v12 }
 0xa8f   : > { %v5322_v31 = vpop.f32.mrf.mxu1  ;;  %v5178_v26 = vpop.f32.mrf.mxu2  ;;  %v5228_v54 = vadd.f32 %v5227_v3, %v11427_v48 }
 0xa90   : > { %v5323_v61 = vadd.f32 %v5322_v31, %v11431_v21  ;;  %v5278_v23 = vpop.f32.mrf.mxu0  ;;  %v5179_v15 = vadd.f32 %v5178_v26, %v11425_v63 }
 0xa91   : > { %v5279_v35 = vadd.f32 %v5278_v23, %v11429_v7  ;;  %v5375_v37 = vmax.f32 %v5228_v54, 0.0 }
 0xa92   : > { %v5373_v59 = vmax.f32 %v5323_v61, 0.0  ;;  %v5374_v61 = vmax.f32 %v5179_v15, 0.0 }
 0xa93   : > { %5714 = vmatmul.bf16.vlgmr.msra.gmra.mxu2 %v5414_v4  ;;  %5763 = vmatmul.bf16.vlgmr.msrb.gmra.mxu3 %v5415_v36  ;;  %v5321_v4 = vadd.f32 %v5320_v20, %v11431_v21 }
 0xa94   : > { %5812 = vmatmul.bf16.vlgmr.msrb.gmra.mxu0 %v5416_v18  ;;  %5861 = vmatmul.bf16.vlgmr.msra.gmra.mxu1 %v5417_v5  ;;  %v5370_v5 = vmax.f32 %v5176_v47, 0.0 }
 0xa95   : > { %v5369_v43 = vmax.f32 %v5321_v4, 0.0  ;;  %v5376_v4 = vmax.f32 %v5277_v62, 0.0 }
 0xa96   : > { %v5229_v18 = vpop.f32.mrf.mxu3  ;;  %v5422_v31 = vpack.c.bf16 %v5370_v5, %v5366_v2 }
 0xa97   : > { %v5325_v49 = vpop.f32.mrf.mxu1  ;;  %v5180_v36 = vpop.f32.mrf.mxu2  ;;  %v5425_v45 = vpack.c.bf16 %v5373_v59, %v5369_v43  ;;  %v5230_v1 = vadd.f32 %v5229_v18, %v11427_v48 }
 0xa98   : > { %v5281_v46 = vpop.f32.mrf.mxu0  ;;  %v5181_v25 = vadd.f32 %v5180_v36, %v11425_v63 }
 0xa99   : > { %v5282_v43 = vadd.f32 %v5281_v46, %v11429_v7 }
 0xa9e   : > { %v5232_v20 = vpop.f32.mrf.mxu3 }
 0xa9f   : > { %v5327_v24 = vpop.f32.mrf.mxu1  ;;  %v5183_v28 = vpop.f32.mrf.mxu2  ;;  %v5233_v12 = vadd.f32 %v5232_v20, %v11427_v48 }
 0xaa0   : > { %v5328_v52 = vadd.f32 %v5327_v24, %v11431_v21  ;;  %v5283_v27 = vpop.f32.mrf.mxu0  ;;  %v5184_v22 = vadd.f32 %v5183_v28, %v11425_v63 }
 0xaa1   : > { %v5284_v59 = vadd.f32 %v5283_v27, %v11429_v7 }
 0xaa2   : > { %v5381_v47 = vmax.f32 %v5328_v52, 0.0  ;;  %v5384_v52 = vmax.f32 %v5282_v43, 0.0 }
 0xaa3   : > { %5719 = vmatmul.bf16.gmra.mxu2 %v5418_v10  ;;  %5768 = vmatmul.bf16.gmra.mxu3 %v5419_v9  ;;  %v5326_v10 = vadd.f32 %v5325_v49, %v11431_v21  ;;  %v5378_v9 = vmax.f32 %v5181_v25, 0.0 }
 0xaa4   : > { %5817 = vmatmul.bf16.gmra.mxu0 %v5420_v30  ;;  %5866 = vmatmul.bf16.gmra.mxu1 %v5421_v38  ;;  %v5379_v30 = vmax.f32 %v5230_v1, 0.0  ;;  %v5380_v38 = vmax.f32 %v5279_v35, 0.0  ;;  %v5382_v1 = vmax.f32 %v5184_v22, 0.0  ;;  %v5383_v35 = vmax.f32 %v5233_v12, 0.0 }
 0xaa5   : > { %v5377_v36 = vmax.f32 %v5326_v10, 0.0  ;;  %v5426_v18 = vpack.c.bf16 %v5378_v9, %v5374_v61 }
 0xaa6   : > { %v5234_v56 = vpop.f32.mrf.mxu3  ;;  %v5427_v26 = vpack.c.bf16 %v5379_v30, %v5375_v37  ;;  %v5428_v5 = vpack.c.bf16 %v5380_v38, %v5376_v4 }
 0xaa7   : > { %v5330_v0 = vpop.f32.mrf.mxu1  ;;  %v5185_v6 = vpop.f32.mrf.mxu2  ;;  %v5429_v3 = vpack.c.bf16 %v5381_v47, %v5377_v36  ;;  %v5235_v23 = vadd.f32 %v5234_v56, %v11427_v48 }
 0xaa8   : > { %v5186_v14 = vadd.f32 %v5185_v6, %v11425_v63  ;;  %v5286_v24 = vpop.f32.mrf.mxu0 }
 0xaa9   : > { %v5287_v37 = vadd.f32 %v5286_v24, %v11429_v7 }
 0xaae   : > { %v5237_v49 = vpop.f32.mrf.mxu3 }
 0xaaf   : > { %v5332_v40 = vpop.f32.mrf.mxu1  ;;  %v5188_v11 = vpop.f32.mrf.mxu2  ;;  %v5238_v61 = vadd.f32 %v5237_v49, %v11427_v48 }
 0xab0   : > { %v5333_v2 = vadd.f32 %v5332_v40, %v11431_v21  ;;  %v5288_v38 = vpop.f32.mrf.mxu0  ;;  %v5189_v56 = vadd.f32 %v5188_v11, %v11425_v63 }
 0xab1   : > { %v5289_v47 = vadd.f32 %v5288_v38, %v11429_v7 }
 0xab2   : > { %v5389_v25 = vmax.f32 %v5333_v2, 0.0  ;;  %v5392_v2 = vmax.f32 %v5287_v37, 0.0 }
 0xab3   : > { %5724 = vmatmul.bf16.gmra.mxu2 %v5422_v31  ;;  %5773 = vmatmul.bf16.gmra.mxu3 %v5423_v34  ;;  %v5331_v31 = vadd.f32 %v5330_v0, %v11431_v21  ;;  %v5386_v34 = vmax.f32 %v5186_v14, 0.0 }
 0xab4   : > { %5822 = vmatmul.bf16.gmra.mxu0 %v5424_v39  ;;  %5871 = vmatmul.bf16.gmra.mxu1 %v5425_v45  ;;  %v5387_v39 = vmax.f32 %v5235_v23, 0.0  ;;  %v5388_v45 = vmax.f32 %v5284_v59, 0.0  ;;  %v5390_v23 = vmax.f32 %v5189_v56, 0.0  ;;  %v5391_v59 = vmax.f32 %v5238_v61, 0.0 }
 0xab5   : > { %v5385_v15 = vmax.f32 %v5331_v31, 0.0  ;;  %v5430_v54 = vpack.c.bf16 %v5386_v34, %v5382_v1 }
 0xab6   : > { %v5431_v62 = vpack.c.bf16 %v5387_v39, %v5383_v35  ;;  %v5432_v10 = vpack.c.bf16 %v5388_v45, %v5384_v52  ;;  %v5239_v28 = vpop.f32.mrf.mxu3 }
 0xab7   : > { %v5335_v51 = vpop.f32.mrf.mxu1  ;;  %v5433_v9 = vpack.c.bf16 %v5389_v25, %v5385_v15  ;;  %v5190_v30 = vpop.f32.mrf.mxu2  ;;  %v5240_v0 = vadd.f32 %v5239_v28, %v11427_v48 }
 0xab8   : > { %v5191_v46 = vadd.f32 %v5190_v30, %v11425_v63  ;;  %v5336_v27 = vadd.f32 %v5335_v51, %v11431_v21 }
 0xaba   : > { %v5394_v36 = vmax.f32 %v5191_v46, 0.0  ;;  %v5393_v22 = vmax.f32 %v5336_v27, 0.0 }
 0xabc   : > { %v5434_v12 = vpack.c.bf16 %v5394_v36, %v5390_v23 }
 0xabe   : > { %v5242_v4 = vpop.f32.mrf.mxu3 }
 0xabf   : > { %v5337_v20 = vpop.f32.mrf.mxu1  ;;  %v5193_v40 = vpop.f32.mrf.mxu2  ;;  %v5243_v52 = vadd.f32 %v5242_v4, %v11427_v48 }
 0xac0   : > { %v5338_v6 = vadd.f32 %v5337_v20, %v11431_v21  ;;  %v5194_v35 = vadd.f32 %v5193_v40, %v11425_v63 }
 0xac1   : > { %v5399_v38 = vmax.f32 %v5243_v52, 0.0  ;;  %v11504_v52 = vld [vmem:[%s12186_s6] ss:$0 sm:$0xff]  ;;  %s8099_s6 = scalar_lea.hbm %s12190_s10, 512 }
 0xac2   : > { %v5397_v14 = vmax.f32 %v5338_v6, 0.0  ;;  %v5398_v28 = vmax.f32 %v5194_v35, 0.0  ;;  %p8101_p12 = scmp.lt.s32.totalorder %s8099_s6, %s8095_s30 }
 0xac3   : > { %5729 = vmatmul.bf16.gmra.mxu2 %v5426_v18  ;;  %5778 = vmatmul.bf16.gmra.mxu3 %v5427_v26  ;;  %v5395_v18 = vmax.f32 %v5240_v0, 0.0  ;;  %v5291_v26 = vpop.f32.mrf.mxu0 }
 0xac4   : > { %5827 = vmatmul.bf16.gmra.mxu0 %v5428_v5  ;;  %5876 = vmatmul.bf16.gmra.mxu1 %v5429_v3  ;;  %v5396_v3 = vmax.f32 %v5289_v47, 0.0  ;;  %v5437_v49 = vpack.c.bf16 %v5397_v14, %v5393_v22  ;;  %v5292_v15 = vadd.f32 %v5291_v26, %v11429_v7  ;;  %p8102_p2 = por %p8101_p12, %p8100_p11 }
 0xac5   : > { %v5435_v11 = vpack.c.bf16 %v5395_v18, %v5391_v59 }
 0xac6   : > { %v5436_v43 = vpack.c.bf16 %v5396_v3, %v5392_v2  ;;  %v5244_v51 = vpop.f32.mrf.mxu3  ;;  %v5400_v20 = vmax.f32 %v5292_v15, 0.0  ;;  %p8103_p7 = pnand %p8102_p2, %p8098_p9 }
 0xac7   : > { %v5340_v5 = vpop.f32.mrf.mxu1  ;;  %v5195_v24 = vpop.f32.mrf.mxu2  ;;  %v5245_v45 = vadd.f32 %v5244_v51, %v11427_v48 }
 0xac8   : > { %v5196_v39 = vadd.f32 %v5195_v24, %v11425_v63 }
 0xacb   : > { %v5293_v31 = vpop.f32.mrf.mxu0 }
 0xacc   : > { %v5294_v25 = vadd.f32 %v5293_v31, %v11429_v7 }
 0xacf   : > { %v5342_v34 = vpop.f32.mrf.mxu1 }
 0xad0   : > { %v5343_v1 = vadd.f32 %v5342_v34, %v11431_v21 }
 0xad2   : > { %v5405_v30 = vmax.f32 %v5343_v1, 0.0 }
 0xad3   : > { %5734 = vmatmul.bf16.gmra.mxu2 %v5430_v54  ;;  %5783 = vmatmul.bf16.gmra.mxu3 %v5431_v62  ;;  %v5341_v54 = vadd.f32 %v5340_v5, %v11431_v21  ;;  %v5402_v62 = vmax.f32 %v5196_v39, 0.0 }
 0xad4   : > { %5832 = vmatmul.bf16.gmra.mxu0 %v5432_v10  ;;  %5881 = vmatmul.bf16.gmra.mxu1 %v5433_v9  ;;  %v5403_v10 = vmax.f32 %v5245_v45, 0.0  ;;  %v5404_v9 = vmax.f32 %v5294_v25, 0.0 }
 0xad5   : > { %v5401_v46 = vmax.f32 %v5341_v54, 0.0  ;;  %v5438_v0 = vpack.c.bf16 %v5402_v62, %v5398_v28 }
 0xad6   : > { %v5439_v47 = vpack.c.bf16 %v5403_v10, %v5399_v38  ;;  %v5440_v6 = vpack.c.bf16 %v5404_v9, %v5400_v20 }
 0xad7   : > { %v5441_v56 = vpack.c.bf16 %v5405_v30, %v5401_v46 }
 0xae3   : > { %5739 = vmatmul.bf16.gmra.mxu2 %v5434_v12  ;;  %5788 = vmatmul.bf16.gmra.mxu3 %v5435_v11 }
 0xae4   : > { %5837 = vmatmul.bf16.gmra.mxu0 %v5436_v43  ;;  %5886 = vmatmul.bf16.gmra.mxu1 %v5437_v49 }
 0xaf3   : > { %5744 = vmatmul.bf16.gmra.mxu2 %v5438_v0  ;;  %5793 = vmatmul.bf16.gmra.mxu3 %v5439_v47 }
 0xaf4   : > { %5842 = vmatmul.bf16.gmra.mxu0 %v5440_v6  ;;  %5891 = vmatmul.bf16.gmra.mxu1 %v5441_v56 }
 0xb01   : > { %v5296_v61 = vpop.f32.mrf.mxu0  ;;  %v5345_v37 = vpop.f32.mrf.mxu1 }
 0xb02   : > { %v5297_v4 = vadd.f32 %v5296_v61, %v11429_v7  ;;  %v5346_v36 = vadd.f32 %v5345_v37, %v11431_v21 }
 0xb04   : > { %v5408_v14 = vmax.f32 %v5297_v4, 0.0  ;;  %v5409_v23 = vmax.f32 %v5346_v36, 0.0 }
 0xb06   : > { %v5198_v27 = vpop.f32.mrf.mxu2  ;;  %v5247_v40 = vpop.f32.mrf.mxu3 }
 0xb07   : > { %v5199_v22 = vadd.f32 %v5198_v27, %v11425_v63  ;;  %v5248_v12 = vadd.f32 %v5247_v40, %v11427_v48 }
 0xb09   : > { %v5298_v18 = vpop.f32.mrf.mxu0  ;;  %v5347_v26 = vpop.f32.mrf.mxu1 }
 0xb0a   : > { %v5299_v5 = vadd.f32 %v5298_v18, %v11429_v7  ;;  %v5348_v3 = vadd.f32 %v5347_v26, %v11431_v21  ;;  %v5406_v7 = vmax.f32 %v5199_v22, 0.0  ;;  %v5407_v21 = vmax.f32 %v5248_v12, 0.0 }
 0xb0c   : > { %v5412_v59 = vmax.f32 %v5299_v5, 0.0  ;;  %v5413_v2 = vmax.f32 %v5348_v3, 0.0 }
 0xb0e   : > { %v5444_v11 = vpack.c.bf16 %v5412_v59, %v5408_v14  ;;  %v5445_v43 = vpack.c.bf16 %v5413_v2, %v5409_v23  ;;  %v5200_v49 = vpop.f32.mrf.mxu2  ;;  %v5249_v24 = vpop.f32.mrf.mxu3 }
 0xb0f   : > { %v5201_v51 = vadd.f32 %v5200_v49, %v11425_v63  ;;  %v5250_v31 = vadd.f32 %v5249_v24, %v11427_v48 }
 0xb10   : > { %5847 = vmatmul.bf16.gmra.mxu0 %v5444_v11  ;;  %5896 = vmatmul.bf16.gmra.mxu1 %v5445_v43 }
 0xb11   : > { %v5410_v34 = vmax.f32 %v5201_v51, 0.0  ;;  %v5411_v39 = vmax.f32 %v5250_v31, 0.0  ;;  %v5813_v45 = vpop.f32.mrf.mxu0  ;;  %v5862_v25 = vpop.f32.mrf.mxu1 }
 0xb13   : > { %v5442_v1 = vpack.c.bf16 %v5410_v34, %v5406_v7  ;;  %v5443_v35 = vpack.c.bf16 %v5411_v39, %v5407_v21 }
 0xb15   : > { %5749 = vmatmul.bf16.gmra.mxu2 %v5442_v1  ;;  %5798 = vmatmul.bf16.gmra.mxu3 %v5443_v35 }
 0xb16   : > { %v5715_v63 = vpop.f32.mrf.mxu2  ;;  %v5764_v15 = vpop.f32.mrf.mxu3 }
 0xb17   : > { %v5716_v48 = vadd.f32 %v11504_v52, %v5715_v63 }
 0xb19   : > { %v5765_v54 = vadd.f32 %v5764_v15, %v5716_v48  ;;  %v5815_v62 = vpop.f32.mrf.mxu0  ;;  %v5864_v10 = vpop.f32.mrf.mxu1 }
 0xb1b   : > { %v5814_v9 = vadd.f32 %v5813_v45, %v5765_v54 }
 0xb1d   : > { %v5863_v30 = vadd.f32 %v5862_v25, %v5814_v9 }
 0xb1e   : > { %v5717_v28 = vpop.f32.mrf.mxu2  ;;  %v5766_v38 = vpop.f32.mrf.mxu3 }
 0xb1f   : > { %v5718_v20 = vadd.f32 %v11504_v52, %v5717_v28  ;;  %v11509_v46 = vadd.f32 %v5863_v30, %v11244_v13 }
 0xb21   : > { %v5767_v0 = vadd.f32 %v5766_v38, %v5718_v20  ;;  %v5818_v47 = vpop.f32.mrf.mxu0  ;;  %v5867_v6 = vpop.f32.mrf.mxu1  ;;  %5918 = vadd.xlane.f32.xlu0 %v11509_v46 }
 0xb23   : > { %v5816_v56 = vadd.f32 %v5815_v62, %v5767_v0 }
 0xb25   : > { %v5865_v61 = vadd.f32 %v5864_v10, %v5816_v56 }
 0xb26   : > { %v5720_v37 = vpop.f32.mrf.mxu2  ;;  %v5769_v27 = vpop.f32.mrf.mxu3 }
 0xb27   : > { %v5721_v40 = vadd.f32 %v11504_v52, %v5720_v37  ;;  %v11514_v4 = vadd.f32 %v5865_v61, %v11247_v17 }
 0xb29   : > { %v5770_v36 = vadd.f32 %v5769_v27, %v5721_v40  ;;  %v5820_v18 = vpop.f32.mrf.mxu0  ;;  %v5869_v26 = vpop.f32.mrf.mxu1  ;;  %5920 = vadd.xlane.f32.xlu1 %v11514_v4 }
 0xb2b   : > { %v5819_v13 = vadd.f32 %v5818_v47, %v5770_v36 }
 0xb2d   : > { %v5868_v5 = vadd.f32 %v5867_v6, %v5819_v13 }
 0xb2e   : > { %v5722_v3 = vpop.f32.mrf.mxu2  ;;  %v5771_v14 = vpop.f32.mrf.mxu3 }
 0xb2f   : > { %v5723_v23 = vadd.f32 %v11504_v52, %v5722_v3  ;;  %v11519_v59 = vadd.f32 %v5868_v5, %v11293_v42 }
 0xb31   : > { %v5772_v2 = vadd.f32 %v5771_v14, %v5723_v23  ;;  %v5823_v22 = vpop.f32.mrf.mxu0  ;;  %v5872_v12 = vpop.f32.mrf.mxu1  ;;  %5922 = vadd.xlane.f32.xlu2 %v11519_v59 }
 0xb33   : > { %v5821_v17 = vadd.f32 %v5820_v18, %v5772_v2 }
 0xb35   : > { %v5870_v11 = vadd.f32 %v5869_v26, %v5821_v17 }
 0xb36   : > { %v5725_v43 = vpop.f32.mrf.mxu2  ;;  %v5774_v49 = vpop.f32.mrf.mxu3 }
 0xb37   : > { %v5726_v24 = vadd.f32 %v11504_v52, %v5725_v43  ;;  %v11524_v51 = vadd.f32 %v5870_v11, %v11296_v58 }
 0xb39   : > { %v5775_v31 = vadd.f32 %v5774_v49, %v5726_v24  ;;  %v5825_v7 = vpop.f32.mrf.mxu0  ;;  %v5874_v21 = vpop.f32.mrf.mxu1  ;;  %5924 = vadd.xlane.f32.xlu0 %v11524_v51 }
 0xb3b   : > { %v5824_v42 = vadd.f32 %v5823_v22, %v5775_v31 }
 0xb3d   : > { %v5873_v34 = vadd.f32 %v5872_v12, %v5824_v42 }
 0xb3e   : > { %v5727_v39 = vpop.f32.mrf.mxu2  ;;  %v5776_v45 = vpop.f32.mrf.mxu3 }
 0xb3f   : > { %v5728_v25 = vadd.f32 %v11504_v52, %v5727_v39  ;;  %v11529_v1 = vadd.f32 %v5873_v34, %v11317_v16 }
 0xb41   : > { %v5777_v35 = vadd.f32 %v5776_v45, %v5728_v25  ;;  %v5828_v63 = vpop.f32.mrf.mxu0  ;;  %v5877_v15 = vpop.f32.mrf.mxu1  ;;  %5926 = vadd.xlane.f32.xlu1 %v11529_v1 }
 0xb43   : > { %v5826_v58 = vadd.f32 %v5825_v7, %v5777_v35 }
 0xb45   : > { %v5875_v48 = vadd.f32 %v5874_v21, %v5826_v58 }
 0xb46   : > { %v5730_v54 = vpop.f32.mrf.mxu2  ;;  %v5779_v62 = vpop.f32.mrf.mxu3 }
 0xb47   : > { %v5731_v10 = vadd.f32 %v11504_v52, %v5730_v54  ;;  %v11534_v9 = vadd.f32 %v5875_v48, %v11320_v55 }
 0xb49   : > { %v5780_v30 = vadd.f32 %v5779_v62, %v5731_v10  ;;  %v5830_v28 = vpop.f32.mrf.mxu0  ;;  %v5879_v38 = vpop.f32.mrf.mxu1  ;;  %5928 = vadd.xlane.f32.xlu2 %v11534_v9 }
 0xb4b   : > { %v5829_v16 = vadd.f32 %v5828_v63, %v5780_v30 }
 0xb4d   : > { %v5878_v20 = vadd.f32 %v5877_v15, %v5829_v16 }
 0xb4e   : > { %v5732_v0 = vpop.f32.mrf.mxu2  ;;  %v5781_v47 = vpop.f32.mrf.mxu3 }
 0xb4f   : > { %v5733_v6 = vadd.f32 %v11504_v52, %v5732_v0  ;;  %v11539_v56 = vadd.f32 %v5878_v20, %v11333_v32 }
 0xb51   : > { %v5782_v61 = vadd.f32 %v5781_v47, %v5733_v6  ;;  %v5833_v37 = vpop.f32.mrf.mxu0  ;;  %v5882_v27 = vpop.f32.mrf.mxu1  ;;  %5930 = vadd.xlane.f32.xlu0 %v11539_v56 }
 0xb53   : > { %v5831_v55 = vadd.f32 %v5830_v28, %v5782_v61 }
 0xb55   : > { %v5880_v40 = vadd.f32 %v5879_v38, %v5831_v55 }
 0xb56   : > { %v5735_v36 = vpop.f32.mrf.mxu2  ;;  %v5784_v18 = vpop.f32.mrf.mxu3 }
 0xb57   : > { %v5736_v26 = vadd.f32 %v11504_v52, %v5735_v36  ;;  %v11544_v13 = vadd.f32 %v5880_v40, %v11336_v8 }
 0xb59   : > { %v5785_v5 = vadd.f32 %v5784_v18, %v5736_v26  ;;  %v5835_v3 = vpop.f32.mrf.mxu0  ;;  %5932 = vadd.xlane.f32.xlu1 %v11544_v13  ;;  %v5884_v14 = vpop.f32.mrf.mxu1 }
 0xb5b   : > { %v5834_v32 = vadd.f32 %v5833_v37, %v5785_v5 }
 0xb5d   : > { %v5883_v23 = vadd.f32 %v5882_v27, %v5834_v32 }
 0xb5e   : > { %v5737_v2 = vpop.f32.mrf.mxu2  ;;  %v5786_v22 = vpop.f32.mrf.mxu3 }
 0xb5f   : > { %v5738_v12 = vadd.f32 %v11504_v52, %v5737_v2  ;;  %v11549_v17 = vadd.f32 %v5883_v23, %v11356_v33 }
 0xb61   : > { %v5787_v11 = vadd.f32 %v5786_v22, %v5738_v12  ;;  %5934 = vadd.xlane.f32.xlu2 %v11549_v17  ;;  %v5838_v8 = vpop.f32.mrf.mxu0  ;;  %v5887_v24 = vpop.f32.mrf.mxu1 }
 0xb63   : > { %v5836_v43 = vadd.f32 %v5835_v3, %v5787_v11 }
 0xb65   : > { %v5885_v49 = vadd.f32 %v5884_v14, %v5836_v43 }
 0xb66   : > { %v5740_v31 = vpop.f32.mrf.mxu2  ;;  %v5789_v7 = vpop.f32.mrf.mxu3 }
 0xb67   : > { %v5741_v21 = vadd.f32 %v11504_v52, %v5740_v31  ;;  %v11554_v42 = vadd.f32 %v5885_v49, %v11359_v44 }
 0xb69   : > { %v5790_v34 = vadd.f32 %v5789_v7, %v5741_v21  ;;  %5936 = vadd.xlane.f32.xlu0 %v11554_v42  ;;  %v5840_v45 = vpop.f32.mrf.mxu0  ;;  %v5889_v58 = vpop.f32.mrf.mxu1 }
 0xb6b   : > { %v5839_v39 = vadd.f32 %v5838_v8, %v5790_v34 }
 0xb6d   : > { %v5888_v33 = vadd.f32 %v5887_v24, %v5839_v39 }
 0xb6e   : > { %v5742_v25 = vpop.f32.mrf.mxu2  ;;  %v5791_v35 = vpop.f32.mrf.mxu3 }
 0xb6f   : > { %v5743_v63 = vadd.f32 %v11504_v52, %v5742_v25  ;;  %v11559_v15 = vadd.f32 %v5888_v33, %v11372_v50 }
 0xb71   : > { %v5792_v48 = vadd.f32 %v5791_v35, %v5743_v63  ;;  %5938 = vadd.xlane.f32.xlu1 %v11559_v15  ;;  %v5843_v38 = vpop.f32.mrf.mxu0  ;;  %v5892_v20 = vpop.f32.mrf.mxu1 }
 0xb73   : > { %v5841_v54 = vadd.f32 %v5840_v45, %v5792_v48 }
 0xb75   : > { %v5890_v44 = vadd.f32 %v5889_v58, %v5841_v54 }
 0xb76   : > { %v5745_v62 = vpop.f32.mrf.mxu2  ;;  %v5794_v10 = vpop.f32.mrf.mxu3 }
 0xb77   : > { %v5746_v30 = vadd.f32 %v11504_v52, %v5745_v62  ;;  %v11564_v28 = vadd.f32 %v5890_v44, %v11369_v29 }
 0xb79   : > { %v5795_v16 = vadd.f32 %v5794_v10, %v5746_v30  ;;  %5940 = vadd.xlane.f32.xlu2 %v11564_v28  ;;  %v5845_v55 = vpop.f32.mrf.mxu0  ;;  %v5894_v40 = vpop.f32.mrf.mxu1 }
 0xb7b   : > { %v5844_v50 = vadd.f32 %v5843_v38, %v5795_v16 }
 0xb7d   : > { %v5893_v0 = vadd.f32 %v5892_v20, %v5844_v50 }
 0xb7e   : > { %v5747_v47 = vpop.f32.mrf.mxu2  ;;  %v5796_v37 = vpop.f32.mrf.mxu3 }
 0xb7f   : > { %v5748_v6 = vadd.f32 %v11504_v52, %v5747_v47  ;;  %v11569_v61 = vadd.f32 %v5893_v0, %v11381_v41 }
 0xb81   : > { %v5797_v27 = vadd.f32 %v5796_v37, %v5748_v6  ;;  %5942 = vadd.xlane.f32.xlu0 %v11569_v61 }
 0xb83   : > { %v5846_v29 = vadd.f32 %v5845_v55, %v5797_v27 }
 0xb85   : > { %v5895_v36 = vadd.f32 %v5894_v40, %v5846_v29 }
 0xb87   : > { %v11573_v18 = vadd.f32 %v5895_v36, %v11384_v60 }
 0xb89   : > { %5944 = vadd.xlane.f32.xlu1 %v11573_v18 }
 0xb8d   : > { %v5848_v2 = vpop.f32.mrf.mxu0  ;;  %v5897_v60 = vpop.f32.mrf.mxu1 }
 0xb94   : > { %v5919_v26 = vpop.xlane.xlu0 %5918 }
 0xb95   : > { %v5950_v5 = vmul.f32 %v5919_v26, %v11137_v19  ;;  %v5850_v21 = vpop.f32.mrf.mxu0  ;;  %v5899_v33 = vpop.f32.mrf.mxu1 }
 0xb97   : > { %v11578_v3 = vsub.f32 %v11509_v46, %v5950_v5 }
 0xb98   : > { %v5750_v41 = vpop.f32.mrf.mxu2  ;;  %v5799_v32 = vpop.f32.mrf.mxu3 }
 0xb99   : > { %v5751_v14 = vadd.f32 %v11504_v52, %v5750_v41  ;;  %v5982_v23 = vmul.f32 %v11578_v3, %v11578_v3 }
 0xb9b   : > { %v5800_v22 = vadd.f32 %v5799_v32, %v5751_v14  ;;  %5998 = vadd.xlane.f32.xlu1 %v5982_v23 }
 0xb9c   : > { %v5921_v11 = vpop.xlane.xlu1 %5920 }
 0xb9d   : > { %v5849_v12 = vadd.f32 %v5848_v2, %v5800_v22  ;;  %v5951_v49 = vmul.f32 %v5921_v11, %v11137_v19 }
 0xb9f   : > { %v5898_v43 = vadd.f32 %v5897_v60, %v5849_v12  ;;  %v11590_v34 = vsub.f32 %v11514_v4, %v5951_v49 }
 0xba0   : > { %v5752_v8 = vpop.f32.mrf.mxu2  ;;  %v5801_v31 = vpop.f32.mrf.mxu3 }
 0xba1   : > { %v5753_v46 = vadd.f32 %v11504_v52, %v5752_v8  ;;  %v11586_v24 = vadd.f32 %v5898_v43, %v11415_v53  ;;  %v5983_v53 = vmul.f32 %v11590_v34, %v11590_v34 }
 0xba3   : > { %v5802_v7 = vadd.f32 %v5801_v31, %v5753_v46  ;;  %5946 = vadd.xlane.f32.xlu2 %v11586_v24 }
 0xba4   : > { %v5923_v45 = vpop.xlane.xlu2 %5922 }
 0xba5   : > { %v5851_v39 = vadd.f32 %v5850_v21, %v5802_v7  ;;  %v5952_v35 = vmul.f32 %v5923_v45, %v11137_v19 }
 0xba7   : > { %v5900_v25 = vadd.f32 %v5899_v33, %v5851_v39  ;;  %v11600_v58 = vsub.f32 %v11519_v59, %v5952_v35 }
 0xba9   : > { %v11594_v63 = vadd.f32 %v5900_v25, %v11418_v57  ;;  %v5984_v57 = vmul.f32 %v11600_v58, %v11600_v58 }
 0xbab   : > { %5948 = vadd.xlane.f32.xlu0 %v11594_v63  ;;  %6000 = vadd.xlane.f32.xlu2 %v5983_v53 }
 0xbac   : > { %v5925_v52 = vpop.xlane.xlu0 %5924 }
 0xbad   : > { %v5953_v4 = vmul.f32 %v5925_v52, %v11137_v19 }
 0xbaf   : > { %v11604_v48 = vsub.f32 %v11524_v51, %v5953_v4 }
 0xbb1   : > { %v5985_v54 = vmul.f32 %v11604_v48, %v11604_v48 }
 0xbb3   : > { %6004 = vadd.xlane.f32.xlu1 %v5985_v54  ;;  %6002 = vadd.xlane.f32.xlu0 %v5984_v57 }
 0xbb4   : > { %v5927_v44 = vpop.xlane.xlu1 %5926 }
 0xbb5   : > { %v5954_v62 = vmul.f32 %v5927_v44, %v11137_v19 }
 0xbb7   : > { %v11612_v10 = vsub.f32 %v11529_v1, %v5954_v62  ;;  %v11685_v62 = vld [vmem:[%s12187_s18] ss:$0 sm:$0xff] }
 0xbb9   : > { %v5986_v59 = vmul.f32 %v11612_v10, %v11612_v10 }
 0xbbb   : > { %6006 = vadd.xlane.f32.xlu2 %v5986_v59 }
 0xbbc   : > { %v5929_v51 = vpop.xlane.xlu2 %5928 }
 0xbbd   : > { %v5955_v30 = vmul.f32 %v5929_v51, %v11137_v19 }
 0xbbf   : > { %v11618_v38 = vsub.f32 %v11534_v9, %v5955_v30 }
 0xbc1   : > { %v5987_v16 = vmul.f32 %v11618_v38, %v11618_v38 }
 0xbc3   : > { %6008 = vadd.xlane.f32.xlu0 %v5987_v16 }
 0xbc4   : > { %v5931_v20 = vpop.xlane.xlu0 %5930 }
 0xbc5   : > { %v5956_v50 = vmul.f32 %v5931_v20, %v11137_v19 }
 0xbc7   : > { %v11624_v1 = vsub.f32 %v11539_v56, %v5956_v50 }
 0xbc9   : > { %v5988_v0 = vmul.f32 %v11624_v1, %v11624_v1 }
 0xbcb   : > { %6010 = vadd.xlane.f32.xlu1 %v5988_v0 }
 0xbcc   : > { %v5933_v47 = vpop.xlane.xlu1 %5932 }
 0xbcd   : > { %v5957_v6 = vmul.f32 %v5933_v47, %v11137_v19 }
 0xbcf   : > { %v11630_v9 = vsub.f32 %v11544_v13, %v5957_v6 }
 0xbd1   : > { %v5989_v37 = vmul.f32 %v11630_v9, %v11630_v9 }
 0xbd3   : > { %6012 = vadd.xlane.f32.xlu2 %v5989_v37 }
 0xbd4   : > { %v5935_v27 = vpop.xlane.xlu2 %5934 }
 0xbd5   : > { %v5958_v55 = vmul.f32 %v5935_v27, %v11137_v19 }
 0xbd7   : > { %v11636_v56 = vsub.f32 %v11549_v17, %v5958_v55 }
 0xbd9   : > { %v5990_v29 = vmul.f32 %v11636_v56, %v11636_v56 }
 0xbdb   : > { %6014 = vadd.xlane.f32.xlu0 %v5990_v29 }
 0xbdc   : > { %v5937_v40 = vpop.xlane.xlu0 %5936 }
 0xbdd   : > { %v5959_v36 = vmul.f32 %v5937_v40, %v11137_v19 }
 0xbdf   : > { %v11642_v13 = vsub.f32 %v11554_v42, %v5959_v36 }
 0xbe1   : > { %v5991_v26 = vmul.f32 %v11642_v13, %v11642_v13 }
 0xbe3   : > { %6016 = vadd.xlane.f32.xlu1 %v5991_v26 }
 0xbe4   : > { %v5939_v5 = vpop.xlane.xlu1 %5938 }
 0xbe5   : > { %v5960_v41 = vmul.f32 %v5939_v5, %v11137_v19 }
 0xbe7   : > { %v11648_v17 = vsub.f32 %v11559_v15, %v5960_v41 }
 0xbe9   : > { %v5992_v32 = vmul.f32 %v11648_v17, %v11648_v17 }
 0xbeb   : > { %6018 = vadd.xlane.f32.xlu2 %v5992_v32 }
 0xbec   : > { %v5941_v14 = vpop.xlane.xlu2 %5940 }
 0xbed   : > { %v5961_v23 = vmul.f32 %v5941_v14, %v11137_v19 }
 0xbef   : > { %v11654_v42 = vsub.f32 %v11564_v28, %v5961_v23 }
 0xbf1   : > { %v5993_v2 = vmul.f32 %v11654_v42, %v11654_v42 }
 0xbf3   : > { %6020 = vadd.xlane.f32.xlu0 %v5993_v2 }
 0xbf4   : > { %v5943_v22 = vpop.xlane.xlu0 %5942 }
 0xbf5   : > { %v5962_v60 = vmul.f32 %v5943_v22, %v11137_v19 }
 0xbf7   : > { %v11660_v15 = vsub.f32 %v11569_v61, %v5962_v60 }
 0xbf9   : > { %v5994_v12 = vmul.f32 %v11660_v15, %v11660_v15 }
 0xbfb   : > { %6022 = vadd.xlane.f32.xlu1 %v5994_v12 }
 0xbfc   : > { %v5945_v11 = vpop.xlane.xlu1 %5944 }
 0xbfd   : > { %v5963_v43 = vmul.f32 %v5945_v11, %v11137_v19 }
 0xbff   : > { %v11666_v28 = vsub.f32 %v11573_v18, %v5963_v43 }
 0xc01   : > { %v5995_v8 = vmul.f32 %v11666_v28, %v11666_v28 }
 0xc03   : > { %6024 = vadd.xlane.f32.xlu2 %v5995_v8 }
 0xc0e   : > { %v5999_v49 = vpop.xlane.xlu1 %5998 }
 0xc0f   : > { %v6030_v46 = vmul.f32 %v5999_v49, %v11137_v19 }
 0xc11   : > { %v6046_v31 = vadd.f32 1e-05, %v6030_v46 }
 0xc13   : > { %7747 = vrsqrt.f32 %v6046_v31  ;;  %vm6068_vm6 = vweird.f32 %v6046_v31 }
 0xc16   : > { %v5947_v61 = vpop.xlane.xlu2 %5946 }
 0xc17   : > { %v5964_v7 = vmul.f32 %v5947_v61, %v11137_v19 }
 0xc19   : > { %v7748_v21 = vpop.eup %7747  ;;  %v11673_v39 = vsub.f32 %v11586_v24, %v5964_v7 }
 0xc1a   : > { %v6063_v33 = vmul.f32 %v7748_v21, %v6046_v31  ;;  %vm6069_vm5 = vweird.f32 %v7748_v21 }
 0xc1b   : > { %v5996_v18 = vmul.f32 %v11673_v39, %v11673_v39  ;;  %vm6070_vm7 = vmor %vm6068_vm6, %vm6069_vm5 }
 0xc1c   : > { %v6064_v45 = vmul.f32 %v7748_v21, %v6063_v33 }
 0xc1d   : > { %6026 = vadd.xlane.f32.xlu0 %v5996_v18 }
 0xc1e   : > { %v6065_v25 = vmul.f32 0.5, %v6064_v45  ;;  %v5949_v35 = vpop.xlane.xlu0 %5948  ;;  %v6001_v53 = vpop.xlane.xlu2 %6000 }
 0xc1f   : > { %v5965_v52 = vmul.f32 %v5949_v35, %v11137_v19  ;;  %v6031_v4 = vmul.f32 %v6001_v53, %v11137_v19 }
 0xc20   : > { %v6066_v54 = vsub.f32 1.5, %v6065_v25 }
 0xc21   : > { %v11680_v57 = vsub.f32 %v11594_v63, %v5965_v52  ;;  %v6047_v24 = vadd.f32 1e-05, %v6031_v4  ;;  %v11692_v63 = vld [vmem:[%s12188_s11] ss:$0 sm:$0xff] }
 0xc22   : > { %v6067_v44 = vmul.f32 %v7748_v21, %v6066_v54 }
 0xc23   : > { %7749 = vrsqrt.f32 %v6047_v24  ;;  %v5997_v59 = vmul.f32 %v11680_v57, %v11680_v57  ;;  %vm6078_vm9 = vweird.f32 %v6047_v24 }
 0xc24   : > { %v6071_v51 = vsel %vm6070_vm7, %v7748_v21, %v6067_v44 }
 0xc25   : > { %v6222_v30 = vmul.f32 %v6071_v51, %v11578_v3  ;;  %6028 = vadd.xlane.f32.xlu1 %v5997_v59 }
 0xc26   : > { %v6005_v16 = vpop.xlane.xlu1 %6004  ;;  %v6003_v20 = vpop.xlane.xlu0 %6002 }
 0xc27   : > { %v6242_v50 = vmul.f32 %v11685_v62, %v6222_v30  ;;  %v6033_v0 = vmul.f32 %v6005_v16, %v11137_v19  ;;  %v6032_v47 = vmul.f32 %v6003_v20, %v11137_v19 }
 0xc29   : > { %v7750_v6 = vpop.eup %7749  ;;  %v6262_v37 = vadd.f32 %v11692_v63, %v6242_v50  ;;  %v6049_v27 = vadd.f32 1e-05, %v6033_v0  ;;  %v6048_v55 = vadd.f32 1e-05, %v6032_v47 }
 0xc2a   : > { %v6073_v29 = vmul.f32 %v7750_v6, %v6047_v24  ;;  %vm6079_vm8 = vweird.f32 %v7750_v6 }
 0xc2b   : > { %6278 = vst [vmem:[%s11701_s26] sm:$0xff] %v6262_v37  ;;  %7751 = vrsqrt.f32 %v6049_v27  ;;  %vm6080_vm10 = vmor %vm6078_vm9, %vm6079_vm8  ;;  %vm6098_vm13 = vweird.f32 %v6049_v27  ;;  %vm6088_vm15 = vweird.f32 %v6048_v55 }
 0xc2c   : > { %v6074_v3 = vmul.f32 %v7750_v6, %v6073_v29  ;;  %7753 = vrsqrt.f32 %v6048_v55 }
 0xc2e   : > { %v6075_v40 = vmul.f32 0.5, %v6074_v3  ;;  %v6007_v36 = vpop.xlane.xlu2 %6006 }
 0xc2f   : > { %v6034_v26 = vmul.f32 %v6007_v36, %v11137_v19 }
 0xc30   : > { %v6076_v5 = vsub.f32 1.5, %v6075_v40 }
 0xc31   : > { %v7752_v41 = vpop.eup %7751  ;;  %v6050_v32 = vadd.f32 1e-05, %v6034_v26 }
 0xc32   : > { %v7754_v14 = vpop.eup %7753  ;;  %v6077_v23 = vmul.f32 %v7750_v6, %v6076_v5  ;;  %v6093_v2 = vmul.f32 %v7752_v41, %v6049_v27  ;;  %vm6099_vm11 = vweird.f32 %v7752_v41 }
 0xc33   : > { %v6083_v22 = vmul.f32 %v7754_v14, %v6048_v55  ;;  %7755 = vrsqrt.f32 %v6050_v32  ;;  %vm6089_vm12 = vweird.f32 %v7754_v14  ;;  %vm6100_vm14 = vmor %vm6098_vm13, %vm6099_vm11  ;;  %vm6108_vm2 = vweird.f32 %v6050_v32 }
 0xc34   : > { %v6081_v60 = vsel %vm6080_vm10, %v7750_v6, %v6077_v23  ;;  %v6094_v12 = vmul.f32 %v7752_v41, %v6093_v2  ;;  %vm6090_vm0 = vmor %vm6088_vm15, %vm6089_vm12 }
 0xc35   : > { %v6223_v11 = vmul.f32 %v6081_v60, %v11590_v34  ;;  %v6084_v43 = vmul.f32 %v7754_v14, %v6083_v22 }
 0xc36   : > { %v6095_v8 = vmul.f32 0.5, %v6094_v12  ;;  %v6009_v49 = vpop.xlane.xlu0 %6008 }
 0xc37   : > { %v6243_v46 = vmul.f32 %v11685_v62, %v6223_v11  ;;  %v6085_v31 = vmul.f32 0.5, %v6084_v43  ;;  %v6035_v61 = vmul.f32 %v6009_v49, %v11137_v19 }
 0xc38   : > { %v6096_v7 = vsub.f32 1.5, %v6095_v8 }
 0xc39   : > { %v7756_v21 = vpop.eup %7755  ;;  %v6263_v33 = vadd.f32 %v11692_v63, %v6243_v46  ;;  %v6086_v18 = vsub.f32 1.5, %v6085_v31  ;;  %v6051_v45 = vadd.f32 1e-05, %v6035_v61 }
 0xc3a   : > { %v6097_v25 = vmul.f32 %v7752_v41, %v6096_v7  ;;  %v6103_v34 = vmul.f32 %v7756_v21, %v6050_v32  ;;  %vm6109_vm1 = vweird.f32 %v7756_v21 }
 0xc3b   : > { %6279 = vst [vmem:[%s11701_s26 + $0x8] sm:$0xff] %v6263_v33  ;;  %v6087_v35 = vmul.f32 %v7754_v14, %v6086_v18  ;;  %7757 = vrsqrt.f32 %v6051_v45  ;;  %vm6110_vm3 = vmor %vm6108_vm2, %vm6109_vm1  ;;  %vm6118_vm5 = vweird.f32 %v6051_v45 }
 0xc3c   : > { %v6101_v53 = vsel %vm6100_vm14, %v7752_v41, %v6097_v25  ;;  %v6104_v52 = vmul.f32 %v7756_v21, %v6103_v34 }
 0xc3d   : > { %v6225_v4 = vmul.f32 %v6101_v53, %v11604_v48  ;;  %v6091_v54 = vsel %vm6090_vm0, %v7754_v14, %v6087_v35 }
 0xc3e   : > { %v6224_v24 = vmul.f32 %v6091_v54, %v11600_v58  ;;  %v6105_v44 = vmul.f32 0.5, %v6104_v52  ;;  %v6011_v59 = vpop.xlane.xlu1 %6010 }
 0xc3f   : > { %v6245_v51 = vmul.f32 %v11685_v62, %v6225_v4  ;;  %v6036_v30 = vmul.f32 %v6011_v59, %v11137_v19 }
 0xc40   : > { %v6244_v16 = vmul.f32 %v11685_v62, %v6224_v24  ;;  %v6106_v20 = vsub.f32 1.5, %v6105_v44 }
 0xc41   : > { %v7758_v50 = vpop.eup %7757  ;;  %v6265_v0 = vadd.f32 %v11692_v63, %v6245_v51  ;;  %v6052_v47 = vadd.f32 1e-05, %v6036_v30 }
 0xc42   : > { %v6264_v48 = vadd.f32 %v11692_v63, %v6244_v16  ;;  %v6107_v6 = vmul.f32 %v7756_v21, %v6106_v20  ;;  %v6113_v58 = vmul.f32 %v7758_v50, %v6051_v45  ;;  %vm6119_vm4 = vweird.f32 %v7758_v50 }
 0xc43   : > { %6281 = vst [vmem:[%s11701_s26 + $0x18] sm:$0xff] %v6265_v0  ;;  %7759 = vrsqrt.f32 %v6052_v47  ;;  %vm6120_vm6 = vmor %vm6118_vm5, %vm6119_vm4  ;;  %vm6128_vm8 = vweird.f32 %v6052_v47 }
 0xc44   : > { %6280 = vst [vmem:[%s11701_s26 + $0x10] sm:$0xff] %v6264_v48  ;;  %v6111_v37 = vsel %vm6110_vm3, %v7756_v21, %v6107_v6  ;;  %v6114_v27 = vmul.f32 %v7758_v50, %v6113_v58 }
 0xc45   : > { %v6226_v55 = vmul.f32 %v6111_v37, %v11612_v10 }
 0xc46   : > { %v6115_v29 = vmul.f32 0.5, %v6114_v27  ;;  %v6013_v3 = vpop.xlane.xlu2 %6012 }
 0xc47   : > { %v6246_v40 = vmul.f32 %v11685_v62, %v6226_v55  ;;  %v6037_v36 = vmul.f32 %v6013_v3, %v11137_v19 }
 0xc48   : > { %v6116_v26 = vsub.f32 1.5, %v6115_v29 }
 0xc49   : > { %v7760_v5 = vpop.eup %7759  ;;  %v6266_v41 = vadd.f32 %v11692_v63, %v6246_v40  ;;  %v6053_v32 = vadd.f32 1e-05, %v6037_v36 }
 0xc4a   : > { %v6117_v14 = vmul.f32 %v7758_v50, %v6116_v26  ;;  %v6123_v23 = vmul.f32 %v7760_v5, %v6052_v47  ;;  %vm6129_vm7 = vweird.f32 %v7760_v5 }
 0xc4b   : > { %6282 = vst [vmem:[%s11701_s26 + $0x20] sm:$0xff] %v6266_v41  ;;  %7761 = vrsqrt.f32 %v6053_v32  ;;  %vm6130_vm9 = vmor %vm6128_vm8, %vm6129_vm7  ;;  %vm6138_vm11 = vweird.f32 %v6053_v32 }
 0xc4c   : > { %v6121_v10 = vsel %vm6120_vm6, %v7758_v50, %v6117_v14  ;;  %v6124_v2 = vmul.f32 %v7760_v5, %v6123_v23 }
 0xc4d   : > { %v6227_v22 = vmul.f32 %v6121_v10, %v11618_v38 }
 0xc4e   : > { %v6125_v60 = vmul.f32 0.5, %v6124_v2  ;;  %v6015_v12 = vpop.xlane.xlu0 %6014 }
 0xc4f   : > { %v6247_v11 = vmul.f32 %v11685_v62, %v6227_v22  ;;  %v6038_v43 = vmul.f32 %v6015_v12, %v11137_v19 }
 0xc50   : > { %v6126_v8 = vsub.f32 1.5, %v6125_v60 }
 0xc51   : > { %v7762_v49 = vpop.eup %7761  ;;  %v6267_v46 = vadd.f32 %v11692_v63, %v6247_v11  ;;  %v6054_v31 = vadd.f32 1e-05, %v6038_v43 }
 0xc52   : > { %v6127_v61 = vmul.f32 %v7760_v5, %v6126_v8  ;;  %v6133_v7 = vmul.f32 %v7762_v49, %v6053_v32  ;;  %vm6139_vm10 = vweird.f32 %v7762_v49 }
 0xc53   : > { %6283 = vst [vmem:[%s11701_s26 + $0x28] sm:$0xff] %v6267_v46  ;;  %7763 = vrsqrt.f32 %v6054_v31  ;;  %vm6140_vm12 = vmor %vm6138_vm11, %vm6139_vm10  ;;  %vm6148_vm14 = vweird.f32 %v6054_v31 }
 0xc54   : > { %v6131_v38 = vsel %vm6130_vm9, %v7760_v5, %v6127_v61  ;;  %v6134_v21 = vmul.f32 %v7762_v49, %v6133_v7 }
 0xc55   : > { %v6228_v33 = vmul.f32 %v6131_v38, %v11624_v1 }
 0xc56   : > { %v6135_v18 = vmul.f32 0.5, %v6134_v21  ;;  %v6017_v45 = vpop.xlane.xlu1 %6016 }
 0xc57   : > { %v6248_v25 = vmul.f32 %v11685_v62, %v6228_v33  ;;  %v6039_v34 = vmul.f32 %v6017_v45, %v11137_v19 }
 0xc58   : > { %v6136_v35 = vsub.f32 1.5, %v6135_v18 }
 0xc59   : > { %v7764_v53 = vpop.eup %7763  ;;  %v6268_v52 = vadd.f32 %v11692_v63, %v6248_v25  ;;  %v6055_v4 = vadd.f32 1e-05, %v6039_v34 }
 0xc5a   : > { %v6137_v54 = vmul.f32 %v7762_v49, %v6136_v35  ;;  %v6143_v24 = vmul.f32 %v7764_v53, %v6054_v31  ;;  %vm6149_vm13 = vweird.f32 %v7764_v53 }
 0xc5b   : > { %6284 = vst [vmem:[%s11701_s26 + $0x30] sm:$0xff] %v6268_v52  ;;  %7765 = vrsqrt.f32 %v6055_v4  ;;  %vm6150_vm15 = vmor %vm6148_vm14, %vm6149_vm13  ;;  %vm6158_vm1 = vweird.f32 %v6055_v4 }
 0xc5c   : > { %v6141_v1 = vsel %vm6140_vm12, %v7762_v49, %v6137_v54  ;;  %v6144_v44 = vmul.f32 %v7764_v53, %v6143_v24 }
 0xc5d   : > { %v6229_v59 = vmul.f32 %v6141_v1, %v11630_v9 }
 0xc5e   : > { %v6145_v51 = vmul.f32 0.5, %v6144_v44  ;;  %v6019_v30 = vpop.xlane.xlu2 %6018 }
 0xc5f   : > { %v6249_v16 = vmul.f32 %v11685_v62, %v6229_v59  ;;  %v6040_v20 = vmul.f32 %v6019_v30, %v11137_v19 }
 0xc60   : > { %v6146_v50 = vsub.f32 1.5, %v6145_v51 }
 0xc61   : > { %v7766_v0 = vpop.eup %7765  ;;  %v6269_v47 = vadd.f32 %v11692_v63, %v6249_v16  ;;  %v6056_v48 = vadd.f32 1e-05, %v6040_v20 }
 0xc62   : > { %v6147_v6 = vmul.f32 %v7764_v53, %v6146_v50  ;;  %v6153_v58 = vmul.f32 %v7766_v0, %v6055_v4  ;;  %vm6159_vm0 = vweird.f32 %v7766_v0 }
 0xc63   : > { %6285 = vst [vmem:[%s11701_s26 + $0x38] sm:$0xff] %v6269_v47  ;;  %7767 = vrsqrt.f32 %v6056_v48  ;;  %vm6160_vm2 = vmor %vm6158_vm1, %vm6159_vm0  ;;  %vm6168_vm4 = vweird.f32 %v6056_v48 }
 0xc64   : > { %v6151_v9 = vsel %vm6150_vm15, %v7764_v53, %v6147_v6  ;;  %v6154_v37 = vmul.f32 %v7766_v0, %v6153_v58 }
 0xc65   : > { %v6230_v27 = vmul.f32 %v6151_v9, %v11636_v56 }
 0xc66   : > { %v6155_v55 = vmul.f32 0.5, %v6154_v37  ;;  %v6021_v29 = vpop.xlane.xlu0 %6020 }
 0xc67   : > { %v6250_v3 = vmul.f32 %v11685_v62, %v6230_v27  ;;  %v6041_v40 = vmul.f32 %v6021_v29, %v11137_v19 }
 0xc68   : > { %v6156_v36 = vsub.f32 1.5, %v6155_v55 }
 0xc69   : > { %v7768_v26 = vpop.eup %7767  ;;  %v6270_v5 = vadd.f32 %v11692_v63, %v6250_v3  ;;  %v6057_v41 = vadd.f32 1e-05, %v6041_v40 }
 0xc6a   : > { %v6157_v32 = vmul.f32 %v7766_v0, %v6156_v36  ;;  %v6163_v14 = vmul.f32 %v7768_v26, %v6056_v48  ;;  %vm6169_vm3 = vweird.f32 %v7768_v26 }
 0xc6b   : > { %6286 = vst [vmem:[%s11701_s26 + $0x40] sm:$0xff] %v6270_v5  ;;  %7769 = vrsqrt.f32 %v6057_v41  ;;  %vm6170_vm5 = vmor %vm6168_vm4, %vm6169_vm3  ;;  %vm6178_vm7 = vweird.f32 %v6057_v41 }
 0xc6c   : > { %v6161_v56 = vsel %vm6160_vm2, %v7766_v0, %v6157_v32  ;;  %v6164_v23 = vmul.f32 %v7768_v26, %v6163_v14 }
 0xc6d   : > { %v6231_v10 = vmul.f32 %v6161_v56, %v11642_v13 }
 0xc6e   : > { %v6165_v2 = vmul.f32 0.5, %v6164_v23  ;;  %v6023_v22 = vpop.xlane.xlu1 %6022 }
 0xc6f   : > { %v6251_v60 = vmul.f32 %v11685_v62, %v6231_v10  ;;  %v6042_v12 = vmul.f32 %v6023_v22, %v11137_v19 }
 0xc70   : > { %v6166_v11 = vsub.f32 1.5, %v6165_v2 }
 0xc71   : > { %v7770_v43 = vpop.eup %7769  ;;  %v6271_v8 = vadd.f32 %v11692_v63, %v6251_v60  ;;  %v6058_v49 = vadd.f32 1e-05, %v6042_v12 }
 0xc72   : > { %v6167_v46 = vmul.f32 %v7768_v26, %v6166_v11  ;;  %v6173_v31 = vmul.f32 %v7770_v43, %v6057_v41  ;;  %vm6179_vm6 = vweird.f32 %v7770_v43 }
 0xc73   : > { %6287 = vst [vmem:[%s11701_s26 + $0x48] sm:$0xff] %v6271_v8  ;;  %7771 = vrsqrt.f32 %v6058_v49  ;;  %vm6180_vm8 = vmor %vm6178_vm7, %vm6179_vm6  ;;  %vm6188_vm10 = vweird.f32 %v6058_v49 }
 0xc74   : > { %v6171_v13 = vsel %vm6170_vm5, %v7768_v26, %v6167_v46  ;;  %v6174_v61 = vmul.f32 %v7770_v43, %v6173_v31 }
 0xc75   : > { %v6232_v7 = vmul.f32 %v6171_v13, %v11648_v17 }
 0xc76   : > { %v6175_v38 = vmul.f32 0.5, %v6174_v61  ;;  %v6025_v21 = vpop.xlane.xlu2 %6024 }
 0xc77   : > { %v6252_v33 = vmul.f32 %v11685_v62, %v6232_v7  ;;  %v6043_v18 = vmul.f32 %v6025_v21, %v11137_v19 }
 0xc78   : > { %v6176_v45 = vsub.f32 1.5, %v6175_v38 }
 0xc79   : > { %v7772_v25 = vpop.eup %7771  ;;  %v6272_v34 = vadd.f32 %v11692_v63, %v6252_v33  ;;  %v6059_v35 = vadd.f32 1e-05, %v6043_v18 }
 0xc7a   : > { %v6177_v53 = vmul.f32 %v7770_v43, %v6176_v45  ;;  %v6183_v52 = vmul.f32 %v7772_v25, %v6058_v49  ;;  %vm6189_vm9 = vweird.f32 %v7772_v25 }
 0xc7b   : > { %6288 = vst [vmem:[%s11701_s26 + $0x50] sm:$0xff] %v6272_v34  ;;  %7773 = vrsqrt.f32 %v6059_v35  ;;  %vm6190_vm11 = vmor %vm6188_vm10, %vm6189_vm9  ;;  %vm6198_vm13 = vweird.f32 %v6059_v35 }
 0xc7c   : > { %v6181_v17 = vsel %vm6180_vm8, %v7770_v43, %v6177_v53  ;;  %v6184_v4 = vmul.f32 %v7772_v25, %v6183_v52 }
 0xc7d   : > { %v6233_v54 = vmul.f32 %v6181_v17, %v11654_v42 }
 0xc7e   : > { %v6185_v24 = vmul.f32 0.5, %v6184_v4 }
 0xc7f   : > { %v6253_v1 = vmul.f32 %v11685_v62, %v6233_v54 }
 0xc80   : > { %v6186_v44 = vsub.f32 1.5, %v6185_v24 }
 0xc81   : > { %v7774_v59 = vpop.eup %7773  ;;  %v6273_v51 = vadd.f32 %v11692_v63, %v6253_v1 }
 0xc82   : > { %v6187_v30 = vmul.f32 %v7772_v25, %v6186_v44  ;;  %v6193_v16 = vmul.f32 %v7774_v59, %v6059_v35  ;;  %vm6199_vm12 = vweird.f32 %v7774_v59 }
 0xc83   : > { %6289 = vst [vmem:[%s11701_s26 + $0x58] sm:$0xff] %v6273_v51  ;;  %vm6200_vm14 = vmor %vm6198_vm13, %vm6199_vm12 }
 0xc84   : > { %v6191_v20 = vsel %vm6190_vm11, %v7772_v25, %v6187_v30  ;;  %v6194_v50 = vmul.f32 %v7774_v59, %v6193_v16 }
 0xc85   : > { %v6234_v0 = vmul.f32 %v6191_v20, %v11660_v15 }
 0xc86   : > { %v6195_v42 = vmul.f32 0.5, %v6194_v50 }
 0xc87   : > { %v6254_v47 = vmul.f32 %v11685_v62, %v6234_v0 }
 0xc88   : > { %v6196_v48 = vsub.f32 1.5, %v6195_v42 }
 0xc89   : > { %v6274_v6 = vadd.f32 %v11692_v63, %v6254_v47 }
 0xc8a   : > { %v6197_v58 = vmul.f32 %v7774_v59, %v6196_v48 }
 0xc8b   : > { %6290 = vst [vmem:[%s11701_s26 + $0x60] sm:$0xff] %v6274_v6 }
 0xc8c   : > { %v6201_v9 = vsel %vm6200_vm14, %v7774_v59, %v6197_v58 }
 0xc8d   : > { %v6235_v37 = vmul.f32 %v6201_v9, %v11666_v28 }
 0xc8f   : > { %v6255_v27 = vmul.f32 %v11685_v62, %v6235_v37 }
 0xc90   : > { %v6027_v55 = vpop.xlane.xlu0 %6026 }
 0xc91   : > { %v6275_v15 = vadd.f32 %v11692_v63, %v6255_v27  ;;  %v6044_v29 = vmul.f32 %v6027_v55, %v11137_v19 }
 0xc93   : > { %6291 = vst [vmem:[%s11701_s26 + $0x68] sm:$0xff] %v6275_v15  ;;  %v6060_v3 = vadd.f32 1e-05, %v6044_v29 }
 0xc95   : > { %7775 = vrsqrt.f32 %v6060_v3  ;;  %vm6208_vm0 = vweird.f32 %v6060_v3 }
 0xc98   : > { %v6029_v40 = vpop.xlane.xlu1 %6028 }
 0xc99   : > { %v6045_v36 = vmul.f32 %v6029_v40, %v11137_v19 }
 0xc9b   : > { %v7776_v26 = vpop.eup %7775  ;;  %v6061_v5 = vadd.f32 1e-05, %v6045_v36 }
 0xc9c   : > { %v6203_v41 = vmul.f32 %v7776_v26, %v6060_v3  ;;  %vm6209_vm15 = vweird.f32 %v7776_v26 }
 0xc9d   : > { %7777 = vrsqrt.f32 %v6061_v5  ;;  %vm6210_vm1 = vmor %vm6208_vm0, %vm6209_vm15  ;;  %vm6218_vm3 = vweird.f32 %v6061_v5 }
 0xc9e   : > { %v6204_v28 = vmul.f32 %v7776_v26, %v6203_v41 }
 0xca0   : > { %v6205_v32 = vmul.f32 0.5, %v6204_v28 }
 0xca2   : > { %v6206_v14 = vsub.f32 1.5, %v6205_v32 }
 0xca3   : > { %v7778_v56 = vpop.eup %7777 }
 0xca4   : > { %v6207_v23 = vmul.f32 %v7776_v26, %v6206_v14  ;;  %v6213_v10 = vmul.f32 %v7778_v56, %v6061_v5  ;;  %vm6219_vm2 = vweird.f32 %v7778_v56 }
 0xca5   : > { %vm6220_vm4 = vmor %vm6218_vm3, %vm6219_vm2 }
 0xca6   : > { %v6211_v2 = vsel %vm6210_vm1, %v7776_v26, %v6207_v23  ;;  %v6214_v22 = vmul.f32 %v7778_v56, %v6213_v10 }
 0xca7   : > { %v6236_v19 = vmul.f32 %v6211_v2, %v11673_v39 }
 0xca8   : > { %v6215_v60 = vmul.f32 0.5, %v6214_v22 }
 0xca9   : > { %v6256_v12 = vmul.f32 %v11685_v62, %v6236_v19 }
 0xcaa   : > { %v6216_v11 = vsub.f32 1.5, %v6215_v60 }
 0xcab   : > { %v6276_v43 = vadd.f32 %v11692_v63, %v6256_v12 }
 0xcac   : > { %v6217_v8 = vmul.f32 %v7778_v56, %v6216_v11 }
 0xcad   : > { %6292 = vst [vmem:[%s11701_s26 + $0x70] sm:$0xff] %v6276_v43 }
 0xcae   : > { %v6221_v39 = vsel %vm6220_vm4, %v7778_v56, %v6217_v8 }
 0xcaf   : > { %v6237_v49 = vmul.f32 %v6221_v39, %v11680_v57 }
 0xcb1   : > { %v6257_v46 = vmul.f32 %v11685_v62, %v6237_v49 }
 0xcb3   : > { %v6277_v31 = vadd.f32 %v11692_v63, %v6257_v46 }
 0xcb5   : > { %6293 = vst [vmem:[%s11701_s26 + $0x78] sm:$0xff] %v6277_v31 }
 0xcb6   : > { %8106 = shalt.err (!%p8103_p7)
}
 0xcb7   : > { %s8243_s7 = smov 128   ;;  %s8244_s18 = smov 8  }
 0xcb8   : > { %7162 = dma.vmem_to_hbm [thread:$0]  (%p8543_p13), %s6310_s8, 2048, %s6312_s29, %s6295_s14, %s8243_s7, %s8243_s7, %s8244_s18  }
 0xcb9 PF: > { %s12191_s15 = sld [smem:[#allocation29_spill]]  ;;  %p7213_p8 = scmp.ge.s32.totalorder %s8225_s4, 2 }
 0xcbb   : > { %p7197_p10 = pnand %p7213_p8, %p8549_p6 }
 0xcbd   : > { %p7198_p4 = pneg %p7197_p10 }
 0xcbf   : > { %s6326_s11 = sand.u32 1, %s12191_s15  }
 0xcc0   : > { %s6327_s26 = scalar_lea.sflag [#allocation5], %s6326_s11 }
 0xcc1   : > { %8180 = dma.done.wait (%p7198_p4), %s6327_s26, 2048  }
 0xcc2   : > { %8182 = vsyncadd (%p7198_p4), %s6327_s26, 4294965248  ;;  %s45_s4 = sadd.s32 1, %s8225_s4   ;;  %s12193_s24 = sld [smem:[#allocation38_spill]] }
 0xcc3   : > { %p42_p0 = scmp.ge.s32.totalorder %s45_s4, 6   ;;  %s12194_s21 = sld [smem:[#allocation30_spill]] }
 0xcc4   : > { %s12195_s25 = sld [smem:[#allocation39_spill]]  ;;  %s12199_s1 = smov %s8189_s22 }
 0xcc5   : > { %s12196_s3 = sld [smem:[#allocation33_spill]]  ;;  %s12200_s22 = smov %s8193_s23 }
 0xcc6   : > { %s12197_s27 = sld [smem:[#allocation35_spill]]  ;;  %s12204_s26 = smov %s8221_s28 }
 0xcc7   : > { %s12198_s12 = sld [smem:[#allocation36_spill]] }
 0xcc8   : > { %s12201_s23 = smov %s12193_s24  ;;  %s12202_s24 = smov %s8201_s2 }
 0xcc9   : > { %s12203_s2 = smov %s12194_s21  ;;  %44 = sbr.rel (!%p42_p0) target bundleno = 38 (0x26), region = 207 }
 0xccd   : > { %s12205_s28 = smov %s12198_s12 }
 0xcce   :  { %6333 = vsyncpa [#allocation4], 1 }
 0xccf   :  { %6335 = vsyncpa [#allocation4 + $0x1], 1 }
 0xcd0   :  { %6336 = vsyncpa [#allocation7], 1 }
 0xcd1   :  { %6338 = vsyncpa [#allocation7 + $0x1], 1 }
 0xcd2   :  { %6339 = vsyncpa [#allocation10], 1 }
 0xcd3   :  { %6341 = vsyncpa [#allocation10 + $0x1], 1 }
 0xcd4   :  { %6342 = vsyncpa [#allocation13], 1 }
 0xcd5   :  { %6343 = vsyncpa [#allocation16], 1 }
 0xcd6   :  { %6344 = vsyncpa [#allocation19], 1 }
 0xcd7   :  { %6345 = vsyncpa [#allocation5], 1 }
 0xcd8   :  { %6347 = vsyncpa [#allocation5 + $0x1], 1 }

</bundles_post_ra>
